<compile_context>
chip_gen: v7x
topology: tpu7x:2x2x1
jax: 0.10.0
libtpu: 0.0.40
codegen_flags: <defaults>
</compile_context>

<pallas_src>
import functools

import jax
import jax.numpy as jnp
from jax.experimental import pallas as pl
from jax.experimental.pallas import tpu as pltpu


EXPANSION = 4


# ----------------------------------------------------------------------------
# Fused bottleneck kernel: one grid step == one image.
# ----------------------------------------------------------------------------
def _bottleneck_kernel(x_ref, hh_ref, ww_ref, w1_ref, s1_ref, w2_ref, s2_ref,
                       w3_ref, s3_ref, *rest, H, W, has_sc_conv, has_ds):
    rest = list(rest)
    o_ref = rest.pop()
    wsc_ref = ssc_ref = sds_ref = None
    if has_sc_conv:
        wsc_ref, ssc_ref = rest[0], rest[1]
        rest = rest[2:]
    if has_ds:
        sds_ref = rest[0]

    P = w1_ref.shape[1]

    xf = x_ref[...]                                # (H*W, Cin) f32
    xb = xf.astype(jnp.bfloat16)
    hh = hh_ref[...]                               # (H*W, 1) i32   (row -> h)
    ww = ww_ref[...]                               # (H*W, 1) i32   (row -> w)

    # conv1 (1x1) + bn1 + relu
    y1 = jnp.dot(xb, w1_ref[...], preferred_element_type=jnp.float32)
    y1 = jnp.maximum(y1 + s1_ref[...], 0.0).astype(jnp.bfloat16)    # (H*W, P)

    # conv2 (3x3, pad=1) at stride 1: nine accumulating channel GEMMs; each
    # tap's (oi, oj) spatial offset is a static roll of the flattened row axis
    # plus a border mask implementing the zero padding.
    acc = jnp.zeros((H * W, P), jnp.float32)
    for t in range(9):
        oi, oj = t // 3 - 1, t % 3 - 1
        z = jnp.dot(y1, w2_ref[t * P:(t + 1) * P, :],
                    preferred_element_type=jnp.float32)             # (H*W, P)
        d = oi * W + oj
        if d != 0:
            z = jnp.roll(z, -d, axis=0)            # out[m] <- z[m + d]
        valid = ((hh >= -oi) & (hh < H - oi) &
                 (ww >= -oj) & (ww < W - oj))
        acc = acc + jnp.where(valid, z, 0.0)
    y2 = jnp.maximum(acc + s2_ref[...], 0.0).astype(jnp.bfloat16)   # (H*W, P)

    # stride>1: spatial subsampling of conv2 output / shortcut input as one
    # 0/1 selection matmul (replaces the XLA strided slice + HBM copy).
    if has_ds:
        sds = sds_ref[...]                         # (Ho*Wo, H*W) bf16
        y2 = jnp.dot(sds, y2,
                     preferred_element_type=jnp.float32).astype(jnp.bfloat16)
        x_sc = jnp.dot(sds, xb,
                       preferred_element_type=jnp.float32).astype(jnp.bfloat16)
    else:
        x_sc = xb

    # conv3 (1x1) + bn3
    y3 = jnp.dot(y2, w3_ref[...], preferred_element_type=jnp.float32)
    y3 = y3 + s3_ref[...]

    # shortcut branch + residual add + final relu (fused epilogue)
    if has_sc_conv:
        sc = jnp.dot(x_sc, wsc_ref[...], preferred_element_type=jnp.float32)
        sc = sc + ssc_ref[...]
    else:
        sc = xf                                    # identity shortcut, f32

    o_ref[...] = jnp.maximum(y3 + sc, 0.0).astype(o_ref.dtype)


# ----------------------------------------------------------------------------
# Wrapper
# ----------------------------------------------------------------------------
def _make_downsample_selector(H, W, stride):
    """0/1 matrix picking rows (ho*stride, wo*stride) of a flattened HxW grid."""
    Ho = (H - 1) // stride + 1
    Wo = (W - 1) // stride + 1
    a = jnp.arange(Ho * Wo, dtype=jnp.int32)
    src = (a // Wo) * (stride * W) + (a % Wo) * stride
    sel = src[:, None] == jnp.arange(H * W, dtype=jnp.int32)[None, :]
    return sel.astype(jnp.bfloat16)


def bottleneck_forward(x_nchw, params):
    stride = params['stride']
    p1, p2, p3 = params['conv1'], params['conv2'], params['conv3']
    psc = params['shortcut']

    # TODO(synk): fold the layout conversion away by keeping the model NHWC.
    x = jnp.transpose(x_nchw, (0, 2, 3, 1)).astype(jnp.float32)     # NHWC f32
    N, H, W, Cin = x.shape
    P = p1['w'].shape[1]
    Cout = p3['w'].shape[1]
    Ho = (H - 1) // stride + 1
    Wo = (W - 1) // stride + 1
    M, Mo = H * W, Ho * Wo

    has_sc_conv = psc is not None
    has_ds = stride != 1
    if not has_sc_conv:
        assert stride == 1 and Cin == Cout, (
            "identity shortcut requires stride==1 and in_planes == 4*planes")

    row = jnp.arange(M, dtype=jnp.int32)
    hh = (row // W).reshape(M, 1)
    ww = (row % W).reshape(M, 1)

    def s2d(v, n):
        return v.reshape(1, n).astype(jnp.float32)

    args = [x.reshape(N * M, Cin), hh, ww,
            p1['w'], s2d(p1['shift'], P),
            p2['w'], s2d(p2['shift'], P),
            p3['w'], s2d(p3['shift'], Cout)]
    in_specs = [
        pl.BlockSpec((M, Cin), lambda n: (n, 0)),
        pl.BlockSpec((M, 1), lambda n: (0, 0)),
        pl.BlockSpec((M, 1), lambda n: (0, 0)),
        pl.BlockSpec((Cin, P), lambda n: (0, 0)),
        pl.BlockSpec((1, P), lambda n: (0, 0)),
        pl.BlockSpec((9 * P, P), lambda n: (0, 0)),
        pl.BlockSpec((1, P), lambda n: (0, 0)),
        pl.BlockSpec((P, Cout), lambda n: (0, 0)),
        pl.BlockSpec((1, Cout), lambda n: (0, 0)),
    ]
    if has_sc_conv:
        args += [psc['w'], s2d(psc['shift'], Cout)]
        in_specs += [pl.BlockSpec((Cin, Cout), lambda n: (0, 0)),
                     pl.BlockSpec((1, Cout), lambda n: (0, 0))]
    if has_ds:
        args.append(_make_downsample_selector(H, W, stride))
        in_specs.append(pl.BlockSpec((Mo, M), lambda n: (0, 0)))

    kern = functools.partial(_bottleneck_kernel, H=H, W=W,
                             has_sc_conv=has_sc_conv, has_ds=has_ds)

    out = pl.pallas_call(
        kern,
        out_shape=jax.ShapeDtypeStruct((N * Mo, Cout), jnp.float32),
        grid_spec=pltpu.PrefetchScalarGridSpec(
            num_scalar_prefetch=0,
            grid=(N,),
            in_specs=in_specs,
            out_specs=pl.BlockSpec((Mo, Cout), lambda n: (n, 0))),
        compiler_params=pltpu.CompilerParams(
            dimension_semantics=("parallel",),
            vmem_limit_bytes=32 * 1024 * 1024),
    )(*args)

    y = out.reshape(N, Ho, Wo, Cout)
    return jnp.transpose(y, (0, 3, 1, 2))                           # NCHW


# ----------------------------------------------------------------------------
# Parameter construction (deterministic, synthetic; BN folded for inference)
# ----------------------------------------------------------------------------
def make_conv_bn_params(key, k, cin, cout):
    k1, k2, k3, k4, k5 = jax.random.split(key, 5)
    std = 1.0 / jnp.sqrt(float(k * k * cin))
    # weight in (kh, kw, cin, cout) order -> rows of the GEMM weight are
    # ordered (di, dj, p), matching the kernel's per-tap row slices.
    w = jax.random.normal(k1, (k, k, cin, cout), jnp.float32) * std
    gamma = 1.0 + 0.1 * jax.random.normal(k2, (cout,), jnp.float32)
    beta = 0.1 * jax.random.normal(k3, (cout,), jnp.float32)
    run_mean = 0.1 * jax.random.normal(k4, (cout,), jnp.float32)
    run_var = jnp.abs(1.0 + 0.1 * jax.random.normal(k5, (cout,), jnp.float32))
    eps = 1e-5
    scale = gamma / jnp.sqrt(run_var + eps)
    shift = beta - run_mean * scale
    w_folded = w * scale                              # fold BN scale into W
    return {
        'w4d': w_folded,                              # f32, for the reference
        'w': w_folded.reshape(k * k * cin, cout).astype(jnp.bfloat16),
        'shift': shift,
        'k': k,
    }


def make_bottleneck_params(key, in_planes, planes, stride=1, flag=1):
    k1, k2, k3, k4 = jax.random.split(key, 4)
    params = {
        'stride': stride,
        'conv1': make_conv_bn_params(k1, 1, in_planes, planes),
        'conv2': make_conv_bn_params(k2, 3, planes, planes),
        'conv3': make_conv_bn_params(k3, 1, planes, EXPANSION * planes),
        'shortcut': None,
    }
    if stride != 1 or in_planes != EXPANSION * planes or flag == 0:
        params['shortcut'] = make_conv_bn_params(
            k4, 1, in_planes, EXPANSION * planes)
    return params


# ----------------------------------------------------------------------------
# Plain-JAX reference (f32) for validation
# ----------------------------------------------------------------------------
def _ref_conv_bn(x_nhwc, p, stride, padding, relu):
    y = jax.lax.conv_general_dilated(
        x_nhwc, p['w4d'], (stride, stride),
        [(padding, padding), (padding, padding)],
        dimension_numbers=('NHWC', 'HWIO', 'NHWC'))
    y = y + p['shift']
    return jnp.maximum(y, 0.0) if relu else y


def bottleneck_reference(x_nchw, params):
    stride = params['stride']
    x = jnp.transpose(x_nchw, (0, 2, 3, 1)).astype(jnp.float32)
    out = _ref_conv_bn(x, params['conv1'], 1, 0, True)
    out = _ref_conv_bn(out, params['conv2'], stride, 1, True)
    out = _ref_conv_bn(out, params['conv3'], 1, 0, False)
    if params['shortcut'] is not None:
        sc = _ref_conv_bn(x, params['shortcut'], stride, 0, False)
    else:
        sc = x
    y = jnp.maximum(out + sc, 0.0)
    return jnp.transpose(y, (0, 3, 1, 2))


# ----------------------------------------------------------------------------
if __name__ == "__main__":
    key = jax.random.PRNGKey(0)
    kx, kp1, kp2, kp3 = jax.random.split(key, 4)

    # NCHW input consistent with the module: batch=2, C=64, 16x16 spatial.
    x = jax.random.normal(kx, (2, 64, 16, 16), jnp.float32)

    # A: downsampling bottleneck (stride=2 -> conv+BN shortcut + subsample).
    params_a = make_bottleneck_params(kp1, in_planes=64, planes=16,
                                      stride=2, flag=1)
    # B: identity-shortcut bottleneck (stride=1, in_planes == 4*planes).
    params_b = make_bottleneck_params(kp2, in_planes=64, planes=16,
                                      stride=1, flag=1)
    # C: flag=0 -> conv+BN shortcut but no spatial downsampling.
    params_c = make_bottleneck_params(kp3, in_planes=64, planes=16,
                                      stride=1, flag=0)

    fwd_a = jax.jit(lambda xx: bottleneck_forward(xx, params_a))
    fwd_b = jax.jit(lambda xx: bottleneck_forward(xx, params_b))
    fwd_c = jax.jit(lambda xx: bottleneck_forward(xx, params_c))

    y_a = jax.block_until_ready(fwd_a(x))
    y_b = jax.block_until_ready(fwd_b(x))
    y_c = jax.block_until_ready(fwd_c(x))

    assert y_a.shape == (2, 64, 8, 8)
    assert y_b.shape == (2, 64, 16, 16)
    assert y_c.shape == (2, 64, 16, 16)
    assert bool(jnp.all(jnp.isfinite(y_a)))
    assert bool(jnp.all(jnp.isfinite(y_b)))
    assert bool(jnp.all(jnp.isfinite(y_c)))

    # Loose tolerance: bf16 MXU operands with f32 accumulation.
    for y, p in ((y_a, params_a), (y_b, params_b), (y_c, params_c)):
        ref = bottleneck_reference(x, p)
        err = float(jnp.max(jnp.abs(y - ref)) /
                    (jnp.max(jnp.abs(ref)) + 1e-6))
        assert err < 0.1, err

    print("KERNEL_OK")
</pallas_src>

<mosaic_0001>
module attributes {stable_mosaic.version = 11 : i64} {
  func.func @_bottleneck_kernel(%arg0: i32, %arg1: memref<256x64xf32, #tpu.memory_space<vmem>>, %arg2: memref<256x1xi32, #tpu.memory_space<vmem>>, %arg3: memref<256x1xi32, #tpu.memory_space<vmem>>, %arg4: memref<64x16xbf16, #tpu.memory_space<vmem>>, %arg5: memref<1x16xf32, #tpu.memory_space<vmem>>, %arg6: memref<144x16xbf16, #tpu.memory_space<vmem>>, %arg7: memref<1x16xf32, #tpu.memory_space<vmem>>, %arg8: memref<16x64xbf16, #tpu.memory_space<vmem>>, %arg9: memref<1x64xf32, #tpu.memory_space<vmem>>, %arg10: memref<64x64xbf16, #tpu.memory_space<vmem>>, %arg11: memref<1x64xf32, #tpu.memory_space<vmem>>, %arg12: memref<64x256xbf16, #tpu.memory_space<vmem>>, %arg13: memref<64x64xf32, #tpu.memory_space<vmem>>) attributes {dimension_semantics = [#tpu.dimension_semantics<parallel>], iteration_bounds = array<i64: 2>, scalar_prefetch = 0 : i64, scratch_operands = 0 : i64, tpu.core_type = #tpu.core_type<tc>, window_params = [{transform_indices = @transform_0, window_bounds = array<i64: 256, 64>}, {pipeline_mode = #tpu.pipeline_mode<synchronous>, transform_indices = @transform_1, window_bounds = array<i64: 256, 1>}, {pipeline_mode = #tpu.pipeline_mode<synchronous>, transform_indices = @transform_2, window_bounds = array<i64: 256, 1>}, {pipeline_mode = #tpu.pipeline_mode<synchronous>, transform_indices = @transform_3, window_bounds = array<i64: 64, 16>}, {pipeline_mode = #tpu.pipeline_mode<synchronous>, transform_indices = @transform_4, window_bounds = array<i64: 1, 16>}, {pipeline_mode = #tpu.pipeline_mode<synchronous>, transform_indices = @transform_5, window_bounds = array<i64: 144, 16>}, {pipeline_mode = #tpu.pipeline_mode<synchronous>, transform_indices = @transform_6, window_bounds = array<i64: 1, 16>}, {pipeline_mode = #tpu.pipeline_mode<synchronous>, transform_indices = @transform_7, window_bounds = array<i64: 16, 64>}, {pipeline_mode = #tpu.pipeline_mode<synchronous>, transform_indices = @transform_8, window_bounds = array<i64: 1, 64>}, {pipeline_mode = #tpu.pipeline_mode<synchronous>, transform_indices = @transform_9, window_bounds = array<i64: 64, 64>}, {pipeline_mode = #tpu.pipeline_mode<synchronous>, transform_indices = @transform_10, window_bounds = array<i64: 1, 64>}, {pipeline_mode = #tpu.pipeline_mode<synchronous>, transform_indices = @transform_11, window_bounds = array<i64: 64, 256>}, {transform_indices = @transform_12, window_bounds = array<i64: 64, 64>}]} {
    %c0 = arith.constant 0 : index
    %c0_0 = arith.constant 0 : index
    %0 = vector.load %arg1[%c0, %c0_0] : memref<256x64xf32, #tpu.memory_space<vmem>>, vector<256x64xf32>
    %1 = arith.truncf %0 : vector<256x64xf32> to vector<256x64xbf16>
    %c0_1 = arith.constant 0 : index
    %c0_2 = arith.constant 0 : index
    %2 = vector.load %arg2[%c0_1, %c0_2] : memref<256x1xi32, #tpu.memory_space<vmem>>, vector<256x1xi32>
    %c0_3 = arith.constant 0 : index
    %c0_4 = arith.constant 0 : index
    %3 = vector.load %arg3[%c0_3, %c0_4] : memref<256x1xi32, #tpu.memory_space<vmem>>, vector<256x1xi32>
    %c0_5 = arith.constant 0 : index
    %c0_6 = arith.constant 0 : index
    %4 = vector.load %arg4[%c0_5, %c0_6] : memref<64x16xbf16, #tpu.memory_space<vmem>>, vector<64x16xbf16>
    %cst = arith.constant dense<0.000000e+00> : vector<256x16xf32>
    %5 = tpu.matmul %1, %4, %cst {dimension_numbers = #tpu.dot_dimension_numbers<[1], [0], [0], [1], [0, 0, 1, 1], [], []>} : vector<256x64xbf16>, vector<64x16xbf16>, vector<256x16xf32> -> vector<256x16xf32>
    %c0_7 = arith.constant 0 : index
    %c0_8 = arith.constant 0 : index
    %6 = vector.load %arg5[%c0_7, %c0_8] : memref<1x16xf32, #tpu.memory_space<vmem>>, vector<1x16xf32>
    %7 = vector.broadcast %6 : vector<1x16xf32> to vector<256x16xf32>
    %8 = arith.addf %5, %7 : vector<256x16xf32>
    %cst_9 = arith.constant 0.000000e+00 : f32
    %9 = vector.broadcast %cst_9 : f32 to vector<256x16xf32>
    %10 = arith.maximumf %8, %9 : vector<256x16xf32>
    %11 = arith.truncf %10 : vector<256x16xf32> to vector<256x16xbf16>
    %cst_10 = arith.constant 0.000000e+00 : f32
    %12 = vector.broadcast %cst_10 : f32 to vector<256x16xf32>
    %c0_11 = arith.constant 0 : index
    %c0_12 = arith.constant 0 : index
    %13 = vector.load %arg6[%c0_11, %c0_12] : memref<144x16xbf16, #tpu.memory_space<vmem>>, vector<16x16xbf16>
    %cst_13 = arith.constant dense<0.000000e+00> : vector<256x16xf32>
    %14 = tpu.matmul %11, %13, %cst_13 {dimension_numbers = #tpu.dot_dimension_numbers<[1], [0], [0], [1], [0, 0, 1, 1], [], []>} : vector<256x16xbf16>, vector<16x16xbf16>, vector<256x16xf32> -> vector<256x16xf32>
    %15 = vector.extract_strided_slice %14 {offsets = [239, 0], sizes = [17, 16], strides = [1, 1]} : vector<256x16xf32> to vector<17x16xf32>
    %16 = vector.extract_strided_slice %14 {offsets = [0, 0], sizes = [239, 16], strides = [1, 1]} : vector<256x16xf32> to vector<239x16xf32>
    %17 = tpu.concatenate %15, %16 in 0 : vector<17x16xf32>, vector<239x16xf32> -> vector<256x16xf32>
    %c1_i32 = arith.constant 1 : i32
    %18 = vector.broadcast %c1_i32 : i32 to vector<256x1xi32>
    %19 = arith.cmpi sge, %2, %18 : vector<256x1xi32>
    %c17_i32 = arith.constant 17 : i32
    %20 = vector.broadcast %c17_i32 : i32 to vector<256x1xi32>
    %21 = arith.cmpi slt, %2, %20 : vector<256x1xi32>
    %22 = arith.andi %19, %21 : vector<256x1xi1>
    %c1_i32_14 = arith.constant 1 : i32
    %23 = vector.broadcast %c1_i32_14 : i32 to vector<256x1xi32>
    %24 = arith.cmpi sge, %3, %23 : vector<256x1xi32>
    %25 = arith.andi %22, %24 : vector<256x1xi1>
    %c17_i32_15 = arith.constant 17 : i32
    %26 = vector.broadcast %c17_i32_15 : i32 to vector<256x1xi32>
    %27 = arith.cmpi slt, %3, %26 : vector<256x1xi32>
    %28 = arith.andi %25, %27 : vector<256x1xi1>
    %cst_16 = arith.constant 0.000000e+00 : f32
    %29 = vector.shape_cast %28 : vector<256x1xi1> to vector<256x1xi1>
    %30 = vector.broadcast %29 : vector<256x1xi1> to vector<256x16xi1>
    %31 = vector.broadcast %cst_16 : f32 to vector<256x16xf32>
    %32 = arith.select %30, %17, %31 : vector<256x16xi1>, vector<256x16xf32>
    %33 = arith.addf %12, %32 : vector<256x16xf32>
    %c16 = arith.constant 16 : index
    %c0_17 = arith.constant 0 : index
    %34 = vector.load %arg6[%c16, %c0_17] : memref<144x16xbf16, #tpu.memory_space<vmem>>, vector<16x16xbf16>
    %cst_18 = arith.constant dense<0.000000e+00> : vector<256x16xf32>
    %35 = tpu.matmul %11, %34, %cst_18 {dimension_numbers = #tpu.dot_dimension_numbers<[1], [0], [0], [1], [0, 0, 1, 1], [], []>} : vector<256x16xbf16>, vector<16x16xbf16>, vector<256x16xf32> -> vector<256x16xf32>
    %36 = vector.extract_strided_slice %35 {offsets = [240, 0], sizes = [16, 16], strides = [1, 1]} : vector<256x16xf32> to vector<16x16xf32>
    %37 = vector.extract_strided_slice %35 {offsets = [0, 0], sizes = [240, 16], strides = [1, 1]} : vector<256x16xf32> to vector<240x16xf32>
    %38 = tpu.concatenate %36, %37 in 0 : vector<16x16xf32>, vector<240x16xf32> -> vector<256x16xf32>
    %c1_i32_19 = arith.constant 1 : i32
    %39 = vector.broadcast %c1_i32_19 : i32 to vector<256x1xi32>
    %40 = arith.cmpi sge, %2, %39 : vector<256x1xi32>
    %c17_i32_20 = arith.constant 17 : i32
    %41 = vector.broadcast %c17_i32_20 : i32 to vector<256x1xi32>
    %42 = arith.cmpi slt, %2, %41 : vector<256x1xi32>
    %43 = arith.andi %40, %42 : vector<256x1xi1>
    %c0_i32 = arith.constant 0 : i32
    %44 = vector.broadcast %c0_i32 : i32 to vector<256x1xi32>
    %45 = arith.cmpi sge, %3, %44 : vector<256x1xi32>
    %46 = arith.andi %43, %45 : vector<256x1xi1>
    %c16_i32 = arith.constant 16 : i32
    %47 = vector.broadcast %c16_i32 : i32 to vector<256x1xi32>
    %48 = arith.cmpi slt, %3, %47 : vector<256x1xi32>
    %49 = arith.andi %46, %48 : vector<256x1xi1>
    %cst_21 = arith.constant 0.000000e+00 : f32
    %50 = vector.shape_cast %49 : vector<256x1xi1> to vector<256x1xi1>
    %51 = vector.broadcast %50 : vector<256x1xi1> to vector<256x16xi1>
    %52 = vector.broadcast %cst_21 : f32 to vector<256x16xf32>
    %53 = arith.select %51, %38, %52 : vector<256x16xi1>, vector<256x16xf32>
    %54 = arith.addf %33, %53 : vector<256x16xf32>
    %c32 = arith.constant 32 : index
    %c0_22 = arith.constant 0 : index
    %55 = vector.load %arg6[%c32, %c0_22] : memref<144x16xbf16, #tpu.memory_space<vmem>>, vector<16x16xbf16>
    %cst_23 = arith.constant dense<0.000000e+00> : vector<256x16xf32>
    %56 = tpu.matmul %11, %55, %cst_23 {dimension_numbers = #tpu.dot_dimension_numbers<[1], [0], [0], [1], [0, 0, 1, 1], [], []>} : vector<256x16xbf16>, vector<16x16xbf16>, vector<256x16xf32> -> vector<256x16xf32>
    %57 = vector.extract_strided_slice %56 {offsets = [241, 0], sizes = [15, 16], strides = [1, 1]} : vector<256x16xf32> to vector<15x16xf32>
    %58 = vector.extract_strided_slice %56 {offsets = [0, 0], sizes = [241, 16], strides = [1, 1]} : vector<256x16xf32> to vector<241x16xf32>
    %59 = tpu.concatenate %57, %58 in 0 : vector<15x16xf32>, vector<241x16xf32> -> vector<256x16xf32>
    %c1_i32_24 = arith.constant 1 : i32
    %60 = vector.broadcast %c1_i32_24 : i32 to vector<256x1xi32>
    %61 = arith.cmpi sge, %2, %60 : vector<256x1xi32>
    %c17_i32_25 = arith.constant 17 : i32
    %62 = vector.broadcast %c17_i32_25 : i32 to vector<256x1xi32>
    %63 = arith.cmpi slt, %2, %62 : vector<256x1xi32>
    %64 = arith.andi %61, %63 : vector<256x1xi1>
    %c-1_i32 = arith.constant -1 : i32
    %65 = vector.broadcast %c-1_i32 : i32 to vector<256x1xi32>
    %66 = arith.cmpi sge, %3, %65 : vector<256x1xi32>
    %67 = arith.andi %64, %66 : vector<256x1xi1>
    %c15_i32 = arith.constant 15 : i32
    %68 = vector.broadcast %c15_i32 : i32 to vector<256x1xi32>
    %69 = arith.cmpi slt, %3, %68 : vector<256x1xi32>
    %70 = arith.andi %67, %69 : vector<256x1xi1>
    %cst_26 = arith.constant 0.000000e+00 : f32
    %71 = vector.shape_cast %70 : vector<256x1xi1> to vector<256x1xi1>
    %72 = vector.broadcast %71 : vector<256x1xi1> to vector<256x16xi1>
    %73 = vector.broadcast %cst_26 : f32 to vector<256x16xf32>
    %74 = arith.select %72, %59, %73 : vector<256x16xi1>, vector<256x16xf32>
    %75 = arith.addf %54, %74 : vector<256x16xf32>
    %c48 = arith.constant 48 : index
    %c0_27 = arith.constant 0 : index
    %76 = vector.load %arg6[%c48, %c0_27] : memref<144x16xbf16, #tpu.memory_space<vmem>>, vector<16x16xbf16>
    %cst_28 = arith.constant dense<0.000000e+00> : vector<256x16xf32>
    %77 = tpu.matmul %11, %76, %cst_28 {dimension_numbers = #tpu.dot_dimension_numbers<[1], [0], [0], [1], [0, 0, 1, 1], [], []>} : vector<256x16xbf16>, vector<16x16xbf16>, vector<256x16xf32> -> vector<256x16xf32>
    %78 = vector.extract_strided_slice %77 {offsets = [255, 0], sizes = [1, 16], strides = [1, 1]} : vector<256x16xf32> to vector<1x16xf32>
    %79 = vector.extract_strided_slice %77 {offsets = [0, 0], sizes = [255, 16], strides = [1, 1]} : vector<256x16xf32> to vector<255x16xf32>
    %80 = tpu.concatenate %78, %79 in 0 : vector<1x16xf32>, vector<255x16xf32> -> vector<256x16xf32>
    %c0_i32_29 = arith.constant 0 : i32
    %81 = vector.broadcast %c0_i32_29 : i32 to vector<256x1xi32>
    %82 = arith.cmpi sge, %2, %81 : vector<256x1xi32>
    %c16_i32_30 = arith.constant 16 : i32
    %83 = vector.broadcast %c16_i32_30 : i32 to vector<256x1xi32>
    %84 = arith.cmpi slt, %2, %83 : vector<256x1xi32>
    %85 = arith.andi %82, %84 : vector<256x1xi1>
    %c1_i32_31 = arith.constant 1 : i32
    %86 = vector.broadcast %c1_i32_31 : i32 to vector<256x1xi32>
    %87 = arith.cmpi sge, %3, %86 : vector<256x1xi32>
    %88 = arith.andi %85, %87 : vector<256x1xi1>
    %c17_i32_32 = arith.constant 17 : i32
    %89 = vector.broadcast %c17_i32_32 : i32 to vector<256x1xi32>
    %90 = arith.cmpi slt, %3, %89 : vector<256x1xi32>
    %91 = arith.andi %88, %90 : vector<256x1xi1>
    %cst_33 = arith.constant 0.000000e+00 : f32
    %92 = vector.shape_cast %91 : vector<256x1xi1> to vector<256x1xi1>
    %93 = vector.broadcast %92 : vector<256x1xi1> to vector<256x16xi1>
    %94 = vector.broadcast %cst_33 : f32 to vector<256x16xf32>
    %95 = arith.select %93, %80, %94 : vector<256x16xi1>, vector<256x16xf32>
    %96 = arith.addf %75, %95 : vector<256x16xf32>
    %c64 = arith.constant 64 : index
    %c0_34 = arith.constant 0 : index
    %97 = vector.load %arg6[%c64, %c0_34] : memref<144x16xbf16, #tpu.memory_space<vmem>>, vector<16x16xbf16>
    %cst_35 = arith.constant dense<0.000000e+00> : vector<256x16xf32>
    %98 = tpu.matmul %11, %97, %cst_35 {dimension_numbers = #tpu.dot_dimension_numbers<[1], [0], [0], [1], [0, 0, 1, 1], [], []>} : vector<256x16xbf16>, vector<16x16xbf16>, vector<256x16xf32> -> vector<256x16xf32>
    %c0_i32_36 = arith.constant 0 : i32
    %99 = vector.broadcast %c0_i32_36 : i32 to vector<256x1xi32>
    %100 = arith.cmpi sge, %2, %99 : vector<256x1xi32>
    %c16_i32_37 = arith.constant 16 : i32
    %101 = vector.broadcast %c16_i32_37 : i32 to vector<256x1xi32>
    %102 = arith.cmpi slt, %2, %101 : vector<256x1xi32>
    %103 = arith.andi %100, %102 : vector<256x1xi1>
    %c0_i32_38 = arith.constant 0 : i32
    %104 = vector.broadcast %c0_i32_38 : i32 to vector<256x1xi32>
    %105 = arith.cmpi sge, %3, %104 : vector<256x1xi32>
    %106 = arith.andi %103, %105 : vector<256x1xi1>
    %c16_i32_39 = arith.constant 16 : i32
    %107 = vector.broadcast %c16_i32_39 : i32 to vector<256x1xi32>
    %108 = arith.cmpi slt, %3, %107 : vector<256x1xi32>
    %109 = arith.andi %106, %108 : vector<256x1xi1>
    %cst_40 = arith.constant 0.000000e+00 : f32
    %110 = vector.shape_cast %109 : vector<256x1xi1> to vector<256x1xi1>
    %111 = vector.broadcast %110 : vector<256x1xi1> to vector<256x16xi1>
    %112 = vector.broadcast %cst_40 : f32 to vector<256x16xf32>
    %113 = arith.select %111, %98, %112 : vector<256x16xi1>, vector<256x16xf32>
    %114 = arith.addf %96, %113 : vector<256x16xf32>
    %c80 = arith.constant 80 : index
    %c0_41 = arith.constant 0 : index
    %115 = vector.load %arg6[%c80, %c0_41] : memref<144x16xbf16, #tpu.memory_space<vmem>>, vector<16x16xbf16>
    %cst_42 = arith.constant dense<0.000000e+00> : vector<256x16xf32>
    %116 = tpu.matmul %11, %115, %cst_42 {dimension_numbers = #tpu.dot_dimension_numbers<[1], [0], [0], [1], [0, 0, 1, 1], [], []>} : vector<256x16xbf16>, vector<16x16xbf16>, vector<256x16xf32> -> vector<256x16xf32>
    %117 = vector.extract_strided_slice %116 {offsets = [1, 0], sizes = [255, 16], strides = [1, 1]} : vector<256x16xf32> to vector<255x16xf32>
    %118 = vector.extract_strided_slice %116 {offsets = [0, 0], sizes = [1, 16], strides = [1, 1]} : vector<256x16xf32> to vector<1x16xf32>
    %119 = tpu.concatenate %117, %118 in 0 : vector<255x16xf32>, vector<1x16xf32> -> vector<256x16xf32>
    %c0_i32_43 = arith.constant 0 : i32
    %120 = vector.broadcast %c0_i32_43 : i32 to vector<256x1xi32>
    %121 = arith.cmpi sge, %2, %120 : vector<256x1xi32>
    %c16_i32_44 = arith.constant 16 : i32
    %122 = vector.broadcast %c16_i32_44 : i32 to vector<256x1xi32>
    %123 = arith.cmpi slt, %2, %122 : vector<256x1xi32>
    %124 = arith.andi %121, %123 : vector<256x1xi1>
    %c-1_i32_45 = arith.constant -1 : i32
    %125 = vector.broadcast %c-1_i32_45 : i32 to vector<256x1xi32>
    %126 = arith.cmpi sge, %3, %125 : vector<256x1xi32>
    %127 = arith.andi %124, %126 : vector<256x1xi1>
    %c15_i32_46 = arith.constant 15 : i32
    %128 = vector.broadcast %c15_i32_46 : i32 to vector<256x1xi32>
    %129 = arith.cmpi slt, %3, %128 : vector<256x1xi32>
    %130 = arith.andi %127, %129 : vector<256x1xi1>
    %cst_47 = arith.constant 0.000000e+00 : f32
    %131 = vector.shape_cast %130 : vector<256x1xi1> to vector<256x1xi1>
    %132 = vector.broadcast %131 : vector<256x1xi1> to vector<256x16xi1>
    %133 = vector.broadcast %cst_47 : f32 to vector<256x16xf32>
    %134 = arith.select %132, %119, %133 : vector<256x16xi1>, vector<256x16xf32>
    %135 = arith.addf %114, %134 : vector<256x16xf32>
    %c96 = arith.constant 96 : index
    %c0_48 = arith.constant 0 : index
    %136 = vector.load %arg6[%c96, %c0_48] : memref<144x16xbf16, #tpu.memory_space<vmem>>, vector<16x16xbf16>
    %cst_49 = arith.constant dense<0.000000e+00> : vector<256x16xf32>
    %137 = tpu.matmul %11, %136, %cst_49 {dimension_numbers = #tpu.dot_dimension_numbers<[1], [0], [0], [1], [0, 0, 1, 1], [], []>} : vector<256x16xbf16>, vector<16x16xbf16>, vector<256x16xf32> -> vector<256x16xf32>
    %138 = vector.extract_strided_slice %137 {offsets = [15, 0], sizes = [241, 16], strides = [1, 1]} : vector<256x16xf32> to vector<241x16xf32>
    %139 = vector.extract_strided_slice %137 {offsets = [0, 0], sizes = [15, 16], strides = [1, 1]} : vector<256x16xf32> to vector<15x16xf32>
    %140 = tpu.concatenate %138, %139 in 0 : vector<241x16xf32>, vector<15x16xf32> -> vector<256x16xf32>
    %c-1_i32_50 = arith.constant -1 : i32
    %141 = vector.broadcast %c-1_i32_50 : i32 to vector<256x1xi32>
    %142 = arith.cmpi sge, %2, %141 : vector<256x1xi32>
    %c15_i32_51 = arith.constant 15 : i32
    %143 = vector.broadcast %c15_i32_51 : i32 to vector<256x1xi32>
    %144 = arith.cmpi slt, %2, %143 : vector<256x1xi32>
    %145 = arith.andi %142, %144 : vector<256x1xi1>
    %c1_i32_52 = arith.constant 1 : i32
    %146 = vector.broadcast %c1_i32_52 : i32 to vector<256x1xi32>
    %147 = arith.cmpi sge, %3, %146 : vector<256x1xi32>
    %148 = arith.andi %145, %147 : vector<256x1xi1>
    %c17_i32_53 = arith.constant 17 : i32
    %149 = vector.broadcast %c17_i32_53 : i32 to vector<256x1xi32>
    %150 = arith.cmpi slt, %3, %149 : vector<256x1xi32>
    %151 = arith.andi %148, %150 : vector<256x1xi1>
    %cst_54 = arith.constant 0.000000e+00 : f32
    %152 = vector.shape_cast %151 : vector<256x1xi1> to vector<256x1xi1>
    %153 = vector.broadcast %152 : vector<256x1xi1> to vector<256x16xi1>
    %154 = vector.broadcast %cst_54 : f32 to vector<256x16xf32>
    %155 = arith.select %153, %140, %154 : vector<256x16xi1>, vector<256x16xf32>
    %156 = arith.addf %135, %155 : vector<256x16xf32>
    %c112 = arith.constant 112 : index
    %c0_55 = arith.constant 0 : index
    %157 = vector.load %arg6[%c112, %c0_55] : memref<144x16xbf16, #tpu.memory_space<vmem>>, vector<16x16xbf16>
    %cst_56 = arith.constant dense<0.000000e+00> : vector<256x16xf32>
    %158 = tpu.matmul %11, %157, %cst_56 {dimension_numbers = #tpu.dot_dimension_numbers<[1], [0], [0], [1], [0, 0, 1, 1], [], []>} : vector<256x16xbf16>, vector<16x16xbf16>, vector<256x16xf32> -> vector<256x16xf32>
    %159 = vector.extract_strided_slice %158 {offsets = [16, 0], sizes = [240, 16], strides = [1, 1]} : vector<256x16xf32> to vector<240x16xf32>
    %160 = vector.extract_strided_slice %158 {offsets = [0, 0], sizes = [16, 16], strides = [1, 1]} : vector<256x16xf32> to vector<16x16xf32>
    %161 = tpu.concatenate %159, %160 in 0 : vector<240x16xf32>, vector<16x16xf32> -> vector<256x16xf32>
    %c-1_i32_57 = arith.constant -1 : i32
    %162 = vector.broadcast %c-1_i32_57 : i32 to vector<256x1xi32>
    %163 = arith.cmpi sge, %2, %162 : vector<256x1xi32>
    %c15_i32_58 = arith.constant 15 : i32
    %164 = vector.broadcast %c15_i32_58 : i32 to vector<256x1xi32>
    %165 = arith.cmpi slt, %2, %164 : vector<256x1xi32>
    %166 = arith.andi %163, %165 : vector<256x1xi1>
    %c0_i32_59 = arith.constant 0 : i32
    %167 = vector.broadcast %c0_i32_59 : i32 to vector<256x1xi32>
    %168 = arith.cmpi sge, %3, %167 : vector<256x1xi32>
    %169 = arith.andi %166, %168 : vector<256x1xi1>
    %c16_i32_60 = arith.constant 16 : i32
    %170 = vector.broadcast %c16_i32_60 : i32 to vector<256x1xi32>
    %171 = arith.cmpi slt, %3, %170 : vector<256x1xi32>
    %172 = arith.andi %169, %171 : vector<256x1xi1>
    %cst_61 = arith.constant 0.000000e+00 : f32
    %173 = vector.shape_cast %172 : vector<256x1xi1> to vector<256x1xi1>
    %174 = vector.broadcast %173 : vector<256x1xi1> to vector<256x16xi1>
    %175 = vector.broadcast %cst_61 : f32 to vector<256x16xf32>
    %176 = arith.select %174, %161, %175 : vector<256x16xi1>, vector<256x16xf32>
    %177 = arith.addf %156, %176 : vector<256x16xf32>
    %c128 = arith.constant 128 : index
    %c0_62 = arith.constant 0 : index
    %178 = vector.load %arg6[%c128, %c0_62] : memref<144x16xbf16, #tpu.memory_space<vmem>>, vector<16x16xbf16>
    %cst_63 = arith.constant dense<0.000000e+00> : vector<256x16xf32>
    %179 = tpu.matmul %11, %178, %cst_63 {dimension_numbers = #tpu.dot_dimension_numbers<[1], [0], [0], [1], [0, 0, 1, 1], [], []>} : vector<256x16xbf16>, vector<16x16xbf16>, vector<256x16xf32> -> vector<256x16xf32>
    %180 = vector.extract_strided_slice %179 {offsets = [17, 0], sizes = [239, 16], strides = [1, 1]} : vector<256x16xf32> to vector<239x16xf32>
    %181 = vector.extract_strided_slice %179 {offsets = [0, 0], sizes = [17, 16], strides = [1, 1]} : vector<256x16xf32> to vector<17x16xf32>
    %182 = tpu.concatenate %180, %181 in 0 : vector<239x16xf32>, vector<17x16xf32> -> vector<256x16xf32>
    %c-1_i32_64 = arith.constant -1 : i32
    %183 = vector.broadcast %c-1_i32_64 : i32 to vector<256x1xi32>
    %184 = arith.cmpi sge, %2, %183 : vector<256x1xi32>
    %c15_i32_65 = arith.constant 15 : i32
    %185 = vector.broadcast %c15_i32_65 : i32 to vector<256x1xi32>
    %186 = arith.cmpi slt, %2, %185 : vector<256x1xi32>
    %187 = arith.andi %184, %186 : vector<256x1xi1>
    %c-1_i32_66 = arith.constant -1 : i32
    %188 = vector.broadcast %c-1_i32_66 : i32 to vector<256x1xi32>
    %189 = arith.cmpi sge, %3, %188 : vector<256x1xi32>
    %190 = arith.andi %187, %189 : vector<256x1xi1>
    %c15_i32_67 = arith.constant 15 : i32
    %191 = vector.broadcast %c15_i32_67 : i32 to vector<256x1xi32>
    %192 = arith.cmpi slt, %3, %191 : vector<256x1xi32>
    %193 = arith.andi %190, %192 : vector<256x1xi1>
    %cst_68 = arith.constant 0.000000e+00 : f32
    %194 = vector.shape_cast %193 : vector<256x1xi1> to vector<256x1xi1>
    %195 = vector.broadcast %194 : vector<256x1xi1> to vector<256x16xi1>
    %196 = vector.broadcast %cst_68 : f32 to vector<256x16xf32>
    %197 = arith.select %195, %182, %196 : vector<256x16xi1>, vector<256x16xf32>
    %198 = arith.addf %177, %197 : vector<256x16xf32>
    %c0_69 = arith.constant 0 : index
    %c0_70 = arith.constant 0 : index
    %199 = vector.load %arg7[%c0_69, %c0_70] : memref<1x16xf32, #tpu.memory_space<vmem>>, vector<1x16xf32>
    %200 = vector.broadcast %199 : vector<1x16xf32> to vector<256x16xf32>
    %201 = arith.addf %198, %200 : vector<256x16xf32>
    %cst_71 = arith.constant 0.000000e+00 : f32
    %202 = vector.broadcast %cst_71 : f32 to vector<256x16xf32>
    %203 = arith.maximumf %201, %202 : vector<256x16xf32>
    %204 = arith.truncf %203 : vector<256x16xf32> to vector<256x16xbf16>
    %c0_72 = arith.constant 0 : index
    %c0_73 = arith.constant 0 : index
    %205 = vector.load %arg12[%c0_72, %c0_73] : memref<64x256xbf16, #tpu.memory_space<vmem>>, vector<64x256xbf16>
    %cst_74 = arith.constant dense<0.000000e+00> : vector<64x16xf32>
    %206 = tpu.matmul %205, %204, %cst_74 {dimension_numbers = #tpu.dot_dimension_numbers<[1], [0], [0], [1], [0, 0, 1, 1], [], []>} : vector<64x256xbf16>, vector<256x16xbf16>, vector<64x16xf32> -> vector<64x16xf32>
    %207 = arith.truncf %206 : vector<64x16xf32> to vector<64x16xbf16>
    %cst_75 = arith.constant dense<0.000000e+00> : vector<64x64xf32>
    %208 = tpu.matmul %205, %1, %cst_75 {dimension_numbers = #tpu.dot_dimension_numbers<[1], [0], [0], [1], [0, 0, 1, 1], [], []>} : vector<64x256xbf16>, vector<256x64xbf16>, vector<64x64xf32> -> vector<64x64xf32>
    %209 = arith.truncf %208 : vector<64x64xf32> to vector<64x64xbf16>
    %c0_76 = arith.constant 0 : index
    %c0_77 = arith.constant 0 : index
    %210 = vector.load %arg8[%c0_76, %c0_77] : memref<16x64xbf16, #tpu.memory_space<vmem>>, vector<16x64xbf16>
    %cst_78 = arith.constant dense<0.000000e+00> : vector<64x64xf32>
    %211 = tpu.matmul %207, %210, %cst_78 {dimension_numbers = #tpu.dot_dimension_numbers<[1], [0], [0], [1], [0, 0, 1, 1], [], []>} : vector<64x16xbf16>, vector<16x64xbf16>, vector<64x64xf32> -> vector<64x64xf32>
    %c0_79 = arith.constant 0 : index
    %c0_80 = arith.constant 0 : index
    %212 = vector.load %arg9[%c0_79, %c0_80] : memref<1x64xf32, #tpu.memory_space<vmem>>, vector<1x64xf32>
    %213 = vector.broadcast %212 : vector<1x64xf32> to vector<64x64xf32>
    %214 = arith.addf %211, %213 : vector<64x64xf32>
    %c0_81 = arith.constant 0 : index
    %c0_82 = arith.constant 0 : index
    %215 = vector.load %arg10[%c0_81, %c0_82] : memref<64x64xbf16, #tpu.memory_space<vmem>>, vector<64x64xbf16>
    %cst_83 = arith.constant dense<0.000000e+00> : vector<64x64xf32>
    %216 = tpu.matmul %209, %215, %cst_83 {dimension_numbers = #tpu.dot_dimension_numbers<[1], [0], [0], [1], [0, 0, 1, 1], [], []>} : vector<64x64xbf16>, vector<64x64xbf16>, vector<64x64xf32> -> vector<64x64xf32>
    %c0_84 = arith.constant 0 : index
    %c0_85 = arith.constant 0 : index
    %217 = vector.load %arg11[%c0_84, %c0_85] : memref<1x64xf32, #tpu.memory_space<vmem>>, vector<1x64xf32>
    %218 = vector.broadcast %217 : vector<1x64xf32> to vector<64x64xf32>
    %219 = arith.addf %216, %218 : vector<64x64xf32>
    %220 = arith.addf %214, %219 : vector<64x64xf32>
    %cst_86 = arith.constant 0.000000e+00 : f32
    %221 = vector.broadcast %cst_86 : f32 to vector<64x64xf32>
    %222 = arith.maximumf %220, %221 : vector<64x64xf32>
    %c0_87 = arith.constant 0 : index
    %c0_88 = arith.constant 0 : index
    %223 = vector.load %arg13[%c0_87, %c0_88] : memref<64x64xf32, #tpu.memory_space<vmem>>, vector<64x64xf32>
    tpu.vector_store %arg13[%c0_87, %c0_88], %222 {strides = array<i32>} : memref<64x64xf32, #tpu.memory_space<vmem>>, vector<64x64xf32>,
    return
  }
  func.func @transform_0(%arg0: i32) -> (i32, i32) {
    %c0_i32 = arith.constant 0 : i32
    %c0_i32_0 = arith.constant 0 : i32
    return %arg0, %c0_i32 : i32, i32
  }
  func.func @transform_1(%arg0: i32) -> (i32, i32) {
    %c0_i32 = arith.constant 0 : i32
    %c0_i32_0 = arith.constant 0 : i32
    %c0_i32_1 = arith.constant 0 : i32
    return %c0_i32, %c0_i32_0 : i32, i32
  }
  func.func @transform_2(%arg0: i32) -> (i32, i32) {
    %c0_i32 = arith.constant 0 : i32
    %c0_i32_0 = arith.constant 0 : i32
    %c0_i32_1 = arith.constant 0 : i32
    return %c0_i32, %c0_i32_0 : i32, i32
  }
  func.func @transform_3(%arg0: i32) -> (i32, i32) {
    %c0_i32 = arith.constant 0 : i32
    %c0_i32_0 = arith.constant 0 : i32
    %c0_i32_1 = arith.constant 0 : i32
    return %c0_i32, %c0_i32_0 : i32, i32
  }
  func.func @transform_4(%arg0: i32) -> (i32, i32) {
    %c0_i32 = arith.constant 0 : i32
    %c0_i32_0 = arith.constant 0 : i32
    %c0_i32_1 = arith.constant 0 : i32
    return %c0_i32, %c0_i32_0 : i32, i32
  }
  func.func @transform_5(%arg0: i32) -> (i32, i32) {
    %c0_i32 = arith.constant 0 : i32
    %c0_i32_0 = arith.constant 0 : i32
    %c0_i32_1 = arith.constant 0 : i32
    return %c0_i32, %c0_i32_0 : i32, i32
  }
  func.func @transform_6(%arg0: i32) -> (i32, i32) {
    %c0_i32 = arith.constant 0 : i32
    %c0_i32_0 = arith.constant 0 : i32
    %c0_i32_1 = arith.constant 0 : i32
    return %c0_i32, %c0_i32_0 : i32, i32
  }
  func.func @transform_7(%arg0: i32) -> (i32, i32) {
    %c0_i32 = arith.constant 0 : i32
    %c0_i32_0 = arith.constant 0 : i32
    %c0_i32_1 = arith.constant 0 : i32
    return %c0_i32, %c0_i32_0 : i32, i32
  }
  func.func @transform_8(%arg0: i32) -> (i32, i32) {
    %c0_i32 = arith.constant 0 : i32
    %c0_i32_0 = arith.constant 0 : i32
    %c0_i32_1 = arith.constant 0 : i32
    return %c0_i32, %c0_i32_0 : i32, i32
  }
  func.func @transform_9(%arg0: i32) -> (i32, i32) {
    %c0_i32 = arith.constant 0 : i32
    %c0_i32_0 = arith.constant 0 : i32
    %c0_i32_1 = arith.constant 0 : i32
    return %c0_i32, %c0_i32_0 : i32, i32
  }
  func.func @transform_10(%arg0: i32) -> (i32, i32) {
    %c0_i32 = arith.constant 0 : i32
    %c0_i32_0 = arith.constant 0 : i32
    %c0_i32_1 = arith.constant 0 : i32
    return %c0_i32, %c0_i32_0 : i32, i32
  }
  func.func @transform_11(%arg0: i32) -> (i32, i32) {
    %c0_i32 = arith.constant 0 : i32
    %c0_i32_0 = arith.constant 0 : i32
    %c0_i32_1 = arith.constant 0 : i32
    return %c0_i32, %c0_i32_0 : i32, i32
  }
  func.func @transform_12(%arg0: i32) -> (i32, i32) {
    %c0_i32 = arith.constant 0 : i32
    %c0_i32_0 = arith.constant 0 : i32
    return %arg0, %c0_i32 : i32, i32
  }
}

</mosaic_0001>

<bundles_post_ra>
// kernel: _lambda_.1
= control target key start
LH: loop header
LB: loop body
LE: loop exit
PB: predicated region body
PF: predicated region fallthrough
CT: control target
= control target key end

     0   :  { %17 = vsyncpa [#allocation3], 0  ;;  %s14984_s0 = inlined_call_operand.vmem [shape: f32[512,64], index: 0, kind: input, shape index: {}]   ;;  %s14985_s1 = inlined_call_operand.vmem [shape: s32[256,1], index: 1, kind: input, shape index: {}]   ;;  %s14986_s2 = inlined_call_operand.vmem [shape: s32[256,1], index: 2, kind: input, shape index: {}]   ;;  %s14987_s3 = inlined_call_operand.hbm [shape: bf16[64,16], index: 3, kind: input, shape index: {}]   ;;  %s14988_s4 = inlined_call_operand.vmem [shape: f32[1,16], index: 4, kind: input, shape index: {}]   ;;  %s14989_s5 = inlined_call_operand.vmem [shape: bf16[144,16], index: 5, kind: input, shape index: {}]   ;;  %s14990_s6 = inlined_call_operand.vmem [shape: f32[1,16], index: 6, kind: input, shape index: {}]   ;;  %s14991_s7 = inlined_call_operand.vmem [shape: bf16[16,64], index: 7, kind: input, shape index: {}]   ;;  %s14992_s8 = inlined_call_operand.vmem [shape: f32[1,64], index: 8, kind: input, shape index: {}]   ;;  %s14993_s9 = inlined_call_operand.vmem [shape: bf16[64,64], index: 9, kind: input, shape index: {}]   ;;  %s14994_s10 = inlined_call_operand.vmem [shape: f32[1,64], index: 10, kind: input, shape index: {}]   ;;  %s14995_s11 = inlined_call_operand.vmem [shape: bf16[64,256], index: 11, kind: input, shape index: {}]   ;;  %s14996_s12 = inlined_call_operand.hbm [shape: f32[128,64], index: 12, kind: output, shape index: {}]  }
   0x1   :  { %18 = vsyncpa [#allocation4], 0 }
   0x2   :  { %20 = vsyncpa [#allocation4 + $0x1], 0  ;;  %s8068_s21 = smov 0   ;;  %s8070_s22 = smov 0  }
   0x3   :  { %s8072_s23 = smov 0   ;;  %s8074_s24 = smov 0  }
   0x4 LB: > { %15688 = sst [smem:[#allocation8_spill]] %s7990_s23  ;;  %s8089_s25 = sadd.s32 4294967295, %s7994_s24   ;;  %s7994_s24 = sphi %s8074_s24, %s17950_s24   ;;  %s7990_s23 = sphi %s8072_s23, %s17947_s23   ;;  %s7986_s22 = sphi %s8070_s22, %s17949_s22   ;;  %s7982_s21 = sphi %s8068_s21, %s17948_s21  }
   0x5   : > { %s6851_s26 = sadd.s32 4294967294, %s7994_s24   ;;  %s8093_s27 = sadd.s32 1, %s7994_s24  }
   0x6   : > { %s290_s28 = sadd.s32 1, %s7990_s23  ;;  %s287_s29 = ssub.s32 %s7994_s24, %s8093_s27 }
   0x7   : > { %p300_p0 = scmp.ne.s32.totalorder %s7990_s23, %s7986_s22  ;;  %p288_p1 = scmp.eq.s32.totalorder %s287_s29, 0 }
   0x8   : > { %p301_p2 = scmp.eq.s32.totalorder %s8089_s25, 1  ;;  %p306_p3 = scmp.ne.s32.totalorder %s7986_s22, %s7982_s21 }
   0x9   : > { %p307_p4 = scmp.eq.s32.totalorder %s6851_s26, 1  ;;  %p6852_p7 = scmp.ge.s32.totalorder %s7994_s24, 1 }
   0xa   : > { %s8104_s30 = scalar_select %p288_p1, %s7990_s23, %s290_s28  }
   0xb   : > { %p8106_p5 = por %p301_p2, %p300_p0  ;;  %p8110_p6 = por %p307_p4, %p306_p3 }
   0xc   : > { %15689 = sst [smem:[#allocation9_spill]] %s8104_s30  ;;  %p314_p8 = scmp.lt.s32.totalorder %s7994_s24, 3 }
   0xd   : > { %s15690_s13 = scalar_select %p8106_p5, 1, 0 }
   0xe   : > { %s15691_s14 = scalar_select %p8110_p6, 1, 0 }
   0xf   : > { %p14998_p9 = scmp.eq.s32.totalorder %s8089_s25, 0  ;;  %p8117_p10 = pnand %p6852_p7, %p314_p8 }
  0x10   : > { %s7996_s16 = smov [#allocation2]   ;;  %s7900_s26 = scalar_lea.hbm %s14987_s3, 512 }
  0x11   : > { %s15692_s15 = scalar_select %p8117_p10, 1, 0 }
  0x12   : > { %s332_s17 = sshll.u32 %s7996_s16, 4  ;;  %p7734_p11 = pneg %p8117_p10  ;;  %s333_s17 = int_to_ptr.vmem [resolvable:$true] %s332_s17 }
  0x13   : > { %p7901_p13 = scmp.ne.s32.totalorder %s14987_s3, %s7900_s26  ;;  %p7907_p3 = scmp.lt.u32.totalorder %s7900_s26, %s14987_s3 }
  0x14   : > { %p8125_p12 = pnand %p14998_p9, %p7734_p11 }
  0x16   : > { %p7902_p0 = pneg %p8125_p12 }
  0x18   : > { %p7903_p1 = pnand %p7902_p0, %p7901_p13 }
  0x1a   : > { %p7904_p2 = pneg %p7903_p1 }
  0x1c   : > { %p7909_p4 = pnand %p7907_p3, %p7904_p2 }
  0x1e   : > { %7912 = shalt.err (!%p7909_p4)
}
  0x1f   : > { %s7913_s23 = scalar_lea.vmem %s333_s17, 512  ;;  %p7921_p9 = scmp.lt.s32.totalorder %s333_s17, %s333_s17 }
  0x20   : > { %p7914_p7 = scmp.ne.s32.totalorder %s333_s17, %s7913_s23  ;;  %p7922_p6 = scmp.lt.s32.totalorder %s7913_s23, %s7913_s23 }
  0x22   : > { %p7916_p8 = pnand %p7914_p7, %p7902_p0  ;;  %p7923_p5 = por %p7922_p6, %p7921_p9 }
  0x24   : > { %p7917_p11 = pneg %p7916_p8 }
  0x26   : > { %p7924_p10 = pnand %p7923_p5, %p7917_p11 }
  0x28   : > { %7927 = shalt.err (!%p7924_p10)
}
  0x29   : > { %s7997_s19 = smov 64   ;;  %s7998_s20 = smov 4  }
  0x2a   : > { %7737 = dma.hbm_to_vmem [thread:$0]  (!%p8125_p12), %s14987_s3, 512, %s333_s17, [#allocation3], %s7997_s19, %s7997_s19, %s7998_s20  }
  0x2b   : > { %p15694_p13 = scmp.ne.s32.totalorder %s15692_s15, 0 }
  0x2d   : > { %381 = sbr.rel (%p15694_p13) target bundleno = 1619 (0x653), region = 68 }
  0x34   : > { %p15695_p1 = scmp.eq.s32.totalorder %s8089_s25, 0 }
  0x36   : > { %7973 = dma.done.wait (%p15695_p1), [#allocation3], 512   ;;  %p15696_p0 = pmov %p15695_p1 }
  0x37   : > { %v15091_v0 = vmov 0   ;;  %s6858_s23 = sshll.u32 %s8089_s25, 5  ;;  %v7785_v1 = vld [vmem:[#allocation2] sm:$0xff]   ;;  %v481_v2 = vld [vmem:[%s14985_s1 + $0x10] sm:$0xff]  ;;  %v7786_v6 = vld [vmem:[#allocation2 + $0x8] sm:$0xff]   ;;  %v15698_v7 = vmov 0 }
  0x38   : > { %7975 = vsyncadd (%p15696_p0), [#allocation3], 4294966784  ;;  %7784 = vset.pattern.permute.xlu1 %v15091_v0  ;;  %7783 = vset.pattern.permute.xlu0 %v15091_v0  ;;  %p8154_p5 = scmp.lt.s32.totalorder %s6858_s23, 63  ;;  %v8164_v3 = vld [vmem:[%s14986_s2 + $0x10] sm:$0xff]  ;;  %v479_v4 = vld [vmem:[%s14985_s1] sm:$0xff]  ;;  %vm1190_vm0 = vcmp.ge.s32.totalorder %v481_v2, 1 }
  0x39   : > { %7330 = vmatprep.subr.bf16.mxu0 %v7785_v1  ;;  %vm1222_vm1 = vcmp.lt.s32.totalorder %v481_v2, 17  ;;  %vm15002_vm2 = vcmp.ge.s32.totalorder %v8164_v3, 1  ;;  %vm15001_vm3 = vcmp.lt.s32.totalorder %v8164_v3, 17  ;;  %v8174_v5 = vld [vmem:[%s14986_s2] sm:$0xff]  ;;  %vm1188_vm5 = vcmp.ge.s32.totalorder %v479_v4, 1  ;;  %v482_v8 = vld [vmem:[%s14985_s1 + $0x18] sm:$0xff] }
  0x3a   : > { %7331 = vmatpush3.bf16.msra.mxu0 %v7785_v1  ;;  %vm8176_vm4 = vmand %vm1190_vm0, %vm1222_vm1  ;;  %vm1220_vm6 = vcmp.lt.s32.totalorder %v479_v4, 17  ;;  %vm15006_vm8 = vcmp.ge.s32.totalorder %v8174_v5, 1  ;;  %s17952_s23 = smov (!%p8154_p5, %s6858_s23), 63  ;;  %vm15005_vm10 = vcmp.lt.s32.totalorder %v8174_v5, 17  ;;  %v8198_v9 = vld [vmem:[%s14986_s2 + $0x18] sm:$0xff]  ;;  %vm1191_vm12 = vcmp.ge.s32.totalorder %v482_v8, 1 }
  0x3b   : > { %v15699_v7 = vsel %vm8176_vm4, 4294967295, %v15698_v7  ;;  %vm1318_vm7 = vmand %vm8176_vm4, %vm15002_vm2  ;;  %7332 = vmatprep.subr.bf16.mxu0 %v7786_v6  ;;  %vm1223_vm13 = vcmp.lt.s32.totalorder %v482_v8, 17  ;;  %v480_v12 = vld [vmem:[%s14985_s1 + $0x8] sm:$0xff]  ;;  %v7787_v13 = vld [vmem:[#allocation2 + $0x10] sm:$0xff]   ;;  %vm15004_vm15 = vcmp.ge.s32.totalorder %v8198_v9, 1  ;;  %vm15003_vm1 = vcmp.lt.s32.totalorder %v8198_v9, 17 }
  0x3c   : > { %vm1382_vm9 = vmand %vm1318_vm7, %vm15001_vm3  ;;  %v8216_v14 = vld [vmem:[%s14986_s2 + $0x8] sm:$0xff]  ;;  %s6859_s20 = sshll.u32 %s17952_s23, 3  ;;  %vm1221_vm7 = vcmp.lt.s32.totalorder %v480_v12, 17  ;;  %v7788_v19 = vld [vmem:[#allocation2 + $0x18] sm:$0xff]   ;;  %v15706_v28 = vmov 0  ;;  %v15710_v35 = vmov 0 }
  0x3d   : > { %v1414_v10 = vsel %vm1382_vm9, 1, %v15091_v0  ;;  %vm8201_vm11 = vmand %vm1188_vm5, %vm1220_vm6  ;;  %vm1189_vm6 = vcmp.ge.s32.totalorder %v480_v12, 1  ;;  %v484_v17 = vld [vmem:[%s14985_s1 + $0x28] sm:$0xff]  ;;  %s8246_s30 = scalar_lea.vmem %s14984_s0, %s6859_s20  ;;  %v483_v22 = vld [vmem:[%s14985_s1 + $0x20] sm:$0xff]  ;;  %v15712_v42 = vmov 0  ;;  %v15718_v49 = vmov 0 }
  0x3e   : > { %1451 = vperm.xlu1 %7784, %v1414_v10   ;;  %vm1316_vm14 = vmand %vm8201_vm11, %vm15006_vm8  ;;  %7333 = vmatpush3.bf16.msra.mxu0 %v7786_v6  ;;  %v8238_v18 = vld [vmem:[%s14986_s2 + $0x28] sm:$0xff]  ;;  %vm1193_vm3 = vcmp.ge.s32.totalorder %v484_v17, 1  ;;  %vm1225_vm2 = vcmp.lt.s32.totalorder %v484_v17, 17  ;;  %v8264_v23 = vld [vmem:[%s14986_s2 + $0x20] sm:$0xff]  ;;  %vm1224_vm8 = vcmp.lt.s32.totalorder %v483_v22, 17  ;;  %v15723_v56 = vmov 0 }
  0x3f   : > { %vm1380_vm0 = vmand %vm1316_vm14, %vm15005_vm10  ;;  %7334 = vmatprep.subr.bf16.mxu0 %v7787_v13  ;;  %vm15009_vm14 = vcmp.ge.s32.totalorder %v8216_v14, 1  ;;  %v486_v24 = vld [vmem:[%s14985_s1 + $0x38] sm:$0xff]  ;;  %v431_v25 = vld [vmem:[%s8246_s30] sm:$0xff]  ;;  %vm1192_vm10 = vcmp.ge.s32.totalorder %v483_v22, 1  ;;  %v15729_v62 = vmov 0  ;;  %v15734_v10 = vmov 0 }
  0x40   : > { %v1412_v15 = vsel %vm1380_vm0, 1, %v15091_v0  ;;  %vm8223_vm5 = vmand %vm1191_vm12, %vm1223_vm13  ;;  %vm15008_vm13 = vcmp.lt.s32.totalorder %v8216_v14, 17  ;;  %v432_v26 = vld [vmem:[%s8246_s30 + $0x8] sm:$0xff]  ;;  %v433_v30 = vld [vmem:[%s8246_s30 + $0x10] sm:$0xff]  ;;  %v15742_v22 = vmov 0  ;;  %s420_s15 = sand.u32 1, %s7986_s22  }
  0x41   : > { %1445 = vperm.xlu0 %7783, %v1412_v15   ;;  %vm1319_vm9 = vmand %vm8223_vm5, %vm15004_vm15  ;;  %v8280_v29 = vpack.c.bf16 %v432_v26, %v431_v25  ;;  %v434_v31 = vld [vmem:[%s8246_s30 + $0x18] sm:$0xff]  ;;  %v485_v36 = vld [vmem:[%s14985_s1 + $0x30] sm:$0xff]  ;;  %s6857_s17 = sshll.u32 %s420_s15, 6  ;;  %s7063_s26 = sshll.u32 %s8089_s25, 10 }
  0x42   : > { %vm1383_vm12 = vmand %vm1319_vm9, %vm15003_vm1  ;;  %7335 = vmatpush3.bf16.msra.mxu0 %v7787_v13  ;;  %vm15007_vm1 = vcmp.ge.s32.totalorder %v8238_v18, 1  ;;  %v8292_v32 = vld [vmem:[%s14986_s2 + $0x38] sm:$0xff]  ;;  %v8294_v33 = vpack.c.bf16 %v434_v31, %v433_v30  ;;  %v8320_v37 = vld [vmem:[%s14986_s2 + $0x30] sm:$0xff]  ;;  %s422_s18 = scalar_lea.vmem [#allocation5], %s6857_s17  ;;  %s14934_s20 = scalar_lea.hbm %s14996_s12, %s7063_s26 }
  0x43   : > { %v1415_v20 = vsel %vm1383_vm12, 1, %v15091_v0  ;;  %vm8249_vm0 = vmand %vm1189_vm6, %vm1221_vm7  ;;  %7336 = vmatprep.subr.bf16.mxu0 %v7788_v19  ;;  %vm15011_vm7 = vcmp.lt.s32.totalorder %v8238_v18, 17  ;;  %vm15012_vm12 = vcmask 523264   ;;  %15708 = vst [vmem:[#allocation10_spill] sm:$0xff] %v8280_v29  ;;  %v488_v38 = vld [vmem:[%s14985_s1 + $0x48] sm:$0xff]  ;;  %v435_v39 = vld [vmem:[%s8246_s30 + $0x20] sm:$0xff] }
  0x44   : > { %1454 = vperm.xlu1 %7784, %v1415_v20   ;;  %vm1317_vm9 = vmand %vm8249_vm0, %vm15009_vm14  ;;  %15709 = vst [vmem:[#allocation11_spill] sm:$0xff] %v8294_v33  ;;  %7338 = vmatprep.mubr.msk.bf16.mxu0 %vm15012_vm12, %v8280_v29  ;;  %vm1227_vm14 = vcmp.lt.s32.totalorder %v486_v24, 17  ;;  %v436_v40 = vld [vmem:[%s8246_s30 + $0x28] sm:$0xff]  ;;  %v437_v44 = vld [vmem:[%s8246_s30 + $0x30] sm:$0xff]  ;;  %s14943_s25 = scalar_lea.sflag [#allocation4], %s420_s15  ;;  %p17944_p9 = scmp.ne.s32.totalorder %s15690_s13, 0 }
  0x45   : > { %vm1381_vm6 = vmand %vm1317_vm9, %vm15008_vm13  ;;  %vm1195_vm13 = vcmp.ge.s32.totalorder %v486_v24, 1  ;;  %v8335_v43 = vpack.c.bf16 %v436_v40, %v435_v39  ;;  %v438_v45 = vld [vmem:[%s8246_s30 + $0x38] sm:$0xff]  ;;  %v8347_v46 = vld [vmem:[%s14986_s2 + $0x48] sm:$0xff]  ;;  %s8000_s29 = smov [#allocation5]  }
  0x46   : > { %v1413_v27 = vsel %vm1381_vm6, 1, %v15091_v0  ;;  %vm8276_vm15 = vmand %vm1193_vm3, %vm1225_vm2  ;;  %7337 = vmatpush3.bf16.msra.mxu0 %v7788_v19  ;;  %vm15010_vm6 = vcmp.ge.s32.totalorder %v8264_v23, 1  ;;  %vm15013_vm3 = vcmp.lt.s32.totalorder %v8264_v23, 17  ;;  %15715 = vst [vmem:[#allocation13_spill] sm:$0xff] %v8347_v46  ;;  %v8349_v47 = vpack.c.bf16 %v438_v45, %v437_v44  ;;  %v487_v50 = vld [vmem:[%s14985_s1 + $0x40] sm:$0xff]  ;;  %v490_v52 = vld [vmem:[%s14985_s1 + $0x58] sm:$0xff] }
  0x47   : > { %v15707_v28 = vsel %vm8276_vm15, 4294967295, %v15706_v28  ;;  %1448 = vperm.xlu0 %7783, %v1413_v27   ;;  %vm1321_vm9 = vmand %vm8276_vm15, %vm15007_vm1  ;;  %15714 = vst [vmem:[#allocation12_spill] sm:$0xff] %v8335_v43  ;;  %v8372_v51 = vld [vmem:[%s14986_s2 + $0x40] sm:$0xff]  ;;  %v440_v54 = vld [vmem:[%s8246_s30 + $0x48] sm:$0xff]  ;;  %s7932_s23 = sshll.u32 %s8000_s29, 4  ;;  %s7933_s23 = int_to_ptr.vmem [resolvable:$false] %s7932_s23 }
  0x48   : > { %vm1385_vm2 = vmand %vm1321_vm9, %vm15011_vm7  ;;  %vm1194_vm7 = vcmp.ge.s32.totalorder %v485_v36, 1  ;;  %15716 = vst [vmem:[#allocation14_spill] sm:$0xff] %v8349_v47  ;;  %v439_v53 = vld [vmem:[%s8246_s30 + $0x40] sm:$0xff]  ;;  %v441_v58 = vld [vmem:[%s8246_s30 + $0x50] sm:$0xff]  ;;  %s7934_s17 = scalar_lea.vmem %s7933_s23, 2048 }
  0x49   : > { %v1417_v34 = vsel %vm1385_vm2, 1, %v15091_v0  ;;  %vm8303_vm1 = vmand %vm1192_vm10, %vm1224_vm8  ;;  %7339 = vmatmul.mubr.msk.bf16.vlgmr.msra.gmra.mrb[0].mxu0 %vm15012_vm12, %v8294_v33  ;;  %vm15014_vm10 = vcmp.ge.s32.totalorder %v8292_v32, 1  ;;  %vm15017_vm2 = vcmp.lt.s32.totalorder %v8292_v32, 17  ;;  %vm1226_vm12 = vcmp.lt.s32.totalorder %v485_v36, 17  ;;  %15721 = vst [vmem:[#allocation15_spill] sm:$0xff] %v8372_v51  ;;  %v442_v59 = vld [vmem:[%s8246_s30 + $0x58] sm:$0xff] }
  0x4a   : > { %v15711_v35 = vsel %vm8303_vm1, 4294967295, %v15710_v35  ;;  %1460 = vperm.xlu1 %7784, %v1417_v34   ;;  %vm1320_vm8 = vmand %vm8303_vm1, %vm15010_vm6  ;;  %v8389_v57 = vpack.c.bf16 %v440_v54, %v439_v53  ;;  %v8401_v60 = vld [vmem:[%s14986_s2 + $0x58] sm:$0xff]  ;;  %v489_v63 = vld [vmem:[%s14985_s1 + $0x50] sm:$0xff]  ;;  %v8416_v1 = vpack.c.bf16 %v442_v59, %v441_v58  ;;  %v15747_v34 = vmov 0 }
  0x4b   : > { %vm1384_vm9 = vmand %vm1320_vm8, %vm15013_vm3  ;;  %vm1197_vm3 = vcmp.ge.s32.totalorder %v488_v38, 1  ;;  %15727 = vst [vmem:[#allocation17_spill] sm:$0xff] %v8401_v60  ;;  %v8426_v2 = vld [vmem:[%s14986_s2 + $0x50] sm:$0xff]  ;;  %v443_v4 = vld [vmem:[%s8246_s30 + $0x60] sm:$0xff] }
  0x4c   : > { %v1416_v41 = vsel %vm1384_vm9, 1, %v15091_v0  ;;  %vm8331_vm6 = vmand %vm1195_vm13, %vm1227_vm14  ;;  %vm15020_vm13 = vcmp.lt.s32.totalorder %v8320_v37, 17  ;;  %vm15717_vm9 = vcmask 523264   ;;  %15725 = vst [vmem:[#allocation16_spill] sm:$0xff] %v8389_v57  ;;  %v444_v6 = vld [vmem:[%s8246_s30 + $0x68] sm:$0xff]  ;;  %v445_v17 = vld [vmem:[%s8246_s30 + $0x70] sm:$0xff] }
  0x4d   : > { %v15713_v42 = vsel %vm8331_vm6, 4294967295, %v15712_v42  ;;  %1457 = vperm.xlu0 %7783, %v1416_v41   ;;  %vm1323_vm8 = vmand %vm8331_vm6, %vm15014_vm10  ;;  %7342 = vmatprep.mubr.msk.bf16.mxu0 %vm15717_vm9, %v8335_v43  ;;  %vm1229_vm6 = vcmp.lt.s32.totalorder %v488_v38, 17  ;;  %15731 = vst [vmem:[#allocation18_spill] sm:$0xff] %v8416_v1  ;;  %v492_v12 = vld [vmem:[%s14985_s1 + $0x68] sm:$0xff]  ;;  %v8441_v13 = vpack.c.bf16 %v444_v6, %v443_v4  ;;  %v446_v19 = vld [vmem:[%s8246_s30 + $0x78] sm:$0xff]  ;;  %v15752_v41 = vmov 0 }
  0x4e   : > { %vm1387_vm14 = vmand %vm1323_vm8, %vm15017_vm2  ;;  %vm15720_vm8 = vcmp.ge.s32.totalorder %v8320_v37, 1  ;;  %vm15722_vm2 = vcmask 523264   ;;  %15733 = vst [vmem:[#allocation19_spill] sm:$0xff] %v8426_v2  ;;  %v8451_v15 = vld [vmem:[%s14986_s2 + $0x68] sm:$0xff]  ;;  %v491_v24 = vld [vmem:[%s14985_s1 + $0x60] sm:$0xff]  ;;  %v8484_v26 = vpack.c.bf16 %v446_v19, %v445_v17  ;;  %v15766_v6 = vmov 0 }
  0x4f   : > { %v1419_v48 = vsel %vm1387_vm14, 1, %v15091_v0  ;;  %vm8357_vm10 = vmand %vm1194_vm7, %vm1226_vm12  ;;  %vm15023_vm12 = vcmp.lt.s32.totalorder %v8347_v46, 17  ;;  %vm1196_vm14 = vcmp.ge.s32.totalorder %v487_v50, 1  ;;  %15736 = vst [vmem:[#allocation20_spill] sm:$0xff] %v8441_v13  ;;  %v8479_v25 = vld [vmem:[%s14986_s2 + $0x60] sm:$0xff]  ;;  %v448_v30 = vld [vmem:[%s8246_s30 + $0x88] sm:$0xff] }
  0x50   : > { %v15719_v49 = vsel %vm8357_vm10, 4294967295, %v15718_v49  ;;  %1466 = vperm.xlu1 %7784, %v1419_v48   ;;  %vm1322_vm9 = vmand %vm8357_vm10, %vm15720_vm8  ;;  %vm1228_vm10 = vcmp.lt.s32.totalorder %v487_v50, 17  ;;  %15738 = vst [vmem:[#allocation21_spill] sm:$0xff] %v8451_v15  ;;  %v447_v27 = vld [vmem:[%s8246_s30 + $0x80] sm:$0xff]  ;;  %v494_v36 = vld [vmem:[%s14985_s1 + $0x78] sm:$0xff]  ;;  %v15815_v43 = vmov 0 }
  0x51   : > { %vm1386_vm7 = vmand %vm1322_vm9, %vm15020_vm13  ;;  %7343 = vmatmul.mubr.msk.bf16.gmra.mrb[4].mxu0 %vm15722_vm2, %v8349_v47  ;;  %vm15726_vm9 = vcmp.ge.s32.totalorder %v8347_v46, 1  ;;  %vm1199_vm13 = vcmp.ge.s32.totalorder %v490_v52, 1  ;;  %15745 = vst [vmem:[#allocation22_spill] sm:$0xff] %v8479_v25  ;;  %v8496_v38 = vpack.c.bf16 %v448_v30, %v447_v27  ;;  %v8506_v39 = vld [vmem:[%s14986_s2 + $0x78] sm:$0xff]  ;;  %v493_v44 = vld [vmem:[%s14985_s1 + $0x70] sm:$0xff]  ;;  %v15807_v47 = vmov 0 }
  0x52   : > { %v1418_v55 = vsel %vm1386_vm7, 1, %v15091_v0  ;;  %vm8385_vm8 = vmand %vm1197_vm3, %vm1229_vm6  ;;  %vm15024_vm3 = vcmp.lt.s32.totalorder %v8372_v51, 17  ;;  %vm15728_vm7 = vcmask 523264   ;;  %15746 = vst [vmem:[#allocation23_spill] sm:$0xff] %v8484_v26  ;;  %v8522_v45 = vld [vmem:[%s14986_s2 + $0x70] sm:$0xff]  ;;  %v450_v50 = vld [vmem:[%s8246_s30 + $0x98] sm:$0xff] }
  0x53   : > { %v15724_v56 = vsel %vm8385_vm8, 4294967295, %v15723_v56  ;;  %1463 = vperm.xlu0 %7783, %v1418_v55   ;;  %vm1325_vm2 = vmand %vm8385_vm8, %vm15726_vm9  ;;  %7346 = vmatprep.mubr.msk.bf16.mxu0 %vm15728_vm7, %v8389_v57  ;;  %vm1231_vm8 = vcmp.lt.s32.totalorder %v490_v52, 17  ;;  %15749 = vst [vmem:[#allocation24_spill] sm:$0xff] %v8496_v38  ;;  %v449_v48 = vld [vmem:[%s8246_s30 + $0x90] sm:$0xff]  ;;  %v451_v52 = vld [vmem:[%s8246_s30 + $0xa0] sm:$0xff]  ;;  %v15760_v55 = vmov 0 }
  0x54   : > { %vm1389_vm6 = vmand %vm1325_vm2, %vm15023_vm12  ;;  %vm15732_vm2 = vcmp.ge.s32.totalorder %v8372_v51, 1  ;;  %15751 = vst [vmem:[#allocation25_spill] sm:$0xff] %v8506_v39  ;;  %v452_v53 = vld [vmem:[%s8246_s30 + $0xa8] sm:$0xff]  ;;  %v498_v17 = vld [vmem:[%s14985_s1 + $0x98] sm:$0xff]  ;;  %v15803_v57 = vmov 0 }
  0x55   : > { %v1421_v61 = vsel %vm1389_vm6, 1, %v15091_v0  ;;  %vm8409_vm9 = vmand %vm1196_vm14, %vm1228_vm10  ;;  %vm15029_vm14 = vcmp.lt.s32.totalorder %v8401_v60, 17  ;;  %vm1230_vm6 = vcmp.lt.s32.totalorder %v489_v63, 17  ;;  %15754 = vst [vmem:[#allocation26_spill] sm:$0xff] %v8522_v45  ;;  %v496_v58 = vld [vmem:[%s14985_s1 + $0x88] sm:$0xff]  ;;  %v8594_v19 = vld [vmem:[%s14986_s2 + $0x98] sm:$0xff] }
  0x56   : > { %v15730_v62 = vsel %vm8409_vm9, 4294967295, %v15729_v62  ;;  %1472 = vperm.xlu1 %7784, %v1421_v61   ;;  %vm1324_vm7 = vmand %vm8409_vm9, %vm15732_vm2  ;;  %vm15030_vm2 = vcmp.lt.s32.totalorder %v8426_v2, 17  ;;  %v8558_v59 = vld [vmem:[%s14986_s2 + $0x88] sm:$0xff]  ;;  %v8560_v61 = vpack.c.bf16 %v450_v50, %v449_v48  ;;  %15770 = vst [vmem:[#allocation31_spill] sm:$0xff] %v8594_v19  ;;  %v453_v27 = vld [vmem:[%s8246_s30 + $0xb0] sm:$0xff]  ;;  %v15778_v50 = vmov 0 }
  0x57   : > { %vm1388_vm10 = vmand %vm1324_vm7, %vm15024_vm3  ;;  %vm15737_vm7 = vcmp.ge.s32.totalorder %v8401_v60, 1  ;;  %15763 = vst [vmem:[#allocation27_spill] sm:$0xff] %v8558_v59  ;;  %v454_v30 = vld [vmem:[%s8246_s30 + $0xb8] sm:$0xff]  ;;  %v507_v33 = vld [vmem:[%s14985_s1 + $0xe0] sm:$0xff] }
  0x58   : > { %v1420_v8 = vsel %vm1388_vm10, 1, %v15091_v0  ;;  %vm8434_vm12 = vmand %vm1199_vm13, %vm1231_vm8  ;;  %vm15739_vm13 = vcmask 523264   ;;  %15764 = vst [vmem:[#allocation28_spill] sm:$0xff] %v8560_v61  ;;  %v510_v29 = vld [vmem:[%s14985_s1 + $0xf8] sm:$0xff]  ;;  %v9323_v16 = vld [vmem:[%s14986_s2 + $0x20] sm:$0xff] }
  0x59   : > { %v15735_v10 = vsel %vm8434_vm12, 4294967295, %v15734_v10  ;;  %1469 = vperm.xlu0 %7783, %v1420_v8   ;;  %vm1327_vm3 = vmand %vm8434_vm12, %vm15737_vm7  ;;  %7347 = vmatmul.mubr.msk.bf16.gmra.mrb[8].mxu0 %vm15739_vm13, %v8416_v1  ;;  %vm15741_vm7 = vcmp.ge.s32.totalorder %v489_v63, 1  ;;  %vm1233_vm12 = vcmp.lt.s32.totalorder %v492_v12, 17  ;;  %v8565_v63 = vpack.c.bf16 %v452_v53, %v451_v52  ;;  %v495_v8 = vld [vmem:[%s14985_s1 + $0x80] sm:$0xff]  ;;  %v500_v53 = vld [vmem:[%s14985_s1 + $0xa8] sm:$0xff]  ;;  %15885 = vst [vmem:[#allocation61_spill] sm:$0xff] %v9323_v16 }
  0x5a   : > { %vm1391_vm8 = vmand %vm1327_vm3, %vm15029_vm14  ;;  %vm15744_vm3 = vcmp.ge.s32.totalorder %v8426_v2, 1  ;;  %vm1232_vm14 = vcmp.lt.s32.totalorder %v491_v24, 17  ;;  %v8631_v52 = vpack.c.bf16 %v454_v30, %v453_v27  ;;  %v458_v27 = vld [vmem:[%s8246_s30 + $0xd8] sm:$0xff]  ;;  %v459_v30 = vld [vmem:[%s8246_s30 + $0xe0] sm:$0xff] }
  0x5b   : > { %vm15740_vm9 = vmmov %vm15739_vm13  ;;  %v1423_v20 = vsel %vm1391_vm8, 1, %v15091_v0  ;;  %vm1201_vm13 = vcmp.ge.s32.totalorder %v492_v12, 1  ;;  %vm15033_vm8 = vcmp.lt.s32.totalorder %v8451_v15, 17  ;;  %15765 = vst [vmem:[#allocation29_spill] sm:$0xff] %v8565_v63  ;;  %v8583_v12 = vld [vmem:[%s14986_s2 + $0x80] sm:$0xff] }
  0x5c   : > { %7350 = vmatprep.mubr.msk.bf16.mxu0 %vm15740_vm9, %v8441_v13  ;;  %vm8464_vm10 = vmand %vm15741_vm7, %vm1230_vm6  ;;  %1478 = vperm.xlu1 %7784, %v1423_v20   ;;  %15769 = vst [vmem:[#allocation30_spill] sm:$0xff] %v8583_v12  ;;  %v8706_v13 = vld [vmem:[%s14986_s2 + $0xb8] sm:$0xff] }
  0x5d   : > { %v15743_v22 = vsel %vm8464_vm10, 4294967295, %v15742_v22  ;;  %vm1326_vm9 = vmand %vm8464_vm10, %vm15744_vm3  ;;  %vm1200_vm3 = vcmp.ge.s32.totalorder %v491_v24, 1  ;;  %v15772_v24 = vmov 0  ;;  %15780 = vst [vmem:[#allocation33_spill] sm:$0xff] %v8631_v52 }
  0x5e   : > { %vm1390_vm6 = vmand %vm1326_vm9, %vm15030_vm2  ;;  %vm15750_vm9 = vcmp.ge.s32.totalorder %v8451_v15, 1 }
  0x5f   : > { %v1422_v31 = vsel %vm1390_vm6, 1, %v15091_v0  ;;  %vm8489_vm7 = vmand %vm1201_vm13, %vm1233_vm12  ;;  %vm15038_vm6 = vcmp.lt.s32.totalorder %v8479_v25, 17  ;;  %vm15039_vm12 = vcmp.lt.s32.totalorder %v8506_v39, 17 }
  0x60   : > { %v15748_v34 = vsel %vm8489_vm7, 4294967295, %v15747_v34  ;;  %1475 = vperm.xlu0 %7783, %v1422_v31   ;;  %vm1329_vm2 = vmand %vm8489_vm7, %vm15750_vm9  ;;  %vm15759_vm7 = vcmp.ge.s32.totalorder %v494_v36, 1  ;;  %v455_v31 = vld [vmem:[%s8246_s30 + $0xc0] sm:$0xff] }
  0x61   : > { %vm1393_vm13 = vmand %vm1329_vm2, %vm15033_vm8  ;;  %vm15755_vm2 = vcmask 523264  }
  0x62   : > { %v1425_v40 = vsel %vm1393_vm13, 1, %v15091_v0  ;;  %vm8512_vm10 = vmand %vm1200_vm3, %vm1232_vm14  ;;  %7351 = vmatmul.mubr.msk.bf16.gmra.mrb[12].mxu0 %vm15755_vm2, %v8484_v26  ;;  %vm15756_vm14 = vcmp.ge.s32.totalorder %v8479_v25, 1  ;;  %vm1234_vm13 = vcmp.lt.s32.totalorder %v493_v44, 17  ;;  %v15794_v26 = vmov 0 }
  0x63   : > { %v15753_v41 = vsel %vm8512_vm10, 4294967295, %v15752_v41  ;;  %1484 = vperm.xlu1 %7784, %v1425_v40   ;;  %vm1328_vm3 = vmand %vm8512_vm10, %vm15756_vm14  ;;  %vm1202_vm14 = vcmp.ge.s32.totalorder %v493_v44, 1  ;;  %v497_v40 = vld [vmem:[%s14985_s1 + $0x90] sm:$0xff] }
  0x64   : > { %vm15757_vm8 = vmmov %vm15755_vm2  ;;  %vm15758_vm2 = vcmp.lt.s32.totalorder %v494_v36, 17  ;;  %v456_v36 = vld [vmem:[%s8246_s30 + $0xc8] sm:$0xff]  ;;  %v8623_v44 = vld [vmem:[%s14986_s2 + $0x90] sm:$0xff] }
  0x65   : > { %7354 = vmatprep.mubr.msk.bf16.mxu0 %vm15757_vm8, %v8496_v38  ;;  %vm1392_vm9 = vmand %vm1328_vm3, %vm15038_vm6  ;;  %vm15762_vm8 = vcmp.ge.s32.totalorder %v8506_v39, 1  ;;  %15777 = vst [vmem:[#allocation32_spill] sm:$0xff] %v8623_v44  ;;  %v8892_v38 = vld [vmem:[%s14986_s2 + $0xf8] sm:$0xff] }
  0x66   : > { %v1424_v54 = vsel %vm1392_vm9, 1, %v15091_v0  ;;  %vm8543_vm1 = vmand %vm15759_vm7, %vm15758_vm2  ;;  %vm15040_vm2 = vcmp.lt.s32.totalorder %v8522_v45, 17  ;;  %vm1237_vm9 = vcmp.lt.s32.totalorder %v496_v58, 17  ;;  %15828 = vst [vmem:[#allocation44_spill] sm:$0xff] %v8892_v38 }
  0x67   : > { %v15761_v55 = vsel %vm8543_vm1, 4294967295, %v15760_v55  ;;  %1481 = vperm.xlu0 %7783, %v1424_v54   ;;  %vm1331_vm3 = vmand %vm8543_vm1, %vm15762_vm8  ;;  %vm1205_vm8 = vcmp.ge.s32.totalorder %v496_v58, 1  ;;  %v8641_v54 = vpack.c.bf16 %v456_v36, %v455_v31  ;;  %v8649_v58 = vld [vmem:[%s14986_s2 + $0xa8] sm:$0xff]  ;;  %v15790_v36 = vmov 0 }
  0x68   : > { %vm1395_vm7 = vmand %vm1331_vm3, %vm15039_vm12  ;;  %vm15768_vm3 = vcmp.ge.s32.totalorder %v8522_v45, 1  ;;  %15783 = vst [vmem:[#allocation35_spill] sm:$0xff] %v8649_v58 }
  0x69   : > { %v1427_v4 = vsel %vm1395_vm7, 1, %v15091_v0  ;;  %vm8568_vm6 = vmand %vm1202_vm14, %vm1234_vm13  ;;  %15781 = vst [vmem:[#allocation34_spill] sm:$0xff] %v8641_v54 }
  0x6a   : > { %v15767_v6 = vsel %vm8568_vm6, 4294967295, %v15766_v6  ;;  %1490 = vperm.xlu1 %7784, %v1427_v4   ;;  %vm1330_vm12 = vmand %vm8568_vm6, %vm15768_vm3  ;;  %vm15771_vm3 = vcmask 523264   ;;  %vm15775_vm6 = vcmp.ge.s32.totalorder %v8558_v59, 1 }
  0x6b   : > { %vm1394_vm13 = vmand %vm1330_vm12, %vm15040_vm2  ;;  %7355 = vmatmul.mubr.msk.bf16.gmra.mrb[16].mxu0 %vm15771_vm3, %v8560_v61  ;;  %vm1204_vm12 = vcmp.ge.s32.totalorder %v495_v8, 1  ;;  %vm1236_vm2 = vcmp.lt.s32.totalorder %v495_v8, 17  ;;  %v15784_v8 = vmov 0 }
  0x6c   : > { %v1426_v20 = vsel %vm1394_vm13, 1, %v15091_v0  ;;  %vm8599_vm7 = vmand %vm1205_vm8, %vm1237_vm9  ;;  %vm15776_vm9 = vcmp.lt.s32.totalorder %v8558_v59, 17  ;;  %vm1206_vm13 = vcmp.ge.s32.totalorder %v497_v40, 1 }
  0x6d   : > { %v15773_v24 = vsel %vm8599_vm7, 4294967295, %v15772_v24  ;;  %vm15774_vm14 = vmmov %vm15771_vm3  ;;  %1487 = vperm.xlu0 %7783, %v1426_v20   ;;  %vm15045_vm3 = vcmp.ge.s32.totalorder %v8583_v12, 1  ;;  %v499_v20 = vld [vmem:[%s14985_s1 + $0xa0] sm:$0xff] }
  0x6e   : > { %7358 = vmatprep.mubr.msk.bf16.mxu0 %vm15774_vm14, %v8565_v63  ;;  %vm1333_vm1 = vmand %vm8599_vm7, %vm15775_vm6  ;;  %vm1239_vm14 = vcmp.lt.s32.totalorder %v498_v17, 17  ;;  %vm15058_vm7 = vcmp.lt.s32.totalorder %v8623_v44, 17  ;;  %v15817_v63 = vmov 0 }
  0x6f   : > { %vm1397_vm8 = vmand %vm1333_vm1, %vm15776_vm9  ;;  %vm1207_vm1 = vcmp.ge.s32.totalorder %v498_v17, 1  ;;  %v457_v17 = vld [vmem:[%s8246_s30 + $0xd0] sm:$0xff] }
  0x70   : > { %v1429_v48 = vsel %vm1397_vm8, 1, %v15091_v0  ;;  %vm8627_vm6 = vmand %vm1204_vm12, %vm1236_vm2  ;;  %vm15782_vm2 = vcmp.lt.s32.totalorder %v8583_v12, 17  ;;  %vm1209_vm8 = vcmp.ge.s32.totalorder %v500_v53, 1 }
  0x71   : > { %v15779_v50 = vsel %vm8627_vm6, 4294967295, %v15778_v50  ;;  %1496 = vperm.xlu1 %7784, %v1429_v48   ;;  %vm1332_vm9 = vmand %vm8627_vm6, %vm15045_vm3  ;;  %vm1238_vm6 = vcmp.lt.s32.totalorder %v497_v40, 17  ;;  %v460_v40 = vld [vmem:[%s8246_s30 + $0xe8] sm:$0xff]  ;;  %v8688_v48 = vld [vmem:[%s14986_s2 + $0xa0] sm:$0xff] }
  0x72   : > { %vm1396_vm12 = vmand %vm1332_vm9, %vm15782_vm2  ;;  %vm15786_vm9 = vcmp.ge.s32.totalorder %v8594_v19, 1  ;;  %v8708_v1 = vpack.c.bf16 %v460_v40, %v459_v30  ;;  %v15797_v30 = vmov 0  ;;  %v461_v40 = vld [vmem:[%s8246_s30 + $0xf0] sm:$0xff] }
  0x73   : > { %v1428_v4 = vsel %vm1396_vm12, 1, %v15091_v0  ;;  %vm8652_vm3 = vmand %vm1207_vm1, %vm1239_vm14  ;;  %vm15787_vm1 = vcmask 523264   ;;  %vm15788_vm14 = vcmp.lt.s32.totalorder %v8594_v19, 17 }
  0x74   : > { %v15785_v8 = vsel %vm8652_vm3, 4294967295, %v15784_v8  ;;  %1493 = vperm.xlu0 %7783, %v1428_v4   ;;  %vm1335_vm2 = vmand %vm8652_vm3, %vm15786_vm9  ;;  %7359 = vmatmul.mubr.msk.bf16.gmra.mrb[20].mxu0 %vm15787_vm1, %v8631_v52  ;;  %vm1241_vm3 = vcmp.lt.s32.totalorder %v500_v53, 17  ;;  %v502_v53 = vld [vmem:[%s14985_s1 + $0xb8] sm:$0xff]  ;;  %v8696_v4 = vpack.c.bf16 %v458_v27, %v457_v17  ;;  %15796 = vst [vmem:[#allocation37_spill] sm:$0xff] %v8708_v1  ;;  %v501_v17 = vld [vmem:[%s14985_s1 + $0xb0] sm:$0xff] }
  0x75   : > { %vm1399_vm12 = vmand %vm1335_vm2, %vm15788_vm14  ;;  %vm15057_vm14 = vcmp.ge.s32.totalorder %v8649_v58, 1  ;;  %v505_v52 = vld [vmem:[%s14985_s1 + $0xd0] sm:$0xff] }
  0x76   : > { %vm15789_vm10 = vmmov %vm15787_vm1  ;;  %v1431_v31 = vsel %vm1399_vm12, 1, %v15091_v0  ;;  %vm15792_vm1 = vcmp.ge.s32.totalorder %v8623_v44, 1  ;;  %15793 = vst [vmem:[#allocation36_spill] sm:$0xff] %v8696_v4  ;;  %vm1208_vm12 = vcmp.ge.s32.totalorder %v499_v20, 1 }
  0x77   : > { %7362 = vmatprep.mubr.msk.bf16.mxu0 %vm15789_vm10, %v8641_v54  ;;  %vm8675_vm9 = vmand %vm1206_vm13, %vm1238_vm6  ;;  %1502 = vperm.xlu1 %7784, %v1431_v31   ;;  %vm15061_vm13 = vcmp.lt.s32.totalorder %v8649_v58, 17 }
  0x78   : > { %v15791_v36 = vsel %vm8675_vm9, 4294967295, %v15790_v36  ;;  %vm1334_vm2 = vmand %vm8675_vm9, %vm15792_vm1  ;;  %vm1240_vm1 = vcmp.lt.s32.totalorder %v499_v20, 17  ;;  %v8724_v20 = vld [vmem:[%s14986_s2 + $0xb0] sm:$0xff]  ;;  %vm15811_vm9 = vcmask 523264  }
  0x79   : > { %vm1398_vm10 = vmand %vm1334_vm2, %vm15058_vm7  ;;  %vm1211_vm7 = vcmp.ge.s32.totalorder %v502_v53, 1 }
  0x7a   : > { %v1430_v31 = vsel %vm1398_vm10, 1, %v15091_v0  ;;  %vm8699_vm6 = vmand %vm1209_vm8, %vm1241_vm3  ;;  %vm1243_vm3 = vcmp.lt.s32.totalorder %v502_v53, 17  ;;  %v462_v53 = vld [vmem:[%s8246_s30 + $0xf8] sm:$0xff]  ;;  %vm1210_vm10 = vcmp.ge.s32.totalorder %v501_v17, 1  ;;  %s6777_s30 = sshll.u32 %s422_s18, 4  ;;  %s14936_s30 = int_to_ptr.vmem [resolvable:$true] %s6777_s30 }
  0x7b   : > { %v15795_v26 = vsel %vm8699_vm6, 4294967295, %v15794_v26  ;;  %1499 = vperm.xlu0 %7783, %v1430_v31   ;;  %vm1337_vm2 = vmand %vm8699_vm6, %vm15057_vm14  ;;  %vm15799_vm6 = vcmask 523264   ;;  %v504_v31 = vld [vmem:[%s14985_s1 + $0xc8] sm:$0xff]  ;;  %v8766_v54 = vpack.c.bf16 %v462_v53, %v461_v40  ;;  %v506_v40 = vld [vmem:[%s14985_s1 + $0xd8] sm:$0xff]  ;;  %s7928_s28 = scalar_lea.vmem %s14936_s30, 1024  ;;  %p7935_p2 = scmp.lt.s32.totalorder %s14936_s30, %s7933_s23 }
  0x7c   : > { %vm1401_vm8 = vmand %vm1337_vm2, %vm15061_vm13  ;;  %7363 = vmatmul.mubr.msk.bf16.gmra.mrb[24].mxu0 %vm15799_vm6, %v8696_v4  ;;  %vm15800_vm2 = vcmp.ge.s32.totalorder %v8688_v48, 1  ;;  %p7929_p6 = scmp.ne.s32.totalorder %s14936_s30, %s7928_s28  ;;  %p7936_p3 = scmp.lt.s32.totalorder %s7934_s17, %s7928_s28 }
  0x7d   : > { %v1433_v27 = vsel %vm1401_vm8, 1, %v15091_v0  ;;  %vm8727_vm14 = vmand %vm1208_vm12, %vm1240_vm1  ;;  %vm15802_vm1 = vcmp.lt.s32.totalorder %v8688_v48, 17  ;;  %vm15069_vm8 = vcmp.lt.s32.totalorder %v8706_v13, 17  ;;  %15806 = vst [vmem:[#allocation38_spill] sm:$0xff] %v8766_v54 }
  0x7e   : > { %v15798_v30 = vsel %vm8727_vm14, 4294967295, %v15797_v30  ;;  %1508 = vperm.xlu1 %7784, %v1433_v27   ;;  %vm1336_vm13 = vmand %vm8727_vm14, %vm15800_vm2  ;;  %v8751_v27 = vld [vmem:[%s14986_s2 + $0xc8] sm:$0xff]  ;;  %vm1242_vm14 = vcmp.lt.s32.totalorder %v501_v17, 17  ;;  %v8774_v17 = vld [vmem:[%s14986_s2 + $0xc0] sm:$0xff]  ;;  %p7930_p10 = pnand %p7929_p6, %p17944_p9  ;;  %p7937_p4 = por %p7936_p3, %p7935_p2 }
  0x7f   : > { %vm15801_vm12 = vmmov %vm15799_vm6 }
  0x80   : > { %7366 = vmatprep.mubr.msk.bf16.mxu0 %vm15801_vm12, %v8708_v1  ;;  %vm1400_vm6 = vmand %vm1336_vm13, %vm15802_vm1  ;;  %v503_v1 = vld [vmem:[%s14985_s1 + $0xc0] sm:$0xff]  ;;  %vm15805_vm13 = vcmp.ge.s32.totalorder %v8706_v13, 1  ;;  %vm1245_vm1 = vcmp.lt.s32.totalorder %v504_v31, 17  ;;  %p7931_p12 = pneg %p7930_p10 }
  0x81   : > { %v1432_v4 = vsel %vm1400_vm6, 1, %v15091_v0  ;;  %vm8754_vm2 = vmand %vm1211_vm7, %vm1243_vm3  ;;  %vm15079_vm3 = vcmp.ge.s32.totalorder %v8751_v27, 1 }
  0x82   : > { %v15804_v57 = vsel %vm8754_vm2, 4294967295, %v15803_v57  ;;  %1505 = vperm.xlu0 %7783, %v1432_v4   ;;  %vm1339_vm12 = vmand %vm8754_vm2, %vm15805_vm13  ;;  %vm1213_vm13 = vcmp.ge.s32.totalorder %v504_v31, 1  ;;  %vm1212_vm2 = vcmp.ge.s32.totalorder %v503_v1, 1  ;;  %v8795_v31 = vld [vmem:[%s14986_s2 + $0xd8] sm:$0xff]  ;;  %p7938_p7 = pnand %p7937_p4, %p7931_p12 }
  0x83   : > { %vm1403_vm7 = vmand %vm1339_vm12, %vm15069_vm8  ;;  %vm15809_vm12 = vcmp.ge.s32.totalorder %v8724_v20, 1 }
  0x84   : > { %v1435_v4 = vsel %vm1403_vm7, 1, %v15091_v0  ;;  %vm8777_vm6 = vmand %vm1210_vm10, %vm1242_vm14  ;;  %vm15810_vm7 = vcmp.lt.s32.totalorder %v8724_v20, 17  ;;  %vm15080_vm10 = vcmp.lt.s32.totalorder %v8751_v27, 17  ;;  %7367 = vmatmul.mubr.msk.bf16.gmra.mrb[28].mxu0 %vm15811_vm9, %v8766_v54 }
  0x85   : > { %v15808_v47 = vsel %vm8777_vm6, 4294967295, %v15807_v47  ;;  %1514 = vperm.xlu1 %7784, %v1435_v4   ;;  %vm1338_vm8 = vmand %vm8777_vm6, %vm15809_vm12  ;;  %v15812_v4 = vmov 0  ;;  %vm1244_vm12 = vcmp.lt.s32.totalorder %v503_v1, 17  ;;  %vm15090_vm6 = vcmp.lt.s32.totalorder %v8795_v31, 17 }
  0x86   : > { %vm1402_vm14 = vmand %vm1338_vm8, %vm15810_vm7  ;;  %vm15087_vm7 = vcmp.ge.s32.totalorder %v8774_v17, 1 }
  0x87   : > { %v1434_v53 = vsel %vm1402_vm14, 1, %v15091_v0  ;;  %vm8800_vm15 = vmand %vm1213_vm13, %vm1245_vm1  ;;  %vm15086_vm1 = vcmp.lt.s32.totalorder %v8774_v17, 17  ;;  %vm1215_vm13 = vcmp.ge.s32.totalorder %v506_v40, 1 }
  0x88   : > { %v15813_v4 = vsel %vm8800_vm15, 4294967295, %v15812_v4  ;;  %1511 = vperm.xlu0 %7783, %v1434_v53   ;;  %vm1341_vm8 = vmand %vm8800_vm15, %vm15079_vm3  ;;  %v8818_v53 = vld [vmem:[%s14986_s2 + $0xd0] sm:$0xff]  ;;  %vm1247_vm3 = vcmp.lt.s32.totalorder %v506_v40, 17  ;;  %v8850_v40 = vld [vmem:[%s14986_s2 + $0xe8] sm:$0xff] }
  0x89   : > { %vm1405_vm9 = vmand %vm1341_vm8, %vm15080_vm10  ;;  %15814 = vst [vmem:[#allocation39_spill] sm:$0xff] %v8818_v53  ;;  %vm15088_vm10 = vcmp.ge.s32.totalorder %v8795_v31, 1 }
  0x8a   : > { %v1437_v54 = vsel %vm1405_vm9, 1, %v15091_v0  ;;  %vm8822_vm14 = vmand %vm1212_vm2, %vm1244_vm12  ;;  %vm1214_vm12 = vcmp.ge.s32.totalorder %v505_v52, 1  ;;  %vm1246_vm9 = vcmp.lt.s32.totalorder %v505_v52, 17  ;;  %15819 = vst [vmem:[#allocation40_spill] sm:$0xff] %v8850_v40 }
  0x8b   : > { %v15816_v43 = vsel %vm8822_vm14, 4294967295, %v15815_v43  ;;  %1520 = vperm.xlu1 %7784, %v1437_v54   ;;  %vm1340_vm8 = vmand %vm8822_vm14, %vm15087_vm7  ;;  %v508_v54 = vld [vmem:[%s14985_s1 + $0xe8] sm:$0xff] }
  0x8c   : > { %vm1404_vm15 = vmand %vm1340_vm8, %vm15086_vm1  ;;  %vm15096_vm1 = vcmp.ge.s32.totalorder %v8818_v53, 1  ;;  %vm1217_vm7 = vcmp.ge.s32.totalorder %v508_v54, 1 }
  0x8d   : > { %v1436_v1 = vsel %vm1404_vm15, 1, %v15091_v0  ;;  %vm8835_vm2 = vmand %vm1215_vm13, %vm1247_vm3  ;;  %vm15098_vm3 = vcmp.lt.s32.totalorder %v8818_v53, 17 }
  0x8e   : > { %v15818_v63 = vsel %vm8835_vm2, 4294967295, %v15817_v63  ;;  %1517 = vperm.xlu0 %7783, %v1436_v1   ;;  %vm1343_vm8 = vmand %vm8835_vm2, %vm15088_vm10  ;;  %v15820_v1 = vmov 0  ;;  %vm1249_vm10 = vcmp.lt.s32.totalorder %v508_v54, 17  ;;  %v15824_v54 = vmov 0  }
  0x8f   : > { %vm1407_vm15 = vmand %vm1343_vm8, %vm15090_vm6  ;;  %vm15102_vm6 = vcmp.ge.s32.totalorder %v8850_v40, 1  ;;  %vm1216_vm2 = vcmp.ge.s32.totalorder %v507_v33, 1 }
  0x90   : > { %v1439_v52 = vsel %vm1407_vm15, 1, %v15091_v0  ;;  %vm8856_vm13 = vmand %vm1214_vm12, %vm1246_vm9  ;;  %v8871_v0 = vld [vmem:[%s14986_s2 + $0xe0] sm:$0xff]  ;;  %vm15105_vm9 = vcmp.lt.s32.totalorder %v8850_v40, 17 }
  0x91   : > { %v15821_v1 = vsel %vm8856_vm13, 4294967295, %v15820_v1  ;;  %1526 = vperm.xlu1 %7784, %v1439_v52   ;;  %vm1342_vm8 = vmand %vm8856_vm13, %vm15096_vm1  ;;  %15823 = vst [vmem:[#allocation42_spill] sm:$0xff] %v8871_v0  ;;  %v15825_v52 = vmov 0  ;;  %vm1248_vm1 = vcmp.lt.s32.totalorder %v507_v33, 17  ;;  %vm1219_vm13 = vcmp.ge.s32.totalorder %v510_v29, 1 }
  0x92   : > { %15822 = vst [vmem:[#allocation41_spill] sm:$0xff] %v15821_v1  ;;  %vm1406_vm12 = vmand %vm1342_vm8, %vm15098_vm3  ;;  %vm15110_vm3 = vcmp.ge.s32.totalorder %v8871_v0, 1  ;;  %v8913_v1 = vld [vmem:[%s14986_s2 + $0xf0] sm:$0xff] }
  0x93   : > { %v1438_v61 = vsel %vm1406_vm12, 1, %v15824_v54  ;;  %vm8877_vm15 = vmand %vm1217_vm7, %vm1249_vm10  ;;  %vm15115_vm7 = vcmp.lt.s32.totalorder %v8871_v0, 17  ;;  %15832 = vst [vmem:[#allocation46_spill] sm:$0xff] %v8913_v1  ;;  %vm15122_vm14 = vcmp.ge.s32.totalorder %v8913_v1, 1  ;;  %v9716_v0 = vld [vmem:[%s14988_s4] ss:$0 sm:$0xff] }
  0x94   : > { %v15826_v52 = vsel %vm8877_vm15, 4294967295, %v15825_v52  ;;  %1523 = vperm.xlu0 %7783, %v1438_v61   ;;  %vm1345_vm8 = vmand %vm8877_vm15, %vm15102_vm6  ;;  %v15829_v61 = vmov 0  ;;  %vm1251_vm6 = vcmp.lt.s32.totalorder %v510_v29, 17 }
  0x95   : > { %15827 = vst [vmem:[#allocation43_spill] sm:$0xff] %v15826_v52  ;;  %vm1409_vm10 = vmand %vm1345_vm8, %vm15105_vm9  ;;  %v509_v52 = vld [vmem:[%s14985_s1 + $0xf0] sm:$0xff]  ;;  %vm15120_vm9 = vcmp.ge.s32.totalorder %v8892_v38, 1 }
  0x96   : > { %v1441_v33 = vsel %vm1409_vm10, 1, %v15824_v54  ;;  %vm8898_vm12 = vmand %vm1216_vm2, %vm1248_vm1  ;;  %vm15121_vm2 = vcmp.lt.s32.totalorder %v8892_v38, 17  ;;  %vm1218_vm15 = vcmp.ge.s32.totalorder %v509_v52, 1 }
  0x97   : > { %v15830_v61 = vsel %vm8898_vm12, 4294967295, %v15829_v61  ;;  %1532 = vperm.xlu1 %7784, %v1441_v33   ;;  %vm1344_vm8 = vmand %vm8898_vm12, %vm15110_vm3  ;;  %vm1250_vm3 = vcmp.lt.s32.totalorder %v509_v52, 17 }
  0x98   : > { %15831 = vst [vmem:[#allocation45_spill] sm:$0xff] %v15830_v61  ;;  %vm1408_vm1 = vmand %vm1344_vm8, %vm15115_vm7  ;;  %vm15124_vm7 = vcmp.lt.s32.totalorder %v8913_v1, 17 }
  0x99   : > { %v1440_v29 = vsel %vm1408_vm1, 1, %v15824_v54  ;;  %vm8919_vm10 = vmand %vm1219_vm13, %vm1251_vm6  ;;  %vm15123_vm13 = vcmp.ge.s32.totalorder %v8216_v14, 0 }
  0x9a   : > { %1529 = vperm.xlu0 %7783, %v1440_v29   ;;  %vm1347_vm12 = vmand %vm8919_vm10, %vm15120_vm9  ;;  %vm15126_vm9 = vcmp.lt.s32.totalorder %v8216_v14, 16 }
  0x9b   : > { %vm1411_vm8 = vmand %vm1347_vm12, %vm15121_vm2  ;;  %vm15125_vm2 = vcmp.ge.s32.totalorder %v8174_v5, 0 }
  0x9c   : > { %v1443_v61 = vsel %vm1411_vm8, 1, %v15824_v54  ;;  %vm8932_vm6 = vmand %vm1218_vm15, %vm1250_vm3  ;;  %vm15128_vm15 = vcmp.lt.s32.totalorder %v8174_v5, 16 }
  0x9d   : > { %1538 = vperm.xlu1 %7784, %v1443_v61   ;;  %vm1346_vm1 = vmand %vm8932_vm6, %vm15122_vm14  ;;  %vm15127_vm14 = vcmp.ge.s32.totalorder %v8198_v9, 0 }
  0x9e   : > { %vm1410_vm12 = vmand %vm1346_vm1, %vm15124_vm7  ;;  %vm15130_vm7 = vcmp.ge.s32.totalorder %v8164_v3, 0 }
  0x9f   : > { %v1442_v52 = vsel %vm1410_vm12, 1, %v15824_v54  ;;  %vm1838_vm3 = vmand %vm8249_vm0, %vm15123_vm13  ;;  %vm15129_vm12 = vcmp.lt.s32.totalorder %v8198_v9, 16 }
  0xa0   : > { %1535 = vperm.xlu0 %7783, %v1442_v52   ;;  %vm1902_vm8 = vmand %vm1838_vm3, %vm15126_vm9  ;;  %vm15133_vm9 = vcmp.ge.s32.totalorder %v8238_v18, 0 }
  0xa1   : > { %v1934_v61 = vsel %vm1902_vm8, 1, %v15824_v54  ;;  %vm1837_vm1 = vmand %vm8201_vm11, %vm15125_vm2  ;;  %vm15132_vm8 = vcmp.lt.s32.totalorder %v8164_v3, 16 }
  0xa2   : > { %1969 = vperm.xlu1 %7784, %v1934_v61   ;;  %vm1901_vm13 = vmand %vm1837_vm1, %vm15128_vm15  ;;  %vm15134_vm1 = vcmp.lt.s32.totalorder %v8238_v18, 16  ;;  %vm15135_vm15 = vcmp.ge.s32.totalorder %v8264_v23, 0 }
  0xa3   : > { %v1933_v29 = vsel %vm1901_vm13, 1, %v15824_v54  ;;  %vm1840_vm3 = vmand %vm8223_vm5, %vm15127_vm14 }
  0xa4   : > { %1966 = vperm.xlu0 %7783, %v1933_v29   ;;  %vm1904_vm2 = vmand %vm1840_vm3, %vm15129_vm12  ;;  %vm15837_vm3 = vnez %v15707_v28  ;;  %vm15136_vm12 = vcmp.lt.s32.totalorder %v8264_v23, 16 }
  0xa5   : > { %v1936_v52 = vsel %vm1904_vm2, 1, %v15824_v54  ;;  %vm1839_vm13 = vmand %vm8176_vm4, %vm15130_vm7  ;;  %vm15137_vm4 = vcmp.ge.s32.totalorder %v8292_v32, 0 }
  0xa6   : > { %1975 = vperm.xlu1 %7784, %v1936_v52   ;;  %vm1903_vm14 = vmand %vm1839_vm13, %vm15132_vm8  ;;  %vm15838_vm13 = vnez %v15711_v35  ;;  %vm15138_vm8 = vcmp.lt.s32.totalorder %v8292_v32, 16 }
  0xa7   : > { %v1935_v61 = vsel %vm1903_vm14, 1, %v15824_v54  ;;  %vm1842_vm2 = vmand %vm15837_vm3, %vm15133_vm9  ;;  %vm15139_vm3 = vcmp.ge.s32.totalorder %v8320_v37, 0 }
  0xa8   : > { %1972 = vperm.xlu0 %7783, %v1935_v61   ;;  %vm1906_vm7 = vmand %vm1842_vm2, %vm15134_vm1  ;;  %vm15839_vm2 = vnez %v15713_v42  ;;  %vm15140_vm1 = vcmp.lt.s32.totalorder %v8320_v37, 16 }
  0xa9   : > { %v1938_v29 = vsel %vm1906_vm7, 1, %v15824_v54  ;;  %vm1841_vm14 = vmand %vm15838_vm13, %vm15135_vm15  ;;  %vm15141_vm13 = vcmp.ge.s32.totalorder %v8347_v46, 0 }
  0xaa   : > { %1981 = vperm.xlu1 %7784, %v1938_v29   ;;  %vm1905_vm9 = vmand %vm1841_vm14, %vm15136_vm12  ;;  %vm15840_vm14 = vnez %v15719_v49  ;;  %vm15142_vm12 = vcmp.lt.s32.totalorder %v8347_v46, 16 }
  0xab   : > { %v1937_v52 = vsel %vm1905_vm9, 1, %v15824_v54  ;;  %vm1844_vm7 = vmand %vm15839_vm2, %vm15137_vm4  ;;  %vm15143_vm2 = vcmp.ge.s32.totalorder %v8372_v51, 0 }
  0xac   : > { %1978 = vperm.xlu0 %7783, %v1937_v52   ;;  %vm1908_vm15 = vmand %vm1844_vm7, %vm15138_vm8  ;;  %vm15841_vm7 = vnez %v15724_v56  ;;  %vm15144_vm8 = vcmp.lt.s32.totalorder %v8372_v51, 16 }
  0xad   : > { %v1940_v61 = vsel %vm1908_vm15, 1, %v15824_v54  ;;  %vm1843_vm9 = vmand %vm15840_vm14, %vm15139_vm3  ;;  %vm15145_vm14 = vcmp.ge.s32.totalorder %v8401_v60, 0 }
  0xae   : > { %1987 = vperm.xlu1 %7784, %v1940_v61   ;;  %vm1907_vm4 = vmand %vm1843_vm9, %vm15140_vm1  ;;  %vm15842_vm9 = vnez %v15730_v62  ;;  %vm15146_vm1 = vcmp.lt.s32.totalorder %v8401_v60, 16 }
  0xaf   : > { %v1939_v29 = vsel %vm1907_vm4, 1, %v15824_v54  ;;  %vm1846_vm15 = vmand %vm15841_vm7, %vm15141_vm13  ;;  %vm15147_vm7 = vcmp.ge.s32.totalorder %v8426_v2, 0 }
  0xb0   : > { %1984 = vperm.xlu0 %7783, %v1939_v29   ;;  %vm1910_vm3 = vmand %vm1846_vm15, %vm15142_vm12  ;;  %vm15843_vm15 = vnez %v15735_v10  ;;  %vm15148_vm12 = vcmp.lt.s32.totalorder %v8426_v2, 16 }
  0xb1   : > { %v1942_v52 = vsel %vm1910_vm3, 1, %v15824_v54  ;;  %vm1845_vm4 = vmand %vm15842_vm9, %vm15143_vm2  ;;  %vm15149_vm9 = vcmp.ge.s32.totalorder %v8451_v15, 0 }
  0xb2   : > { %1993 = vperm.xlu1 %7784, %v1942_v52   ;;  %vm1909_vm13 = vmand %vm1845_vm4, %vm15144_vm8  ;;  %vm15844_vm4 = vnez %v15743_v22  ;;  %vm15150_vm8 = vcmp.lt.s32.totalorder %v8451_v15, 16 }
  0xb3   : > { %v1941_v61 = vsel %vm1909_vm13, 1, %v15824_v54  ;;  %vm1848_vm3 = vmand %vm15843_vm15, %vm15145_vm14  ;;  %vm15151_vm15 = vcmp.ge.s32.totalorder %v8479_v25, 0 }
  0xb4   : > { %1990 = vperm.xlu0 %7783, %v1941_v61   ;;  %vm1912_vm2 = vmand %vm1848_vm3, %vm15146_vm1  ;;  %vm15845_vm3 = vnez %v15748_v34  ;;  %vm15152_vm1 = vcmp.lt.s32.totalorder %v8479_v25, 16 }
  0xb5   : > { %v1944_v29 = vsel %vm1912_vm2, 1, %v15824_v54  ;;  %vm1847_vm13 = vmand %vm15844_vm4, %vm15147_vm7  ;;  %vm15153_vm4 = vcmp.ge.s32.totalorder %v8506_v39, 0 }
  0xb6   : > { %1999 = vperm.xlu1 %7784, %v1944_v29   ;;  %vm1911_vm14 = vmand %vm1847_vm13, %vm15148_vm12  ;;  %vm15846_vm13 = vnez %v15753_v41  ;;  %vm15154_vm12 = vcmp.lt.s32.totalorder %v8506_v39, 16 }
  0xb7   : > { %v1943_v52 = vsel %vm1911_vm14, 1, %v15824_v54  ;;  %vm1850_vm2 = vmand %vm15845_vm3, %vm15149_vm9  ;;  %vm15155_vm3 = vcmp.ge.s32.totalorder %v8522_v45, 0 }
  0xb8   : > { %1996 = vperm.xlu0 %7783, %v1943_v52   ;;  %vm1914_vm7 = vmand %vm1850_vm2, %vm15150_vm8  ;;  %vm15847_vm2 = vnez %v15761_v55  ;;  %vm15156_vm8 = vcmp.lt.s32.totalorder %v8522_v45, 16  ;;  %v9263_v45 = vld [vmem:[%s14986_s2] sm:$0xff] }
  0xb9   : > { %v1946_v61 = vsel %vm1914_vm7, 1, %v15824_v54  ;;  %vm1849_vm14 = vmand %vm15846_vm13, %vm15151_vm15  ;;  %vm15157_vm13 = vcmp.ge.s32.totalorder %v8558_v59, 0  ;;  %15878 = vst [vmem:[#allocation55_spill] sm:$0xff] %v9263_v45 }
  0xba   : > { %2005 = vperm.xlu1 %7784, %v1946_v61   ;;  %vm1913_vm9 = vmand %vm1849_vm14, %vm15152_vm1  ;;  %vm15848_vm14 = vnez %v15767_v6  ;;  %vm15158_vm1 = vcmp.lt.s32.totalorder %v8558_v59, 16 }
  0xbb   : > { %v1945_v29 = vsel %vm1913_vm9, 1, %v15824_v54  ;;  %vm1852_vm7 = vmand %vm15847_vm2, %vm15153_vm4  ;;  %vm15159_vm2 = vcmp.ge.s32.totalorder %v8583_v12, 0 }
  0xbc   : > { %2002 = vperm.xlu0 %7783, %v1945_v29   ;;  %vm1916_vm15 = vmand %vm1852_vm7, %vm15154_vm12  ;;  %vm15849_vm7 = vnez %v15773_v24  ;;  %vm15160_vm12 = vcmp.lt.s32.totalorder %v8583_v12, 16  ;;  %v15873_v12 = vld [vmem:[#allocation45_spill] sm:$0xff] }
  0xbd   : > { %v1948_v52 = vsel %vm1916_vm15, 1, %v15824_v54  ;;  %vm1851_vm9 = vmand %vm15848_vm14, %vm15155_vm3  ;;  %vm15162_vm14 = vcmp.ge.s32.totalorder %v8594_v19, 0 }
  0xbe   : > { %2011 = vperm.xlu1 %7784, %v1948_v52   ;;  %vm1915_vm4 = vmand %vm1851_vm9, %vm15156_vm8  ;;  %vm15850_vm9 = vnez %v15779_v50  ;;  %vm15163_vm8 = vcmp.lt.s32.totalorder %v8594_v19, 16  ;;  %v9107_v52 = vpop.permute.xlu1 %1451 }
  0xbf   : > { %v1947_v61 = vsel %vm1915_vm4, 1, %v15824_v54  ;;  %vm1854_vm15 = vmand %vm15849_vm7, %vm15157_vm13  ;;  %vm15164_vm7 = vcmp.ge.s32.totalorder %v8623_v44, 0  ;;  %15851 = vst [vmem:[#allocation47_spill] sm:$0xff] %v9107_v52 }
  0xc0   : > { %2008 = vperm.xlu0 %7783, %v1947_v61   ;;  %vm1918_vm3 = vmand %vm1854_vm15, %vm15158_vm1  ;;  %vm15166_vm1 = vcmp.lt.s32.totalorder %v8623_v44, 16  ;;  %v9124_v52 = vpop.permute.xlu0 %1445 }
  0xc1   : > { %v1950_v29 = vsel %vm1918_vm3, 1, %v15824_v54  ;;  %vm1853_vm4 = vmand %vm15850_vm9, %vm15159_vm2  ;;  %vm15852_vm3 = vnez %v15785_v8  ;;  %vm15167_vm9 = vcmp.ge.s32.totalorder %v8649_v58, 0  ;;  %15854 = vst [vmem:[#allocation48_spill] sm:$0xff] %v9124_v52 }
  0xc2   : > { %2017 = vperm.xlu1 %7784, %v1950_v29   ;;  %vm1917_vm13 = vmand %vm1853_vm4, %vm15160_vm12  ;;  %vm15853_vm4 = vnez %v15791_v36  ;;  %vm15168_vm12 = vcmp.lt.s32.totalorder %v8649_v58, 16  ;;  %v15867_v58 = vld [vmem:[#allocation41_spill] sm:$0xff] }
  0xc3   : > { %v1949_v61 = vsel %vm1917_vm13, 1, %v15824_v54  ;;  %vm1856_vm15 = vmand %vm15852_vm3, %vm15162_vm14  ;;  %vm15170_vm3 = vcmp.ge.s32.totalorder %v8688_v48, 0 }
  0xc4   : > { %2014 = vperm.xlu0 %7783, %v1949_v61   ;;  %vm1920_vm2 = vmand %vm1856_vm15, %vm15163_vm8  ;;  %vm15171_vm8 = vcmp.lt.s32.totalorder %v8688_v48, 16 }
  0xc5   : > { %v1952_v29 = vsel %vm1920_vm2, 1, %v15824_v54  ;;  %vm1855_vm13 = vmand %vm15853_vm4, %vm15164_vm7  ;;  %vm15855_vm2 = vnez %v15795_v26  ;;  %vm15172_vm4 = vcmp.ge.s32.totalorder %v8706_v13, 0 }
  0xc6   : > { %2023 = vperm.xlu1 %7784, %v1952_v29   ;;  %vm1919_vm14 = vmand %vm1855_vm13, %vm15166_vm1  ;;  %v9138_v29 = vpop.permute.xlu1 %1454  ;;  %vm15174_vm1 = vcmp.lt.s32.totalorder %v8706_v13, 16 }
  0xc7   : > { %v1951_v61 = vsel %vm1919_vm14, 1, %v15824_v54  ;;  %vm1858_vm15 = vmand %vm15855_vm2, %vm15167_vm9  ;;  %15856 = vst [vmem:[#allocation49_spill] sm:$0xff] %v9138_v29  ;;  %vm15857_vm14 = vnez %v15798_v30  ;;  %vm15175_vm2 = vcmp.ge.s32.totalorder %v8724_v20, 0  ;;  %v9155_v29 = vpop.permute.xlu0 %1448 }
  0xc8   : > { %2020 = vperm.xlu0 %7783, %v1951_v61   ;;  %vm1922_vm7 = vmand %vm1858_vm15, %vm15168_vm12  ;;  %vm15858_vm15 = vnez %v15804_v57  ;;  %vm15176_vm12 = vcmp.lt.s32.totalorder %v8724_v20, 16  ;;  %15859 = vst [vmem:[#allocation50_spill] sm:$0xff] %v9155_v29 }
  0xc9   : > { %v1954_v52 = vsel %vm1922_vm7, 1, %v15824_v54  ;;  %vm1857_vm13 = vmand %vm15857_vm14, %vm15170_vm3  ;;  %vm15178_vm14 = vcmp.ge.s32.totalorder %v8751_v27, 0 }
  0xca   : > { %2029 = vperm.xlu1 %7784, %v1954_v52   ;;  %vm1921_vm9 = vmand %vm1857_vm13, %vm15171_vm8  ;;  %vm15179_vm8 = vcmp.lt.s32.totalorder %v8751_v27, 16 }
  0xcb   : > { %v1953_v61 = vsel %vm1921_vm9, 1, %v15824_v54  ;;  %vm1860_vm7 = vmand %vm15858_vm15, %vm15172_vm4  ;;  %vm15860_vm9 = vnez %v15808_v47  ;;  %vm15180_vm15 = vcmp.ge.s32.totalorder %v8774_v17, 0 }
  0xcc   : > { %2026 = vperm.xlu0 %7783, %v1953_v61   ;;  %vm1924_vm3 = vmand %vm1860_vm7, %vm15174_vm1  ;;  %v9169_v61 = vpop.permute.xlu1 %1460  ;;  %vm15184_vm1 = vcmp.lt.s32.totalorder %v8774_v17, 16 }
  0xcd   : > { %v1956_v52 = vsel %vm1924_vm3, 1, %v15824_v54  ;;  %vm1859_vm13 = vmand %vm15860_vm9, %vm15175_vm2  ;;  %15861 = vst [vmem:[#allocation51_spill] sm:$0xff] %v9169_v61  ;;  %vm15862_vm3 = vnez %v15813_v4  ;;  %vm15185_vm9 = vcmp.ge.s32.totalorder %v8795_v31, 0  ;;  %v9186_v61 = vpop.permute.xlu0 %1457 }
  0xce   : > { %2035 = vperm.xlu1 %7784, %v1956_v52   ;;  %vm1923_vm4 = vmand %vm1859_vm13, %vm15176_vm12  ;;  %vm15863_vm13 = vnez %v15816_v43  ;;  %vm15189_vm12 = vcmp.lt.s32.totalorder %v8795_v31, 16  ;;  %15864 = vst [vmem:[#allocation52_spill] sm:$0xff] %v9186_v61 }
  0xcf   : > { %v1955_v29 = vsel %vm1923_vm4, 1, %v15824_v54  ;;  %vm1862_vm7 = vmand %vm15862_vm3, %vm15178_vm14  ;;  %vm15192_vm3 = vcmp.ge.s32.totalorder %v8818_v53, 0 }
  0xd0   : > { %2032 = vperm.xlu0 %7783, %v1955_v29   ;;  %vm1926_vm2 = vmand %vm1862_vm7, %vm15179_vm8  ;;  %vm15195_vm8 = vcmp.lt.s32.totalorder %v8818_v53, 16 }
  0xd1   : > { %v1958_v52 = vsel %vm1926_vm2, 1, %v15824_v54  ;;  %vm1861_vm4 = vmand %vm15863_vm13, %vm15180_vm15  ;;  %vm15865_vm2 = vnez %v15818_v63  ;;  %vm15196_vm13 = vcmp.ge.s32.totalorder %v8850_v40, 0 }
  0xd2   : > { %2041 = vperm.xlu1 %7784, %v1958_v52   ;;  %vm1925_vm14 = vmand %vm1861_vm4, %vm15184_vm1  ;;  %v9200_v52 = vpop.permute.xlu1 %1466  ;;  %vm15213_vm1 = vcmp.lt.s32.totalorder %v8850_v40, 16  ;;  %v9217_v19 = vpop.permute.xlu0 %1463 }
  0xd3   : > { %v1957_v29 = vsel %vm1925_vm14, 1, %v15824_v54  ;;  %vm1864_vm7 = vmand %vm15865_vm2, %vm15185_vm9  ;;  %15866 = vst [vmem:[#allocation53_spill] sm:$0xff] %v9200_v52  ;;  %vm15868_vm14 = vnez %v15867_v58  ;;  %v15870_v52 = vld [vmem:[#allocation43_spill] sm:$0xff] }
  0xd4   : > { %2038 = vperm.xlu0 %7783, %v1957_v29   ;;  %vm1928_vm15 = vmand %vm1864_vm7, %vm15189_vm12  ;;  %v15869_v29 = vld [vmem:[#allocation42_spill] sm:$0xff]  ;;  %vm15871_vm7 = vnez %v15870_v52  ;;  %15872 = vst [vmem:[#allocation41_spill] sm:$0xff] %v9217_v19 }
  0xd5   : > { %v1960_v61 = vsel %vm1928_vm15, 1, %v15824_v54  ;;  %vm1863_vm4 = vmand %vm15868_vm14, %vm15192_vm3  ;;  %vm15198_vm2 = vcmp.ge.s32.totalorder %v15869_v29, 0  ;;  %vm15211_vm12 = vcmp.lt.s32.totalorder %v15869_v29, 16  ;;  %vm15208_vm14 = vcmp.ge.s32.totalorder %v8892_v38, 0 }
  0xd6   : > { %2047 = vperm.xlu1 %7784, %v1960_v61   ;;  %vm1927_vm9 = vmand %vm1863_vm4, %vm15195_vm8  ;;  %vm15202_vm8 = vcmp.lt.s32.totalorder %v8892_v38, 16 }
  0xd7   : > { %v1959_v44 = vsel %vm1927_vm9, 1, %v15824_v54  ;;  %vm1866_vm15 = vmand %vm15871_vm7, %vm15196_vm13  ;;  %vm15874_vm9 = vnez %v15873_v12  ;;  %vm15207_vm7 = vcmp.ge.s32.totalorder %v8913_v1, 0 }
  0xd8   : > { %2044 = vperm.xlu0 %7783, %v1959_v44   ;;  %vm1930_vm3 = vmand %vm1866_vm15, %vm15213_vm1  ;;  %v9231_v44 = vpop.permute.xlu1 %1472  ;;  %vm15210_vm15 = vcmp.lt.s32.totalorder %v8913_v1, 16 }
  0xd9   : > { %v1962_v61 = vsel %vm1930_vm3, 1, %v15824_v54  ;;  %vm1865_vm4 = vmand %vm15874_vm9, %vm15198_vm2  ;;  %15875 = vst [vmem:[#allocation43_spill] sm:$0xff] %v9231_v44  ;;  %v7789_v44 = vld [vmem:[%s14989_s5] sm:$0xff]  }
  0xda   : > { %2053 = vperm.xlu1 %7784, %v1962_v61   ;;  %vm1929_vm13 = vmand %vm1865_vm4, %vm15211_vm12  ;;  %v9244_v61 = vld [vmem:[%s14986_s2 + $0x8] sm:$0xff]  ;;  %7370 = vmatprep.subr.bf16.mxu0 %v7789_v44 }
  0xdb   : > { %v1961_v19 = vsel %vm1929_vm13, 1, %v15824_v54  ;;  %vm1868_vm3 = vmand %vm8919_vm10, %vm15208_vm14  ;;  %15876 = vst [vmem:[#allocation45_spill] sm:$0xff] %v9244_v61  ;;  %vm15262_vm4 = vcmp.ge.s32.totalorder %v9244_v61, 4294967295  ;;  %vm15257_vm14 = vcmp.lt.s32.totalorder %v9263_v45, 15  ;;  %7371 = vmatpush3.bf16.msra.mxu0 %v7789_v44  ;;  %7702 = vmatprep.subr.bf16.mxu1 %v7789_v44 }
  0xdc   : > { %2050 = vperm.xlu0 %7783, %v1961_v19   ;;  %vm1932_vm2 = vmand %vm1868_vm3, %vm15202_vm8  ;;  %vm15261_vm3 = vcmp.lt.s32.totalorder %v9244_v61, 15  ;;  %v9256_v19 = vpop.permute.xlu0 %1469  ;;  %7703 = vmatpush3.bf16.msra.mxu1 %v7789_v44 }
  0xdd   : > { %v1964_v59 = vsel %vm1932_vm2, 1, %v15824_v54  ;;  %vm1867_vm13 = vmand %vm8932_vm6, %vm15207_vm7  ;;  %15877 = vst [vmem:[#allocation54_spill] sm:$0xff] %v9256_v19  ;;  %vm15260_vm2 = vcmp.ge.s32.totalorder %v9263_v45, 4294967295  ;;  %v9280_v19 = vpop.permute.xlu1 %1478 }
  0xde   : > { %2059 = vperm.xlu1 %7784, %v1964_v59   ;;  %vm1931_vm8 = vmand %vm1867_vm13, %vm15210_vm15  ;;  %v9277_v59 = vld [vmem:[%s14986_s2 + $0x18] sm:$0xff]  ;;  %15880 = vst [vmem:[#allocation57_spill] sm:$0xff] %v9280_v19 }
  0xdf   : > { %v1963_v39 = vsel %vm1931_vm8, 1, %v15824_v54  ;;  %vm2489_vm7 = vmand %vm8249_vm0, %vm15262_vm4  ;;  %15879 = vst [vmem:[#allocation56_spill] sm:$0xff] %v9277_v59  ;;  %vm15214_vm8 = vcmp.ge.s32.totalorder %v9277_v59, 4294967295  ;;  %vm15215_vm15 = vcmp.lt.s32.totalorder %v9277_v59, 15 }
  0xe0   : > { %2056 = vperm.xlu0 %7783, %v1963_v39   ;;  %vm2553_vm13 = vmand %vm2489_vm7, %vm15261_vm3  ;;  %v9293_v39 = vld [vmem:[%s14986_s2 + $0x10] sm:$0xff]  ;;  %v9302_v11 = vpop.permute.xlu0 %1475 }
  0xe1   : > { %v2585_v21 = vsel %vm2553_vm13, 1, %v15824_v54  ;;  %vm2488_vm0 = vmand %vm8201_vm11, %vm15260_vm2  ;;  %15881 = vst [vmem:[#allocation58_spill] sm:$0xff] %v9293_v39  ;;  %vm15217_vm12 = vcmp.ge.s32.totalorder %v9293_v39, 4294967295  ;;  %vm15218_vm13 = vcmp.lt.s32.totalorder %v9293_v39, 15 }
  0xe2   : > { %2620 = vperm.xlu1 %7784, %v2585_v21   ;;  %vm2552_vm7 = vmand %vm2488_vm0, %vm15257_vm14  ;;  %15882 = vst [vmem:[#allocation59_spill] sm:$0xff] %v9302_v11  ;;  %v9309_v21 = vld [vmem:[%s14986_s2 + $0x28] sm:$0xff] }
  0xe3   : > { %v2584_v44 = vsel %vm2552_vm7, 1, %v15824_v54  ;;  %vm2491_vm11 = vmand %vm8223_vm5, %vm15214_vm8  ;;  %15883 = vst [vmem:[#allocation60_spill] sm:$0xff] %v9309_v21  ;;  %vm15222_vm7 = vcmp.ge.s32.totalorder %v9309_v21, 4294967295  ;;  %vm15884_vm5 = vnez %v15699_v7  ;;  %vm15219_vm8 = vcmp.lt.s32.totalorder %v9309_v21, 15  ;;  %v9339_v7 = vld [vmem:[%s14986_s2 + $0x38] sm:$0xff] }
  0xe4   : > { %2617 = vperm.xlu0 %7783, %v2584_v44   ;;  %vm2555_vm0 = vmand %vm2491_vm11, %vm15215_vm15  ;;  %vm15221_vm15 = vcmp.ge.s32.totalorder %v9323_v16, 4294967295  ;;  %v9326_v44 = vpop.permute.xlu1 %1484  ;;  %15888 = vst [vmem:[#allocation63_spill] sm:$0xff] %v9339_v7 }
  0xe5   : > { %v2587_v19 = vsel %vm2555_vm0, 1, %v15824_v54  ;;  %vm2490_vm1 = vmand %vm15884_vm5, %vm15217_vm12  ;;  %15886 = vst [vmem:[#allocation62_spill] sm:$0xff] %v9326_v44  ;;  %vm15887_vm0 = vnez %v15707_v28  ;;  %vm15223_vm12 = vcmp.lt.s32.totalorder %v9323_v16, 15  ;;  %v9360_v44 = vld [vmem:[%s14986_s2 + $0x30] sm:$0xff] }
  0xe6   : > { %2626 = vperm.xlu1 %7784, %v2587_v19   ;;  %vm2554_vm11 = vmand %vm2490_vm1, %vm15218_vm13  ;;  %vm15227_vm13 = vcmp.ge.s32.totalorder %v9339_v7, 4294967295  ;;  %v9345_v19 = vld [vmem:[%s14989_s5 + $0x10] sm:$0xff]   ;;  %15891 = vst [vmem:[#allocation65_spill] sm:$0xff] %v9360_v44 }
  0xe7   : > { %v2586_v11 = vsel %vm2554_vm11, 1, %v15824_v54  ;;  %vm2493_vm5 = vmand %vm15887_vm0, %vm15222_vm7  ;;  %vm15889_vm11 = vnez %v15711_v35  ;;  %7438 = vmatprep.subr.bf16.mxu0 %v9345_v19  ;;  %vm15232_vm7 = vcmp.lt.s32.totalorder %v9360_v44, 15 }
  0xe8   : > { %2623 = vperm.xlu0 %7783, %v2586_v11   ;;  %vm2557_vm1 = vmand %vm2493_vm5, %vm15219_vm8  ;;  %vm15228_vm5 = vcmp.lt.s32.totalorder %v9339_v7, 15  ;;  %v9353_v11 = vpop.permute.xlu0 %1481 }
  0xe9   : > { %v2589_v28 = vsel %vm2557_vm1, 1, %v15824_v54  ;;  %vm2492_vm0 = vmand %vm15889_vm11, %vm15221_vm15  ;;  %15890 = vst [vmem:[#allocation64_spill] sm:$0xff] %v9353_v11  ;;  %vm15229_vm1 = vcmp.ge.s32.totalorder %v9360_v44, 4294967295  ;;  %vm15892_vm11 = vnez %v15713_v42  ;;  %v9378_v11 = vpop.permute.xlu1 %1490  ;;  %v9391_v42 = vld [vmem:[%s14986_s2 + $0x40] sm:$0xff] }
  0xea   : > { %2632 = vperm.xlu1 %7784, %v2589_v28   ;;  %vm2556_vm8 = vmand %vm2492_vm0, %vm15223_vm12  ;;  %v9375_v28 = vld [vmem:[%s14986_s2 + $0x48] sm:$0xff]  ;;  %15894 = vst [vmem:[#allocation67_spill] sm:$0xff] %v9378_v11 }
  0xeb   : > { %v2588_v35 = vsel %vm2556_vm8, 1, %v15824_v54  ;;  %vm2495_vm15 = vmand %vm15892_vm11, %vm15227_vm13  ;;  %15893 = vst [vmem:[#allocation66_spill] sm:$0xff] %v9375_v28  ;;  %vm15231_vm12 = vcmp.ge.s32.totalorder %v9375_v28, 4294967295  ;;  %vm15895_vm8 = vnez %v15719_v49  ;;  %vm15233_vm13 = vcmp.lt.s32.totalorder %v9375_v28, 15 }
  0xec   : > { %2629 = vperm.xlu0 %7783, %v2588_v35   ;;  %vm2559_vm0 = vmand %vm2495_vm15, %vm15228_vm5  ;;  %15896 = vst [vmem:[#allocation68_spill] sm:$0xff] %v9391_v42  ;;  %vm15235_vm5 = vcmp.ge.s32.totalorder %v9391_v42, 4294967295  ;;  %v9400_v49 = vpop.permute.xlu0 %1487 }
  0xed   : > { %v2591_v16 = vsel %vm2559_vm0, 1, %v15824_v54  ;;  %vm2494_vm11 = vmand %vm15895_vm8, %vm15229_vm1  ;;  %vm15897_vm0 = vnez %v15724_v56  ;;  %vm15236_vm1 = vcmp.lt.s32.totalorder %v9391_v42, 15  ;;  %15898 = vst [vmem:[#allocation69_spill] sm:$0xff] %v9400_v49  ;;  %v9421_v56 = vld [vmem:[%s14986_s2 + $0x50] sm:$0xff] }
  0xee   : > { %2638 = vperm.xlu1 %7784, %v2591_v16   ;;  %vm2558_vm15 = vmand %vm2494_vm11, %vm15232_vm7  ;;  %v9407_v16 = vld [vmem:[%s14986_s2 + $0x58] sm:$0xff]  ;;  %15901 = vst [vmem:[#allocation71_spill] sm:$0xff] %v9421_v56 }
  0xef   : > { %v2590_v35 = vsel %vm2558_vm15, 1, %v15824_v54  ;;  %vm2497_vm8 = vmand %vm15897_vm0, %vm15231_vm12  ;;  %15899 = vst [vmem:[#allocation70_spill] sm:$0xff] %v9407_v16  ;;  %vm15237_vm15 = vcmp.ge.s32.totalorder %v9407_v16, 4294967295  ;;  %vm15900_vm0 = vnez %v15730_v62  ;;  %vm15241_vm7 = vcmp.lt.s32.totalorder %v9407_v16, 15  ;;  %v9437_v62 = vld [vmem:[%s14986_s2 + $0x68] sm:$0xff] }
  0xf0   : > { %2635 = vperm.xlu0 %7783, %v2590_v35   ;;  %vm2561_vm11 = vmand %vm2497_vm8, %vm15233_vm13  ;;  %vm15240_vm13 = vcmp.ge.s32.totalorder %v9421_v56, 4294967295  ;;  %v9424_v35 = vpop.permute.xlu1 %1496  ;;  %15904 = vst [vmem:[#allocation73_spill] sm:$0xff] %v9437_v62 }
  0xf1   : > { %v2593_v11 = vsel %vm2561_vm11, 1, %v15824_v54  ;;  %vm2496_vm12 = vmand %vm15900_vm0, %vm15235_vm5  ;;  %15902 = vst [vmem:[#allocation72_spill] sm:$0xff] %v9424_v35  ;;  %vm15903_vm11 = vnez %v15735_v10  ;;  %vm15242_vm5 = vcmp.lt.s32.totalorder %v9421_v56, 15 }
  0xf2   : > { %2644 = vperm.xlu1 %7784, %v2593_v11   ;;  %vm2560_vm8 = vmand %vm2496_vm12, %vm15236_vm1  ;;  %vm15245_vm1 = vcmp.ge.s32.totalorder %v9437_v62, 4294967295 }
  0xf3   : > { %v2592_v49 = vsel %vm2560_vm8, 1, %v15824_v54  ;;  %vm2499_vm0 = vmand %vm15903_vm11, %vm15237_vm15  ;;  %vm15905_vm8 = vnez %v15743_v22  ;;  %vm15246_vm15 = vcmp.lt.s32.totalorder %v9437_v62, 15  ;;  %v9446_v10 = vpop.permute.xlu0 %1493  ;;  %v9467_v22 = vld [vmem:[%s14986_s2 + $0x78] sm:$0xff] }
  0xf4   : > { %2641 = vperm.xlu0 %7783, %v2592_v49   ;;  %vm2563_vm12 = vmand %vm2499_vm0, %vm15241_vm7  ;;  %15906 = vst [vmem:[#allocation74_spill] sm:$0xff] %v9446_v10  ;;  %v9453_v49 = vld [vmem:[%s14986_s2 + $0x60] sm:$0xff]  ;;  %v15973_v10 = vmov 0 }
  0xf5   : > { %v2595_v11 = vsel %vm2563_vm12, 1, %v15824_v54  ;;  %vm2498_vm11 = vmand %vm15905_vm8, %vm15240_vm13  ;;  %15907 = vst [vmem:[#allocation75_spill] sm:$0xff] %v9453_v49  ;;  %vm15247_vm12 = vcmp.ge.s32.totalorder %v9453_v49, 4294967295  ;;  %vm15908_vm8 = vnez %v15748_v34  ;;  %vm15251_vm7 = vcmp.lt.s32.totalorder %v9453_v49, 15  ;;  %v9483_v34 = vld [vmem:[%s14986_s2 + $0x70] sm:$0xff] }
  0xf6   : > { %2650 = vperm.xlu1 %7784, %v2595_v11   ;;  %vm2562_vm0 = vmand %vm2498_vm11, %vm15242_vm5  ;;  %15909 = vst [vmem:[#allocation76_spill] sm:$0xff] %v9467_v22  ;;  %vm15250_vm5 = vcmp.ge.s32.totalorder %v9467_v22, 4294967295  ;;  %v9470_v11 = vpop.permute.xlu1 %1502 }
  0xf7   : > { %v2594_v16 = vsel %vm2562_vm0, 1, %v15824_v54  ;;  %vm2501_vm13 = vmand %vm15908_vm8, %vm15245_vm1  ;;  %15910 = vst [vmem:[#allocation77_spill] sm:$0xff] %v9470_v11  ;;  %vm15911_vm0 = vnez %v15753_v41  ;;  %vm15252_vm1 = vcmp.lt.s32.totalorder %v9467_v22, 15 }
  0xf8   : > { %2647 = vperm.xlu0 %7783, %v2594_v16   ;;  %vm2565_vm11 = vmand %vm2501_vm13, %vm15246_vm15  ;;  %15912 = vst [vmem:[#allocation78_spill] sm:$0xff] %v9483_v34  ;;  %vm15255_vm15 = vcmp.ge.s32.totalorder %v9483_v34, 4294967295 }
  0xf9   : > { %v2597_v56 = vsel %vm2565_vm11, 1, %v15824_v54  ;;  %vm2500_vm8 = vmand %vm15911_vm0, %vm15247_vm12  ;;  %vm15913_vm11 = vnez %v15761_v55  ;;  %vm15256_vm12 = vcmp.lt.s32.totalorder %v9483_v34, 15  ;;  %v9513_v55 = vld [vmem:[%s14986_s2 + $0x80] sm:$0xff] }
  0xfa   : > { %2656 = vperm.xlu1 %7784, %v2597_v56   ;;  %vm2564_vm13 = vmand %vm2500_vm8, %vm15251_vm7  ;;  %v9492_v41 = vpop.permute.xlu0 %1499  ;;  %v9499_v56 = vld [vmem:[%s14986_s2 + $0x88] sm:$0xff]  ;;  %15917 = vst [vmem:[#allocation81_spill] sm:$0xff] %v9513_v55 }
  0xfb   : > { %v2596_v16 = vsel %vm2564_vm13, 1, %v15824_v54  ;;  %vm2503_vm0 = vmand %vm15913_vm11, %vm15250_vm5  ;;  %15914 = vst [vmem:[#allocation79_spill] sm:$0xff] %v9492_v41  ;;  %vm15321_vm13 = vcmp.ge.s32.totalorder %v9499_v56, 4294967295  ;;  %vm15916_vm11 = vnez %v15767_v6  ;;  %vm15315_vm7 = vcmp.lt.s32.totalorder %v9499_v56, 15  ;;  %v9529_v6 = vld [vmem:[%s14986_s2 + $0x98] sm:$0xff] }
  0xfc   : > { %2653 = vperm.xlu0 %7783, %v2596_v16   ;;  %vm2567_vm8 = vmand %vm2503_vm0, %vm15252_vm1  ;;  %15915 = vst [vmem:[#allocation80_spill] sm:$0xff] %v9499_v56  ;;  %vm15268_vm1 = vcmp.ge.s32.totalorder %v9513_v55, 4294967295  ;;  %vm15266_vm14 = vcmp.lt.s32.totalorder %v9529_v6, 15 }
  0xfd   : > { %v2599_v49 = vsel %vm2567_vm8, 1, %v15824_v54  ;;  %vm2502_vm5 = vmand %vm15916_vm11, %vm15255_vm15  ;;  %v9516_v16 = vpop.permute.xlu1 %1508  ;;  %vm15919_vm8 = vnez %v15773_v24  ;;  %vm15267_vm15 = vcmp.lt.s32.totalorder %v9513_v55, 15  ;;  %15920 = vst [vmem:[#allocation83_spill] sm:$0xff] %v9529_v6 }
  0xfe   : > { %2662 = vperm.xlu1 %7784, %v2599_v49   ;;  %vm2566_vm0 = vmand %vm2502_vm5, %vm15256_vm12  ;;  %15918 = vst [vmem:[#allocation82_spill] sm:$0xff] %v9516_v16  ;;  %vm15265_vm12 = vcmp.ge.s32.totalorder %v9529_v6, 4294967295  ;;  %v16065_v6 = vld [vmem:[#allocation27_spill] sm:$0xff] }
  0xff   : > { %v2598_v22 = vsel %vm2566_vm0, 1, %v15824_v54  ;;  %vm2505_vm11 = vmand %vm15919_vm8, %vm15321_vm13  ;;  %vm15921_vm0 = vnez %v15779_v50  ;;  %v9559_v50 = vld [vmem:[%s14986_s2 + $0xa8] sm:$0xff] }
 0x100   : > { %2659 = vperm.xlu0 %7783, %v2598_v22   ;;  %vm2569_vm5 = vmand %vm2505_vm11, %vm15315_vm7  ;;  %v9545_v22 = vld [vmem:[%s14986_s2 + $0x90] sm:$0xff]  ;;  %15925 = vst [vmem:[#allocation86_spill] sm:$0xff] %v9559_v50  ;;  %vm15271_vm4 = vcmp.ge.s32.totalorder %v9559_v50, 4294967295 }
 0x101   : > { %v2601_v49 = vsel %vm2569_vm5, 1, %v15824_v54  ;;  %vm2504_vm8 = vmand %vm15921_vm0, %vm15268_vm1  ;;  %v9538_v24 = vpop.permute.xlu0 %1505  ;;  %15923 = vst [vmem:[#allocation85_spill] sm:$0xff] %v9545_v22  ;;  %vm15269_vm5 = vcmp.ge.s32.totalorder %v9545_v22, 4294967295  ;;  %vm15924_vm0 = vnez %v15785_v8  ;;  %vm15270_vm3 = vcmp.lt.s32.totalorder %v9545_v22, 15 }
 0x102   : > { %15922 = vst [vmem:[#allocation84_spill] sm:$0xff] %v9538_v24  ;;  %2668 = vperm.xlu1 %7784, %v2601_v49   ;;  %vm2568_vm11 = vmand %vm2504_vm8, %vm15267_vm15  ;;  %vm15928_vm15 = vnez %v15795_v26  ;;  %vm15274_vm1 = vcmp.lt.s32.totalorder %v8688_v48, 15 }
 0x103   : > { %v2600_v34 = vsel %vm2568_vm11, 1, %v15824_v54  ;;  %vm2507_vm2 = vmand %vm15924_vm0, %vm15265_vm12  ;;  %vm15927_vm11 = vnez %v15791_v36  ;;  %vm15272_vm12 = vcmp.lt.s32.totalorder %v9559_v50, 15  ;;  %v16013_v50 = vmov 0 }
 0x104   : > { %2665 = vperm.xlu0 %7783, %v2600_v34   ;;  %vm2571_vm8 = vmand %vm2507_vm2, %vm15266_vm14  ;;  %v9562_v49 = vpop.permute.xlu1 %1514  ;;  %vm15273_vm14 = vcmp.ge.s32.totalorder %v8688_v48, 4294967295 }
 0x105   : > { %15926 = vst [vmem:[#allocation87_spill] sm:$0xff] %v9562_v49  ;;  %v2603_v62 = vsel %vm2571_vm8, 1, %v15824_v54  ;;  %vm2506_vm0 = vmand %vm15927_vm11, %vm15269_vm5  ;;  %vm15275_vm5 = vcmp.ge.s32.totalorder %v8706_v13, 4294967295 }
 0x106   : > { %2674 = vperm.xlu1 %7784, %v2603_v62   ;;  %vm2570_vm2 = vmand %vm2506_vm0, %vm15270_vm3  ;;  %vm15930_vm0 = vnez %v15798_v30  ;;  %vm15276_vm3 = vcmp.lt.s32.totalorder %v8706_v13, 15 }
 0x107   : > { %v2602_v8 = vsel %vm2570_vm2, 1, %v15824_v54  ;;  %vm2509_vm8 = vmand %vm15928_vm15, %vm15271_vm4  ;;  %v9579_v34 = vpop.permute.xlu0 %1511  ;;  %vm15277_vm4 = vcmp.ge.s32.totalorder %v8724_v20, 4294967295 }
 0x108   : > { %15929 = vst [vmem:[#allocation88_spill] sm:$0xff] %v9579_v34  ;;  %2671 = vperm.xlu0 %7783, %v2602_v8   ;;  %vm2573_vm11 = vmand %vm2509_vm8, %vm15272_vm12  ;;  %vm15932_vm8 = vnez %v15804_v57  ;;  %vm15282_vm12 = vcmp.lt.s32.totalorder %v8724_v20, 15 }
 0x109   : > { %v2605_v36 = vsel %vm2573_vm11, 1, %v15824_v54  ;;  %vm2508_vm2 = vmand %vm15930_vm0, %vm15273_vm14  ;;  %vm15279_vm14 = vcmp.ge.s32.totalorder %v8751_v27, 4294967295 }
 0x10a   : > { %2680 = vperm.xlu1 %7784, %v2605_v36   ;;  %vm2572_vm15 = vmand %vm2508_vm2, %vm15274_vm1  ;;  %v9593_v26 = vpop.permute.xlu1 %1520  ;;  %vm15933_vm2 = vnez %v15808_v47  ;;  %vm15278_vm1 = vcmp.lt.s32.totalorder %v8751_v27, 15  ;;  %v9629_v36 = vld [vmem:[%s14989_s5 + $0x8] sm:$0xff]  }
 0x10b   : > { %15931 = vst [vmem:[#allocation89_spill] sm:$0xff] %v9593_v26  ;;  %v2604_v62 = vsel %vm2572_vm15, 1, %v15824_v54  ;;  %vm2511_vm11 = vmand %vm15932_vm8, %vm15275_vm5  ;;  %vm15280_vm5 = vcmp.ge.s32.totalorder %v8774_v17, 4294967295  ;;  %7404 = vmatprep.subr.bf16.mxu1 %v9629_v36 }
 0x10c   : > { %2677 = vperm.xlu0 %7783, %v2604_v62   ;;  %vm2575_vm0 = vmand %vm2511_vm11, %vm15276_vm3  ;;  %vm15935_vm11 = vnez %v15813_v4  ;;  %vm15281_vm3 = vcmp.lt.s32.totalorder %v8774_v17, 15 }
 0x10d   : > { %v2607_v30 = vsel %vm2575_vm0, 1, %v15824_v54  ;;  %vm2510_vm15 = vmand %vm15933_vm2, %vm15277_vm4  ;;  %v9609_v8 = vpop.permute.xlu0 %1517  ;;  %vm15283_vm4 = vcmp.ge.s32.totalorder %v8795_v31, 4294967295 }
 0x10e   : > { %15934 = vst [vmem:[#allocation90_spill] sm:$0xff] %v9609_v8  ;;  %2686 = vperm.xlu1 %7784, %v2607_v30   ;;  %vm2574_vm8 = vmand %vm2510_vm15, %vm15282_vm12  ;;  %vm15937_vm15 = vnez %v15816_v43  ;;  %vm15307_vm12 = vcmp.lt.s32.totalorder %v8850_v40, 15  ;;  %v7840_v8 = vld [vmem:[%s14985_s1 + $0x28] sm:$0xff] }
 0x10f   : > { %v2606_v57 = vsel %vm2574_vm8, 1, %v15824_v54  ;;  %vm2513_vm0 = vmand %vm15935_vm11, %vm15279_vm14  ;;  %vm15284_vm11 = vcmp.lt.s32.totalorder %v8795_v31, 15 }
 0x110   : > { %2683 = vperm.xlu0 %7783, %v2606_v57   ;;  %vm2577_vm2 = vmand %vm2513_vm0, %vm15278_vm1  ;;  %v9623_v47 = vpop.permute.xlu1 %1526  ;;  %vm15285_vm1 = vcmp.ge.s32.totalorder %v8818_v53, 4294967295 }
 0x111   : > { %15936 = vst [vmem:[#allocation91_spill] sm:$0xff] %v9623_v47  ;;  %v2609_v62 = vsel %vm2577_vm2, 1, %v15824_v54  ;;  %vm2512_vm8 = vmand %vm15937_vm15, %vm15280_vm5  ;;  %vm15939_vm2 = vnez %v15818_v63  ;;  %vm15313_vm15 = vcmp.lt.s32.totalorder %v8818_v53, 15 }
 0x112   : > { %2692 = vperm.xlu1 %7784, %v2609_v62   ;;  %vm2576_vm0 = vmand %vm2512_vm8, %vm15281_vm3  ;;  %vm15286_vm8 = vcmp.ge.s32.totalorder %v8850_v40, 4294967295 }
 0x113   : > { %v2608_v4 = vsel %vm2576_vm0, 1, %v15824_v54  ;;  %v9642_v30 = vpop.permute.xlu0 %1523  ;;  %vm2515_vm14 = vmand %vm15939_vm2, %vm15283_vm4  ;;  %vm15940_vm0 = vnez %v15867_v58  ;;  %vm15304_vm4 = vcmp.ge.s32.totalorder %v15869_v29, 4294967295 }
 0x114   : > { %15938 = vst [vmem:[#allocation92_spill] sm:$0xff] %v9642_v30  ;;  %2689 = vperm.xlu0 %7783, %v2608_v4   ;;  %vm2579_vm5 = vmand %vm2515_vm14, %vm15284_vm11  ;;  %vm15942_vm14 = vnez %v15870_v52  ;;  %vm15287_vm11 = vcmp.lt.s32.totalorder %v15869_v29, 15  ;;  %v7836_v4 = vld [vmem:[%s14985_s1 + $0x8] sm:$0xff] }
 0x115   : > { %v2611_v43 = vsel %vm2579_vm5, 1, %v15824_v54  ;;  %vm2514_vm3 = vmand %vm15940_vm0, %vm15285_vm1  ;;  %vm15302_vm1 = vcmp.ge.s32.totalorder %v8892_v38, 4294967295 }
 0x116   : > { %2698 = vperm.xlu1 %7784, %v2611_v43   ;;  %vm2578_vm2 = vmand %vm2514_vm3, %vm15313_vm15  ;;  %v9660_v63 = vpop.permute.xlu1 %1532 }
 0x117   : > { %15941 = vst [vmem:[#allocation93_spill] sm:$0xff] %v9660_v63  ;;  %v2610_v57 = vsel %vm2578_vm2, 1, %v15824_v54  ;;  %vm2517_vm5 = vmand %vm15942_vm14, %vm15286_vm8  ;;  %vm15288_vm2 = vcmp.lt.s32.totalorder %v8892_v38, 15  ;;  %vm15291_vm8 = vcmp.ge.s32.totalorder %v8913_v1, 4294967295 }
 0x118   : > { %2695 = vperm.xlu0 %7783, %v2610_v57   ;;  %vm2581_vm0 = vmand %vm2517_vm5, %vm15307_vm12 }
 0x119   : > { %v9672_v58 = vpop.permute.xlu0 %1529  ;;  %v2613_v62 = vsel %vm2581_vm0, 1, %v15824_v54  ;;  %vm2516_vm3 = vmand %vm15874_vm9, %vm15304_vm4  ;;  %vm15290_vm0 = vcmp.lt.s32.totalorder %v8913_v1, 15  ;;  %vm15325_vm4 = vcmask 130048  }
 0x11a   : > { %15943 = vst [vmem:[#allocation94_spill] sm:$0xff] %v9672_v58  ;;  %2704 = vperm.xlu1 %7784, %v2613_v62   ;;  %vm2580_vm14 = vmand %vm2516_vm3, %vm15287_vm11  ;;  %vm3107_vm3 = vcmp.ge.s32.totalorder %v7836_v4, 0  ;;  %vm3139_vm11 = vcmp.lt.s32.totalorder %v7836_v4, 16 }
 0x11b   : > { %v2612_v52 = vsel %vm2580_vm14, 1, %v15824_v54  ;;  %vm2519_vm5 = vmand %vm8919_vm10, %vm15302_vm1 }
 0x11c   : > { %2701 = vperm.xlu0 %7783, %v2612_v52   ;;  %v9689_v12 = vpop.permute.xlu1 %1538  ;;  %vm2583_vm9 = vmand %vm2519_vm5, %vm15288_vm2  ;;  %v7837_v52 = vld [vmem:[%s14985_s1] sm:$0xff] }
 0x11d   : > { %15944 = vst [vmem:[#allocation95_spill] sm:$0xff] %v9689_v12  ;;  %v2615_v43 = vsel %vm2583_vm9, 1, %v15824_v54  ;;  %vm2518_vm10 = vmand %vm8932_vm6, %vm15291_vm8  ;;  %vm3106_vm9 = vcmp.ge.s32.totalorder %v7837_v52, 0  ;;  %vm3138_vm2 = vcmp.lt.s32.totalorder %v7837_v52, 16  ;;  %vm15948_vm6 = vcmp.ge.s32.totalorder %v8216_v14, 1 }
 0x11e   : > { %2710 = vperm.xlu1 %7784, %v2615_v43   ;;  %vm2582_vm14 = vmand %vm2518_vm10, %vm15290_vm0  ;;  %v7340_v43 = vpop.f32.mrb[0].mxu0 }
 0x11f   : > { %v9703_v33 = vpop.permute.xlu0 %1535  ;;  %v2614_v57 = vsel %vm2582_vm14, 1, %v15824_v54  ;;  %vm9706_vm5 = vmand %vm3107_vm3, %vm3139_vm11  ;;  %vm15950_vm3 = vcmp.lt.s32.totalorder %v8216_v14, 17  ;;  %v674_v12 = vadd.f32 %v7340_v43, %v9716_v0  ;;  %v665_v47 = vpop.f32.mrb[1].mxu0 }
 0x120   : > { %15945 = vst [vmem:[#allocation96_spill] sm:$0xff] %v9703_v33  ;;  %2707 = vperm.xlu0 %7783, %v2614_v57   ;;  %vm3203_vm11 = vmand %vm9706_vm5, %vm15948_vm6  ;;  %v7838_v57 = vld [vmem:[%s14985_s1 + $0x18] sm:$0xff]  ;;  %vm15954_vm6 = vcmp.ge.s32.totalorder %v8174_v5, 1  ;;  %v666_v63 = vadd.f32 %v9716_v0, %v665_v47  ;;  %v7341_v30 = vpop.f32.mrb[2].mxu0 }
 0x121   : > { %v9722_v4 = vpop.permute.xlu1 %1969  ;;  %vm3235_vm10 = vmand %vm3203_vm11, %vm15950_vm3  ;;  %vm3109_vm0 = vcmp.ge.s32.totalorder %v7838_v57, 0  ;;  %vm3141_vm8 = vcmp.lt.s32.totalorder %v7838_v57, 16  ;;  %v677_v58 = vadd.f32 %v7341_v30, %v9716_v0  ;;  %v668_v57 = vpop.f32.mrb[3].mxu0  ;;  %v794_v30 = vmax.f32 %v674_v12, 0.0 }
 0x122   : > { %15949 = vst [vmem:[#allocation97_spill] sm:$0xff] %v9722_v4  ;;  %v3267_v33 = vsel %vm3235_vm10, 1, %v15824_v54  ;;  %vm9727_vm14 = vmand %vm3106_vm9, %vm3138_vm2  ;;  %vm15955_vm9 = vcmp.lt.s32.totalorder %v8174_v5, 17  ;;  %v669_v47 = vadd.f32 %v9716_v0, %v668_v57 }
 0x123   : > { %v9735_v4 = vpop.permute.xlu0 %1966  ;;  %3302 = vperm.xlu1 %7784, %v3267_v33   ;;  %vm3202_vm2 = vmand %vm9727_vm14, %vm15954_vm6  ;;  %v795_v26 = vmax.f32 %v677_v58, 0.0 }
 0x124   : > { %15953 = vst [vmem:[#allocation98_spill] sm:$0xff] %v9735_v4  ;;  %vm3234_vm11 = vmand %vm3202_vm2, %vm15955_vm9  ;;  %v7839_v4 = vld [vmem:[%s14985_s1 + $0x10] sm:$0xff]  ;;  %vm15959_vm2 = vcmp.ge.s32.totalorder %v8198_v9, 1  ;;  %v793_v57 = vmax.f32 %v669_v47, 0.0  ;;  %v7344_v47 = vpop.f32.mrb[4].mxu0 }
 0x125   : > { %v3266_v43 = vsel %vm3234_vm11, 1, %v15824_v54  ;;  %v9746_v49 = vpop.permute.xlu1 %1975  ;;  %vm9748_vm3 = vmand %vm3109_vm0, %vm3141_vm8  ;;  %vm3108_vm10 = vcmp.ge.s32.totalorder %v7839_v4, 0  ;;  %vm3140_vm6 = vcmp.lt.s32.totalorder %v7839_v4, 16  ;;  %vm15961_vm8 = vcmp.lt.s32.totalorder %v8198_v9, 17  ;;  %v681_v41 = vpop.f32.mrb[5].mxu0 }
 0x126   : > { %15956 = vst [vmem:[#allocation99_spill] sm:$0xff] %v9746_v49  ;;  %3299 = vperm.xlu0 %7783, %v3266_v43   ;;  %vm3205_vm9 = vmand %vm9748_vm3, %vm15959_vm2  ;;  %vm3111_vm11 = vcmp.ge.s32.totalorder %v7840_v8, 0  ;;  %v792_v4 = vmax.f32 %v666_v63, 0.0  ;;  %vm3143_vm2 = vcmp.lt.s32.totalorder %v7840_v8, 16  ;;  %v9772_v58 = vpack.c.bf16 %v795_v26, %v794_v30  ;;  %v7345_v24 = vpop.f32.mrb[6].mxu0 }
 0x127   : > { %v9760_v34 = vpop.permute.xlu0 %1972  ;;  %vm3237_vm0 = vmand %vm3205_vm9, %vm15961_vm8  ;;  %vm15964_vm9 = vcmp.ge.s32.totalorder %v8164_v3, 1  ;;  %v690_v16 = vadd.f32 %v7344_v47, %v9716_v0  ;;  %v693_v8 = vadd.f32 %v7345_v24, %v9716_v0  ;;  %v684_v47 = vpop.f32.mrb[7].mxu0 }
 0x128   : > { %15960 = vst [vmem:[#allocation100_spill] sm:$0xff] %v9760_v34  ;;  %v3269_v43 = vsel %vm3237_vm0, 1, %v15824_v54  ;;  %vm9768_vm1 = vmand %vm3108_vm10, %vm3140_vm6  ;;  %v9780_v63 = vpack.c.bf16 %v793_v57, %v792_v4  ;;  %vm15966_vm10 = vcmp.lt.s32.totalorder %v8164_v3, 17  ;;  %v7841_v4 = vld [vmem:[%s14985_s1 + $0x20] sm:$0xff]  ;;  %v682_v57 = vadd.f32 %v9716_v0, %v681_v41 }
 0x129   : > { %3308 = vperm.xlu1 %7784, %v3269_v43   ;;  %vm3204_vm8 = vmand %vm9768_vm1, %vm15964_vm9  ;;  %v9778_v12 = vpop.permute.xlu1 %1981  ;;  %v15968_v43 = vmov 0  ;;  %vm3110_vm9 = vcmp.ge.s32.totalorder %v7841_v4, 0  ;;  %vm3142_vm12 = vcmp.lt.s32.totalorder %v7841_v4, 16  ;;  %v685_v35 = vadd.f32 %v9716_v0, %v684_v47  ;;  %v7845_v34 = vld [vmem:[%s14985_s1 + $0x40] sm:$0xff] }
 0x12a   : > { %15965 = vst [vmem:[#allocation101_spill] sm:$0xff] %v9778_v12  ;;  %vm3236_vm6 = vmand %vm3204_vm8, %vm15966_vm10  ;;  %7372 = vmatprep.mubr.msk.bf16.mxu0 %vm15325_vm4, %v9780_v63  ;;  %vm15970_vm8 = vcmp.ge.s32.totalorder %v8238_v18, 1  ;;  %v799_v49 = vmax.f32 %v693_v8, 0.0  ;;  %v7843_v8 = vld [vmem:[%s14985_s1 + $0x30] sm:$0xff]  ;;  %vm3114_vm13 = vcmp.ge.s32.totalorder %v7845_v34, 0 }
 0x12b   : > { %v3268_v26 = vsel %vm3236_vm6, 1, %v15824_v54  ;;  %v9786_v30 = vpop.permute.xlu0 %1978  ;;  %vm9789_vm0 = vmand %vm3111_vm11, %vm3143_vm2  ;;  %7373 = vmatmul.mubr.msk.bf16.vlgmr.msra.gmra.mrb[32].mxu0 %vm15325_vm4, %v9772_v58  ;;  %vm15971_vm2 = vcmp.lt.s32.totalorder %v8238_v18, 17  ;;  %v797_v12 = vmax.f32 %v685_v35, 0.0 }
 0x12c   : > { %15967 = vst [vmem:[#allocation102_spill] sm:$0xff] %v9786_v30  ;;  %v15969_v43 = vsel %vm9789_vm0, 4294967295, %v15968_v43  ;;  %3305 = vperm.xlu0 %7783, %v3268_v26   ;;  %vm3207_vm11 = vmand %vm9789_vm0, %vm15970_vm8  ;;  %v7842_v26 = vld [vmem:[%s14985_s1 + $0x38] sm:$0xff]  ;;  %7440 = vmatprep.mubr.msk.bf16.mxu0 %vm15325_vm4, %v9780_v63 }
 0x12d   : > { %vm3239_vm10 = vmand %vm3207_vm11, %vm15971_vm2  ;;  %v9808_v41 = vpop.permute.xlu1 %1987  ;;  %vm3113_vm6 = vcmp.ge.s32.totalorder %v7842_v26, 0  ;;  %7439 = vmatpush3.bf16.msra.mxu0 %v9345_v19  ;;  %vm3145_vm11 = vcmp.lt.s32.totalorder %v7842_v26, 16  ;;  %vm15975_vm2 = vcmp.ge.s32.totalorder %v8264_v23, 1  ;;  %v796_v19 = vmax.f32 %v682_v57, 0.0 }
 0x12e   : > { %15972 = vst [vmem:[#allocation103_spill] sm:$0xff] %v9808_v41  ;;  %v3271_v24 = vsel %vm3239_vm10, 1, %v15824_v54  ;;  %vm9820_vm8 = vmand %vm3110_vm9, %vm3142_vm12  ;;  %v798_v41 = vmax.f32 %v690_v16, 0.0  ;;  %vm15977_vm10 = vcmp.lt.s32.totalorder %v8264_v23, 17  ;;  %v15978_v16 = vmov 0 }
 0x12f   : > { %v15974_v10 = vsel %vm9820_vm8, 4294967295, %v15973_v10  ;;  %3314 = vperm.xlu1 %7784, %v3271_v24   ;;  %vm3206_vm15 = vmand %vm9820_vm8, %vm15975_vm2  ;;  %v9828_v47 = vpop.permute.xlu0 %1984  ;;  %vm3112_vm9 = vcmp.ge.s32.totalorder %v7843_v8, 0  ;;  %vm3144_vm2 = vcmp.lt.s32.totalorder %v7843_v8, 16  ;;  %v9845_v35 = vpack.c.bf16 %v797_v12, %v796_v19  ;;  %v7348_v24 = vpop.f32.mrb[8].mxu0  ;;  %v7844_v19 = vld [vmem:[%s14985_s1 + $0x48] sm:$0xff]  ;;  %v7792_v8 = vld [vmem:[%s14989_s5 + $0x20] sm:$0xff]  }
 0x130   : > { %15976 = vst [vmem:[#allocation104_spill] sm:$0xff] %v9828_v47  ;;  %vm3238_vm7 = vmand %vm3206_vm15, %vm15977_vm10  ;;  %v9832_v4 = vpack.c.bf16 %v799_v49, %v798_v41  ;;  %vm15981_vm15 = vcmp.ge.s32.totalorder %v8292_v32, 1  ;;  %v706_v49 = vadd.f32 %v7348_v24, %v9716_v0  ;;  %v697_v41 = vpop.f32.mrb[9].mxu0  ;;  %7506 = vmatprep.subr.bf16.mxu0 %v7792_v8 }
 0x131   : > { %v3270_v30 = vsel %vm3238_vm7, 1, %v15824_v54  ;;  %vm9836_vm12 = vmand %vm3113_vm6, %vm3145_vm11  ;;  %v9843_v57 = vpop.permute.xlu1 %1993  ;;  %vm15982_vm6 = vcmp.lt.s32.totalorder %v8292_v32, 17  ;;  %v698_v47 = vadd.f32 %v9716_v0, %v697_v41  ;;  %7376 = vmatprep.mubr.msk.bf16.mxu1 %vm15325_vm4, %v9845_v35 }
 0x132   : > { %v15979_v16 = vsel %vm9836_vm12, 4294967295, %v15978_v16  ;;  %15980 = vst [vmem:[#allocation105_spill] sm:$0xff] %v9843_v57  ;;  %3311 = vperm.xlu0 %7783, %v3270_v30   ;;  %vm3209_vm7 = vmand %vm9836_vm12, %vm15981_vm15  ;;  %v7349_v57 = vpop.f32.mrb[10].mxu0  ;;  %v15984_v30 = vmov 0  ;;  %vm3115_vm15 = vcmp.ge.s32.totalorder %v7844_v19, 0  ;;  %7377 = vmatmul.mubr.msk.bf16.vlgmr.msra.gmra.mrb[0].mxu1 %vm15325_vm4, %v9832_v4 }
 0x133   : > { %vm3241_vm11 = vmand %vm3209_vm7, %vm15982_vm6  ;;  %v9854_v26 = vpop.permute.xlu0 %1990  ;;  %vm3147_vm7 = vcmp.lt.s32.totalorder %v7844_v19, 16  ;;  %v709_v24 = vadd.f32 %v7349_v57, %v9716_v0  ;;  %v700_v41 = vpop.f32.mrb[11].mxu0  ;;  %7441 = vmatmul.mubr.msk.bf16.vlgmr.msra.gmra.mrb[36].mxu0 %vm15325_vm4, %v9772_v58  ;;  %vm15988_vm6 = vcmp.lt.s32.totalorder %v8320_v37, 17  ;;  %7405 = vmatpush3.bf16.msra.mxu1 %v9629_v36  ;;  %v800_v44 = vmax.f32 %v698_v47, 0.0 }
 0x134   : > { %15983 = vst [vmem:[#allocation106_spill] sm:$0xff] %v9854_v26  ;;  %v3273_v12 = vsel %vm3241_vm11, 1, %v15824_v54  ;;  %vm9861_vm10 = vmand %vm3112_vm9, %vm3144_vm2  ;;  %vm15986_vm9 = vcmp.ge.s32.totalorder %v8320_v37, 1  ;;  %v701_v57 = vadd.f32 %v9716_v0, %v700_v41  ;;  %7444 = vmatprep.mubr.msk.bf16.mxu0 %vm15325_vm4, %v9845_v35  ;;  %v15989_v41 = vmov 0  ;;  %7507 = vmatpush3.bf16.msra.mxu0 %v7792_v8 }
 0x135   : > { %v15985_v30 = vsel %vm9861_vm10, 4294967295, %v15984_v30  ;;  %3320 = vperm.xlu1 %7784, %v3273_v12   ;;  %vm3208_vm2 = vmand %vm9861_vm10, %vm15986_vm9  ;;  %v9880_v26 = vpop.permute.xlu1 %1999  ;;  %v802_v12 = vmax.f32 %v706_v49, 0.0  ;;  %v803_v42 = vmax.f32 %v709_v24, 0.0  ;;  %vm3146_vm4 = vcmp.lt.s32.totalorder %v7845_v34, 16  ;;  %v7352_v24 = vpop.f32.mrb[12].mxu0 }
 0x136   : > { %15987 = vst [vmem:[#allocation107_spill] sm:$0xff] %v9880_v26  ;;  %vm3240_vm11 = vmand %vm3208_vm2, %vm15988_vm6  ;;  %v801_v7 = vmax.f32 %v701_v57, 0.0  ;;  %vm15992_vm2 = vcmp.ge.s32.totalorder %v8347_v46, 1  ;;  %v722_v8 = vadd.f32 %v7352_v24, %v9716_v0  ;;  %v713_v57 = vpop.f32.mrb[13].mxu0 }
 0x137   : > { %v3272_v26 = vsel %vm3240_vm11, 1, %v15824_v54  ;;  %vm9894_vm9 = vmand %vm3115_vm15, %vm3147_vm7  ;;  %v9898_v28 = vpop.permute.xlu0 %1996  ;;  %v9904_v36 = vpack.c.bf16 %v803_v42, %v802_v12  ;;  %vm15993_vm11 = vcmp.lt.s32.totalorder %v8347_v46, 17  ;;  %v7846_v42 = vld [vmem:[%s14985_s1 + $0x58] sm:$0xff]  ;;  %v7353_v34 = vpop.f32.mrb[14].mxu0 }
 0x138   : > { %v15990_v41 = vsel %vm9894_vm9, 4294967295, %v15989_v41  ;;  %15991 = vst [vmem:[#allocation108_spill] sm:$0xff] %v9898_v28  ;;  %3317 = vperm.xlu0 %7783, %v3272_v26   ;;  %vm3211_vm6 = vmand %vm9894_vm9, %vm15992_vm2  ;;  %v9910_v19 = vpack.c.bf16 %v801_v7, %v800_v44  ;;  %v15995_v26 = vmov 0  ;;  %v714_v7 = vadd.f32 %v9716_v0, %v713_v57  ;;  %v716_v24 = vpop.f32.mrb[15].mxu0 }
 0x139   : > { %vm3243_vm15 = vmand %vm3211_vm6, %vm15993_vm11  ;;  %v9908_v49 = vpop.permute.xlu1 %2005  ;;  %vm15997_vm6 = vcmp.ge.s32.totalorder %v8372_v51, 1  ;;  %v725_v12 = vadd.f32 %v7353_v34, %v9716_v0  ;;  %v16005_v57 = vmov 0 }
 0x13a   : > { %15994 = vst [vmem:[#allocation109_spill] sm:$0xff] %v9908_v49  ;;  %v3275_v47 = vsel %vm3243_vm15, 1, %v15824_v54  ;;  %vm9914_vm7 = vmand %vm3114_vm13, %vm3146_vm4  ;;  %vm15999_vm4 = vcmask 130048   ;;  %vm16000_vm13 = vcmp.lt.s32.totalorder %v8372_v51, 17  ;;  %v7847_v49 = vld [vmem:[%s14985_s1 + $0x50] sm:$0xff] }
 0x13b   : > { %v15996_v26 = vsel %vm9914_vm7, 4294967295, %v15995_v26  ;;  %3326 = vperm.xlu1 %7784, %v3275_v47   ;;  %vm3210_vm11 = vmand %vm9914_vm7, %vm15997_vm6  ;;  %v9926_v44 = vpop.permute.xlu0 %2002  ;;  %7380 = vmatprep.mubr.msk.bf16.mxu1 %vm15999_vm4, %v9910_v19  ;;  %vm16003_vm6 = vcmp.lt.s32.totalorder %v7846_v42, 16  ;;  %vm16004_vm7 = vcmp.ge.s32.totalorder %v7846_v42, 0  ;;  %v806_v42 = vmax.f32 %v722_v8, 0.0 }
 0x13c   : > { %15998 = vst [vmem:[#allocation110_spill] sm:$0xff] %v9926_v44  ;;  %vm3242_vm15 = vmand %vm3210_vm11, %vm16000_vm13  ;;  %vm3116_vm11 = vcmp.ge.s32.totalorder %v7847_v49, 0  ;;  %v717_v44 = vadd.f32 %v9716_v0, %v716_v24  ;;  %v807_v28 = vmax.f32 %v725_v12, 0.0  ;;  %vm16011_vm13 = vcmp.lt.s32.totalorder %v8401_v60, 17 }
 0x13d   : > { %vm16001_vm2 = vmmov %vm15999_vm4  ;;  %v3274_v47 = vsel %vm3242_vm15, 1, %v15824_v54  ;;  %vm3148_vm4 = vcmp.lt.s32.totalorder %v7847_v49, 16  ;;  %v9948_v34 = vpop.permute.xlu1 %2011  ;;  %v804_v49 = vmax.f32 %v714_v7, 0.0 }
 0x13e   : > { %7381 = vmatmul.mubr.msk.bf16.gmra.mrb[4].mxu1 %vm16001_vm2, %v9904_v36  ;;  %vm16002_vm9 = vmmov %vm16001_vm2  ;;  %16008 = vst [vmem:[#allocation112_spill] sm:$0xff] %v9948_v34  ;;  %3323 = vperm.xlu0 %7783, %v3274_v47   ;;  %v805_v34 = vmax.f32 %v717_v44, 0.0  ;;  %v7848_v47 = vld [vmem:[%s14985_s1 + $0x68] sm:$0xff]  ;;  %v9969_v8 = vpack.c.bf16 %v807_v28, %v806_v42  ;;  %v7356_v12 = vpop.f32.mrb[16].mxu0  ;;  %v16019_v42 = vmov 0 }
 0x13f   : > { %7445 = vmatmul.mubr.msk.bf16.gmra.mrb[40].mxu0 %vm16002_vm9, %v9832_v4  ;;  %vm9941_vm10 = vmand %vm16004_vm7, %vm16003_vm6  ;;  %v9959_v21 = vpop.permute.xlu0 %2008  ;;  %v729_v39 = vpop.f32.mrb[17].mxu0 }
 0x140   : > { %v16006_v57 = vsel %vm9941_vm10, 4294967295, %v16005_v57  ;;  %vm16009_vm9 = vmmov %vm16001_vm2  ;;  %vm16010_vm2 = vcmp.ge.s32.totalorder %v8401_v60, 1  ;;  %16012 = vst [vmem:[#allocation113_spill] sm:$0xff] %v9959_v21  ;;  %v9977_v7 = vpack.c.bf16 %v805_v34, %v804_v49  ;;  %v738_v21 = vadd.f32 %v7356_v12, %v9716_v0 }
 0x141   : > { %16007 = vst [vmem:[#allocation111_spill] sm:$0xff] %v16006_v57  ;;  %7448 = vmatprep.mubr.msk.bf16.mxu0 %vm16009_vm9, %v9910_v19  ;;  %vm3213_vm7 = vmand %vm9941_vm10, %vm16010_vm2  ;;  %vm3119_vm9 = vcmp.ge.s32.totalorder %v7848_v47, 0  ;;  %vm3151_vm2 = vcmp.lt.s32.totalorder %v7848_v47, 16  ;;  %v9975_v44 = vpop.permute.xlu1 %2017  ;;  %v730_v49 = vadd.f32 %v9716_v0, %v729_v39  ;;  %v7357_v47 = vpop.f32.mrb[18].mxu0  ;;  %v7850_v39 = vld [vmem:[%s14985_s1 + $0x78] sm:$0xff] }
 0x142   : > { %vm3245_vm15 = vmand %vm3213_vm7, %vm16011_vm13  ;;  %vm16016_vm7 = vcmp.ge.s32.totalorder %v8426_v2, 1  ;;  %16017 = vst [vmem:[#allocation115_spill] sm:$0xff] %v9975_v44  ;;  %v741_v12 = vadd.f32 %v7357_v47, %v9716_v0  ;;  %v732_v44 = vpop.f32.mrb[19].mxu0 }
 0x143   : > { %v3277_v24 = vsel %vm3245_vm15, 1, %v15824_v54  ;;  %vm9962_vm6 = vmand %vm3116_vm11, %vm3148_vm4  ;;  %vm16018_vm11 = vcmp.lt.s32.totalorder %v8426_v2, 17  ;;  %v9990_v34 = vpop.permute.xlu0 %2014 }
 0x144   : > { %v16014_v50 = vsel %vm9962_vm6, 4294967295, %v16013_v50  ;;  %3332 = vperm.xlu1 %7784, %v3277_v24   ;;  %vm3212_vm13 = vmand %vm9962_vm6, %vm16016_vm7  ;;  %v7849_v24 = vld [vmem:[%s14985_s1 + $0x60] sm:$0xff]  ;;  %16022 = vst [vmem:[#allocation117_spill] sm:$0xff] %v9990_v34  ;;  %v733_v34 = vadd.f32 %v9716_v0, %v732_v44  ;;  %v811_v59 = vmax.f32 %v741_v12, 0.0  ;;  %v16039_v12 = vmov 0 }
 0x145   : > { %16015 = vst [vmem:[#allocation114_spill] sm:$0xff] %v16014_v50  ;;  %vm3244_vm4 = vmand %vm3212_vm13, %vm16018_vm11  ;;  %vm3150_vm6 = vcmp.lt.s32.totalorder %v7849_v24, 16  ;;  %vm16023_vm13 = vcmask 130048  }
 0x146   : > { %v3276_v28 = vsel %vm3244_vm4, 1, %v15824_v54  ;;  %vm9983_vm15 = vmand %vm3119_vm9, %vm3151_vm2  ;;  %7384 = vmatprep.mubr.msk.bf16.mxu1 %vm16023_vm13, %v9977_v7  ;;  %vm16024_vm9 = vcmp.ge.s32.totalorder %v8451_v15, 1  ;;  %vm16026_vm4 = vcmp.lt.s32.totalorder %v8451_v15, 17  ;;  %v810_v15 = vmax.f32 %v738_v21, 0.0 }
 0x147   : > { %v16020_v42 = vsel %vm9983_vm15, 4294967295, %v16019_v42  ;;  %3329 = vperm.xlu0 %7783, %v3276_v28   ;;  %vm3215_vm2 = vmand %vm9983_vm15, %vm16024_vm9  ;;  %v10007_v28 = vpop.permute.xlu1 %2023  ;;  %vm16029_vm15 = vcmp.ge.s32.totalorder %v7849_v24, 0  ;;  %v10025_v44 = vpop.permute.xlu0 %2020  ;;  %v809_v24 = vmax.f32 %v733_v34, 0.0 }
 0x148   : > { %16021 = vst [vmem:[#allocation116_spill] sm:$0xff] %v16020_v42  ;;  %vm16025_vm11 = vmmov %vm16023_vm13  ;;  %v16030_v42 = vmov 0  ;;  %vm16034_vm13 = vcmp.ge.s32.totalorder %v8479_v25, 1  ;;  %v10029_v22 = vpack.c.bf16 %v811_v59, %v810_v15  ;;  %v16043_v15 = vld [vmem:[#allocation25_spill] sm:$0xff] }
 0x149   : > { %7385 = vmatmul.mubr.msk.bf16.gmra.mrb[8].mxu1 %vm16025_vm11, %v9969_v8  ;;  %vm3247_vm7 = vmand %vm3215_vm2, %vm16026_vm4  ;;  %16027 = vst [vmem:[#allocation118_spill] sm:$0xff] %v10007_v28  ;;  %vm3153_vm2 = vcmp.lt.s32.totalorder %v7850_v39, 16  ;;  %v808_v28 = vmax.f32 %v730_v49, 0.0 }
 0x14a   : > { %vm16028_vm9 = vmmov %vm16025_vm11  ;;  %v3279_v47 = vsel %vm3247_vm7, 1, %v15824_v54  ;;  %16035 = vst [vmem:[#allocation120_spill] sm:$0xff] %v10025_v44  ;;  %vm16038_vm7 = vcmp.ge.s32.totalorder %v7850_v39, 0 }
 0x14b   : > { %7449 = vmatmul.mubr.msk.bf16.gmra.mrb[44].mxu0 %vm16028_vm9, %v9904_v36  ;;  %vm10015_vm11 = vmand %vm16029_vm15, %vm3150_vm6  ;;  %3338 = vperm.xlu1 %7784, %v3279_v47   ;;  %vm16036_vm6 = vcmp.lt.s32.totalorder %v8479_v25, 17  ;;  %16037 = vst [vmem:[#allocation121_spill] sm:$0xff] %v10029_v22  ;;  %v7851_v47 = vld [vmem:[%s14985_s1 + $0x70] sm:$0xff]  ;;  %v10040_v49 = vpop.permute.xlu1 %2029  ;;  %v10042_v34 = vpack.c.bf16 %v809_v24, %v808_v28  ;;  %v10051_v25 = vpop.permute.xlu0 %2026  ;;  %v16048_v24 = vmov 0 }
 0x14c   : > { %v16031_v42 = vsel %vm10015_vm11, 4294967295, %v16030_v42  ;;  %vm16033_vm4 = vmmov %vm16028_vm9  ;;  %16042 = vst [vmem:[#allocation123_spill] sm:$0xff] %v10040_v49 }
 0x14d   : > { %16032 = vst [vmem:[#allocation119_spill] sm:$0xff] %v16031_v42  ;;  %7452 = vmatprep.mubr.msk.bf16.mxu0 %vm16033_vm4, %v9977_v7  ;;  %vm3214_vm9 = vmand %vm10015_vm11, %vm16034_vm13  ;;  %vm3120_vm13 = vcmp.ge.s32.totalorder %v7851_v47, 0  ;;  %vm3152_vm4 = vcmp.lt.s32.totalorder %v7851_v47, 16  ;;  %v7360_v42 = vpop.f32.mrb[20].mxu0  ;;  %v16053_v47 = vld [vmem:[#allocation26_spill] sm:$0xff] }
 0x14e   : > { %vm3246_vm15 = vmand %vm3214_vm9, %vm16036_vm6  ;;  %vm16044_vm9 = vcmp.ge.s32.totalorder %v16043_v15, 1  ;;  %v754_v59 = vadd.f32 %v7360_v42, %v9716_v0  ;;  %v745_v39 = vpop.f32.mrb[21].mxu0  ;;  %vm16045_vm6 = vcmp.lt.s32.totalorder %v16043_v15, 17  ;;  %16046 = vst [vmem:[#allocation124_spill] sm:$0xff] %v10051_v25  ;;  %v10065_v42 = vld [vmem:[%s14985_s1 + $0x88] sm:$0xff] }
 0x14f   : > { %v3278_v21 = vsel %vm3246_vm15, 1, %v15824_v54  ;;  %vm10033_vm10 = vmand %vm16038_vm7, %vm3153_vm2  ;;  %v746_v44 = vadd.f32 %v9716_v0, %v745_v39  ;;  %v7361_v49 = vpop.f32.mrb[22].mxu0  ;;  %vm16047_vm7 = vcmask 130048   ;;  %16051 = vst [vmem:[#allocation126_spill] sm:$0xff] %v10065_v42 }
 0x150   : > { %v16040_v12 = vsel %vm10033_vm10, 4294967295, %v16039_v12  ;;  %3335 = vperm.xlu0 %7783, %v3278_v21   ;;  %vm3217_vm2 = vmand %vm10033_vm10, %vm16044_vm9  ;;  %7388 = vmatprep.mubr.msk.bf16.mxu1 %vm16047_vm7, %v10042_v34  ;;  %v757_v21 = vadd.f32 %v7361_v49, %v9716_v0  ;;  %v748_v39 = vpop.f32.mrb[23].mxu0  ;;  %v10086_v49 = vld [vmem:[%s14985_s1 + $0x80] sm:$0xff] }
 0x151   : > { %16041 = vst [vmem:[#allocation122_spill] sm:$0xff] %v16040_v12  ;;  %vm3249_vm15 = vmand %vm3217_vm2, %vm16045_vm6  ;;  %vm3155_vm2 = vcmp.lt.s32.totalorder %v10065_v42, 16  ;;  %v10076_v12 = vpop.permute.xlu1 %2035  ;;  %v749_v15 = vadd.f32 %v9716_v0, %v748_v39  ;;  %v10094_v39 = vld [vmem:[%s14989_s5 + $0x18] sm:$0xff]  }
 0x152   : > { %v3281_v28 = vsel %vm3249_vm15, 1, %v15824_v54  ;;  %vm10058_vm11 = vmand %vm3120_vm13, %vm3152_vm4  ;;  %vm16054_vm13 = vcmp.ge.s32.totalorder %v16053_v47, 1  ;;  %16055 = vst [vmem:[#allocation127_spill] sm:$0xff] %v10076_v12  ;;  %v16061_v12 = vmov 0  ;;  %7472 = vmatprep.subr.bf16.mxu1 %v10094_v39 }
 0x153   : > { %v16049_v24 = vsel %vm10058_vm11, 4294967295, %v16048_v24  ;;  %vm16052_vm6 = vmmov %vm16047_vm7  ;;  %3344 = vperm.xlu1 %7784, %v3281_v28   ;;  %vm16057_vm7 = vcmp.lt.s32.totalorder %v16053_v47, 17  ;;  %16058 = vst [vmem:[#allocation128_spill] sm:$0xff] %v10086_v49  ;;  %v814_v28 = vmax.f32 %v754_v59, 0.0  ;;  %v10106_v59 = vpop.permute.xlu0 %2032  ;;  %v813_v25 = vmax.f32 %v749_v15, 0.0 }
 0x154   : > { %16050 = vst [vmem:[#allocation125_spill] sm:$0xff] %v16049_v24  ;;  %7389 = vmatmul.mubr.msk.bf16.gmra.mrb[12].mxu1 %vm16052_vm6, %v10029_v22  ;;  %vm3216_vm4 = vmand %vm10058_vm11, %vm16054_vm13  ;;  %v815_v24 = vmax.f32 %v757_v21, 0.0  ;;  %v812_v21 = vmax.f32 %v746_v44, 0.0  ;;  %v16071_v15 = vmov 0 }
 0x155   : > { %vm16056_vm15 = vmmov %vm16052_vm6  ;;  %vm3122_vm6 = vcmp.ge.s32.totalorder %v10086_v49, 0  ;;  %16064 = vst [vmem:[#allocation130_spill] sm:$0xff] %v10106_v59  ;;  %v7364_v59 = vpop.f32.mrb[24].mxu0 }
 0x156   : > { %7453 = vmatmul.mubr.msk.bf16.gmra.mrb[48].mxu0 %vm16056_vm15, %v9969_v8  ;;  %vm3248_vm9 = vmand %vm3216_vm4, %vm16057_vm7  ;;  %vm16060_vm4 = vcmp.ge.s32.totalorder %v10065_v42, 0  ;;  %vm3154_vm7 = vcmp.lt.s32.totalorder %v10086_v49, 16  ;;  %v10112_v45 = vpack.c.bf16 %v815_v24, %v814_v28  ;;  %v10117_v42 = vpop.permute.xlu1 %2041  ;;  %v10119_v61 = vpack.c.bf16 %v813_v25, %v812_v21  ;;  %v10131_v24 = vld [vmem:[%s14985_s1 + $0x98] sm:$0xff]  ;;  %v16075_v28 = vld [vmem:[#allocation30_spill] sm:$0xff] }
 0x157   : > { %vm16059_vm13 = vmmov %vm16056_vm15  ;;  %v3280_v47 = vsel %vm3248_vm9, 1, %v15824_v54  ;;  %16069 = vst [vmem:[#allocation132_spill] sm:$0xff] %v10117_v42  ;;  %v770_v25 = vadd.f32 %v7364_v59, %v9716_v0  ;;  %v10140_v21 = vpop.permute.xlu0 %2038 }
 0x158   : > { %7456 = vmatprep.mubr.msk.bf16.mxu0 %vm16059_vm13, %v10042_v34  ;;  %vm10101_vm15 = vmand %vm16060_vm4, %vm3155_vm2  ;;  %3341 = vperm.xlu0 %7783, %v3280_v47   ;;  %vm16066_vm13 = vcmp.ge.s32.totalorder %v16065_v6, 1  ;;  %16067 = vst [vmem:[#allocation131_spill] sm:$0xff] %v10112_v45  ;;  %vm16068_vm2 = vcmp.lt.s32.totalorder %v16065_v6, 17  ;;  %v761_v47 = vpop.f32.mrb[25].mxu0 }
 0x159   : > { %v16062_v12 = vsel %vm10101_vm15, 4294967295, %v16061_v12  ;;  %vm3219_vm9 = vmand %vm10101_vm15, %vm16066_vm13  ;;  %16070 = vst [vmem:[#allocation133_spill] sm:$0xff] %v10119_v61  ;;  %v762_v42 = vadd.f32 %v9716_v0, %v761_v47  ;;  %v7365_v49 = vpop.f32.mrb[26].mxu0  ;;  %v10160_v47 = vld [vmem:[%s14985_s1 + $0x90] sm:$0xff] }
 0x15a   : > { %16063 = vst [vmem:[#allocation129_spill] sm:$0xff] %v16062_v12  ;;  %vm3251_vm4 = vmand %vm3219_vm9, %vm16068_vm2  ;;  %vm3157_vm9 = vcmp.lt.s32.totalorder %v10131_v24, 16  ;;  %vm16076_vm2 = vcmp.ge.s32.totalorder %v16075_v28, 1  ;;  %v773_v59 = vadd.f32 %v7365_v49, %v9716_v0  ;;  %v764_v55 = vpop.f32.mrb[27].mxu0  ;;  %v10164_v49 = vpop.permute.xlu1 %2047 }
 0x15b   : > { %v3283_v44 = vsel %vm3251_vm4, 1, %v15824_v54  ;;  %vm10124_vm11 = vmand %vm3122_vm6, %vm3154_vm7  ;;  %16074 = vst [vmem:[#allocation135_spill] sm:$0xff] %v10131_v24  ;;  %vm16078_vm7 = vcmask 130048   ;;  %vm16079_vm4 = vcmp.lt.s32.totalorder %v16075_v28, 17  ;;  %v765_v56 = vadd.f32 %v9716_v0, %v764_v55 }
 0x15c   : > { %v16072_v15 = vsel %vm10124_vm11, 4294967295, %v16071_v15  ;;  %3350 = vperm.xlu1 %7784, %v3283_v44   ;;  %vm3218_vm6 = vmand %vm10124_vm11, %vm16076_vm2  ;;  %16077 = vst [vmem:[#allocation136_spill] sm:$0xff] %v10140_v21  ;;  %7392 = vmatprep.mubr.msk.bf16.mxu1 %vm16078_vm7, %v10119_v61  ;;  %vm16081_vm2 = vcmp.ge.s32.totalorder %v10131_v24, 0  ;;  %v16082_v21 = vmov 0  ;;  %v16087_v24 = vld [vmem:[#allocation31_spill] sm:$0xff]  ;;  %v819_v28 = vmax.f32 %v773_v59, 0.0 }
 0x15d   : > { %16073 = vst [vmem:[#allocation134_spill] sm:$0xff] %v16072_v15  ;;  %vm3250_vm13 = vmand %vm3218_vm6, %vm16079_vm4  ;;  %v818_v15 = vmax.f32 %v770_v25, 0.0  ;;  %v816_v55 = vmax.f32 %v762_v42, 0.0  ;;  %v817_v12 = vmax.f32 %v765_v56, 0.0  ;;  %v10189_v25 = vld [vmem:[%s14985_s1 + $0xa8] sm:$0xff]  ;;  %v16098_v56 = vld [vmem:[#allocation32_spill] sm:$0xff] }
 0x15e   : > { %vm16080_vm10 = vmmov %vm16078_vm7  ;;  %v3282_v44 = vsel %vm3250_vm13, 1, %v15824_v54  ;;  %16085 = vst [vmem:[#allocation138_spill] sm:$0xff] %v10160_v47  ;;  %vm3156_vm7 = vcmp.lt.s32.totalorder %v10160_v47, 16  ;;  %vm16088_vm13 = vcmp.ge.s32.totalorder %v16087_v24, 1  ;;  %v10199_v42 = vpop.permute.xlu1 %2053 }
 0x15f   : > { %7393 = vmatmul.mubr.msk.bf16.gmra.mrb[16].mxu1 %vm16080_vm10, %v10112_v45  ;;  %vm10153_vm11 = vmand %vm16081_vm2, %vm3157_vm9  ;;  %16086 = vst [vmem:[#allocation139_spill] sm:$0xff] %v10164_v49  ;;  %7457 = vmatmul.mubr.msk.bf16.gmra.mrb[52].mxu0 %vm16080_vm10, %v10029_v22  ;;  %vm16090_vm2 = vcmp.lt.s32.totalorder %v16087_v24, 17  ;;  %v10177_v49 = vpop.permute.xlu0 %2044  ;;  %v10193_v59 = vpack.c.bf16 %v819_v28, %v818_v15  ;;  %v10214_v28 = vld [vmem:[%s14985_s1 + $0xa0] sm:$0xff] }
 0x160   : > { %v16083_v21 = vsel %vm10153_vm11, 4294967295, %v16082_v21  ;;  %3347 = vperm.xlu0 %7783, %v3282_v44   ;;  %vm3221_vm9 = vmand %vm10153_vm11, %vm16088_vm13  ;;  %16091 = vst [vmem:[#allocation140_spill] sm:$0xff] %v10177_v49  ;;  %v16093_v44 = vmov 0  ;;  %vm3127_vm13 = vcmp.ge.s32.totalorder %v10189_v25, 0  ;;  %v10201_v49 = vpack.c.bf16 %v817_v12, %v816_v55 }
 0x161   : > { %16084 = vst [vmem:[#allocation137_spill] sm:$0xff] %v16083_v21  ;;  %vm16089_vm4 = vmmov %vm16080_vm10  ;;  %vm16092_vm10 = vcmp.ge.s32.totalorder %v10160_v47, 0  ;;  %v7368_v47 = vpop.f32.mrb[28].mxu0 }
 0x162   : > { %7460 = vmatprep.mubr.msk.bf16.mxu0 %vm16089_vm4, %v10119_v61  ;;  %vm3253_vm6 = vmand %vm3221_vm9, %vm16090_vm2  ;;  %16096 = vst [vmem:[#allocation142_spill] sm:$0xff] %v10189_v25  ;;  %vm3159_vm9 = vcmp.lt.s32.totalorder %v10189_v25, 16  ;;  %vm16102_vm4 = vcmp.lt.s32.totalorder %v16098_v56, 17  ;;  %v786_v21 = vadd.f32 %v7368_v47, %v9716_v0  ;;  %v777_v24 = vpop.f32.mrb[29].mxu0 }
 0x163   : > { %v3285_v6 = vsel %vm3253_vm6, 1, %v15824_v54  ;;  %vm10182_vm15 = vmand %vm16092_vm10, %vm3156_vm7  ;;  %16097 = vst [vmem:[#allocation143_spill] sm:$0xff] %v10193_v59  ;;  %vm16099_vm6 = vcmp.ge.s32.totalorder %v16098_v56, 1  ;;  %v10218_v12 = vpop.permute.xlu0 %2050  ;;  %v778_v47 = vadd.f32 %v9716_v0, %v777_v24  ;;  %v7369_v55 = vpop.f32.mrb[30].mxu0  ;;  %v7858_v24 = vld [vmem:[%s14985_s1 + $0xb8] sm:$0xff] }
 0x164   : > { %v16094_v44 = vsel %vm10182_vm15, 4294967295, %v16093_v44  ;;  %3356 = vperm.xlu1 %7784, %v3285_v6   ;;  %vm3220_vm7 = vmand %vm10182_vm15, %vm16099_vm6  ;;  %16100 = vst [vmem:[#allocation144_spill] sm:$0xff] %v10199_v42  ;;  %v16103_v6 = vmov 0  ;;  %vm3158_vm15 = vcmp.lt.s32.totalorder %v10214_v28, 16  ;;  %v16109_v42 = vld [vmem:[#allocation35_spill] sm:$0xff]  ;;  %v789_v25 = vadd.f32 %v7369_v55, %v9716_v0 }
 0x165   : > { %16095 = vst [vmem:[#allocation141_spill] sm:$0xff] %v16094_v44  ;;  %16101 = vst [vmem:[#allocation145_spill] sm:$0xff] %v10201_v49  ;;  %v780_v44 = vpop.f32.mrb[31].mxu0 }
 0x166   : > { %vm3252_vm2 = vmand %vm3220_vm7, %vm16102_vm4  ;;  %16106 = vst [vmem:[#allocation147_spill] sm:$0xff] %v10214_v28  ;;  %vm16108_vm7 = vcmask 130048   ;;  %v823_v56 = vmax.f32 %v789_v25, 0.0  ;;  %v16124_v25 = vmov 0 }
 0x167   : > { %v3284_v15 = vsel %vm3252_vm2, 1, %v15824_v54  ;;  %vm10207_vm10 = vmand %vm3127_vm13, %vm3159_vm9  ;;  %16107 = vst [vmem:[#allocation148_spill] sm:$0xff] %v10218_v12  ;;  %7396 = vmatprep.mubr.msk.bf16.mxu1 %vm16108_vm7, %v10201_v49  ;;  %vm16110_vm13 = vcmp.ge.s32.totalorder %v16109_v42, 1  ;;  %vm16112_vm2 = vcmp.lt.s32.totalorder %v16109_v42, 17  ;;  %v781_v12 = vadd.f32 %v9716_v0, %v780_v44  ;;  %v10255_v0 = vpop.permute.xlu0 %2056 }
 0x168   : > { %v16104_v6 = vsel %vm10207_vm10, 4294967295, %v16103_v6  ;;  %3353 = vperm.xlu0 %7783, %v3284_v15   ;;  %vm3223_vm9 = vmand %vm10207_vm10, %vm16110_vm13  ;;  %v10235_v15 = vpop.permute.xlu1 %2059  ;;  %v822_v42 = vmax.f32 %v786_v21, 0.0  ;;  %16120 = vst [vmem:[#allocation150_spill] sm:$0xff] %v10255_v0  ;;  %v820_v44 = vmax.f32 %v778_v47, 0.0  ;;  %v16145_v0 = vmov 0 }
 0x169   : > { %16105 = vst [vmem:[#allocation146_spill] sm:$0xff] %v16104_v6  ;;  %vm16111_vm4 = vmmov %vm16108_vm7  ;;  %v16116_v6 = vmov 0 }
 0x16a   : > { %7397 = vmatmul.mubr.msk.bf16.gmra.mrb[20].mxu1 %vm16111_vm4, %v10193_v59  ;;  %vm3255_vm6 = vmand %vm3223_vm9, %vm16112_vm2  ;;  %16113 = vst [vmem:[#allocation149_spill] sm:$0xff] %v10235_v15  ;;  %vm3161_vm9 = vcmp.lt.s32.totalorder %v7858_v24, 16  ;;  %v821_v15 = vmax.f32 %v781_v12, 0.0 }
 0x16b   : > { %vm16114_vm13 = vmmov %vm16111_vm4  ;;  %v3287_v55 = vsel %vm3255_vm6, 1, %v15824_v54  ;;  %vm16115_vm4 = vcmp.ge.s32.totalorder %v10214_v28, 0  ;;  %v10259_v28 = vpack.c.bf16 %v823_v56, %v822_v42  ;;  %v10280_v56 = vpop.permute.xlu0 %2617 }
 0x16c   : > { %7461 = vmatmul.mubr.msk.bf16.gmra.mrb[56].mxu0 %vm16114_vm13, %v10112_v45  ;;  %vm10245_vm10 = vmand %vm16115_vm4, %vm3158_vm15  ;;  %3362 = vperm.xlu1 %7784, %v3287_v55   ;;  %vm16121_vm15 = vcmp.lt.s32.totalorder %v8688_v48, 17  ;;  %vm16123_vm4 = vcmp.ge.s32.totalorder %v7858_v24, 0  ;;  %v7859_v55 = vld [vmem:[%s14985_s1 + $0xb0] sm:$0xff]  ;;  %v10270_v47 = vpop.permute.xlu1 %2620  ;;  %v10272_v12 = vpack.c.bf16 %v821_v15, %v820_v44  ;;  %16130 = vst [vmem:[#allocation154_spill] sm:$0xff] %v10280_v56  ;;  %v16132_v24 = vmov 0  ;;  %v7860_v15 = vld [vmem:[%s14985_s1 + $0xc8] sm:$0xff] }
 0x16d   : > { %v16117_v6 = vsel %vm10245_vm10, 4294967295, %v16116_v6  ;;  %vm16118_vm2 = vmmov %vm16108_vm7  ;;  %vm16119_vm7 = vcmp.ge.s32.totalorder %v8688_v48, 1  ;;  %16122 = vst [vmem:[#allocation151_spill] sm:$0xff] %v10259_v28  ;;  %vm3131_vm12 = vcmp.ge.s32.totalorder %v7860_v15, 0 }
 0x16e   : > { %7464 = vmatprep.mubr.msk.bf16.mxu0 %vm16118_vm2, %v10201_v49  ;;  %vm3222_vm6 = vmand %vm10245_vm10, %vm16119_vm7  ;;  %vm3128_vm7 = vcmp.ge.s32.totalorder %v7859_v55, 0  ;;  %vm3160_vm2 = vcmp.lt.s32.totalorder %v7859_v55, 16  ;;  %16126 = vst [vmem:[#allocation152_spill] sm:$0xff] %v10270_v47  ;;  %v16140_v55 = vmov 0 }
 0x16f   : > { %vm3254_vm13 = vmand %vm3222_vm6, %vm16121_vm15  ;;  %16127 = vst [vmem:[#allocation153_spill] sm:$0xff] %v10272_v12  ;;  %vm16128_vm6 = vcmp.ge.s32.totalorder %v8706_v13, 1 }
 0x170   : > { %v3286_v21 = vsel %vm3254_vm13, 1, %v15824_v54  ;;  %vm10263_vm11 = vmand %vm16123_vm4, %vm3161_vm9  ;;  %vm16129_vm9 = vcmp.lt.s32.totalorder %v8706_v13, 17  ;;  %vm16131_vm4 = vcmask 130048   ;;  %v10298_v44 = vpop.permute.xlu1 %2626 }
 0x171   : > { %v16125_v25 = vsel %vm10263_vm11, 4294967295, %v16124_v25  ;;  %3359 = vperm.xlu0 %7783, %v3286_v21   ;;  %vm3225_vm15 = vmand %vm10263_vm11, %vm16128_vm6  ;;  %7400 = vmatprep.mubr.msk.bf16.mxu1 %vm16131_vm4, %v10272_v12  ;;  %vm3163_vm6 = vcmp.lt.s32.totalorder %v7860_v15, 16  ;;  %16136 = vst [vmem:[#allocation155_spill] sm:$0xff] %v10298_v44  ;;  %v10316_v15 = vpop.permute.xlu0 %2623 }
 0x172   : > { %vm3257_vm13 = vmand %vm3225_vm15, %vm16129_vm9  ;;  %vm16135_vm15 = vcmp.ge.s32.totalorder %v8724_v20, 1 }
 0x173   : > { %v3289_v42 = vsel %vm3257_vm13, 1, %v15824_v54  ;;  %vm10285_vm10 = vmand %vm3128_vm7, %vm3160_vm2  ;;  %vm16138_vm2 = vcmp.lt.s32.totalorder %v8724_v20, 17 }
 0x174   : > { %v16133_v24 = vsel %vm10285_vm10, 4294967295, %v16132_v24  ;;  %vm16134_vm11 = vmmov %vm16131_vm4  ;;  %3368 = vperm.xlu1 %7784, %v3289_v42   ;;  %v7861_v42 = vld [vmem:[%s14985_s1 + $0xc0] sm:$0xff]  ;;  %v10324_v47 = vpop.permute.xlu1 %2632 }
 0x175   : > { %7401 = vmatmul.mubr.msk.bf16.gmra.mrb[24].mxu1 %vm16134_vm11, %v10259_v28  ;;  %vm3224_vm9 = vmand %vm10285_vm10, %vm16135_vm15  ;;  %vm3130_vm15 = vcmp.ge.s32.totalorder %v7861_v42, 0  ;;  %16144 = vst [vmem:[#allocation156_spill] sm:$0xff] %v10324_v47  ;;  %v16151_v47 = vmov 0 }
 0x176   : > { %vm16137_vm7 = vmmov %vm16131_vm4  ;;  %7406 = vmatprep.mubr.msk.bf16.mxu1 %vm16131_vm4, %v9780_v63 }
 0x177   : > { %7465 = vmatmul.mubr.msk.bf16.gmra.mrb[60].mxu0 %vm16137_vm7, %v10193_v59  ;;  %vm3256_vm13 = vmand %vm3224_vm9, %vm16138_vm2  ;;  %vm3162_vm7 = vcmp.lt.s32.totalorder %v7861_v42, 16  ;;  %vm16142_vm9 = vcmp.ge.s32.totalorder %v8751_v27, 1  ;;  %vm16143_vm2 = vcmp.lt.s32.totalorder %v8751_v27, 17  ;;  %v10338_v42 = vpop.permute.xlu0 %2629 }
 0x178   : > { %vm16139_vm8 = vmmov %vm16131_vm4  ;;  %v3288_v21 = vsel %vm3256_vm13, 1, %v15824_v54  ;;  %16148 = vst [vmem:[#allocation157_spill] sm:$0xff] %v10338_v42  ;;  %v16161_v42 = vmov 0 }
 0x179   : > { %7468 = vmatprep.mubr.msk.bf16.mxu0 %vm16139_vm8, %v10272_v12  ;;  %vm10309_vm11 = vmand %vm3131_vm12, %vm3163_vm6  ;;  %3365 = vperm.xlu0 %7783, %v3288_v21   ;;  %v7862_v21 = vld [vmem:[%s14985_s1 + $0xd8] sm:$0xff] }
 0x17a   : > { %v16141_v55 = vsel %vm10309_vm11, 4294967295, %v16140_v55  ;;  %vm3227_vm8 = vmand %vm10309_vm11, %vm16142_vm9  ;;  %vm3133_vm13 = vcmp.ge.s32.totalorder %v7862_v21, 0  ;;  %vm3165_vm4 = vcmp.lt.s32.totalorder %v7862_v21, 16  ;;  %vm16147_vm9 = vcmp.ge.s32.totalorder %v8774_v17, 1  ;;  %v10352_v21 = vpop.permute.xlu1 %2638 }
 0x17b   : > { %vm3259_vm12 = vmand %vm3227_vm8, %vm16143_vm2  ;;  %vm16149_vm2 = vcmp.lt.s32.totalorder %v8774_v17, 17  ;;  %16154 = vst [vmem:[#allocation159_spill] sm:$0xff] %v10352_v21 }
 0x17c   : > { %v3291_v56 = vsel %vm3259_vm12, 1, %v15824_v54  ;;  %vm10327_vm6 = vmand %vm3130_vm15, %vm3162_vm7  ;;  %vm16150_vm7 = vcmask 130048  }
 0x17d   : > { %v16146_v0 = vsel %vm10327_vm6, 4294967295, %v16145_v0  ;;  %3374 = vperm.xlu1 %7784, %v3291_v56   ;;  %vm3226_vm8 = vmand %vm10327_vm6, %vm16147_vm9  ;;  %7407 = vmatmul.mubr.msk.bf16.vlgmr.msra.gmra.mrb[28].mxu1 %vm16150_vm7, %v9772_v58  ;;  %v7863_v56 = vld [vmem:[%s14985_s1 + $0xd0] sm:$0xff] }
 0x17e   : > { %vm3258_vm15 = vmand %vm3226_vm8, %vm16149_vm2  ;;  %vm3132_vm11 = vcmp.ge.s32.totalorder %v7863_v56, 0  ;;  %vm3164_vm9 = vcmp.lt.s32.totalorder %v7863_v56, 16  ;;  %v10366_v56 = vpop.permute.xlu0 %2635  ;;  %7473 = vmatpush3.bf16.msra.mxu1 %v10094_v39 }
 0x17f   : > { %v3290_v44 = vsel %vm3258_vm15, 1, %v15824_v54  ;;  %vm10345_vm12 = vmand %vm3133_vm13, %vm3165_vm4  ;;  %vm16157_vm13 = vcmp.ge.s32.totalorder %v8795_v31, 1  ;;  %vm16159_vm15 = vcmp.lt.s32.totalorder %v8795_v31, 17  ;;  %16160 = vst [vmem:[#allocation160_spill] sm:$0xff] %v10366_v56  ;;  %v10381_v56 = vpop.permute.xlu1 %2644 }
 0x180   : > { %v16152_v47 = vsel %vm10345_vm12, 4294967295, %v16151_v47  ;;  %vm16155_vm6 = vmmov %vm16150_vm7  ;;  %3371 = vperm.xlu0 %7783, %v3290_v44   ;;  %v7864_v44 = vld [vmem:[%s14985_s1 + $0xe8] sm:$0xff]  ;;  %16165 = vst [vmem:[#allocation162_spill] sm:$0xff] %v10381_v56 }
 0x181   : > { %16153 = vst [vmem:[#allocation158_spill] sm:$0xff] %v16152_v47  ;;  %7469 = vmatmul.mubr.msk.bf16.gmra.mrb[64].mxu0 %vm16155_vm6, %v10259_v28  ;;  %vm16156_vm8 = vmmov %vm16155_vm6  ;;  %v16167_v47 = vmov 0 }
 0x182   : > { %7410 = vmatprep.mubr.msk.bf16.mxu1 %vm16156_vm8, %v9845_v35  ;;  %vm3229_vm4 = vmand %vm10345_vm12, %vm16157_vm13  ;;  %vm3135_vm8 = vcmp.ge.s32.totalorder %v7864_v44, 0  ;;  %vm3167_vm13 = vcmp.lt.s32.totalorder %v7864_v44, 16  ;;  %v10393_v44 = vpop.permute.xlu0 %2641 }
 0x183   : > { %vm16158_vm2 = vmmov %vm16155_vm6  ;;  %16170 = vst [vmem:[#allocation164_spill] sm:$0xff] %v10393_v44  ;;  %v10403_v56 = vpop.permute.xlu1 %2650  ;;  %v16184_v44 = vmov 0 }
 0x184   : > { %7508 = vmatprep.mubr.msk.bf16.mxu0 %vm16158_vm2, %v9780_v63  ;;  %vm3261_vm7 = vmand %vm3229_vm4, %vm16159_vm15  ;;  %vm16164_vm2 = vcmp.ge.s32.totalorder %v8818_v53, 1  ;;  %vm16166_vm15 = vcmp.lt.s32.totalorder %v8818_v53, 17  ;;  %16174 = vst [vmem:[#allocation165_spill] sm:$0xff] %v10403_v56  ;;  %v16334_v53 = vld [vmem:[#allocation85_spill] sm:$0xff] }
 0x185   : > { %v3293_v21 = vsel %vm3261_vm7, 1, %v15824_v54  ;;  %vm10370_vm6 = vmand %vm3132_vm11, %vm3164_vm9 }
 0x186   : > { %v16162_v42 = vsel %vm10370_vm6, 4294967295, %v16161_v42  ;;  %3380 = vperm.xlu1 %7784, %v3293_v21   ;;  %vm3228_vm4 = vmand %vm10370_vm6, %vm16164_vm2  ;;  %v7865_v21 = vld [vmem:[%s14985_s1 + $0xe0] sm:$0xff]  ;;  %vm16171_vm2 = vcmp.ge.s32.totalorder %v8850_v40, 1 }
 0x187   : > { %16163 = vst [vmem:[#allocation161_spill] sm:$0xff] %v16162_v42  ;;  %vm3260_vm11 = vmand %vm3228_vm4, %vm16166_vm15  ;;  %vm3134_vm7 = vcmp.ge.s32.totalorder %v7865_v21, 0  ;;  %vm3166_vm12 = vcmp.lt.s32.totalorder %v7865_v21, 16  ;;  %vm16172_vm15 = vcmask 130048   ;;  %v16177_v21 = vmov 0 }
 0x188   : > { %v3292_v39 = vsel %vm3260_vm11, 1, %v15824_v54  ;;  %vm10386_vm9 = vmand %vm3135_vm8, %vm3167_vm13  ;;  %7411 = vmatmul.mubr.msk.bf16.gmra.mrb[32].mxu1 %vm16172_vm15, %v9832_v4  ;;  %vm16173_vm8 = vcmp.lt.s32.totalorder %v8850_v40, 17  ;;  %v10423_v40 = vpop.permute.xlu0 %2647  ;;  %v16316_v42 = vmov 0 }
 0x189   : > { %v16168_v47 = vsel %vm10386_vm9, 4294967295, %v16167_v47  ;;  %3377 = vperm.xlu0 %7783, %v3292_v39   ;;  %vm3231_vm4 = vmand %vm10386_vm9, %vm16171_vm2  ;;  %16182 = vst [vmem:[#allocation167_spill] sm:$0xff] %v10423_v40 }
 0x18a   : > { %16169 = vst [vmem:[#allocation163_spill] sm:$0xff] %v16168_v47  ;;  %vm3263_vm13 = vmand %vm3231_vm4, %vm16173_vm8  ;;  %v7866_v47 = vld [vmem:[%s14985_s1 + $0xf8] sm:$0xff]  ;;  %vm16181_vm8 = vcmp.ge.s32.totalorder %v15869_v29, 1 }
 0x18b   : > { %vm16175_vm11 = vmmov %vm16172_vm15  ;;  %v3295_v39 = vsel %vm3263_vm13, 1, %v15824_v54  ;;  %vm3137_vm2 = vcmp.ge.s32.totalorder %v7866_v47, 0  ;;  %vm3169_vm4 = vcmp.lt.s32.totalorder %v7866_v47, 16  ;;  %v7867_v47 = vld [vmem:[%s14985_s1 + $0xf0] sm:$0xff] }
 0x18c   : > { %7509 = vmatmul.mubr.msk.bf16.vlgmr.msra.gmra.mrb[68].mxu0 %vm16175_vm11, %v9772_v58  ;;  %vm16176_vm6 = vmmov %vm16175_vm11  ;;  %3386 = vperm.xlu1 %7784, %v3295_v39   ;;  %vm3136_vm11 = vcmp.ge.s32.totalorder %v7867_v47, 0  ;;  %v10435_v39 = vpop.permute.xlu1 %2656 }
 0x18d   : > { %7414 = vmatprep.mubr.msk.bf16.mxu1 %vm16176_vm6, %v9910_v19  ;;  %vm10410_vm10 = vmand %vm3134_vm7, %vm3166_vm12  ;;  %vm16183_vm12 = vcmp.lt.s32.totalorder %v15869_v29, 17  ;;  %16187 = vst [vmem:[#allocation169_spill] sm:$0xff] %v10435_v39  ;;  %v10446_v29 = vpop.permute.xlu0 %2653  ;;  %v16293_v39 = vld [vmem:[#allocation126_spill] sm:$0xff] }
 0x18e   : > { %v16178_v21 = vsel %vm10410_vm10, 4294967295, %v16177_v21  ;;  %vm16180_vm15 = vmmov %vm16176_vm6  ;;  %16190 = vst [vmem:[#allocation170_spill] sm:$0xff] %v10446_v29 }
 0x18f   : > { %16179 = vst [vmem:[#allocation166_spill] sm:$0xff] %v16178_v21  ;;  %7512 = vmatprep.mubr.msk.bf16.mxu0 %vm16180_vm15, %v9845_v35  ;;  %vm3230_vm6 = vmand %vm10410_vm10, %vm16181_vm8  ;;  %vm3168_vm15 = vcmp.lt.s32.totalorder %v7867_v47, 16  ;;  %vm16188_vm8 = vcmp.ge.s32.totalorder %v8892_v38, 1  ;;  %v7794_v21 = vld [vmem:[%s14989_s5 + $0x30] sm:$0xff]   ;;  %v16191_v47 = vmov 0  ;;  %vm16225_vm10 = vnez %v15979_v16 }
 0x190   : > { %vm3262_vm7 = vmand %vm3230_vm6, %vm16183_vm12  ;;  %7574 = vmatprep.subr.bf16.mxu0 %v7794_v21 }
 0x191   : > { %v3294_v56 = vsel %vm3262_vm7, 1, %v15824_v54  ;;  %vm10428_vm13 = vmand %vm3137_vm2, %vm3169_vm4  ;;  %vm16189_vm2 = vcmp.lt.s32.totalorder %v8892_v38, 17  ;;  %vm16194_vm7 = vcmask 130048   ;;  %7575 = vmatpush3.bf16.msra.mxu0 %v7794_v21 }
 0x192   : > { %v16185_v44 = vsel %vm10428_vm13, 4294967295, %v16184_v44  ;;  %3383 = vperm.xlu0 %7783, %v3294_v56   ;;  %vm3233_vm6 = vmand %vm10428_vm13, %vm16188_vm8  ;;  %7415 = vmatmul.mubr.msk.bf16.gmra.mrb[36].mxu1 %vm16194_vm7, %v9904_v36  ;;  %vm16195_vm8 = vcmp.ge.s32.totalorder %v8913_v1, 1  ;;  %v10459_v56 = vpop.permute.xlu1 %2662 }
 0x193   : > { %16186 = vst [vmem:[#allocation168_spill] sm:$0xff] %v16185_v44  ;;  %vm3265_vm4 = vmand %vm3233_vm6, %vm16189_vm2 }
 0x194   : > { %v3297_v40 = vsel %vm3265_vm4, 1, %v15824_v54  ;;  %vm10449_vm12 = vmand %vm3136_vm11, %vm3168_vm15  ;;  %16196 = vst [vmem:[#allocation172_spill] sm:$0xff] %v10459_v56  ;;  %vm16198_vm11 = vcmp.lt.s32.totalorder %v8913_v1, 17 }
 0x195   : > { %v16192_v47 = vsel %vm10449_vm12, 4294967295, %v16191_v47  ;;  %3392 = vperm.xlu1 %7784, %v3297_v40   ;;  %vm3232_vm13 = vmand %vm10449_vm12, %vm16195_vm8 }
 0x196   : > { %16193 = vst [vmem:[#allocation171_spill] sm:$0xff] %v16192_v47  ;;  %vm16197_vm6 = vmmov %vm16194_vm7  ;;  %vm16201_vm7 = vcmp.ge.s32.totalorder %v8216_v14, 0  ;;  %v10474_v47 = vpop.permute.xlu0 %2659  ;;  %v10483_v44 = vpop.permute.xlu1 %2668 }
 0x197   : > { %7513 = vmatmul.mubr.msk.bf16.gmra.mrb[72].mxu0 %vm16197_vm6, %v9832_v4  ;;  %vm3264_vm15 = vmand %vm3232_vm13, %vm16198_vm11  ;;  %16202 = vst [vmem:[#allocation173_spill] sm:$0xff] %v10474_v47  ;;  %vm16204_vm11 = vcmp.ge.s32.totalorder %v8174_v5, 0 }
 0x198   : > { %vm16199_vm2 = vmmov %vm16197_vm6  ;;  %v3296_v40 = vsel %vm3264_vm15, 1, %v15824_v54  ;;  %vm16203_vm6 = vcmp.lt.s32.totalorder %v8216_v14, 16  ;;  %16205 = vst [vmem:[#allocation174_spill] sm:$0xff] %v10483_v44  ;;  %vm16206_vm15 = vcmp.lt.s32.totalorder %v8174_v5, 16 }
 0x199   : > { %7418 = vmatprep.mubr.msk.bf16.mxu1 %vm16199_vm2, %v9977_v7  ;;  %vm16200_vm4 = vmmov %vm16199_vm2  ;;  %3389 = vperm.xlu0 %7783, %v3296_v40  }
 0x19a   : > { %7516 = vmatprep.mubr.msk.bf16.mxu0 %vm16200_vm4, %v9910_v19  ;;  %vm3660_vm8 = vmand %vm9706_vm5, %vm16201_vm7  ;;  %vm16207_vm7 = vcmp.ge.s32.totalorder %v8198_v9, 0  ;;  %v10492_v21 = vpop.permute.xlu0 %2665  ;;  %v10503_v40 = vpop.permute.xlu1 %2674 }
 0x19b   : > { %vm3692_vm13 = vmand %vm3660_vm8, %vm16203_vm6  ;;  %16208 = vst [vmem:[#allocation175_spill] sm:$0xff] %v10492_v21  ;;  %vm16209_vm6 = vcmp.lt.s32.totalorder %v8198_v9, 16  ;;  %v16268_v21 = vld [vmem:[#allocation80_spill] sm:$0xff] }
 0x19c   : > { %v3724_v1 = vsel %vm3692_vm13, 1, %v15824_v54  ;;  %vm3659_vm2 = vmand %vm9727_vm14, %vm16204_vm11  ;;  %vm16210_vm11 = vcmask 130048   ;;  %16212 = vst [vmem:[#allocation176_spill] sm:$0xff] %v10503_v40 }
 0x19d   : > { %3759 = vperm.xlu1 %7784, %v3724_v1   ;;  %vm3691_vm4 = vmand %vm3659_vm2, %vm16206_vm15  ;;  %7419 = vmatmul.mubr.msk.bf16.gmra.mrb[40].mxu1 %vm16210_vm11, %v9969_v8  ;;  %vm16211_vm2 = vcmp.ge.s32.totalorder %v8164_v3, 0 }
 0x19e   : > { %v3723_v38 = vsel %vm3691_vm4, 1, %v15824_v54  ;;  %vm3662_vm8 = vmand %vm9748_vm3, %vm16207_vm7  ;;  %v10518_v40 = vpop.permute.xlu0 %2671  ;;  %v10527_v56 = vpop.permute.xlu1 %2680 }
 0x19f   : > { %3756 = vperm.xlu0 %7783, %v3723_v38   ;;  %vm3694_vm13 = vmand %vm3662_vm8, %vm16209_vm6  ;;  %vm16215_vm8 = vcmp.lt.s32.totalorder %v8164_v3, 16  ;;  %16218 = vst [vmem:[#allocation177_spill] sm:$0xff] %v10518_v40 }
 0x1a0   : > { %v3726_v1 = vsel %vm3694_vm13, 1, %v15824_v54  ;;  %vm3661_vm15 = vmand %vm9768_vm1, %vm16211_vm2  ;;  %vm16217_vm13 = vcmp.ge.s32.totalorder %v8238_v18, 0  ;;  %16222 = vst [vmem:[#allocation178_spill] sm:$0xff] %v10527_v56 }
 0x1a1   : > { %vm16213_vm4 = vmmov %vm16210_vm11  ;;  %3765 = vperm.xlu1 %7784, %v3726_v1  }
 0x1a2   : > { %7517 = vmatmul.mubr.msk.bf16.gmra.mrb[76].mxu0 %vm16213_vm4, %v9904_v36  ;;  %vm16214_vm7 = vmmov %vm16213_vm4  ;;  %v10547_v56 = vpop.permute.xlu1 %2686 }
 0x1a3   : > { %7422 = vmatprep.mubr.msk.bf16.mxu1 %vm16214_vm7, %v10042_v34  ;;  %vm3693_vm6 = vmand %vm3661_vm15, %vm16215_vm8  ;;  %vm16220_vm15 = vcmp.ge.s32.totalorder %v8264_v23, 0  ;;  %vm16221_vm8 = vnez %v15974_v10  ;;  %16231 = vst [vmem:[#allocation180_spill] sm:$0xff] %v10547_v56 }
 0x1a4   : > { %vm16216_vm11 = vmmov %vm16213_vm4  ;;  %v3725_v38 = vsel %vm3693_vm6, 1, %v15824_v54  ;;  %vm16219_vm4 = vcmp.lt.s32.totalorder %v8238_v18, 16  ;;  %vm16223_vm6 = vcmp.lt.s32.totalorder %v8264_v23, 16 }
 0x1a5   : > { %7520 = vmatprep.mubr.msk.bf16.mxu0 %vm16216_vm11, %v9977_v7  ;;  %vm3664_vm2 = vmand %vm9789_vm0, %vm16217_vm13  ;;  %3762 = vperm.xlu0 %7783, %v3725_v38   ;;  %vm16224_vm13 = vcmp.ge.s32.totalorder %v8292_v32, 0  ;;  %v10536_v38 = vpop.permute.xlu0 %2677 }
 0x1a6   : > { %vm3696_vm7 = vmand %vm3664_vm2, %vm16219_vm4  ;;  %16226 = vst [vmem:[#allocation179_spill] sm:$0xff] %v10536_v38  ;;  %vm16227_vm4 = vcmp.lt.s32.totalorder %v8292_v32, 16  ;;  %v10571_v38 = vpop.permute.xlu1 %2692 }
 0x1a7   : > { %v3728_v1 = vsel %vm3696_vm7, 1, %v15824_v54  ;;  %vm3663_vm11 = vmand %vm16221_vm8, %vm16220_vm15  ;;  %vm16228_vm15 = vcmask 130048   ;;  %16242 = vst [vmem:[#allocation182_spill] sm:$0xff] %v10571_v38 }
 0x1a8   : > { %3771 = vperm.xlu1 %7784, %v3728_v1   ;;  %vm3695_vm12 = vmand %vm3663_vm11, %vm16223_vm6  ;;  %7423 = vmatmul.mubr.msk.bf16.gmra.mrb[44].mxu1 %vm16228_vm15, %v10029_v22  ;;  %vm16229_vm11 = vcmp.ge.s32.totalorder %v8320_v37, 0 }
 0x1a9   : > { %v3727_v44 = vsel %vm3695_vm12, 1, %v15824_v54  ;;  %vm3666_vm2 = vmand %vm16225_vm10, %vm16224_vm13  ;;  %vm16230_vm12 = vnez %v15985_v30  ;;  %v10562_v56 = vpop.permute.xlu0 %2683 }
 0x1aa   : > { %3768 = vperm.xlu0 %7783, %v3727_v44   ;;  %vm3698_vm7 = vmand %vm3666_vm2, %vm16227_vm4  ;;  %vm16234_vm2 = vcmp.lt.s32.totalorder %v8320_v37, 16  ;;  %16238 = vst [vmem:[#allocation181_spill] sm:$0xff] %v10562_v56  ;;  %v16258_v56 = vld [vmem:[#allocation129_spill] sm:$0xff] }
 0x1ab   : > { %v3730_v1 = vsel %vm3698_vm7, 1, %v15824_v54  ;;  %vm3665_vm6 = vmand %vm16230_vm12, %vm16229_vm11  ;;  %vm16236_vm7 = vcmp.ge.s32.totalorder %v8347_v46, 0  ;;  %vm16237_vm11 = vnez %v15990_v41 }
 0x1ac   : > { %vm16232_vm13 = vmmov %vm16228_vm15  ;;  %3777 = vperm.xlu1 %7784, %v3730_v1  }
 0x1ad   : > { %7521 = vmatmul.mubr.msk.bf16.gmra.mrb[80].mxu0 %vm16232_vm13, %v9969_v8  ;;  %vm16233_vm9 = vmmov %vm16232_vm13  ;;  %vm16239_vm13 = vcmp.lt.s32.totalorder %v8347_v46, 16 }
 0x1ae   : > { %7426 = vmatprep.mubr.msk.bf16.mxu1 %vm16233_vm9, %v10119_v61  ;;  %vm3697_vm4 = vmand %vm3665_vm6, %vm16234_vm2  ;;  %vm16240_vm6 = vcmp.ge.s32.totalorder %v8372_v51, 0  ;;  %vm16241_vm2 = vnez %v15996_v26 }
 0x1af   : > { %vm16235_vm15 = vmmov %vm16233_vm9  ;;  %v3729_v44 = vsel %vm3697_vm4, 1, %v15824_v54  ;;  %vm16243_vm4 = vcmp.lt.s32.totalorder %v8372_v51, 16 }
 0x1b0   : > { %7524 = vmatprep.mubr.msk.bf16.mxu0 %vm16235_vm15, %v10042_v34  ;;  %vm3668_vm12 = vmand %vm16237_vm11, %vm16236_vm7  ;;  %3774 = vperm.xlu0 %7783, %v3729_v44   ;;  %vm16244_vm7 = vcmp.ge.s32.totalorder %v8401_v60, 0  ;;  %vm16245_vm11 = vnez %v16006_v57  ;;  %v10580_v44 = vpop.permute.xlu0 %2689 }
 0x1b1   : > { %vm3700_vm9 = vmand %vm3668_vm12, %vm16239_vm13  ;;  %16246 = vst [vmem:[#allocation183_spill] sm:$0xff] %v10580_v44  ;;  %vm16247_vm13 = vcmp.lt.s32.totalorder %v8401_v60, 16  ;;  %v10596_v44 = vpop.permute.xlu1 %2698  ;;  %v16256_v60 = vld [vmem:[#allocation27_spill] sm:$0xff] }
 0x1b2   : > { %v3732_v1 = vsel %vm3700_vm9, 1, %v15824_v54  ;;  %vm3667_vm15 = vmand %vm16241_vm2, %vm16240_vm6  ;;  %vm16248_vm6 = vcmask 130048   ;;  %16251 = vst [vmem:[#allocation184_spill] sm:$0xff] %v10596_v44  ;;  %vm16269_vm2 = vcmp.ge.s32.totalorder %v16268_v21, 4294967295 }
 0x1b3   : > { %3783 = vperm.xlu1 %7784, %v3732_v1   ;;  %vm3699_vm10 = vmand %vm3667_vm15, %vm16243_vm4  ;;  %7427 = vmatmul.mubr.msk.bf16.gmra.mrb[48].mxu1 %vm16248_vm6, %v10112_v45  ;;  %v10589_v1 = vld [vmem:[%s14989_s5 + $0x28] sm:$0xff]   ;;  %vm16250_vm15 = vnez %v16014_v50  ;;  %v16264_v50 = vld [vmem:[#allocation134_spill] sm:$0xff] }
 0x1b4   : > { %v3731_v40 = vsel %vm3699_vm10, 1, %v15824_v54  ;;  %vm3670_vm12 = vmand %vm16245_vm11, %vm16244_vm7  ;;  %vm16249_vm10 = vcmp.ge.s32.totalorder %v8426_v2, 0  ;;  %v10611_v44 = vpop.permute.xlu0 %2695  ;;  %7540 = vmatprep.subr.bf16.mxu1 %v10589_v1 }
 0x1b5   : > { %3780 = vperm.xlu0 %7783, %v3731_v40   ;;  %vm3702_vm9 = vmand %vm3670_vm12, %vm16247_vm13  ;;  %vm16254_vm13 = vcmp.lt.s32.totalorder %v8426_v2, 16  ;;  %16260 = vst [vmem:[#allocation27_spill] sm:$0xff] %v10611_v44  ;;  %v16262_v2 = vld [vmem:[#allocation30_spill] sm:$0xff]  ;;  %v10621_v57 = vpop.permute.xlu1 %2704 }
 0x1b6   : > { %v3734_v38 = vsel %vm3702_vm9, 1, %v15824_v54  ;;  %vm3669_vm4 = vmand %vm16250_vm15, %vm16249_vm10  ;;  %vm16257_vm9 = vcmp.ge.s32.totalorder %v16256_v60, 0  ;;  %vm16259_vm10 = vnez %v16258_v56  ;;  %16266 = vst [vmem:[#allocation129_spill] sm:$0xff] %v10621_v57  ;;  %v16273_v57 = vld [vmem:[#allocation81_spill] sm:$0xff] }
 0x1b7   : > { %vm16252_vm7 = vmmov %vm16248_vm6  ;;  %3789 = vperm.xlu1 %7784, %v3734_v38  }
 0x1b8   : > { %7525 = vmatmul.mubr.msk.bf16.gmra.mrb[84].mxu0 %vm16252_vm7, %v10029_v22  ;;  %vm16253_vm12 = vmmov %vm16248_vm6 }
 0x1b9   : > { %7430 = vmatprep.mubr.msk.bf16.mxu1 %vm16253_vm12, %v10201_v49  ;;  %vm3701_vm6 = vmand %vm3669_vm4, %vm16254_vm13  ;;  %vm16263_vm4 = vcmp.ge.s32.totalorder %v16262_v2, 0  ;;  %v10641_v47 = vpop.permute.xlu1 %2710 }
 0x1ba   : > { %vm16255_vm11 = vmmov %vm16252_vm7  ;;  %v3733_v40 = vsel %vm3701_vm6, 1, %v15824_v54  ;;  %vm16261_vm7 = vcmp.lt.s32.totalorder %v16256_v60, 16  ;;  %vm16267_vm6 = vcmp.lt.s32.totalorder %v16262_v2, 16  ;;  %16275 = vst [vmem:[#allocation134_spill] sm:$0xff] %v10641_v47  ;;  %v16284_v47 = vld [vmem:[#allocation55_spill] sm:$0xff] }
 0x1bb   : > { %7528 = vmatprep.mubr.msk.bf16.mxu0 %vm16255_vm11, %v10119_v61  ;;  %vm3676_vm15 = vmand %vm16259_vm10, %vm16257_vm9  ;;  %3786 = vperm.xlu0 %7783, %v3733_v40   ;;  %vm16265_vm11 = vnez %v16264_v50  ;;  %v10630_v40 = vpop.permute.xlu0 %2701 }
 0x1bc   : > { %vm3708_vm12 = vmand %vm3676_vm15, %vm16261_vm7  ;;  %16270 = vst [vmem:[#allocation30_spill] sm:$0xff] %v10630_v40  ;;  %vm16271_vm7 = vcmp.lt.s32.totalorder %v16268_v21, 15 }
 0x1bd   : > { %v3740_v38 = vsel %vm3708_vm12, 1, %v15824_v54  ;;  %vm3675_vm13 = vmand %vm16265_vm11, %vm16263_vm4  ;;  %vm16272_vm4 = vcmask 130048   ;;  %v10667_v40 = vpop.permute.xlu1 %3302 }
 0x1be   : > { %3807 = vperm.xlu1 %7784, %v3740_v38   ;;  %vm3707_vm9 = vmand %vm3675_vm13, %vm16267_vm6  ;;  %7431 = vmatmul.mubr.msk.bf16.gmra.mrb[52].mxu1 %vm16272_vm4, %v10193_v59  ;;  %vm16274_vm13 = vcmp.ge.s32.totalorder %v16273_v57, 4294967295  ;;  %16287 = vst [vmem:[#allocation81_spill] sm:$0xff] %v10667_v40  ;;  %v16297_v40 = vld [vmem:[#allocation141_spill] sm:$0xff] }
 0x1bf   : > { %v3739_v44 = vsel %vm3707_vm9, 1, %v15824_v54  ;;  %vm4262_vm15 = vmand %vm16259_vm10, %vm16269_vm2  ;;  %vm16278_vm9 = vcmp.lt.s32.totalorder %v16273_v57, 15  ;;  %v10656_v50 = vpop.permute.xlu0 %2707 }
 0x1c0   : > { %3804 = vperm.xlu0 %7783, %v3739_v44   ;;  %vm4294_vm12 = vmand %vm4262_vm15, %vm16271_vm7  ;;  %v16280_v44 = vld [vmem:[#allocation45_spill] sm:$0xff]  ;;  %16282 = vst [vmem:[#allocation80_spill] sm:$0xff] %v10656_v50  ;;  %v16288_v50 = vld [vmem:[#allocation31_spill] sm:$0xff] }
 0x1c1   : > { %v4326_v38 = vsel %vm4294_vm12, 1, %v15824_v54  ;;  %vm4261_vm6 = vmand %vm16265_vm11, %vm16274_vm13  ;;  %vm16281_vm12 = vcmp.ge.s32.totalorder %v16280_v44, 4294967295 }
 0x1c2   : > { %vm16276_vm2 = vmmov %vm16272_vm4  ;;  %4393 = vperm.xlu1 %7784, %v4326_v38   ;;  %vm16283_vm4 = vcmp.lt.s32.totalorder %v16280_v44, 15 }
 0x1c3   : > { %7529 = vmatmul.mubr.msk.bf16.gmra.mrb[88].mxu0 %vm16276_vm2, %v10112_v45  ;;  %vm16277_vm10 = vmmov %vm16276_vm2  ;;  %v10685_v29 = vpop.permute.xlu0 %3299 }
 0x1c4   : > { %7434 = vmatprep.mubr.msk.bf16.mxu1 %vm16277_vm10, %v10272_v12  ;;  %vm4293_vm15 = vmand %vm4261_vm6, %vm16278_vm9  ;;  %vm16285_vm6 = vcmp.ge.s32.totalorder %v16284_v47, 4294967295  ;;  %vm16286_vm10 = vcmp.lt.s32.totalorder %v16284_v47, 15  ;;  %16299 = vst [vmem:[#allocation45_spill] sm:$0xff] %v10685_v29  ;;  %v16306_v29 = vld [vmem:[#allocation128_spill] sm:$0xff] }
 0x1c5   : > { %vm16279_vm7 = vmmov %vm16276_vm2  ;;  %v4325_v56 = vsel %vm4293_vm15, 1, %v15824_v54 }
 0x1c6   : > { %7532 = vmatprep.mubr.msk.bf16.mxu0 %vm16279_vm7, %v10201_v49  ;;  %vm4246_vm11 = vmand %vm9706_vm5, %vm16281_vm12  ;;  %4390 = vperm.xlu0 %7783, %v4325_v56   ;;  %vm16289_vm5 = vcmp.ge.s32.totalorder %v16288_v50, 0  ;;  %v16290_v56 = vld [vmem:[#allocation137_spill] sm:$0xff]  ;;  %vm16292_vm12 = vcmp.lt.s32.totalorder %v16288_v50, 16 }
 0x1c7   : > { %vm4278_vm13 = vmand %vm4246_vm11, %vm16283_vm4  ;;  %vm16291_vm15 = vnez %v16290_v56  ;;  %vm4848_vm4 = vcmp.ge.s32.totalorder %v16293_v39, 4294967295 }
 0x1c8   : > { %v4310_v38 = vsel %vm4278_vm13, 1, %v15824_v54  ;;  %vm4245_vm2 = vmand %vm9727_vm14, %vm16285_vm6  ;;  %vm4880_vm14 = vcmp.lt.s32.totalorder %v16293_v39, 15  ;;  %vm16294_vm13 = vcmask 130048  }
 0x1c9   : > { %4345 = vperm.xlu1 %7784, %v4310_v38   ;;  %vm4277_vm9 = vmand %vm4245_vm2, %vm16286_vm10  ;;  %7435 = vmatmul.mubr.msk.bf16.gmra.mrb[56].mxu1 %vm16294_vm13, %v10259_v28  ;;  %v16295_v38 = vld [vmem:[#allocation32_spill] sm:$0xff]  ;;  %vm16298_vm2 = vnez %v16297_v40 }
 0x1ca   : > { %v4309_v62 = vsel %vm4277_vm9, 1, %v15824_v54  ;;  %vm3678_vm7 = vmand %vm16291_vm15, %vm16289_vm5  ;;  %vm16296_vm6 = vcmp.ge.s32.totalorder %v16295_v38, 0 }
 0x1cb   : > { %4342 = vperm.xlu0 %7783, %v4309_v62   ;;  %vm3710_vm11 = vmand %vm3678_vm7, %vm16292_vm12  ;;  %vm16302_vm7 = vcmp.lt.s32.totalorder %v16295_v38, 16 }
 0x1cc   : > { %v3742_v52 = vsel %vm3710_vm11, 1, %v15824_v54  ;;  %vm3677_vm10 = vmand %vm16298_vm2, %vm16296_vm6  ;;  %vm4847_vm6 = vcmp.ge.s32.totalorder %v16306_v29, 4294967295 }
 0x1cd   : > { %vm16300_vm9 = vmmov %vm16294_vm13  ;;  %3813 = vperm.xlu1 %7784, %v3742_v52   ;;  %v10706_v52 = vpop.permute.xlu1 %3308 }
 0x1ce   : > { %7533 = vmatmul.mubr.msk.bf16.gmra.mrb[92].mxu0 %vm16300_vm9, %v10193_v59  ;;  %vm16301_vm5 = vmmov %vm16300_vm9  ;;  %vm4879_vm9 = vcmp.lt.s32.totalorder %v16306_v29, 15  ;;  %16308 = vst [vmem:[#allocation55_spill] sm:$0xff] %v10706_v52  ;;  %v7868_v29 = vld [vmem:[%s14985_s1 + $0x8] sm:$0xff] }
 0x1cf   : > { %7474 = vmatprep.mubr.msk.bf16.mxu1 %vm16301_vm5, %v9780_v63  ;;  %vm3709_vm12 = vmand %vm3677_vm10, %vm16302_vm7  ;;  %vm16309_vm10 = vcmp.lt.s32.totalorder %v16256_v60, 17 }
 0x1d0   : > { %vm16303_vm13 = vmmov %vm16301_vm5  ;;  %v3741_v39 = vsel %vm3709_vm12, 1, %v15824_v54  ;;  %vm16307_vm5 = vcmp.ge.s32.totalorder %v16256_v60, 1  ;;  %vm4864_vm12 = vcmp.lt.s32.totalorder %v7868_v29, 15 }
 0x1d1   : > { %7536 = vmatprep.mubr.msk.bf16.mxu0 %vm16303_vm13, %v10272_v12  ;;  %vm10696_vm11 = vmand %vm4848_vm4, %vm4880_vm14  ;;  %3810 = vperm.xlu0 %7783, %v3741_v39   ;;  %vm4832_vm14 = vcmp.ge.s32.totalorder %v7868_v29, 4294967295  ;;  %vm16312_vm13 = vcmp.ge.s32.totalorder %v16262_v2, 1  ;;  %v10722_v39 = vpop.permute.xlu0 %3305  ;;  %v10744_v29 = vpop.permute.xlu1 %3314 }
 0x1d2   : > { %vm4944_vm8 = vmand %vm10696_vm11, %vm16307_vm5  ;;  %16313 = vst [vmem:[#allocation31_spill] sm:$0xff] %v10722_v39 }
 0x1d3   : > { %vm4976_vm7 = vmand %vm4944_vm8, %vm16309_vm10  ;;  %vm16314_vm8 = vcmp.lt.s32.totalorder %v16262_v2, 17  ;;  %16321 = vst [vmem:[#allocation137_spill] sm:$0xff] %v10744_v29 }
 0x1d4   : > { %v5008_v51 = vsel %vm4976_vm7, 1, %v15824_v54  ;;  %vm10711_vm4 = vmand %vm4847_vm6, %vm4879_vm9  ;;  %vm16315_vm9 = vcmask 130048  }
 0x1d5   : > { %5075 = vperm.xlu1 %7784, %v5008_v51   ;;  %vm4943_vm5 = vmand %vm10711_vm4, %vm16312_vm13  ;;  %7475 = vmatmul.mubr.msk.bf16.vlgmr.msra.gmra.mrb[60].mxu1 %vm16315_vm9, %v9772_v58  ;;  %v7869_v51 = vld [vmem:[%s14985_s1] sm:$0xff] }
 0x1d6   : > { %vm4975_vm6 = vmand %vm4943_vm5, %vm16314_vm8  ;;  %vm4831_vm7 = vcmp.ge.s32.totalorder %v7869_v51, 4294967295  ;;  %vm4863_vm13 = vcmp.lt.s32.totalorder %v7869_v51, 15  ;;  %vm16320_vm8 = vcmp.ge.s32.totalorder %v8216_v14, 1  ;;  %7541 = vmatpush3.bf16.msra.mxu1 %v10589_v1  ;;  %v16329_v1 = vld [vmem:[#allocation83_spill] sm:$0xff] }
 0x1d7   : > { %v5007_v52 = vsel %vm4975_vm6, 1, %v15824_v54  ;;  %vm10729_vm10 = vmand %vm4832_vm14, %vm4864_vm12  ;;  %vm16323_vm6 = vcmp.lt.s32.totalorder %v8216_v14, 17 }
 0x1d8   : > { %v16317_v42 = vsel %vm10729_vm10, 4294967295, %v16316_v42  ;;  %vm16318_vm0 = vmmov %vm16315_vm9  ;;  %5072 = vperm.xlu0 %7783, %v5007_v52   ;;  %v10760_v52 = vpop.permute.xlu0 %3311 }
 0x1d9   : > { %7537 = vmatmul.mubr.msk.bf16.gmra.mrb[96].mxu0 %vm16318_vm0, %v10259_v28  ;;  %vm16319_vm5 = vmmov %vm16318_vm0  ;;  %16327 = vst [vmem:[#allocation126_spill] sm:$0xff] %v10760_v52 }
 0x1da   : > { %7478 = vmatprep.mubr.msk.bf16.mxu1 %vm16319_vm5, %v9845_v35  ;;  %vm4928_vm14 = vmand %vm10729_vm10, %vm16320_vm8  ;;  %vm16326_vm5 = vcmp.ge.s32.totalorder %v8174_v5, 1 }
 0x1db   : > { %vm16322_vm12 = vmmov %vm16318_vm0 }
 0x1dc   : > { %7576 = vmatprep.mubr.msk.bf16.mxu0 %vm16322_vm12, %v9780_v63  ;;  %vm4960_vm9 = vmand %vm4928_vm14, %vm16323_vm6  ;;  %vm16328_vm12 = vcmp.lt.s32.totalorder %v8174_v5, 17  ;;  %vm16330_vm14 = vcmp.ge.s32.totalorder %v16329_v1, 4294967295  ;;  %v10793_v40 = vpop.permute.xlu0 %3317 }
 0x1dd   : > { %v4992_v51 = vsel %vm4960_vm9, 1, %v15824_v54  ;;  %vm10752_vm0 = vmand %vm4831_vm7, %vm4863_vm13  ;;  %vm16331_vm13 = vcmp.lt.s32.totalorder %v16329_v1, 15  ;;  %vm16333_vm9 = vcmask 130048   ;;  %16341 = vst [vmem:[#allocation141_spill] sm:$0xff] %v10793_v40  ;;  %v16346_v40 = vld [vmem:[#allocation56_spill] sm:$0xff] }
 0x1de   : > { %5027 = vperm.xlu1 %7784, %v4992_v51   ;;  %vm4927_vm8 = vmand %vm10752_vm0, %vm16326_vm5  ;;  %v10771_v51 = vpop.permute.xlu1 %3320  ;;  %7479 = vmatmul.mubr.msk.bf16.gmra.mrb[64].mxu1 %vm16333_vm9, %v9832_v4  ;;  %vm16335_vm5 = vcmp.ge.s32.totalorder %v16334_v53, 4294967295 }
 0x1df   : > { %vm4959_vm10 = vmand %vm4927_vm8, %vm16328_vm12  ;;  %16332 = vst [vmem:[#allocation32_spill] sm:$0xff] %v10771_v51  ;;  %vm16338_vm12 = vcmp.lt.s32.totalorder %v16334_v53, 15 }
 0x1e0   : > { %v4991_v29 = vsel %vm4959_vm10, 1, %v15824_v54  ;;  %vm4264_vm7 = vmand %vm16291_vm15, %vm16330_vm14 }
 0x1e1   : > { %5024 = vperm.xlu0 %7783, %v4991_v29   ;;  %vm4296_vm6 = vmand %vm4264_vm7, %vm16331_vm13  ;;  %vm16340_vm13 = vcmp.ge.s32.totalorder %v16256_v60, 0 }
 0x1e2   : > { %v4328_v52 = vsel %vm4296_vm6, 1, %v15824_v54  ;;  %vm4263_vm10 = vmand %vm16298_vm2, %vm16335_vm5  ;;  %vm16342_vm6 = vcmp.lt.s32.totalorder %v16256_v60, 16  ;;  %vm16343_vm5 = vcmp.ge.s32.totalorder %v16262_v2, 0 }
 0x1e3   : > { %vm16336_vm8 = vmmov %vm16333_vm9  ;;  %4399 = vperm.xlu1 %7784, %v4328_v52   ;;  %v10804_v52 = vpop.permute.xlu1 %3326 }
 0x1e4   : > { %7577 = vmatmul.mubr.msk.bf16.vlgmr.msra.gmra.mrb[100].mxu0 %vm16336_vm8, %v9772_v58  ;;  %vm16337_vm15 = vmmov %vm16336_vm8  ;;  %16345 = vst [vmem:[#allocation128_spill] sm:$0xff] %v10804_v52 }
 0x1e5   : > { %7482 = vmatprep.mubr.msk.bf16.mxu1 %vm16337_vm15, %v9910_v19  ;;  %vm4295_vm14 = vmand %vm4263_vm10, %vm16338_vm12  ;;  %vm16347_vm12 = vcmp.ge.s32.totalorder %v16346_v40, 4294967295 }
 0x1e6   : > { %vm16339_vm7 = vmmov %vm16336_vm8  ;;  %v4327_v56 = vsel %vm4295_vm14, 1, %v15824_v54  ;;  %vm16344_vm8 = vcmp.lt.s32.totalorder %v16262_v2, 16  ;;  %v16350_v2 = vld [vmem:[#allocation58_spill] sm:$0xff] }
 0x1e7   : > { %7580 = vmatprep.mubr.msk.bf16.mxu0 %vm16339_vm7, %v9845_v35  ;;  %vm5401_vm2 = vmand %vm10696_vm11, %vm16340_vm13  ;;  %4396 = vperm.xlu0 %7783, %v4327_v56   ;;  %vm16348_vm7 = vcmp.lt.s32.totalorder %v16346_v40, 15  ;;  %v10820_v56 = vpop.permute.xlu0 %3323  ;;  %v10837_v11 = vpop.permute.xlu1 %3332 }
 0x1e8   : > { %vm5433_vm9 = vmand %vm5401_vm2, %vm16342_vm6  ;;  %vm16349_vm2 = vcmask 130048   ;;  %vm16351_vm6 = vcmp.ge.s32.totalorder %v16350_v2, 4294967295  ;;  %16352 = vst [vmem:[#allocation83_spill] sm:$0xff] %v10820_v56 }
 0x1e9   : > { %v5465_v29 = vsel %vm5433_vm9, 1, %v15824_v54  ;;  %vm5400_vm10 = vmand %vm10711_vm4, %vm16343_vm5  ;;  %7483 = vmatmul.mubr.msk.bf16.gmra.mrb[68].mxu1 %vm16349_vm2, %v9904_v36  ;;  %16360 = vst [vmem:[#allocation85_spill] sm:$0xff] %v10837_v11  ;;  %v16369_v11 = vld [vmem:[#allocation135_spill] sm:$0xff] }
 0x1ea   : > { %5532 = vperm.xlu1 %7784, %v5465_v29   ;;  %vm5432_vm15 = vmand %vm5400_vm10, %vm16344_vm8  ;;  %vm16355_vm10 = vcmp.lt.s32.totalorder %v16350_v2, 15 }
 0x1eb   : > { %v5464_v51 = vsel %vm5432_vm15, 1, %v15824_v54  ;;  %vm4248_vm14 = vmand %vm9748_vm3, %vm16347_vm12  ;;  %vm16357_vm12 = vcmp.ge.s32.totalorder %v8216_v14, 0  ;;  %v10854_v52 = vpop.permute.xlu0 %3329 }
 0x1ec   : > { %5529 = vperm.xlu0 %7783, %v5464_v51   ;;  %vm4280_vm13 = vmand %vm4248_vm14, %vm16348_vm7  ;;  %vm16359_vm7 = vcmp.lt.s32.totalorder %v8216_v14, 16  ;;  %v7796_v51 = vld [vmem:[%s14989_s5 + $0x40] sm:$0xff]   ;;  %16367 = vst [vmem:[#allocation56_spill] sm:$0xff] %v10854_v52  ;;  %v16381_v52 = vld [vmem:[#allocation24_spill] sm:$0xff] }
 0x1ed   : > { %v4312_v60 = vsel %vm4280_vm13, 1, %v15824_v54  ;;  %vm4247_vm9 = vmand %vm9768_vm1, %vm16351_vm6  ;;  %vm16358_vm1 = vnez %v16317_v42  ;;  %7642 = vmatprep.subr.bf16.mxu0 %v7796_v51 }
 0x1ee   : > { %vm16353_vm5 = vmmov %vm16349_vm2  ;;  %4351 = vperm.xlu1 %7784, %v4312_v60   ;;  %v16363_v60 = vld [vmem:[#allocation35_spill] sm:$0xff]  ;;  %7643 = vmatpush3.bf16.msra.mxu0 %v7796_v51 }
 0x1ef   : > { %7581 = vmatmul.mubr.msk.bf16.gmra.mrb[104].mxu0 %vm16353_vm5, %v9832_v4  ;;  %vm16354_vm3 = vmmov %vm16349_vm2  ;;  %7277 = vmatprep.subr.bf16.mxu0 %v16381_v52 }
 0x1f0   : > { %7486 = vmatprep.mubr.msk.bf16.mxu1 %vm16354_vm3, %v9977_v7  ;;  %vm4279_vm8 = vmand %vm4247_vm9, %vm16355_vm10  ;;  %vm16362_vm9 = vcmp.lt.s32.totalorder %v8174_v5, 16  ;;  %vm16364_vm3 = vcmp.ge.s32.totalorder %v16363_v60, 0 }
 0x1f1   : > { %vm16356_vm15 = vmmov %vm16349_vm2  ;;  %v4311_v33 = vsel %vm4279_vm8, 1, %v15824_v54  ;;  %vm16361_vm2 = vcmp.ge.s32.totalorder %v8174_v5, 0 }
 0x1f2   : > { %7584 = vmatprep.mubr.msk.bf16.mxu0 %vm16356_vm15, %v9910_v19  ;;  %vm5385_vm14 = vmand %vm16358_vm1, %vm16357_vm12  ;;  %4348 = vperm.xlu0 %7783, %v4311_v33   ;;  %v16365_v33 = vld [vmem:[#allocation146_spill] sm:$0xff]  ;;  %vm16368_vm15 = vcmp.lt.s32.totalorder %v16363_v60, 16 }
 0x1f3   : > { %vm5417_vm13 = vmand %vm5385_vm14, %vm16359_vm7  ;;  %vm16366_vm10 = vnez %v16365_v33  ;;  %vm4850_vm14 = vcmp.ge.s32.totalorder %v16369_v11, 4294967295  ;;  %vm4882_vm7 = vcmp.lt.s32.totalorder %v16369_v11, 15  ;;  %v10873_v11 = vpop.permute.xlu1 %3338 }
 0x1f4   : > { %v5449_v29 = vsel %vm5417_vm13, 1, %v15824_v54  ;;  %vm5384_vm6 = vmand %vm10752_vm0, %vm16361_vm2  ;;  %vm16370_vm13 = vcmask 130048   ;;  %vm16371_vm2 = vcmp.ge.s32.totalorder %v8688_v48, 0  ;;  %16376 = vst [vmem:[#allocation58_spill] sm:$0xff] %v10873_v11 }
 0x1f5   : > { %5484 = vperm.xlu1 %7784, %v5449_v29   ;;  %vm5416_vm5 = vmand %vm5384_vm6, %vm16362_vm9  ;;  %7487 = vmatmul.mubr.msk.bf16.gmra.mrb[72].mxu1 %vm16370_vm13, %v9969_v8  ;;  %vm16372_vm6 = vnez %v16117_v6 }
 0x1f6   : > { %v5448_v14 = vsel %vm5416_vm5, 1, %v15824_v54  ;;  %vm3680_vm8 = vmand %vm16366_vm10, %vm16364_vm3 }
 0x1f7   : > { %5481 = vperm.xlu0 %7783, %v5448_v14   ;;  %vm3712_vm12 = vmand %vm3680_vm8, %vm16368_vm15  ;;  %vm16375_vm8 = vcmp.lt.s32.totalorder %v8688_v48, 16  ;;  %v16380_v14 = vld [vmem:[#allocation138_spill] sm:$0xff]  ;;  %v10904_v52 = vpop.permute.xlu1 %3344 }
 0x1f8   : > { %v3744_v5 = vsel %vm3712_vm12, 1, %v15824_v54  ;;  %vm3679_vm9 = vmand %vm16372_vm6, %vm16371_vm2  ;;  %vm4849_vm2 = vcmp.ge.s32.totalorder %v16380_v14, 4294967295  ;;  %vm16388_vm6 = vcmp.lt.s32.totalorder %v16295_v38, 17  ;;  %16389 = vst [vmem:[#allocation146_spill] sm:$0xff] %v10904_v52  ;;  %v16533_v52 = vld [vmem:[#allocation63_spill] sm:$0xff] }
 0x1f9   : > { %vm16373_vm5 = vmmov %vm16370_vm13  ;;  %3819 = vperm.xlu1 %7784, %v3744_v5   ;;  %v10891_v5 = vpop.permute.xlu0 %3335 }
 0x1fa   : > { %7585 = vmatmul.mubr.msk.bf16.gmra.mrb[108].mxu0 %vm16373_vm5, %v9904_v36  ;;  %vm16374_vm3 = vmmov %vm16373_vm5  ;;  %vm4881_vm5 = vcmp.lt.s32.totalorder %v16380_v14, 15  ;;  %16384 = vst [vmem:[#allocation35_spill] sm:$0xff] %v10891_v5 }
 0x1fb   : > { %7490 = vmatprep.mubr.msk.bf16.mxu1 %vm16374_vm3, %v10042_v34  ;;  %vm3711_vm15 = vmand %vm3679_vm9, %vm16375_vm8  ;;  %vm16382_vm9 = vcmp.ge.s32.totalorder %v16288_v50, 1  ;;  %vm16383_vm8 = vcmp.lt.s32.totalorder %v16288_v50, 17  ;;  %v10945_v46 = vpop.permute.xlu1 %3350 }
 0x1fc   : > { %vm16377_vm13 = vmmov %vm16374_vm3  ;;  %v3743_v51 = vsel %vm3711_vm15, 1, %v15824_v54  ;;  %16401 = vst [vmem:[#allocation138_spill] sm:$0xff] %v10945_v46 }
 0x1fd   : > { %7588 = vmatprep.mubr.msk.bf16.mxu0 %vm16377_vm13, %v9977_v7  ;;  %vm10878_vm12 = vmand %vm4850_vm14, %vm4882_vm7  ;;  %3816 = vperm.xlu0 %7783, %v3743_v51   ;;  %vm16387_vm7 = vcmp.ge.s32.totalorder %v16295_v38, 1  ;;  %v10929_v14 = vpop.permute.xlu0 %3341 }
 0x1fe   : > { %vm4946_vm3 = vmand %vm10878_vm12, %vm16382_vm9  ;;  %16396 = vst [vmem:[#allocation135_spill] sm:$0xff] %v10929_v14 }
 0x1ff   : > { %vm4978_vm13 = vmand %vm4946_vm3, %vm16383_vm8  ;;  %vm16390_vm3 = vcmask 130048  }
 0x200   : > { %v5010_v11 = vsel %vm4978_vm13, 1, %v15824_v54  ;;  %vm10894_vm14 = vmand %vm4849_vm2, %vm4881_vm5  ;;  %7491 = vmatmul.mubr.msk.bf16.gmra.mrb[76].mxu1 %vm16390_vm3, %v10029_v22  ;;  %vm16391_vm2 = vcmp.ge.s32.totalorder %v16268_v21, 4294967295 }
 0x201   : > { %5081 = vperm.xlu1 %7784, %v5010_v11   ;;  %vm4945_vm15 = vmand %vm10894_vm14, %vm16387_vm7  ;;  %v7870_v11 = vld [vmem:[%s14985_s1 + $0x18] sm:$0xff] }
 0x202   : > { %vm4977_vm9 = vmand %vm4945_vm15, %vm16388_vm6  ;;  %vm16394_vm6 = vcmp.lt.s32.totalorder %v16268_v21, 15  ;;  %vm4834_vm15 = vcmp.ge.s32.totalorder %v7870_v11, 4294967295 }
 0x203   : > { %v5009_v51 = vsel %vm4977_vm9, 1, %v15824_v54  ;;  %vm5987_vm5 = vmand %vm10696_vm11, %vm16391_vm2  ;;  %vm4866_vm9 = vcmp.lt.s32.totalorder %v7870_v11, 15  ;;  %vm16395_vm11 = vcmp.ge.s32.totalorder %v16273_v57, 4294967295  ;;  %v7871_v11 = vld [vmem:[%s14985_s1 + $0x10] sm:$0xff] }
 0x204   : > { %vm16392_vm8 = vmmov %vm16390_vm3  ;;  %5078 = vperm.xlu0 %7783, %v5009_v51  }
 0x205   : > { %7589 = vmatmul.mubr.msk.bf16.gmra.mrb[112].mxu0 %vm16392_vm8, %v9969_v8  ;;  %vm16393_vm13 = vmmov %vm16390_vm3 }
 0x206   : > { %7494 = vmatprep.mubr.msk.bf16.mxu1 %vm16393_vm13, %v10119_v61  ;;  %vm6019_vm7 = vmand %vm5987_vm5, %vm16394_vm6  ;;  %7592 = vmatprep.mubr.msk.bf16.mxu0 %vm16390_vm3, %v10042_v34  ;;  %vm16397_vm5 = vcmp.lt.s32.totalorder %v16273_v57, 15  ;;  %vm4833_vm6 = vcmp.ge.s32.totalorder %v7871_v11, 4294967295 }
 0x207   : > { %v6051_v62 = vsel %vm6019_vm7, 1, %v15824_v54  ;;  %vm5986_vm2 = vmand %vm10711_vm4, %vm16395_vm11  ;;  %vm4865_vm7 = vcmp.lt.s32.totalorder %v7871_v11, 15  ;;  %vm16400_vm4 = vcmp.ge.s32.totalorder %v8198_v9, 1  ;;  %vm16402_vm11 = vcmp.lt.s32.totalorder %v8198_v9, 17 }
 0x208   : > { %6118 = vperm.xlu1 %7784, %v6051_v62   ;;  %vm6018_vm8 = vmand %vm5986_vm2, %vm16397_vm5  ;;  %vm16405_vm2 = vcmask 130048   ;;  %vm16406_vm5 = vcmp.ge.s32.totalorder %v8164_v3, 1 }
 0x209   : > { %v6050_v21 = vsel %vm6018_vm8, 1, %v15824_v54  ;;  %vm10934_vm13 = vmand %vm4834_vm15, %vm4866_vm9  ;;  %7495 = vmatmul.mubr.msk.bf16.gmra.mrb[80].mxu1 %vm16405_vm2, %v10112_v45 }
 0x20a   : > { %6115 = vperm.xlu0 %7783, %v6050_v21   ;;  %vm4930_vm3 = vmand %vm10934_vm13, %vm16400_vm4  ;;  %v10960_v21 = vpop.permute.xlu0 %3347 }
 0x20b   : > { %vm4962_vm15 = vmand %vm4930_vm3, %vm16402_vm11  ;;  %16407 = vst [vmem:[#allocation24_spill] sm:$0xff] %v10960_v21  ;;  %vm16409_vm3 = vcmp.lt.s32.totalorder %v8164_v3, 17  ;;  %v16417_v21 = vld [vmem:[#allocation86_spill] sm:$0xff] }
 0x20c   : > { %v4994_v57 = vsel %vm4962_vm15, 1, %v15824_v54  ;;  %vm10950_vm9 = vmand %vm4833_vm6, %vm4865_vm7  ;;  %vm16412_vm15 = vcmp.ge.s32.totalorder %v16280_v44, 4294967295 }
 0x20d   : > { %5033 = vperm.xlu1 %7784, %v4994_v57   ;;  %vm4929_vm8 = vmand %vm10950_vm9, %vm16406_vm5  ;;  %vm16413_vm5 = vcmp.lt.s32.totalorder %v16280_v44, 15  ;;  %v10977_v57 = vpop.permute.xlu1 %3356 }
 0x20e   : > { %vm16408_vm4 = vmmov %vm16405_vm2  ;;  %16414 = vst [vmem:[#allocation185_spill] sm:$0xff] %v10977_v57  ;;  %v10991_v44 = vpop.permute.xlu0 %3353 }
 0x20f   : > { %7593 = vmatmul.mubr.msk.bf16.gmra.mrb[116].mxu0 %vm16408_vm4, %v10029_v22  ;;  %vm4961_vm6 = vmand %vm4929_vm8, %vm16409_vm3  ;;  %vm16415_vm8 = vcmp.ge.s32.totalorder %v16284_v47, 4294967295  ;;  %16419 = vst [vmem:[#allocation86_spill] sm:$0xff] %v10991_v44 }
 0x210   : > { %vm16410_vm7 = vmmov %vm16405_vm2  ;;  %v4993_v11 = vsel %vm4961_vm6, 1, %v15824_v54  ;;  %vm16416_vm6 = vcmp.lt.s32.totalorder %v16284_v47, 15  ;;  %v7797_v47 = vld [vmem:[%s14989_s5 + $0x38] sm:$0xff]  }
 0x211   : > { %7498 = vmatprep.mubr.msk.bf16.mxu1 %vm16410_vm7, %v10201_v49  ;;  %vm16411_vm11 = vmmov %vm16405_vm2  ;;  %5030 = vperm.xlu0 %7783, %v4993_v11   ;;  %v11011_v33 = vpop.permute.xlu1 %3362 }
 0x212   : > { %7596 = vmatprep.mubr.msk.bf16.mxu0 %vm16411_vm11, %v10119_v61  ;;  %vm5971_vm2 = vmand %vm16358_vm1, %vm16412_vm15  ;;  %vm16418_vm1 = vcmp.ge.s32.totalorder %v16417_v21, 4294967295  ;;  %vm16420_vm15 = vcmp.lt.s32.totalorder %v16417_v21, 15  ;;  %16427 = vst [vmem:[#allocation186_spill] sm:$0xff] %v11011_v33  ;;  %7608 = vmatprep.subr.bf16.mxu1 %v7797_v47  ;;  %v11027_v11 = vpop.permute.xlu0 %3359  ;;  %v16513_v33 = vld [vmem:[#allocation14_spill] sm:$0xff] }
 0x213   : > { %vm6003_vm4 = vmand %vm5971_vm2, %vm16413_vm5  ;;  %vm16421_vm5 = vcmask 130048   ;;  %16432 = vst [vmem:[#allocation187_spill] sm:$0xff] %v11027_v11 }
 0x214   : > { %v6035_v46 = vsel %vm6003_vm4, 1, %v15824_v54  ;;  %vm5970_vm3 = vmand %vm10752_vm0, %vm16415_vm8  ;;  %7499 = vmatmul.mubr.msk.bf16.gmra.mrb[84].mxu1 %vm16421_vm5, %v10193_v59  ;;  %vm16422_vm0 = vcmp.ge.s32.totalorder %v8688_v48, 4294967295  ;;  %vm16423_vm4 = vnez %v16117_v6 }
 0x215   : > { %6070 = vperm.xlu1 %7784, %v6035_v46   ;;  %vm6002_vm7 = vmand %vm5970_vm3, %vm16416_vm6  ;;  %vm16426_vm6 = vcmp.lt.s32.totalorder %v8688_v48, 15 }
 0x216   : > { %v6034_v42 = vsel %vm6002_vm7, 1, %v15824_v54  ;;  %vm4266_vm11 = vmand %vm16366_vm10, %vm16418_vm1 }
 0x217   : > { %6067 = vperm.xlu0 %7783, %v6034_v42   ;;  %vm4298_vm2 = vmand %vm4266_vm11, %vm16420_vm15  ;;  %vm16429_vm11 = vcmp.ge.s32.totalorder %v16288_v50, 0 }
 0x218   : > { %v4330_v39 = vsel %vm4298_vm2, 1, %v15824_v54  ;;  %vm4265_vm10 = vmand %vm16423_vm4, %vm16422_vm0  ;;  %vm16430_vm2 = vcmp.lt.s32.totalorder %v16288_v50, 16  ;;  %vm16431_vm0 = vcmp.ge.s32.totalorder %v16295_v38, 0  ;;  %v11038_v50 = vpop.permute.xlu1 %3368 }
 0x219   : > { %vm16424_vm8 = vmmov %vm16421_vm5  ;;  %4405 = vperm.xlu1 %7784, %v4330_v39   ;;  %v16434_v39 = vld [vmem:[#allocation60_spill] sm:$0xff] }
 0x21a   : > { %7597 = vmatmul.mubr.msk.bf16.gmra.mrb[120].mxu0 %vm16424_vm8, %v10112_v45  ;;  %vm16425_vm3 = vmmov %vm16421_vm5  ;;  %16438 = vst [vmem:[#allocation60_spill] sm:$0xff] %v11038_v50 }
 0x21b   : > { %7502 = vmatprep.mubr.msk.bf16.mxu1 %vm16425_vm3, %v10272_v12  ;;  %vm4297_vm7 = vmand %vm4265_vm10, %vm16426_vm6  ;;  %vm16433_vm10 = vcmp.lt.s32.totalorder %v16295_v38, 16  ;;  %vm16436_vm6 = vnez %v15969_v43  ;;  %v16440_v38 = vld [vmem:[#allocation61_spill] sm:$0xff] }
 0x21c   : > { %vm16428_vm1 = vmmov %vm16425_vm3  ;;  %v4329_v46 = vsel %vm4297_vm7, 1, %v15824_v54  ;;  %vm16435_vm3 = vcmp.ge.s32.totalorder %v16434_v39, 4294967295 }
 0x21d   : > { %7600 = vmatprep.mubr.msk.bf16.mxu0 %vm16428_vm1, %v10201_v49  ;;  %vm5403_vm15 = vmand %vm10878_vm12, %vm16429_vm11  ;;  %4402 = vperm.xlu0 %7783, %v4329_v46   ;;  %vm16437_vm1 = vcmp.lt.s32.totalorder %v16434_v39, 15 }
 0x21e   : > { %vm5435_vm5 = vmand %vm5403_vm15, %vm16430_vm2  ;;  %vm16439_vm15 = vcmask 130048   ;;  %vm16441_vm2 = vcmp.ge.s32.totalorder %v16440_v38, 4294967295 }
 0x21f   : > { %v5467_v6 = vsel %vm5435_vm5, 1, %v15824_v54  ;;  %vm5402_vm4 = vmand %vm10894_vm14, %vm16431_vm0  ;;  %7503 = vmatmul.mubr.msk.bf16.gmra.mrb[88].mxu1 %vm16439_vm15, %v10259_v28  ;;  %vm16442_vm5 = vnez %v15974_v10  ;;  %v11060_v10 = vpop.permute.xlu0 %3365 }
 0x220   : > { %5538 = vperm.xlu1 %7784, %v5467_v6   ;;  %vm5434_vm8 = vmand %vm5402_vm4, %vm16433_vm10  ;;  %16448 = vst [vmem:[#allocation61_spill] sm:$0xff] %v11060_v10 }
 0x221   : > { %v5466_v42 = vsel %vm5434_vm8, 1, %v15824_v54  ;;  %vm4250_vm7 = vmand %vm16436_vm6, %vm16435_vm3  ;;  %vm16445_vm8 = vcmp.lt.s32.totalorder %v16440_v38, 15 }
 0x222   : > { %5535 = vperm.xlu0 %7783, %v5466_v42   ;;  %vm4282_vm11 = vmand %vm4250_vm7, %vm16437_vm1  ;;  %vm16447_vm7 = vcmp.ge.s32.totalorder %v8198_v9, 0  ;;  %v11071_v42 = vpop.permute.xlu1 %3374 }
 0x223   : > { %v4314_v46 = vsel %vm4282_vm11, 1, %v15824_v54  ;;  %vm4249_vm0 = vmand %vm16442_vm5, %vm16441_vm2  ;;  %vm16449_vm11 = vcmp.lt.s32.totalorder %v8198_v9, 16  ;;  %vm16450_vm2 = vcmp.ge.s32.totalorder %v8164_v3, 0  ;;  %16452 = vst [vmem:[#allocation188_spill] sm:$0xff] %v11071_v42  ;;  %v16456_v9 = vld [vmem:[#allocation142_spill] sm:$0xff] }
 0x224   : > { %vm16443_vm4 = vmmov %vm16439_vm15  ;;  %4357 = vperm.xlu1 %7784, %v4314_v46  }
 0x225   : > { %7601 = vmatmul.mubr.msk.bf16.gmra.mrb[124].mxu0 %vm16443_vm4, %v10193_v59  ;;  %vm16444_vm10 = vmmov %vm16443_vm4 }
 0x226   : > { %7542 = vmatprep.mubr.msk.bf16.mxu1 %vm16444_vm10, %v9780_v63  ;;  %vm4281_vm3 = vmand %vm4249_vm0, %vm16445_vm8  ;;  %vm16451_vm0 = vcmp.lt.s32.totalorder %v8164_v3, 16  ;;  %vm16453_vm10 = vcmp.ge.s32.totalorder %v8706_v13, 0  ;;  %vm16454_vm8 = vnez %v16125_v25 }
 0x227   : > { %vm16446_vm6 = vmmov %vm16443_vm4  ;;  %v4313_v43 = vsel %vm4281_vm3, 1, %v15824_v54 }
 0x228   : > { %7604 = vmatprep.mubr.msk.bf16.mxu0 %vm16446_vm6, %v10272_v12  ;;  %vm5387_vm1 = vmand %vm10934_vm13, %vm16447_vm7  ;;  %4354 = vperm.xlu0 %7783, %v4313_v43   ;;  %vm16455_vm6 = vcmp.lt.s32.totalorder %v8706_v13, 16  ;;  %v11089_v43 = vpop.permute.xlu0 %3371 }
 0x229   : > { %vm5419_vm15 = vmand %vm5387_vm1, %vm16449_vm11  ;;  %vm4852_vm1 = vcmp.ge.s32.totalorder %v16456_v9, 4294967295  ;;  %vm4884_vm11 = vcmp.lt.s32.totalorder %v16456_v9, 15  ;;  %16460 = vst [vmem:[#allocation142_spill] sm:$0xff] %v11089_v43  ;;  %v16467_v9 = vld [vmem:[#allocation147_spill] sm:$0xff] }
 0x22a   : > { %v5451_v6 = vsel %vm5419_vm15, 1, %v15824_v54  ;;  %vm5386_vm5 = vmand %vm10950_vm9, %vm16450_vm2  ;;  %vm16457_vm15 = vcmask 130048   ;;  %vm16458_vm2 = vcmp.ge.s32.totalorder %v8724_v20, 0 }
 0x22b   : > { %5490 = vperm.xlu1 %7784, %v5451_v6   ;;  %vm5418_vm4 = vmand %vm5386_vm5, %vm16451_vm0  ;;  %7543 = vmatmul.mubr.msk.bf16.vlgmr.msra.gmra.mrb[92].mxu1 %vm16457_vm15, %v9772_v58  ;;  %vm16459_vm5 = vnez %v16133_v24 }
 0x22c   : > { %v5450_v46 = vsel %vm5418_vm4, 1, %v15824_v54  ;;  %vm3682_vm3 = vmand %vm16454_vm8, %vm16453_vm10  ;;  %7609 = vmatpush3.bf16.msra.mxu1 %v7797_v47  ;;  %v11123_v47 = vpop.permute.xlu0 %3377 }
 0x22d   : > { %5487 = vperm.xlu0 %7783, %v5450_v46   ;;  %vm3714_vm7 = vmand %vm3682_vm3, %vm16455_vm6  ;;  %vm16463_vm3 = vcmp.lt.s32.totalorder %v8724_v20, 16  ;;  %v16465_v46 = vmov 0  ;;  %16474 = vst [vmem:[#allocation189_spill] sm:$0xff] %v11123_v47  ;;  %v7873_v47 = vld [vmem:[%s14985_s1 + $0x20] sm:$0xff] }
 0x22e   : > { %v3746_v3 = vsel %vm3714_vm7, 1, %v15824_v54  ;;  %vm3681_vm0 = vmand %vm16459_vm5, %vm16458_vm2  ;;  %vm4851_vm2 = vcmp.ge.s32.totalorder %v16467_v9, 4294967295  ;;  %vm16476_vm5 = vcmask 130048  }
 0x22f   : > { %vm16461_vm4 = vmmov %vm16457_vm15  ;;  %3825 = vperm.xlu1 %7784, %v3746_v3   ;;  %v11110_v3 = vpop.permute.xlu1 %3380 }
 0x230   : > { %7605 = vmatmul.mubr.msk.bf16.gmra.mrb[128].mxu0 %vm16461_vm4, %v10259_v28  ;;  %vm16462_vm10 = vmmov %vm16461_vm4  ;;  %16469 = vst [vmem:[#allocation147_spill] sm:$0xff] %v11110_v3  ;;  %v11164_v56 = vpop.permute.xlu0 %3383 }
 0x231   : > { %7546 = vmatprep.mubr.msk.bf16.mxu1 %vm16462_vm10, %v9845_v35  ;;  %vm3713_vm6 = vmand %vm3681_vm0, %vm16463_vm3  ;;  %vm16468_vm10 = vcmp.ge.s32.totalorder %v16363_v60, 1  ;;  %vm16470_vm3 = vcmp.lt.s32.totalorder %v16363_v60, 17 }
 0x232   : > { %vm16464_vm15 = vmmov %vm16461_vm4  ;;  %v3745_v6 = vsel %vm3713_vm6, 1, %v15824_v54  ;;  %vm4883_vm4 = vcmp.lt.s32.totalorder %v16467_v9, 15 }
 0x233   : > { %7644 = vmatprep.mubr.msk.bf16.mxu0 %vm16464_vm15, %v9780_v63  ;;  %vm11100_vm7 = vmand %vm4852_vm1, %vm4884_vm11  ;;  %3822 = vperm.xlu0 %7783, %v3745_v6   ;;  %vm16473_vm11 = vcmp.ge.s32.totalorder %v8688_v48, 1  ;;  %v11143_v9 = vpop.permute.xlu1 %3386 }
 0x234   : > { %v16466_v46 = vsel %vm11100_vm7, 4294967295, %v16465_v46  ;;  %vm4948_vm0 = vmand %vm11100_vm7, %vm16468_vm10  ;;  %vm16475_vm10 = vcmp.lt.s32.totalorder %v8688_v48, 17  ;;  %7547 = vmatmul.mubr.msk.bf16.gmra.mrb[96].mxu1 %vm16476_vm5, %v9832_v4  ;;  %16481 = vst [vmem:[#allocation190_spill] sm:$0xff] %v11143_v9 }
 0x235   : > { %vm4980_vm6 = vmand %vm4948_vm0, %vm16470_vm3 }
 0x236   : > { %v5012_v42 = vsel %vm4980_vm6, 1, %v15824_v54  ;;  %vm11115_vm1 = vmand %vm4851_vm2, %vm4883_vm4  ;;  %vm16477_vm2 = vcmp.ge.s32.totalorder %v16329_v1, 4294967295  ;;  %vm16480_vm6 = vcmp.lt.s32.totalorder %v16329_v1, 15  ;;  %v16484_v1 = vld [vmem:[#allocation10_spill] sm:$0xff] }
 0x237   : > { %5087 = vperm.xlu1 %7784, %v5012_v42   ;;  %vm4947_vm15 = vmand %vm11115_vm1, %vm16473_vm11  ;;  %v7872_v42 = vld [vmem:[%s14985_s1 + $0x28] sm:$0xff]  ;;  %16489 = vst [vmem:[#allocation10_spill] sm:$0xff] %v11164_v56  ;;  %v16507_v56 = vld [vmem:[#allocation33_spill] sm:$0xff] }
 0x238   : > { %vm4979_vm7 = vmand %vm4947_vm15, %vm16475_vm10  ;;  %vm16483_vm15 = vcmp.ge.s32.totalorder %v16334_v53, 4294967295 }
 0x239   : > { %v5011_v6 = vsel %vm4979_vm7, 1, %v15824_v54  ;;  %vm5989_vm4 = vmand %vm10878_vm12, %vm16477_vm2  ;;  %vm4868_vm7 = vcmp.lt.s32.totalorder %v7872_v42, 15  ;;  %vm16485_vm2 = vcmp.lt.s32.totalorder %v16334_v53, 15  ;;  %v16492_v53 = vld [vmem:[#allocation11_spill] sm:$0xff] }
 0x23a   : > { %vm16478_vm0 = vmmov %vm16476_vm5  ;;  %5084 = vperm.xlu0 %7783, %v5011_v6   ;;  %vm4836_vm5 = vcmp.ge.s32.totalorder %v7872_v42, 4294967295  ;;  %v16486_v6 = vld [vmem:[#allocation28_spill] sm:$0xff] }
 0x23b   : > { %7645 = vmatmul.mubr.msk.bf16.vlgmr.msra.gmra.mrb[132].mxu0 %vm16478_vm0, %v9772_v58  ;;  %vm16479_vm3 = vmmov %vm16478_vm0 }
 0x23c   : > { %7550 = vmatprep.mubr.msk.bf16.mxu1 %vm16479_vm3, %v9910_v19  ;;  %vm6021_vm11 = vmand %vm5989_vm4, %vm16480_vm6  ;;  %7278 = vmatpush3.bf16.msra.mxu0 %v16484_v1  ;;  %vm4835_vm3 = vcmp.ge.s32.totalorder %v7873_v47, 4294967295  ;;  %vm16490_vm6 = vcmp.ge.s32.totalorder %v8238_v18, 1 }
 0x23d   : > { %vm16482_vm12 = vmmov %vm16478_vm0  ;;  %v6053_v29 = vsel %vm6021_vm11, 1, %v15824_v54  ;;  %7279 = vmatprep.subr.bf16.mxu0 %v16486_v6  ;;  %v16497_v6 = vld [vmem:[#allocation29_spill] sm:$0xff] }
 0x23e   : > { %7648 = vmatprep.mubr.msk.bf16.mxu0 %vm16482_vm12, %v9845_v35  ;;  %vm5988_vm10 = vmand %vm10894_vm14, %vm16483_vm15  ;;  %6124 = vperm.xlu1 %7784, %v6053_v29   ;;  %vm4867_vm14 = vcmp.lt.s32.totalorder %v7873_v47, 15  ;;  %vm16491_vm12 = vcmp.lt.s32.totalorder %v8238_v18, 17  ;;  %v11178_v47 = vpop.permute.xlu1 %3392  ;;  %vm16496_vm15 = vcmask 130048  }
 0x23f   : > { %vm6020_vm4 = vmand %vm5988_vm10, %vm16485_vm2  ;;  %16495 = vst [vmem:[#allocation28_spill] sm:$0xff] %v11178_v47  ;;  %7551 = vmatmul.mubr.msk.bf16.gmra.mrb[100].mxu1 %vm16496_vm15, %v9904_v36  ;;  %vm16498_vm10 = vcmp.ge.s32.totalorder %v8264_v23, 1 }
 0x240   : > { %v6052_v42 = vsel %vm6020_vm4, 1, %v15824_v54  ;;  %vm11157_vm0 = vmand %vm4836_vm5, %vm4868_vm7  ;;  %7280 = vmatpush3.bf16.msra.mxu0 %v16492_v53  ;;  %v11200_v53 = vpop.permute.xlu0 %3389 }
 0x241   : > { %6121 = vperm.xlu0 %7783, %v6052_v42   ;;  %vm4932_vm11 = vmand %vm11157_vm0, %vm16490_vm6  ;;  %7281 = vmatprep.subr.bf16.mxu0 %v16497_v6  ;;  %16504 = vst [vmem:[#allocation11_spill] sm:$0xff] %v11200_v53  ;;  %v16505_v6 = vld [vmem:[#allocation12_spill] sm:$0xff] }
 0x242   : > { %vm4964_vm5 = vmand %vm4932_vm11, %vm16491_vm12  ;;  %vm16503_vm12 = vcmp.ge.s32.totalorder %v16346_v40, 4294967295  ;;  %v11213_v51 = vpop.permute.xlu1 %3759 }
 0x243   : > { %v4996_v29 = vsel %vm4964_vm5, 1, %v15824_v54  ;;  %vm11174_vm7 = vmand %vm4835_vm3, %vm4867_vm14  ;;  %vm16500_vm3 = vcmp.lt.s32.totalorder %v8264_v23, 17  ;;  %16509 = vst [vmem:[#allocation29_spill] sm:$0xff] %v11213_v51 }
 0x244   : > { %5039 = vperm.xlu1 %7784, %v4996_v29   ;;  %vm4931_vm2 = vmand %vm11174_vm7, %vm16498_vm10  ;;  %v7374_v29 = vpop.f32.mrb[32].mxu0  ;;  %7282 = vmatpush3.bf16.msra.mxu0 %v16505_v6  ;;  %v11222_v62 = vpop.permute.xlu0 %3756 }
 0x245   : > { %vm16499_vm4 = vmmov %vm16496_vm15  ;;  %vm16506_vm15 = vcmp.lt.s32.totalorder %v16346_v40, 15  ;;  %v11205_v47 = vpop.f32.mrb[33].mxu0  ;;  %7283 = vmatprep.subr.bf16.mxu0 %v16507_v56  ;;  %v1102_v40 = vrot.slane %v7374_v29, 7  ;;  %16512 = vst [vmem:[#allocation12_spill] sm:$0xff] %v11222_v62 }
 0x246   : > { %7649 = vmatmul.mubr.msk.bf16.gmra.mrb[136].mxu0 %vm16499_vm4, %v9832_v4  ;;  %vm4963_vm14 = vmand %vm4931_vm2, %vm16500_vm3  ;;  %vm16508_vm2 = vcmp.ge.s32.totalorder %v16350_v2, 4294967295  ;;  %v7375_v53 = vpop.f32.mrb[34].mxu0  ;;  %vm16510_vm3 = vcmp.lt.s32.totalorder %v16350_v2, 15  ;;  %v15553_v10 = vrot.slane %v11205_v47, 7 }
 0x247   : > { %vm16501_vm6 = vmmov %vm16499_vm4  ;;  %v4995_v42 = vsel %vm4963_vm14, 1, %v15824_v54  ;;  %v934_v6 = vpop.f32.mrb[35].mxu0 }
 0x248   : > { %7554 = vmatprep.mubr.msk.bf16.mxu1 %vm16501_vm6, %v9977_v7  ;;  %vm16502_vm11 = vmmov %vm16499_vm4  ;;  %5036 = vperm.xlu0 %7783, %v4995_v42   ;;  %vm15580_vm4 = vcmask 1040384   ;;  %v1104_v42 = vrot.slane %v7375_v53, 7  ;;  %vm16511_vm6 = vcmp.ge.s32.totalorder %v8706_v13, 4294967295  ;;  %v1100_v50 = vrot.slane %v934_v6, 7  ;;  %v11261_v29 = vpop.permute.xlu0 %3762  ;;  %v16526_v6 = vld [vmem:[#allocation34_spill] sm:$0xff] }
 0x249   : > { %7652 = vmatprep.mubr.msk.bf16.mxu0 %vm16502_vm11, %v9910_v19  ;;  %vm5973_vm5 = vmand %vm10934_vm13, %vm16503_vm12  ;;  %7284 = vmatpush3.bf16.msra.mxu0 %v16513_v33  ;;  %16525 = vst [vmem:[#allocation14_spill] sm:$0xff] %v11261_v29 }
 0x24a   : > { %vm6005_vm10 = vmand %vm5973_vm5, %vm16506_vm15  ;;  %vm16515_vm5 = vcmask 130048   ;;  %v11231_v2 = vsel %vm15580_vm4, %v1102_v40, %v1104_v42  ;;  %vm16517_vm15 = vnez %v16133_v24  ;;  %v11245_v33 = vsel %vm15580_vm4, %v1100_v50, %v1102_v40  ;;  %v7378_v40 = vpop.f32.mrb[0].mxu1  ;;  %7285 = vmatprep.subr.bf16.mxu0 %v16526_v6 }
 0x24b   : > { %v6037_v3 = vsel %vm6005_vm10, 1, %v15824_v54  ;;  %vm5972_vm13 = vmand %vm10950_vm9, %vm16508_vm2  ;;  %vm16514_vm9 = vcmp.lt.s32.totalorder %v8706_v13, 15  ;;  %7555 = vmatmul.mubr.msk.bf16.gmra.mrb[104].mxu1 %vm16515_vm5, %v9969_v8  ;;  %v11250_v53 = vsel %vm15580_vm4, %v15553_v10, %v1100_v50  ;;  %v7442_v50 = vpop.f32.mrb[36].mxu0 }
 0x24c   : > { %6076 = vperm.xlu1 %7784, %v6037_v3   ;;  %vm6004_vm14 = vmand %vm5972_vm13, %vm16510_vm3  ;;  %v11238_v3 = vpop.permute.xlu1 %3765  ;;  %vm16521_vm3 = vcmp.lt.s32.totalorder %v8724_v20, 15  ;;  %v11274_v44 = vpop.f32.mrb[37].mxu0  ;;  %v2367_v6 = vrot.slane %v7442_v50, 1 }
 0x24d   : > { %v6036_v56 = vsel %vm6004_vm14, 1, %v15824_v54  ;;  %vm4268_vm11 = vmand %vm16454_vm8, %vm16511_vm6  ;;  %vm16516_vm8 = vcmp.ge.s32.totalorder %v8724_v20, 4294967295  ;;  %16518 = vst [vmem:[#allocation33_spill] sm:$0xff] %v11238_v3  ;;  %v11281_v57 = vpop.f32.mrb[38].mxu0 }
 0x24e   : > { %6073 = vperm.xlu0 %7783, %v6036_v56   ;;  %vm4300_vm12 = vmand %vm4268_vm11, %vm16514_vm9  ;;  %vm16523_vm11 = vcmp.ge.s32.totalorder %v16363_v60, 0  ;;  %vm16524_vm9 = vnez %v16466_v46  ;;  %v947_v56 = vpop.f32.mrb[1].mxu1  ;;  %v2202_v29 = vpop.f32.mrb[39].mxu0  ;;  %v7876_v46 = vld [vmem:[%s14985_s1 + $0x38] sm:$0xff] }
 0x24f   : > { %v4332_v25 = vsel %vm4300_vm12, 1, %v15824_v54  ;;  %vm4267_vm10 = vmand %vm16517_vm15, %vm16516_vm8  ;;  %vm16529_vm15 = vcmp.ge.s32.totalorder %v8688_v48, 0  ;;  %v1106_v11 = vrot.slane %v947_v56, 7  ;;  %v11288_v56 = vpop.permute.xlu0 %3768 }
 0x250   : > { %vm16519_vm2 = vmmov %vm16515_vm5  ;;  %4411 = vperm.xlu1 %7784, %v4332_v25   ;;  %vm16527_vm5 = vcmp.lt.s32.totalorder %v16363_v60, 16  ;;  %v16528_v25 = vld [vmem:[#allocation16_spill] sm:$0xff]  ;;  %v11272_v62 = vpop.permute.xlu1 %3771  ;;  %v1110_v60 = vrot.slane %v7378_v40, 7 }
 0x251   : > { %7653 = vmatmul.mubr.msk.bf16.gmra.mrb[140].mxu0 %vm16519_vm2, %v9904_v36  ;;  %vm16520_vm13 = vmmov %vm16519_vm2  ;;  %16530 = vst [vmem:[#allocation34_spill] sm:$0xff] %v11272_v62  ;;  %v11293_v50 = vsel %vm15580_vm4, %v1104_v42, %v1106_v11  ;;  %v2365_v42 = vrot.slane %v2202_v29, 1 }
 0x252   : > { %7558 = vmatprep.mubr.msk.bf16.mxu1 %vm16520_vm13, %v10042_v34  ;;  %vm4299_vm14 = vmand %vm4267_vm10, %vm16521_vm3  ;;  %7286 = vmatpush3.bf16.msra.mxu0 %v16528_v25  ;;  %v11279_v25 = vpop.f32.mrb[2].mxu1  ;;  %vm15577_vm3 = vcmask 1046528   ;;  %16536 = vst [vmem:[#allocation16_spill] sm:$0xff] %v11288_v56 }
 0x253   : > { %vm16522_vm6 = vmmov %vm16519_vm2  ;;  %v4331_v24 = vsel %vm4299_vm14, 1, %v15824_v54  ;;  %vm16532_vm2 = vcmp.lt.s32.totalorder %v8688_v48, 16  ;;  %vm16534_vm14 = vcmp.ge.s32.totalorder %v16533_v52, 4294967295  ;;  %v950_v40 = vpop.f32.mrb[3].mxu1 }
 0x254   : > { %7656 = vmatprep.mubr.msk.bf16.mxu0 %vm16522_vm6, %v9977_v7  ;;  %vm5405_vm12 = vmand %vm16524_vm9, %vm16523_vm11  ;;  %4408 = vperm.xlu0 %7783, %v4331_v24   ;;  %v16531_v24 = vld [vmem:[#allocation36_spill] sm:$0xff]  ;;  %vm16535_vm6 = vnez %v15979_v16  ;;  %v1108_v5 = vrot.slane %v950_v40, 7  ;;  %v16546_v40 = vrot.slane %v11279_v25, 7  ;;  %v11344_v51 = vpop.f32.mrb[4].mxu1 }
 0x255   : > { %vm5437_vm8 = vmand %vm5405_vm12, %vm16527_vm5  ;;  %7287 = vmatprep.subr.bf16.mxu0 %v16531_v24  ;;  %v2369_v24 = vrot.slane %v11281_v57, 1  ;;  %16537 = vst [vmem:[#allocation36_spill] sm:$0xff] %v11293_v50  ;;  %vm16538_vm12 = vcmp.lt.s32.totalorder %v16533_v52, 15  ;;  %v11305_v57 = vpop.permute.xlu1 %3777  ;;  %v11349_v3 = vpop.f32.mrb[5].mxu1  ;;  %v16564_v52 = vld [vmem:[#allocation20_spill] sm:$0xff] }
 0x256   : > { %v5469_v10 = vsel %vm5437_vm8, 1, %v15824_v54  ;;  %vm5404_vm10 = vmand %vm11115_vm1, %vm16529_vm15  ;;  %vm16539_vm8 = vcmask 130048   ;;  %16543 = vst [vmem:[#allocation191_spill] sm:$0xff] %v11305_v57  ;;  %v11317_v62 = vsel %vm15580_vm4, %v1110_v60, %v16546_v40  ;;  %v11327_v29 = vsel %vm15580_vm4, %v1106_v11, %v1108_v5  ;;  %v7446_v11 = vpop.f32.mrb[40].mxu0 }
 0x257   : > { %5544 = vperm.xlu1 %7784, %v5469_v10   ;;  %vm5436_vm13 = vmand %vm5404_vm10, %vm16532_vm2  ;;  %7559 = vmatmul.mubr.msk.bf16.gmra.mrb[108].mxu1 %vm16539_vm8, %v10029_v22  ;;  %v16540_v10 = vld [vmem:[#allocation65_spill] sm:$0xff]  ;;  %vm16542_vm10 = vnez %v15985_v30  ;;  %16547 = vst [vmem:[#allocation192_spill] sm:$0xff] %v11317_v62  ;;  %v11324_v30 = vsel %vm15580_vm4, %v1108_v5, %v1110_v60  ;;  %v16554_v40 = vrot.slane %v11274_v44, 1  ;;  %v11342_v60 = vsel %vm15577_vm3, %v2365_v42, %v2367_v6  ;;  %v16555_v5 = vld [vmem:[#allocation18_spill] sm:$0xff] }
 0x258   : > { %v5468_v14 = vsel %vm5436_vm13, 1, %v15824_v54  ;;  %vm4252_vm11 = vmand %vm16535_vm6, %vm16534_vm14  ;;  %vm16541_vm15 = vcmp.ge.s32.totalorder %v16540_v10, 4294967295  ;;  %vm16548_vm6 = vcmp.lt.s32.totalorder %v16540_v10, 15  ;;  %16550 = vst [vmem:[#allocation193_spill] sm:$0xff] %v11324_v30  ;;  %7288 = vmatpush3.bf16.msra.mxu0 %v16555_v5 }
 0x259   : > { %5541 = vperm.xlu0 %7783, %v5468_v14   ;;  %vm4284_vm5 = vmand %vm4252_vm11, %vm16538_vm12  ;;  %v11308_v14 = vsel %vm15577_vm3, %v2367_v6, %v2369_v24  ;;  %16551 = vst [vmem:[#allocation194_spill] sm:$0xff] %v11327_v29  ;;  %v11339_v56 = vsel %vm15577_vm3, %v16554_v40, %v2365_v42  ;;  %v11357_v6 = vpop.permute.xlu1 %3783  ;;  %v2215_v42 = vpop.f32.mrb[41].mxu0  ;;  %v1118_v29 = vrot.slane %v11344_v51, 7 }
 0x25a   : > { %v4316_v16 = vsel %vm4284_vm5, 1, %v15824_v54  ;;  %vm4251_vm2 = vmand %vm16542_vm10, %vm16541_vm15  ;;  %vm16552_vm5 = vcmp.ge.s32.totalorder %v8238_v18, 0  ;;  %vm16556_vm15 = vcmp.lt.s32.totalorder %v8238_v18, 16  ;;  %16559 = vst [vmem:[#allocation18_spill] sm:$0xff] %v11357_v6  ;;  %v1114_v18 = vrot.slane %v11349_v3, 7  ;;  %v11362_v40 = vpop.f32.mrb[6].mxu1 }
 0x25b   : > { %vm16544_vm13 = vmmov %vm16539_vm8  ;;  %4363 = vperm.xlu1 %7784, %v4316_v16   ;;  %v11334_v16 = vpop.permute.xlu0 %3774  ;;  %v2375_v3 = vrot.slane %v7446_v11, 1  ;;  %v966_v6 = vpop.f32.mrb[7].mxu1 }
 0x25c   : > { %7657 = vmatmul.mubr.msk.bf16.gmra.mrb[144].mxu0 %vm16544_vm13, %v9969_v8  ;;  %vm16545_vm14 = vmmov %vm16539_vm8  ;;  %16553 = vst [vmem:[#allocation195_spill] sm:$0xff] %v11334_v16  ;;  %v16557_v16 = vld [vmem:[#allocation37_spill] sm:$0xff]  ;;  %v1116_v30 = vrot.slane %v966_v6, 7  ;;  %v7875_v6 = vld [vmem:[%s14985_s1 + $0xb0] sm:$0xff] }
 0x25d   : > { %7562 = vmatprep.mubr.msk.bf16.mxu1 %vm16545_vm14, %v10119_v61  ;;  %vm4283_vm11 = vmand %vm4251_vm2, %vm16548_vm6  ;;  %7289 = vmatprep.subr.bf16.mxu0 %v16557_v16  ;;  %vm16558_vm2 = vcmp.ge.s32.totalorder %v8264_v23, 0  ;;  %vm16560_vm14 = vcmp.lt.s32.totalorder %v8264_v23, 16  ;;  %v11364_v16 = vpop.f32.mrb[42].mxu0 }
 0x25e   : > { %vm16549_vm12 = vmmov %vm16539_vm8  ;;  %v4315_v57 = vsel %vm4283_vm11, 1, %v15824_v54  ;;  %vm16561_vm11 = vcmp.ge.s32.totalorder %v8751_v27, 0  ;;  %7290 = vmatpush3.bf16.msra.mxu0 %v16564_v52  ;;  %v2218_v50 = vpop.f32.mrb[43].mxu0  ;;  %v11391_v52 = vpop.permute.xlu1 %3789 }
 0x25f   : > { %7660 = vmatprep.mubr.msk.bf16.mxu0 %vm16549_vm12, %v10042_v34  ;;  %vm5389_vm8 = vmand %vm11157_vm0, %vm16552_vm5  ;;  %4360 = vperm.xlu0 %7783, %v4315_v57   ;;  %v2371_v57 = vrot.slane %v2215_v42, 1  ;;  %vm16562_vm12 = vnez %v16141_v55  ;;  %v11374_v23 = vpop.permute.xlu0 %3780  ;;  %v2377_v42 = vrot.slane %v11364_v16, 1  ;;  %16569 = vst [vmem:[#allocation20_spill] sm:$0xff] %v11391_v52  ;;  %v1120_v16 = vrot.slane %v11362_v40, 7 }
 0x260   : > { %vm5421_vm10 = vmand %vm5389_vm8, %vm16556_vm15  ;;  %16563 = vst [vmem:[#allocation37_spill] sm:$0xff] %v11374_v23  ;;  %vm16565_vm15 = vcmp.lt.s32.totalorder %v8751_v27, 16  ;;  %v16575_v40 = vrot.slane %v11279_v25, 7  ;;  %v7386_v25 = vpop.f32.mrb[8].mxu1 }
 0x261   : > { %v5453_v10 = vsel %vm5421_vm10, 1, %v15824_v54  ;;  %vm5388_vm13 = vmand %vm11174_vm7, %vm16558_vm2  ;;  %v11382_v62 = vsel %vm15577_vm3, %v2369_v24, %v2371_v57  ;;  %v11395_v51 = vsel %vm15577_vm3, %v2375_v3, %v2377_v42  ;;  %v2373_v24 = vrot.slane %v2218_v50, 1 }
 0x262   : > { %5496 = vperm.xlu1 %7784, %v5453_v10   ;;  %vm5420_vm6 = vmand %vm5388_vm13, %vm16560_vm14  ;;  %v7874_v10 = vld [vmem:[%s14985_s1 + $0xb8] sm:$0xff]  ;;  %vm16566_vm13 = vcmask 130048   ;;  %vm16567_vm14 = vcmp.ge.s32.totalorder %v8774_v17, 0  ;;  %v11409_v50 = vsel %vm15580_vm4, %v1116_v30, %v1118_v29 }
 0x263   : > { %v5452_v5 = vsel %vm5420_vm6, 1, %v15824_v54  ;;  %vm3684_vm5 = vmand %vm16562_vm12, %vm16561_vm11  ;;  %vm4886_vm2 = vcmp.lt.s32.totalorder %v7874_v10, 15  ;;  %7563 = vmatmul.mubr.msk.bf16.gmra.mrb[112].mxu1 %vm16566_vm13, %v10112_v45  ;;  %vm16568_vm6 = vnez %v16146_v0  ;;  %16574 = vst [vmem:[#allocation196_spill] sm:$0xff] %v11409_v50  ;;  %v11423_v23 = vpop.permute.xlu0 %3786  ;;  %v11429_v50 = vsel %vm15577_vm3, %v2373_v24, %v2375_v3 }
 0x264   : > { %5493 = vperm.xlu0 %7783, %v5452_v5   ;;  %vm3716_vm10 = vmand %vm3684_vm5, %vm16565_vm15  ;;  %v11414_v5 = vsel %vm15580_vm4, %v16575_v40, %v1114_v18  ;;  %16580 = vst [vmem:[#allocation198_spill] sm:$0xff] %v11423_v23  ;;  %v16583_v40 = vld [vmem:[#allocation38_spill] sm:$0xff] }
 0x265   : > { %v3748_v11 = vsel %vm3716_vm10, 1, %v15824_v54  ;;  %vm3683_vm11 = vmand %vm16568_vm6, %vm16567_vm14  ;;  %vm16572_vm10 = vcmp.lt.s32.totalorder %v8774_v17, 16  ;;  %vm4853_vm14 = vcmp.ge.s32.totalorder %v7875_v6, 4294967295  ;;  %16576 = vst [vmem:[#allocation197_spill] sm:$0xff] %v11414_v5  ;;  %7291 = vmatprep.subr.bf16.mxu0 %v16583_v40  ;;  %v11436_v5 = vpop.f32.mrb[9].mxu1  ;;  %v11448_v40 = vsel %vm15580_vm4, %v1114_v18, %v1116_v30 }
 0x266   : > { %vm16570_vm5 = vmmov %vm16566_vm13  ;;  %3831 = vperm.xlu1 %7784, %v3748_v11   ;;  %16582 = vst [vmem:[#allocation200_spill] sm:$0xff] %v11429_v50 }
 0x267   : > { %7661 = vmatmul.mubr.msk.bf16.gmra.mrb[148].mxu0 %vm16570_vm5, %v10029_v22  ;;  %vm16571_vm15 = vmmov %vm16570_vm5  ;;  %v16585_v22 = vld [vmem:[#allocation23_spill] sm:$0xff]  ;;  %16589 = vst [vmem:[#allocation201_spill] sm:$0xff] %v11448_v40  ;;  %v11465_v30 = vpop.permute.xlu0 %3804 }
 0x268   : > { %7566 = vmatprep.mubr.msk.bf16.mxu1 %vm16571_vm15, %v10201_v49  ;;  %vm3715_vm13 = vmand %vm3683_vm11, %vm16572_vm10  ;;  %vm16577_vm11 = vcmp.ge.s32.totalorder %v7874_v10, 4294967295  ;;  %vm4885_vm15 = vcmp.lt.s32.totalorder %v7875_v6, 15  ;;  %v7450_v10 = vpop.f32.mrb[44].mxu0  ;;  %7292 = vmatpush3.bf16.msra.mxu0 %v16585_v22  ;;  %vm16586_vm10 = vcmp.lt.s32.totalorder %v8706_v13, 17  ;;  %16593 = vst [vmem:[#allocation202_spill] sm:$0xff] %v11465_v30 }
 0x269   : > { %vm16573_vm8 = vmmov %vm16570_vm5  ;;  %v3747_v11 = vsel %vm3715_vm13, 1, %v15824_v54 }
 0x26a   : > { %7664 = vmatprep.mubr.msk.bf16.mxu0 %vm16573_vm8, %v10119_v61  ;;  %vm11419_vm5 = vmand %vm16577_vm11, %vm4886_vm2  ;;  %v11426_v61 = vsel %vm15577_vm3, %v2371_v57, %v2373_v24  ;;  %3828 = vperm.xlu0 %7783, %v3747_v11   ;;  %vm16584_vm8 = vcmp.ge.s32.totalorder %v8706_v13, 1  ;;  %v11441_v57 = vpop.permute.xlu1 %3807  ;;  %v2231_v24 = vpop.f32.mrb[45].mxu0  ;;  %v11445_v11 = vsel %vm15580_vm4, %v1118_v29, %v1120_v16  ;;  %v2383_v29 = vrot.slane %v7450_v10, 1 }
 0x26b   : > { %16581 = vst [vmem:[#allocation199_spill] sm:$0xff] %v11426_v61  ;;  %vm4950_vm2 = vmand %vm11419_vm5, %vm16584_vm8  ;;  %v2379_v50 = vrot.slane %v2231_v24, 1  ;;  %v11457_v61 = vpop.f32.mrb[10].mxu1  ;;  %vm16592_vm8 = vcmp.ge.s32.totalorder %v8724_v20, 1  ;;  %v16594_v24 = vrot.slane %v11436_v5, 7 }
 0x26c   : > { %vm4982_vm13 = vmand %vm4950_vm2, %vm16586_vm10  ;;  %16587 = vst [vmem:[#allocation38_spill] sm:$0xff] %v11441_v57  ;;  %v11459_v57 = vpop.f32.mrb[46].mxu0  ;;  %v15581_v18 = vrot.slane %v11457_v61, 7  ;;  %v11469_v3 = vpop.f32.mrb[11].mxu1  ;;  %vm16597_vm10 = vcmask 130048  }
 0x26d   : > { %16588 = vst [vmem:[#allocation23_spill] sm:$0xff] %v11445_v11  ;;  %v5014_v23 = vsel %vm4982_vm13, 1, %v15824_v54  ;;  %vm11453_vm11 = vmand %vm4853_vm14, %vm4885_vm15  ;;  %v2385_v6 = vrot.slane %v11459_v57, 1  ;;  %v11474_v40 = vsel %vm15580_vm4, %v1120_v16, %v16594_v24  ;;  %vm16596_vm14 = vcmp.lt.s32.totalorder %v8724_v20, 17  ;;  %v2234_v30 = vpop.f32.mrb[47].mxu0  ;;  %7567 = vmatmul.mubr.msk.bf16.gmra.mrb[116].mxu1 %vm16597_vm10, %v10193_v59 }
 0x26e   : > { %5093 = vperm.xlu1 %7784, %v5014_v23   ;;  %vm4949_vm2 = vmand %vm11453_vm11, %vm16592_vm8  ;;  %16595 = vst [vmem:[#allocation203_spill] sm:$0xff] %v11474_v40  ;;  %v1126_v23 = vrot.slane %v7386_v25, 7  ;;  %v11479_v11 = vsel %vm15577_vm3, %v2377_v42, %v2379_v50  ;;  %v15579_v10 = vrot.slane %v11469_v3, 7  ;;  %vm16598_vm13 = vcmp.ge.s32.totalorder %v16417_v21, 4294967295  ;;  %v11489_v16 = vpop.permute.xlu1 %4393  ;;  %v11528_v40 = vpop.f32.mrb[12].mxu1 }
 0x26f   : > { %vm4981_vm15 = vmand %vm4949_vm2, %vm16596_vm14  ;;  %16599 = vst [vmem:[#allocation204_spill] sm:$0xff] %v11489_v16  ;;  %v11492_v25 = vsel %vm15577_vm3, %v2383_v29, %v2385_v6  ;;  %v2381_v42 = vrot.slane %v2234_v30, 1 }
 0x270   : > { %v5013_v57 = vsel %vm4981_vm15, 1, %v15824_v54  ;;  %vm5991_vm8 = vmand %vm16524_vm9, %vm16598_vm13  ;;  %16600 = vst [vmem:[#allocation205_spill] sm:$0xff] %v11492_v25  ;;  %vm16603_vm15 = vcmp.lt.s32.totalorder %v16417_v21, 15  ;;  %vm4838_vm9 = vcmp.ge.s32.totalorder %v7876_v46, 4294967295  ;;  %vm4870_vm13 = vcmp.lt.s32.totalorder %v7876_v46, 15 }
 0x271   : > { %vm16601_vm2 = vmmov %vm16597_vm10  ;;  %5090 = vperm.xlu0 %7783, %v5013_v57   ;;  %v11508_v30 = vsel %vm15580_vm4, %v15579_v10, %v1126_v23  ;;  %v11513_v24 = vsel %vm15580_vm4, %v1126_v23, %v15581_v18  ;;  %v11520_v57 = vpop.permute.xlu0 %4390  ;;  %v7454_v23 = vpop.f32.mrb[48].mxu0 }
 0x272   : > { %7665 = vmatmul.mubr.msk.bf16.gmra.mrb[152].mxu0 %vm16601_vm2, %v10112_v45  ;;  %vm16602_vm14 = vmmov %vm16601_vm2  ;;  %16605 = vst [vmem:[#allocation206_spill] sm:$0xff] %v11508_v30  ;;  %v995_v18 = vpop.f32.mrb[13].mxu1 }
 0x273   : > { %7570 = vmatprep.mubr.msk.bf16.mxu1 %vm16602_vm14, %v10272_v12  ;;  %vm6023_vm10 = vmand %vm5991_vm8, %vm16603_vm15  ;;  %16606 = vst [vmem:[#allocation207_spill] sm:$0xff] %v11513_v24  ;;  %vm16607_vm8 = vcmp.ge.s32.totalorder %v8688_v48, 4294967295  ;;  %vm16613_vm15 = vcmp.lt.s32.totalorder %v8688_v48, 15  ;;  %v2247_v48 = vpop.f32.mrb[49].mxu0 }
 0x274   : > { %vm16604_vm3 = vmmov %vm16601_vm2  ;;  %v6055_v21 = vsel %vm6023_vm10, 1, %v15824_v54  ;;  %16608 = vst [vmem:[#allocation208_spill] sm:$0xff] %v11520_v57  ;;  %v2387_v46 = vrot.slane %v2247_v48, 1  ;;  %v7455_v57 = vpop.f32.mrb[50].mxu0 }
 0x275   : > { %7668 = vmatprep.mubr.msk.bf16.mxu0 %vm16604_vm3, %v10201_v49  ;;  %vm5990_vm2 = vmand %vm11115_vm1, %vm16607_vm8  ;;  %vm16609_vm3 = vcmask 1046528   ;;  %6130 = vperm.xlu1 %7784, %v6055_v21   ;;  %v11548_v21 = vpop.f32.mrb[14].mxu1  ;;  %v11552_v30 = vpop.permute.xlu0 %4342  ;;  %v2393_v49 = vrot.slane %v7455_v57, 1 }
 0x276   : > { %v11523_v16 = vsel %vm16609_vm3, %v2379_v50, %v2381_v42  ;;  %vm16611_vm14 = vmmov %vm16609_vm3  ;;  %v7877_v50 = vld [vmem:[%s14985_s1 + $0x30] sm:$0xff]  ;;  %16619 = vst [vmem:[#allocation212_spill] sm:$0xff] %v11552_v30  ;;  %v2250_v25 = vpop.f32.mrb[51].mxu0 }
 0x277   : > { %16610 = vst [vmem:[#allocation209_spill] sm:$0xff] %v11523_v16  ;;  %v11526_v10 = vsel %vm16611_vm14, %v2381_v42, %v2383_v29  ;;  %vm6022_vm4 = vmand %vm5990_vm2, %vm16613_vm15  ;;  %vm4837_vm10 = vcmp.ge.s32.totalorder %v7877_v50, 4294967295  ;;  %vm4869_vm8 = vcmp.lt.s32.totalorder %v7877_v50, 15  ;;  %v11542_v29 = vpop.permute.xlu1 %4345  ;;  %vm16617_vm2 = vcmp.ge.s32.totalorder %v8292_v32, 1  ;;  %v16874_v45 = vld [vmem:[#allocation205_spill] sm:$0xff] }
 0x278   : > { %16612 = vst [vmem:[#allocation210_spill] sm:$0xff] %v11526_v10  ;;  %v6054_v24 = vsel %vm6022_vm4, 1, %v15824_v54  ;;  %vm11535_vm1 = vmand %vm4838_vm9, %vm4870_vm13  ;;  %v1130_v42 = vrot.slane %v995_v18, 7  ;;  %vm16618_vm9 = vcmp.lt.s32.totalorder %v8292_v32, 17  ;;  %v2391_v10 = vrot.slane %v7454_v23, 1 }
 0x279   : > { %16616 = vst [vmem:[#allocation211_spill] sm:$0xff] %v11542_v29  ;;  %6127 = vperm.xlu0 %7783, %v6054_v24   ;;  %vm4934_vm4 = vmand %vm11535_vm1, %vm16617_vm2  ;;  %v998_v29 = vpop.f32.mrb[15].mxu1  ;;  %v1134_v18 = vrot.slane %v11528_v40, 7  ;;  %v11563_v48 = vsel %vm16611_vm14, %v2385_v6, %v2387_v46  ;;  %vm16622_vm15 = vcmask 130048   ;;  %vm16623_vm2 = vcmp.ge.s32.totalorder %v8320_v37, 1 }
 0x27a   : > { %vm4966_vm13 = vmand %vm4934_vm4, %vm16618_vm9  ;;  %v1132_v16 = vrot.slane %v998_v29, 7  ;;  %7571 = vmatmul.mubr.msk.bf16.gmra.mrb[120].mxu1 %vm16622_vm15, %v10259_v28  ;;  %v2389_v40 = vrot.slane %v2250_v25, 1  ;;  %vm16627_vm9 = vcmp.lt.s32.totalorder %v8320_v37, 17  ;;  %v1136_v6 = vrot.slane %v11548_v21, 7 }
 0x27b   : > { %v4998_v24 = vsel %vm4966_vm13, 1, %v15824_v54  ;;  %vm11557_vm3 = vmand %vm4837_vm10, %vm4869_vm8  ;;  %v11571_v57 = vpop.permute.xlu1 %3813  ;;  %v16630_v50 = vrot.slane %v11469_v3, 7  ;;  %v16631_v29 = vrot.slane %v11436_v5, 7  ;;  %v11605_v3 = vpop.permute.xlu0 %3810 }
 0x27c   : > { %5045 = vperm.xlu1 %7784, %v4998_v24   ;;  %vm4933_vm4 = vmand %vm11557_vm3, %vm16623_vm2  ;;  %16624 = vst [vmem:[#allocation213_spill] sm:$0xff] %v11571_v57  ;;  %vm16632_vm2 = vcmask 1040384   ;;  %v16636_v57 = vrot.slane %v11457_v61, 7  ;;  %v7458_v61 = vpop.f32.mrb[52].mxu0 }
 0x27d   : > { %vm16625_vm10 = vmmov %vm16611_vm14  ;;  %v11590_v25 = vsel %vm16632_vm2, %v16631_v29, %v16630_v50  ;;  %16640 = vst [vmem:[#allocation217_spill] sm:$0xff] %v11605_v3  ;;  %v7394_v29 = vpop.f32.mrb[16].mxu1  ;;  %v2263_v9 = vpop.f32.mrb[53].mxu0 }
 0x27e   : > { %v11574_v23 = vsel %vm16625_vm10, %v2391_v10, %v2393_v49  ;;  %vm16626_vm8 = vmmov %vm16622_vm15  ;;  %16633 = vst [vmem:[#allocation214_spill] sm:$0xff] %v11590_v25 }
 0x27f   : > { %7669 = vmatmul.mubr.msk.bf16.gmra.mrb[156].mxu0 %vm16626_vm8, %v10193_v59  ;;  %vm4965_vm13 = vmand %vm4933_vm4, %vm16627_vm9  ;;  %v16750_v59 = vld [vmem:[#allocation54_spill] sm:$0xff] }
 0x280   : > { %vm16628_vm14 = vmmov %vm16626_vm8 }
 0x281   : > { %7610 = vmatprep.mubr.msk.bf16.mxu1 %vm16628_vm14, %v9780_v63  ;;  %vm16629_vm15 = vmmov %vm16626_vm8  ;;  %v4997_v63 = vsel %vm4965_vm13, 1, %v15824_v54  ;;  %vm16639_vm8 = vcmp.ge.s32.totalorder %v16434_v39, 4294967295  ;;  %vm16641_vm14 = vcmask 1046528  }
 0x282   : > { %7672 = vmatprep.mubr.msk.bf16.mxu0 %vm16629_vm15, %v10272_v12  ;;  %vm16634_vm10 = vmmov %vm16632_vm2  ;;  %v11608_v5 = vsel %vm16641_vm14, %v2387_v46, %v2389_v40  ;;  %5042 = vperm.xlu0 %7783, %v4997_v63  }
 0x283   : > { %v11593_v24 = vsel %vm16634_vm10, %v1132_v16, %v1134_v18  ;;  %vm16637_vm4 = vmmov %vm16632_vm2  ;;  %16642 = vst [vmem:[#allocation218_spill] sm:$0xff] %v11608_v5  ;;  %vm16645_vm2 = vcmp.lt.s32.totalorder %v16434_v39, 15  ;;  %v2395_v39 = vrot.slane %v2263_v9, 1  ;;  %v16760_v5 = vld [vmem:[#allocation106_spill] sm:$0xff] }
 0x284   : > { %16635 = vst [vmem:[#allocation215_spill] sm:$0xff] %v11593_v24  ;;  %v11598_v21 = vsel %vm16637_vm4, %v16636_v57, %v1130_v42  ;;  %vm5975_vm9 = vmand %vm11157_vm0, %vm16639_vm8  ;;  %v11615_v57 = vpop.f32.mrb[17].mxu1  ;;  %vm16646_vm0 = vcmp.ge.s32.totalorder %v16440_v38, 4294967295  ;;  %vm16647_vm4 = vcmp.lt.s32.totalorder %v16440_v38, 15 }
 0x285   : > { %16638 = vst [vmem:[#allocation216_spill] sm:$0xff] %v11598_v21  ;;  %vm16643_vm15 = vmmov %vm16641_vm14  ;;  %v11622_v46 = vpop.f32.mrb[18].mxu1 }
 0x286   : > { %v11611_v50 = vsel %vm16643_vm15, %v2389_v40, %v2391_v10  ;;  %vm6007_vm10 = vmand %vm5975_vm9, %vm16645_vm2  ;;  %v11626_v10 = vpop.permute.xlu1 %5075  ;;  %v7459_v40 = vpop.f32.mrb[54].mxu0  ;;  %vm16649_vm9 = vcmask 1040384   ;;  %vm16654_vm2 = vcmp.lt.s32.totalorder %v8751_v27, 15 }
 0x287   : > { %16644 = vst [vmem:[#allocation219_spill] sm:$0xff] %v11611_v50  ;;  %v6039_v30 = vsel %vm6007_vm10, 1, %v15824_v54  ;;  %vm5974_vm13 = vmand %vm11174_vm7, %vm16646_vm0  ;;  %v11629_v63 = vsel %vm16649_vm9, %v1134_v18, %v1136_v6  ;;  %vm16653_vm7 = vcmp.ge.s32.totalorder %v8751_v27, 4294967295  ;;  %v2401_v38 = vrot.slane %v7459_v40, 1  ;;  %v1014_v21 = vpop.f32.mrb[19].mxu1  ;;  %v2266_v24 = vpop.f32.mrb[55].mxu0 }
 0x288   : > { %6082 = vperm.xlu1 %7784, %v6039_v30   ;;  %vm6006_vm8 = vmand %vm5974_vm13, %vm16647_vm4  ;;  %16648 = vst [vmem:[#allocation220_spill] sm:$0xff] %v11626_v10  ;;  %v2399_v30 = vrot.slane %v7458_v61, 1  ;;  %v1138_v18 = vrot.slane %v11615_v57, 7  ;;  %vm16655_vm0 = vcmask 1046528   ;;  %v2397_v9 = vrot.slane %v2266_v24, 1  ;;  %v11652_v61 = vpop.permute.xlu0 %5072 }
 0x289   : > { %16650 = vst [vmem:[#allocation221_spill] sm:$0xff] %v11629_v63  ;;  %vm16651_vm14 = vmmov %vm16649_vm9  ;;  %v6038_v1 = vsel %vm6006_vm8, 1, %v15824_v54  ;;  %vm16657_vm13 = vcmask 130048   ;;  %v1142_v40 = vrot.slane %v7394_v29, 7 }
 0x28a   : > { %v11632_v3 = vsel %vm16651_vm14, %v1130_v42, %v1132_v16  ;;  %vm4270_vm15 = vmand %vm16562_vm12, %vm16653_vm7  ;;  %6079 = vperm.xlu0 %7783, %v6038_v1   ;;  %v11643_v16 = vsel %vm16655_vm0, %v2393_v49, %v2395_v39  ;;  %v1140_v42 = vrot.slane %v1014_v21, 7  ;;  %7611 = vmatmul.mubr.msk.bf16.vlgmr.msra.gmra.mrb[124].mxu1 %vm16657_vm13, %v9772_v58  ;;  %vm16658_vm12 = vcmp.ge.s32.totalorder %v8774_v17, 4294967295  ;;  %16659 = vst [vmem:[#allocation224_spill] sm:$0xff] %v11652_v61  ;;  %v11682_v29 = vpop.permute.xlu1 %5027 }
 0x28b   : > { %16652 = vst [vmem:[#allocation222_spill] sm:$0xff] %v11632_v3  ;;  %vm4302_vm10 = vmand %vm4270_vm15, %vm16654_vm2  ;;  %vm16664_vm7 = vcmp.lt.s32.totalorder %v8774_v17, 15 }
 0x28c   : > { %16656 = vst [vmem:[#allocation223_spill] sm:$0xff] %v11643_v16  ;;  %v4334_v55 = vsel %vm4302_vm10, 1, %v15824_v54  ;;  %vm4269_vm4 = vmand %vm16568_vm6, %vm16658_vm12  ;;  %vm16669_vm10 = vcmp.ge.s32.totalorder %v8706_v13, 0  ;;  %vm16672_vm12 = vcmp.lt.s32.totalorder %v8706_v13, 16  ;;  %v16749_v16 = vld [vmem:[#allocation43_spill] sm:$0xff] }
 0x28d   : > { %vm16660_vm8 = vmmov %vm16655_vm0  ;;  %4417 = vperm.xlu1 %7784, %v4334_v55   ;;  %16673 = vst [vmem:[#allocation229_spill] sm:$0xff] %v11682_v29 }
 0x28e   : > { %v11655_v57 = vsel %vm16660_vm8, %v2399_v30, %v2401_v38  ;;  %vm16662_vm9 = vmmov %vm16657_vm13  ;;  %vm16670_vm13 = vcmask 1040384  }
 0x28f   : > { %16661 = vst [vmem:[#allocation225_spill] sm:$0xff] %v11655_v57  ;;  %7673 = vmatmul.mubr.msk.bf16.gmra.mrb[160].mxu0 %vm16662_vm9, %v10259_v28  ;;  %vm16663_vm14 = vmmov %vm16662_vm9  ;;  %v11678_v21 = vsel %vm16670_vm13, %v1140_v42, %v1142_v40  ;;  %vm16676_vm9 = vcmp.ge.s32.totalorder %v8724_v20, 0 }
 0x290   : > { %7614 = vmatprep.mubr.msk.bf16.mxu1 %vm16663_vm14, %v9845_v35  ;;  %vm4301_vm15 = vmand %vm4269_vm4, %vm16664_vm7  ;;  %v11675_v35 = vpop.f32.mrb[20].mxu1  ;;  %16671 = vst [vmem:[#allocation228_spill] sm:$0xff] %v11678_v21  ;;  %vm16677_vm7 = vcmp.lt.s32.totalorder %v8724_v20, 16 }
 0x291   : > { %vm16665_vm2 = vmmov %vm16655_vm0  ;;  %v4333_v24 = vsel %vm4301_vm15, 1, %v15824_v54 }
 0x292   : > { %v11665_v49 = vsel %vm16665_vm2, %v2395_v39, %v2397_v9  ;;  %vm16667_vm6 = vmmov %vm16655_vm0  ;;  %4414 = vperm.xlu0 %7783, %v4333_v24   ;;  %v7462_v39 = vpop.f32.mrb[56].mxu0 }
 0x293   : > { %16666 = vst [vmem:[#allocation226_spill] sm:$0xff] %v11665_v49  ;;  %v11668_v0 = vsel %vm16667_vm6, %v2397_v9, %v2399_v30  ;;  %vm5407_vm0 = vmand %vm11419_vm5, %vm16669_vm10  ;;  %v11692_v9 = vpop.f32.mrb[21].mxu1  ;;  %v2279_v55 = vpop.f32.mrb[57].mxu0  ;;  %vm16683_vm10 = vnez %v15990_v41  ;;  %v2407_v21 = vrot.slane %v7462_v39, 1 }
 0x294   : > { %16668 = vst [vmem:[#allocation227_spill] sm:$0xff] %v11668_v0  ;;  %vm5439_vm4 = vmand %vm5407_vm0, %vm16672_vm12  ;;  %v2403_v24 = vrot.slane %v2279_v55, 1  ;;  %v11696_v58 = vpop.f32.mrb[22].mxu1  ;;  %v11698_v10 = vpop.f32.mrb[58].mxu0 }
 0x295   : > { %vm16674_vm8 = vmmov %vm16670_vm13  ;;  %v5471_v30 = vsel %vm5439_vm4, 1, %v15824_v54  ;;  %v15593_v55 = vrot.slane %v11698_v10, 1  ;;  %v1030_v0 = vpop.f32.mrb[23].mxu1  ;;  %vm16686_vm4 = vcmask 1046528  }
 0x296   : > { %v11685_v1 = vsel %vm16674_vm8, %v1136_v6, %v1138_v18  ;;  %vm5406_vm14 = vmand %vm11453_vm11, %vm16676_vm9  ;;  %5550 = vperm.xlu1 %7784, %v5471_v30   ;;  %v16678_v6 = vrot.slane %v11622_v46, 7  ;;  %v11710_v30 = vpop.permute.xlu0 %5024 }
 0x297   : > { %16675 = vst [vmem:[#allocation230_spill] sm:$0xff] %v11685_v1  ;;  %vm5438_vm15 = vmand %vm5406_vm14, %vm16677_vm7  ;;  %v16681_v1 = vld [vmem:[#allocation66_spill] sm:$0xff]  ;;  %vm16693_vm7 = vnez %v15996_v26  ;;  %v1146_v26 = vrot.slane %v11692_v9, 7 }
 0x298   : > { %vm16679_vm2 = vmmov %vm16674_vm8  ;;  %v5470_v29 = vsel %vm5438_vm15, 1, %v15824_v54  ;;  %vm16682_vm6 = vcmp.ge.s32.totalorder %v16681_v1, 4294967295  ;;  %16684 = vst [vmem:[#allocation232_spill] sm:$0xff] %v11710_v30  ;;  %vm16685_vm13 = vcmp.lt.s32.totalorder %v16681_v1, 15  ;;  %vm16688_vm8 = vcmask 130048   ;;  %v16691_v30 = vld [vmem:[#allocation68_spill] sm:$0xff] }
 0x299   : > { %v11703_v61 = vsel %vm16679_vm2, %v1142_v40, %v16678_v6  ;;  %vm4254_vm0 = vmand %vm16683_vm10, %vm16682_vm6  ;;  %5547 = vperm.xlu0 %7783, %v5470_v29   ;;  %v11716_v40 = vsel %vm16686_vm4, %v2401_v38, %v2403_v24  ;;  %v1148_v6 = vrot.slane %v1030_v0, 7  ;;  %7615 = vmatmul.mubr.msk.bf16.gmra.mrb[128].mxu1 %vm16688_vm8, %v9832_v4  ;;  %vm16692_vm14 = vcmp.ge.s32.totalorder %v16691_v30, 4294967295  ;;  %v11728_v29 = vpop.permute.xlu1 %4399 }
 0x29a   : > { %16680 = vst [vmem:[#allocation231_spill] sm:$0xff] %v11703_v61  ;;  %vm4286_vm12 = vmand %vm4254_vm0, %vm16685_vm13  ;;  %v2282_v61 = vpop.f32.mrb[59].mxu0  ;;  %v1150_v38 = vrot.slane %v11675_v35, 7  ;;  %vm16698_vm10 = vcmp.lt.s32.totalorder %v16691_v30, 15  ;;  %vm16699_vm13 = vcmp.ge.s32.totalorder %v8292_v32, 0  ;;  %v11747_v35 = vpop.permute.xlu0 %4396  ;;  %v16709_v30 = vld [vmem:[#allocation52_spill] sm:$0xff] }
 0x29b   : > { %16687 = vst [vmem:[#allocation233_spill] sm:$0xff] %v11716_v40  ;;  %vm16689_vm9 = vmmov %vm16679_vm2  ;;  %v4318_v39 = vsel %vm4286_vm12, 1, %v15824_v54  ;;  %v2405_v4 = vrot.slane %v2282_v61, 1  ;;  %v16718_v40 = vrot.slane %v11622_v46, 7 }
 0x29c   : > { %v11721_v41 = vsel %vm16689_vm9, %v1138_v18, %v1140_v42  ;;  %vm4253_vm15 = vmand %vm16693_vm7, %vm16692_vm14  ;;  %16694 = vst [vmem:[#allocation235_spill] sm:$0xff] %v11728_v29  ;;  %4369 = vperm.xlu1 %7784, %v4318_v39   ;;  %v11755_v39 = vpop.f32.mrb[24].mxu1  ;;  %v11758_v9 = vsel %vm16689_vm9, %v1148_v6, %v1150_v38  ;;  %v16707_v18 = vld [vmem:[#allocation49_spill] sm:$0xff]  ;;  %v16708_v29 = vld [vmem:[#allocation51_spill] sm:$0xff] }
 0x29d   : > { %16690 = vst [vmem:[#allocation234_spill] sm:$0xff] %v11721_v41  ;;  %vm16695_vm2 = vmmov %vm16686_vm4 }
 0x29e   : > { %v11734_v0 = vsel %vm16695_vm2, %v2407_v21, %v15593_v55  ;;  %vm16697_vm6 = vmmov %vm16688_vm8  ;;  %16700 = vst [vmem:[#allocation237_spill] sm:$0xff] %v11747_v35  ;;  %v16706_v55 = vld [vmem:[#allocation47_spill] sm:$0xff]  ;;  %v16712_v35 = vld [vmem:[#allocation156_spill] sm:$0xff]  ;;  %v11804_v49 = vpop.permute.xlu0 %5529 }
 0x29f   : > { %16696 = vst [vmem:[#allocation236_spill] sm:$0xff] %v11734_v0  ;;  %7618 = vmatprep.mubr.msk.bf16.mxu1 %vm16697_vm6, %v9910_v19  ;;  %vm4285_vm0 = vmand %vm4253_vm15, %vm16698_vm10  ;;  %vm16710_vm6 = vcmp.lt.s32.totalorder %v8292_v32, 16  ;;  %v16717_v0 = vld [vmem:[#allocation101_spill] sm:$0xff] }
 0x2a0   : > { %v4317_v42 = vsel %vm4285_vm0, 1, %v15824_v54  ;;  %vm5391_vm12 = vmand %vm11535_vm1, %vm16699_vm13  ;;  %16705 = vst [vmem:[#allocation240_spill] sm:$0xff] %v11758_v9  ;;  %v16715_v9 = vld [vmem:[#allocation102_spill] sm:$0xff] }
 0x2a1   : > { %vm16701_vm4 = vmmov %vm16695_vm2  ;;  %4366 = vperm.xlu0 %7783, %v4317_v42   ;;  %v11776_v42 = vpop.permute.xlu1 %5532 }
 0x2a2   : > { %v11750_v61 = vsel %vm16701_vm4, %v2403_v24, %v2405_v4  ;;  %vm16703_vm8 = vmmov %vm16695_vm2  ;;  %v7466_v24 = vpop.f32.mrb[60].mxu0  ;;  %16714 = vst [vmem:[#allocation47_spill] sm:$0xff] %v11776_v42  ;;  %vm16719_vm4 = vcmask 1040384   ;;  %v16721_v42 = vrot.slane %v11696_v58, 7 }
 0x2a3   : > { %16702 = vst [vmem:[#allocation238_spill] sm:$0xff] %v11750_v61  ;;  %v11753_v19 = vsel %vm16703_vm8, %v2405_v4, %v2407_v21  ;;  %vm5423_vm10 = vmand %vm5391_vm12, %vm16710_vm6  ;;  %v11766_v21 = vpop.f32.mrb[25].mxu1  ;;  %v16711_v4 = vld [vmem:[#allocation100_spill] sm:$0xff]  ;;  %vm16713_vm8 = vcmp.ge.s32.totalorder %v8320_v37, 0  ;;  %v2295_v32 = vpop.f32.mrb[61].mxu0  ;;  %vm16716_vm6 = vcmp.lt.s32.totalorder %v8320_v37, 16  ;;  %v11789_v28 = vsel %vm16719_vm4, %v16718_v40, %v1146_v26 }
 0x2a4   : > { %16704 = vst [vmem:[#allocation239_spill] sm:$0xff] %v11753_v19  ;;  %v5455_v1 = vsel %vm5423_vm10, 1, %v15824_v54  ;;  %vm5390_vm9 = vmand %vm11557_vm3, %vm16713_vm8  ;;  %v2411_v19 = vrot.slane %v2295_v32, 1  ;;  %v11781_v41 = vpop.f32.mrb[26].mxu1  ;;  %v11783_v61 = vpop.f32.mrb[62].mxu0  ;;  %v16727_v32 = vld [vmem:[#allocation158_spill] sm:$0xff] }
 0x2a5   : > { %5502 = vperm.xlu1 %7784, %v5455_v1   ;;  %vm5422_vm0 = vmand %vm5390_vm9, %vm16716_vm6  ;;  %16720 = vst [vmem:[#allocation49_spill] sm:$0xff] %v11789_v28  ;;  %vm16726_vm9 = vcmp.ge.s32.totalorder %v8795_v31, 0  ;;  %vm16728_vm6 = vnez %v16727_v32  ;;  %v2415_v46 = vrot.slane %v7466_v24, 1  ;;  %v11808_v63 = vpop.f32.mrb[27].mxu1  ;;  %v16733_v24 = vrot.slane %v11698_v10, 1  ;;  %v2298_v40 = vpop.f32.mrb[63].mxu0 }
 0x2a6   : > { %vm16722_vm8 = vmmov %vm16719_vm4  ;;  %v5454_v1 = vsel %vm5422_vm0, 1, %v15824_v54  ;;  %16729 = vst [vmem:[#allocation100_spill] sm:$0xff] %v11804_v49  ;;  %vm16732_vm0 = vcmp.lt.s32.totalorder %v8795_v31, 16  ;;  %v16737_v28 = vld [vmem:[#allocation41_spill] sm:$0xff]  ;;  %v11831_v57 = vpop.permute.xlu1 %4351  ;;  %v16744_v10 = vrot.slane %v11783_v61, 1  ;;  %v16747_v50 = vrot.slane %v11781_v41, 7 }
 0x2a7   : > { %v11794_v3 = vsel %vm16722_vm8, %v1150_v38, %v16721_v42  ;;  %vm16724_vm13 = vmmov %vm16719_vm4  ;;  %v16730_v38 = vld [vmem:[#allocation99_spill] sm:$0xff]  ;;  %5499 = vperm.xlu0 %7783, %v5454_v1   ;;  %vm16736_vm4 = vcmask 130048   ;;  %16743 = vst [vmem:[#allocation102_spill] sm:$0xff] %v11831_v57 }
 0x2a8   : > { %16723 = vst [vmem:[#allocation51_spill] sm:$0xff] %v11794_v3  ;;  %v11797_v37 = vsel %vm16724_vm13, %v1146_v26, %v1148_v6  ;;  %vm3686_vm10 = vmand %vm16728_vm6, %vm16726_vm9  ;;  %v16731_v6 = vld [vmem:[#allocation157_spill] sm:$0xff]  ;;  %v7878_v26 = vld [vmem:[%s14985_s1 + $0xc8] sm:$0xff]  ;;  %7619 = vmatmul.mubr.msk.bf16.gmra.mrb[132].mxu1 %vm16736_vm4, %v9904_v36  ;;  %v16746_v36 = vrot.slane %v11205_v47, 7 }
 0x2a9   : > { %16725 = vst [vmem:[#allocation52_spill] sm:$0xff] %v11797_v37  ;;  %vm3718_vm8 = vmand %vm3686_vm10, %vm16732_vm0  ;;  %vm4856_vm9 = vcmp.ge.s32.totalorder %v7878_v26, 4294967295  ;;  %vm4888_vm14 = vcmp.lt.s32.totalorder %v7878_v26, 15  ;;  %v16738_v1 = vld [vmem:[#allocation155_spill] sm:$0xff]  ;;  %v16741_v3 = vld [vmem:[#allocation161_spill] sm:$0xff]  ;;  %7622 = vmatprep.mubr.msk.bf16.mxu1 %vm16736_vm4, %v9977_v7 }
 0x2aa   : > { %vm16734_vm7 = vmmov %vm16695_vm2  ;;  %v3750_v49 = vsel %vm3718_vm8, 1, %v15824_v54  ;;  %v16739_v37 = vld [vmem:[#allocation39_spill] sm:$0xff]  ;;  %vm16742_vm0 = vnez %v16741_v3  ;;  %v16752_v47 = vld [vmem:[#allocation53_spill] sm:$0xff] }
 0x2ab   : > { %v11820_v42 = vsel %vm16734_vm7, %v16733_v24, %v2411_v19  ;;  %vm16740_vm10 = vcmp.ge.s32.totalorder %v16739_v37, 0  ;;  %v11836_v24 = vsel %vm16734_vm7, %v2415_v46, %v16744_v10  ;;  %vm16748_vm8 = vmmov %vm16724_vm13  ;;  %3837 = vperm.xlu1 %7784, %v3750_v49   ;;  %vm16751_vm12 = vcmp.lt.s32.totalorder %v16739_v37, 16  ;;  %v11855_v7 = vld [vmem:[%s14985_s1 + $0x48] sm:$0xff]  ;;  %v11867_v10 = vpop.permute.xlu0 %4348 }
 0x2ac   : > { %16735 = vst [vmem:[#allocation156_spill] sm:$0xff] %v11820_v42  ;;  %vm3685_vm2 = vmand %vm16742_vm0, %vm16740_vm10  ;;  %v2413_v42 = vrot.slane %v2298_v40, 1  ;;  %v1187_v12 = vsel %vm16748_vm8, %v16747_v50, %v16746_v36  ;;  %v7879_v40 = vld [vmem:[%s14985_s1 + $0xc0] sm:$0xff]  ;;  %vm16759_vm8 = vcmp.eq.s32.totalorder %v16708_v29, 1  ;;  %vm16764_vm13 = vcmp.eq.s32.totalorder %v16731_v6, 1 }
 0x2ad   : > { %16745 = vst [vmem:[#allocation101_spill] sm:$0xff] %v11836_v24  ;;  %vm3717_vm15 = vmand %vm3685_vm2, %vm16751_vm12  ;;  %vm4887_vm4 = vcmp.lt.s32.totalorder %v7879_v40, 15  ;;  %v7408_v24 = vpop.f32.mrb[28].mxu1  ;;  %v1577_v25 = vsel %vm16759_vm8, %v11231_v2, 0.0  ;;  %v2748_v29 = vsel %vm16764_vm13, %v11308_v14, 0.0  ;;  %v11891_v2 = vpop.f32.mrb[64].mxu0 }
 0x2ae   : > { %v3749_v50 = vsel %vm3717_vm15, 1, %v15824_v54  ;;  %vm11863_vm2 = vmand %vm4856_vm9, %vm4888_vm14  ;;  %16755 = vst [vmem:[#allocation158_spill] sm:$0xff] %v11867_v10  ;;  %v11873_v57 = vsel %vm16734_vm7, %v2413_v42, %v2415_v46  ;;  %vm16761_vm14 = vcmp.ge.s32.totalorder %v8751_v27, 1  ;;  %v1678_v26 = vpop.f32.mrb[29].mxu1  ;;  %vm16765_vm8 = vcmp.eq.s32.totalorder %v16707_v18, 1  ;;  %v16767_v10 = vld [vmem:[#allocation164_spill] sm:$0xff]  ;;  %v11907_v14 = vpop.permute.xlu1 %5484 }
 0x2af   : > { %vm16756_vm12 = vmmov %vm16734_vm7  ;;  %16758 = vst [vmem:[#allocation157_spill] sm:$0xff] %v11873_v57  ;;  %3834 = vperm.xlu0 %7783, %v3749_v50   ;;  %vm16763_vm7 = vcmp.eq.s32.totalorder %v16715_v9, 1  ;;  %v16766_v50 = vld [vmem:[#allocation104_spill] sm:$0xff]  ;;  %vm16771_vm10 = vcmp.eq.s32.totalorder %v16711_v4, 1  ;;  %v2311_v6 = vpop.f32.mrb[65].mxu0  ;;  %v7409_v4 = vpop.f32.mrb[30].mxu1 }
 0x2b0   : > { %v11870_v36 = vsel %vm16756_vm12, %v2411_v19, %v2413_v42  ;;  %vm4952_vm9 = vmand %vm11863_vm2, %vm16761_vm14  ;;  %vm16762_vm12 = vcmp.eq.s32.totalorder %v16709_v30, 1  ;;  %v2097_v46 = vsel %vm16763_vm7, %v7408_v24, 0.0  ;;  %v1575_v42 = vsel %vm16765_vm8, %v11250_v53, 0.0  ;;  %16769 = vst [vmem:[#allocation41_spill] sm:$0xff] %v11907_v14  ;;  %v16773_v24 = vld [vmem:[#allocation105_spill] sm:$0xff]  ;;  %v16774_v57 = vld [vmem:[#allocation160_spill] sm:$0xff] }
 0x2b1   : > { %16757 = vst [vmem:[#allocation99_spill] sm:$0xff] %v11870_v36  ;;  %v1576_v19 = vsel %vm16762_vm12, %v11245_v33, 0.0  ;;  %vm16768_vm12 = vcmp.lt.s32.totalorder %v8751_v27, 17  ;;  %v11903_v33 = vld [vmem:[%s14985_s1 + $0x40] sm:$0xff]  ;;  %vm16770_vm8 = vcmp.eq.s32.totalorder %v16706_v55, 1  ;;  %v2095_v18 = vsel %vm16771_vm10, %v1678_v26, 0.0 }
 0x2b2   : > { %vm4984_vm15 = vmand %vm4952_vm9, %vm16768_vm12  ;;  %v2129_v30 = vadd.f32 %v2097_v46, %v1576_v19  ;;  %v1574_v53 = vsel %vm16770_vm8, %v1187_v12, 0.0  ;;  %vm16772_vm9 = vcmp.eq.s32.totalorder %v10316_v15, 1  ;;  %vm2070_vm12 = vcmp.eq.s32.totalorder %v16773_v24, 1  ;;  %v16779_v46 = vld [vmem:[#allocation162_spill] sm:$0xff]  ;;  %v16828_v24 = vld [vmem:[#allocation107_spill] sm:$0xff] }
 0x2b3   : > { %v2746_v9 = vsel %vm16772_vm9, %v11339_v56, 0.0  ;;  %v5016_v36 = vsel %vm4984_vm15, 1, %v15824_v54  ;;  %vm16775_vm7 = vcmp.ge.s32.totalorder %v7879_v40, 4294967295  ;;  %v2127_v12 = vadd.f32 %v2095_v18, %v1574_v53  ;;  %v7471_v56 = vpop.f32.mrb[66].mxu0  ;;  %v11933_v40 = vpop.permute.xlu0 %5481  ;;  %v7885_v19 = vld [vmem:[%s14985_s1 + $0x50] sm:$0xff] }
 0x2b4   : > { %vm11921_vm14 = vmand %vm16775_vm7, %vm4887_vm4  ;;  %v2419_v55 = vrot.slane %v2311_v6, 1  ;;  %vm16778_vm10 = vcmp.eq.s32.totalorder %v16712_v35, 1  ;;  %5099 = vperm.xlu1 %7784, %v5016_v36   ;;  %vm16780_vm9 = vcmp.ge.s32.totalorder %v8774_v17, 1  ;;  %16781 = vst [vmem:[#allocation155_spill] sm:$0xff] %v11933_v40  ;;  %v11935_v26 = vadd.f32 %v2748_v29, %v2129_v30  ;;  %v16783_v6 = vld [vmem:[#allocation103_spill] sm:$0xff] }
 0x2b5   : > { %v2749_v15 = vsel %vm16778_vm10, %v11382_v62, 0.0  ;;  %vm4951_vm15 = vmand %vm11921_vm14, %vm16780_vm9  ;;  %v2329_v53 = vrot.slane %v11891_v2, 1  ;;  %vm16782_vm4 = vcmp.eq.s32.totalorder %v16717_v0, 1  ;;  %v2330_v35 = vrot.slane %v7471_v56, 1  ;;  %v1681_v62 = vpop.f32.mrb[31].mxu1  ;;  %v2314_v0 = vpop.f32.mrb[67].mxu0 }
 0x2b6   : > { %v2098_v18 = vsel %vm16782_vm4, %v7409_v4, 0.0  ;;  %vm16784_vm10 = vcmp.lt.s32.totalorder %v8774_v17, 17  ;;  %v11943_v36 = vadd.f32 %v2746_v9, %v2127_v12  ;;  %v16785_v14 = vrot.slane %v11783_v61, 1  ;;  %v11959_v9 = vpop.permute.xlu1 %3819  ;;  %v16796_v4 = vld [vmem:[#allocation36_spill] sm:$0xff] }
 0x2b7   : > { %vm4983_vm8 = vmand %vm4951_vm15, %vm16784_vm10  ;;  %vm16786_vm9 = vcmask 1046528   ;;  %v2130_v29 = vadd.f32 %v2098_v18, %v1577_v25  ;;  %vm16787_vm13 = vcmp.eq.s32.totalorder %v16730_v38, 1  ;;  %vm16788_vm4 = vcmask 130048   ;;  %16790 = vst [vmem:[#allocation39_spill] sm:$0xff] %v11959_v9  ;;  %v16798_v56 = vld [vmem:[#allocation64_spill] sm:$0xff] }
 0x2b8   : > { %v11948_v40 = vsel %vm16786_vm9, %v16785_v14, %v2419_v55  ;;  %v2096_v2 = vsel %vm16787_vm13, %v1681_v62, 0.0  ;;  %7623 = vmatmul.mubr.msk.bf16.gmra.mrb[136].mxu1 %vm16788_vm4, %v9969_v8  ;;  %v5015_v30 = vsel %vm4983_vm8, 1, %v15824_v54  ;;  %vm16789_vm7 = vcmp.ge.s32.totalorder %v8706_v13, 4294967295  ;;  %vm16791_vm10 = vmmov %vm16786_vm9  ;;  %v16864_v9 = vld [vmem:[#allocation72_spill] sm:$0xff] }
 0x2b9   : > { %vm5993_vm15 = vmand %vm11419_vm5, %vm16789_vm7  ;;  %v11962_v61 = vsel %vm16791_vm10, %v2329_v53, %v2330_v35  ;;  %v16792_v25 = vrot.slane %v11274_v44, 1  ;;  %v2128_v14 = vadd.f32 %v2096_v2, %v1575_v42  ;;  %5096 = vperm.xlu0 %7783, %v5015_v30   ;;  %vm16794_vm8 = vcmp.lt.s32.totalorder %v8706_v13, 15  ;;  %v11987_v13 = vpop.permute.xlu0 %3816  ;;  %v16812_v30 = vld [vmem:[#allocation108_spill] sm:$0xff] }
 0x2ba   : > { %vm16793_vm13 = vmmov %vm16788_vm4  ;;  %v11973_v8 = vadd.f32 %v2749_v15, %v2130_v29  ;;  %vm16795_vm5 = vcmp.eq.s32.totalorder %v16738_v1, 1  ;;  %v2421_v12 = vrot.slane %v2314_v0, 1  ;;  %vm16797_vm7 = vcmp.eq.s32.totalorder %v16737_v28, 1  ;;  %16800 = vst [vmem:[#allocation161_spill] sm:$0xff] %v11987_v13  ;;  %v16801_v1 = vld [vmem:[#allocation193_spill] sm:$0xff]  ;;  %v7412_v15 = vpop.f32.mrb[32].mxu1 }
 0x2bb   : > { %v11967_v38 = vsel %vm16786_vm9, %v2330_v35, %v16792_v25  ;;  %7626 = vmatprep.mubr.msk.bf16.mxu1 %vm16793_vm13, %v10042_v34  ;;  %vm6025_vm4 = vmand %vm5993_vm15, %vm16794_vm8  ;;  %v2747_v52 = vsel %vm16795_vm5, %v11342_v60, 0.0  ;;  %v1578_v44 = vsel %vm16797_vm7, %v16796_v4, 0.0  ;;  %vm16799_vm9 = vcmp.ge.s32.totalorder %v8724_v20, 4294967295  ;;  %v16803_v28 = vld [vmem:[#allocation192_spill] sm:$0xff]  ;;  %v16805_v35 = vld [vmem:[#allocation59_spill] sm:$0xff]  ;;  %v12008_v29 = vpop.f32.mrb[68].mxu0 }
 0x2bc   : > { %v6057_v42 = vsel %vm6025_vm4, 1, %v15824_v54  ;;  %vm5992_vm15 = vmand %vm11453_vm11, %vm16799_vm9  ;;  %v11989_v34 = vadd.f32 %v2747_v52, %v2128_v14  ;;  %vm16802_vm13 = vcmp.eq.s32.totalorder %v16750_v59, 1  ;;  %vm16804_vm8 = vcmp.eq.s32.totalorder %v16749_v16, 1  ;;  %v1694_v2 = vpop.f32.mrb[33].mxu1  ;;  %v16810_v16 = vld [vmem:[#allocation194_spill] sm:$0xff]  ;;  %v12027_v14 = vpop.f32.mrb[69].mxu0 }
 0x2bd   : > { %v1580_v60 = vsel %vm16802_vm13, %v16801_v1, 0.0  ;;  %v1581_v18 = vsel %vm16804_vm8, %v16803_v28, 0.0  ;;  %6136 = vperm.xlu1 %7784, %v6057_v42   ;;  %vm16806_vm5 = vcmp.lt.s32.totalorder %v8724_v20, 15  ;;  %vm16807_vm11 = vmmov %vm16791_vm10  ;;  %vm16811_vm13 = vcmp.eq.s32.totalorder %v16752_v47, 1  ;;  %v16813_v20 = vld [vmem:[#allocation62_spill] sm:$0xff]  ;;  %16819 = vst [vmem:[#allocation43_spill] sm:$0xff] %v12027_v14 }
 0x2be   : > { %vm6024_vm7 = vmand %vm5992_vm15, %vm16806_vm5  ;;  %v12001_v22 = vsel %vm16807_vm11, %v2419_v55, %v2421_v12  ;;  %v1579_v0 = vsel %vm16811_vm13, %v16810_v16, 0.0  ;;  %vm16814_vm5 = vcmp.lt.s32.totalorder %v11855_v7, 15  ;;  %vm16815_vm11 = vcmp.ge.s32.totalorder %v11855_v7, 4294967295  ;;  %v7413_v52 = vpop.f32.mrb[34].mxu1  ;;  %v12033_v7 = vpop.permute.xlu1 %5081 }
 0x2bf   : > { %vm16808_vm9 = vmmov %vm16791_vm10  ;;  %vm16809_vm10 = vcmp.eq.s32.totalorder %v16760_v5, 1  ;;  %v6056_v55 = vsel %vm6024_vm7, 1, %v15824_v54  ;;  %v16816_v5 = vmov 0  ;;  %16822 = vst [vmem:[#allocation54_spill] sm:$0xff] %v12033_v7  ;;  %v15611_v4 = vrot.slane %v11766_v21, 7 }
 0x2c0   : > { %v12004_v62 = vsel %vm16808_vm9, %v2421_v12, %v2329_v53  ;;  %v2101_v59 = vsel %vm16809_vm10, %v7412_v15, 0.0  ;;  %vm12020_vm9 = vmand %vm16815_vm11, %vm16814_vm5  ;;  %v15612_v53 = vrot.slane %v11808_v63, 7  ;;  %vm16818_vm10 = vcmp.eq.s32.totalorder %v16766_v50, 1  ;;  %6133 = vperm.xlu0 %7783, %v6056_v55   ;;  %v16820_v12 = vld [vmem:[#allocation13_spill] sm:$0xff] }
 0x2c1   : > { %v16817_v5 = vsel %vm12020_vm9, 4294967295, %v16816_v5  ;;  %v2133_v25 = vadd.f32 %v2101_v59, %v1580_v60  ;;  %v2099_v47 = vsel %vm16818_vm10, %v1694_v2, 0.0  ;;  %vm16821_vm7 = vcmp.ge.s32.totalorder %v16820_v12, 1  ;;  %v12041_v60 = vpop.f32.mrb[70].mxu0  ;;  %v16824_v15 = vld [vmem:[#allocation57_spill] sm:$0xff]  ;;  %v16826_v2 = vld [vmem:[#allocation199_spill] sm:$0xff] }
 0x2c2   : > { %vm4936_vm13 = vmand %vm12020_vm9, %vm16821_vm7  ;;  %vm16823_vm5 = vcmp.eq.s32.totalorder %v16767_v10, 1  ;;  %v2131_v1 = vadd.f32 %v2099_v47, %v1578_v44  ;;  %v2102_v50 = vsel %vm2070_vm12, %v7413_v52, 0.0  ;;  %vm16825_vm10 = vcmp.lt.s32.totalorder %v16820_v12, 17  ;;  %v1697_v44 = vpop.f32.mrb[35].mxu1  ;;  %v12052_v16 = vpop.f32.mrb[71].mxu0  ;;  %v16835_v47 = vld [vmem:[#allocation121_spill] sm:$0xff] }
 0x2c3   : > { %v2752_v42 = vsel %vm16823_vm5, %v11395_v51, 0.0  ;;  %vm4968_vm15 = vmand %vm4936_vm13, %vm16825_vm10  ;;  %v1063_v28 = vrot.slane %v11755_v39, 7  ;;  %vm16827_vm7 = vcmp.eq.s32.totalorder %v16774_v57, 1  ;;  %v2134_v51 = vadd.f32 %v2102_v50, %v1581_v18  ;;  %v16837_v52 = vld [vmem:[#allocation159_spill] sm:$0xff]  ;;  %v16845_v50 = vld [vmem:[#allocation200_spill] sm:$0xff] }
 0x2c4   : > { %v12047_v59 = vadd.f32 %v2752_v42, %v2133_v25  ;;  %v2750_v10 = vsel %vm16827_vm7, %v16826_v2, 0.0  ;;  %v5000_v55 = vsel %vm4968_vm15, 1, %v15824_v54  ;;  %vm16829_vm5 = vcmp.lt.s32.totalorder %v11903_v33, 15  ;;  %v12078_v42 = vpop.permute.xlu0 %5078 }
 0x2c5   : > { %vm16830_vm13 = vcmp.ge.s32.totalorder %v11903_v33, 4294967295  ;;  %v16831_v39 = vmov 0  ;;  %v12064_v25 = vadd.f32 %v2750_v10, %v2131_v1  ;;  %vm16833_vm7 = vcmp.eq.s32.totalorder %v16779_v46, 1  ;;  %5051 = vperm.xlu1 %7784, %v5000_v55   ;;  %v16838_v33 = vld [vmem:[#allocation15_spill] sm:$0xff]  ;;  %16840 = vst [vmem:[#allocation53_spill] sm:$0xff] %v12078_v42  ;;  %v16846_v10 = vld [vmem:[#allocation110_spill] sm:$0xff] }
 0x2c6   : > { %vm12060_vm10 = vmand %vm16830_vm13, %vm16829_vm5  ;;  %v2753_v57 = vsel %vm16833_vm7, %v11479_v11, 0.0  ;;  %vm16834_vm11 = vcmp.eq.s32.totalorder %v16783_v6, 1  ;;  %vm16836_vm12 = vcmask 130048   ;;  %vm2719_vm15 = vcmp.eq.s32.totalorder %v16837_v52, 1  ;;  %v16841_v11 = vld [vmem:[#allocation133_spill] sm:$0xff]  ;;  %v16850_v55 = vld [vmem:[#allocation74_spill] sm:$0xff] }
 0x2c7   : > { %v16832_v39 = vsel %vm12060_vm10, 4294967295, %v16831_v39  ;;  %v2100_v18 = vsel %vm16834_vm11, %v1697_v44, 0.0  ;;  %7627 = vmatmul.mubr.msk.bf16.gmra.mrb[140].mxu1 %vm16836_vm12, %v16835_v47  ;;  %vm16839_vm5 = vcmp.ge.s32.totalorder %v16838_v33, 1  ;;  %v12080_v1 = vadd.f32 %v2753_v57, %v2134_v51  ;;  %vm16842_vm7 = vmmov %vm16836_vm12  ;;  %v16847_v44 = vld [vmem:[#allocation109_spill] sm:$0xff]  ;;  %v16853_v52 = vld [vmem:[#allocation63_spill] sm:$0xff]  ;;  %v12122_v42 = vpop.f32.mrb[72].mxu0 }
 0x2c8   : > { %vm4935_vm13 = vmand %vm12060_vm10, %vm16839_vm5  ;;  %v2132_v46 = vadd.f32 %v2100_v18, %v1579_v0  ;;  %7630 = vmatprep.mubr.msk.bf16.mxu1 %vm16842_vm7, %v16841_v11  ;;  %vm16843_vm11 = vcmask 1040384   ;;  %vm16844_vm12 = vcmp.lt.s32.totalorder %v16838_v33, 17  ;;  %v2751_v2 = vsel %vm2719_vm15, %v16845_v50, 0.0  ;;  %v16851_v57 = vld [vmem:[#allocation165_spill] sm:$0xff]  ;;  %v16852_v18 = vld [vmem:[#allocation167_spill] sm:$0xff]  ;;  %v12109_v11 = vpop.permute.xlu1 %6118  ;;  %16861 = vst [vmem:[#allocation104_spill] sm:$0xff] %v12122_v42 }
 0x2c9   : > { %v12087_v6 = vsel %vm16843_vm11, %v15612_v53, %v1063_v28  ;;  %vm4967_vm8 = vmand %vm4935_vm13, %vm16844_vm12  ;;  %vm2073_vm5 = vcmp.eq.s32.totalorder %v16846_v10, 1  ;;  %vm2074_vm4 = vcmp.eq.s32.totalorder %v16847_v44, 1  ;;  %v16848_v0 = vrot.slane %v11696_v58, 7  ;;  %16855 = vst [vmem:[#allocation106_spill] sm:$0xff] %v12109_v11  ;;  %v7416_v58 = vpop.f32.mrb[36].mxu1  ;;  %v16859_v53 = vld [vmem:[#allocation196_spill] sm:$0xff] }
 0x2ca   : > { %vm16849_vm10 = vmmov %vm16843_vm11  ;;  %vm2722_vm9 = vcmp.eq.s32.totalorder %v16852_v18, 1  ;;  %v4999_v47 = vsel %vm4967_vm8, 1, %v15824_v54  ;;  %vm16854_vm15 = vcmp.ge.s32.totalorder %v16853_v52, 4294967295  ;;  %v12111_v50 = vadd.f32 %v2751_v2, %v2132_v46  ;;  %v1710_v46 = vpop.f32.mrb[37].mxu1  ;;  %v16868_v10 = vld [vmem:[#allocation197_spill] sm:$0xff]  ;;  %v16969_v42 = vld [vmem:[#allocation130_spill] sm:$0xff] }
 0x2cb   : > { %v12099_v51 = vsel %vm16849_vm10, %v16848_v0, %v15611_v4  ;;  %vm5977_vm13 = vmand %vm11535_vm1, %vm16854_vm15  ;;  %v16856_v0 = vld [vmem:[#allocation69_spill] sm:$0xff]  ;;  %v16857_v4 = vld [vmem:[#allocation170_spill] sm:$0xff]  ;;  %5048 = vperm.xlu0 %7783, %v4999_v47   ;;  %vm16858_vm7 = vcmp.lt.s32.totalorder %v16853_v52, 15  ;;  %vm16860_vm8 = vcmp.eq.s32.totalorder %v16798_v56, 1  ;;  %v2105_v43 = vsel %vm2073_vm5, %v7416_v58, 0.0  ;;  %v12135_v56 = vpop.permute.xlu0 %6115 }
 0x2cc   : > { %vm1554_vm10 = vcmp.eq.s32.totalorder %v16856_v0, 1  ;;  %vm2724_vm12 = vcmp.eq.s32.totalorder %v16857_v4, 1  ;;  %vm6009_vm11 = vmand %vm5977_vm13, %vm16858_vm7  ;;  %v1584_v7 = vsel %vm16860_vm8, %v16859_v53, 0.0  ;;  %v16862_v2 = vrot.slane %v11781_v41, 7  ;;  %v16865_v52 = vld [vmem:[#allocation65_spill] sm:$0xff]  ;;  %16867 = vst [vmem:[#allocation164_spill] sm:$0xff] %v12135_v56 }
 0x2cd   : > { %vm16863_vm1 = vcmask 1040384   ;;  %v6041_v47 = vsel %vm6009_vm11, 1, %v15824_v54  ;;  %vm16866_vm7 = vcmp.ge.s32.totalorder %v16865_v52, 4294967295  ;;  %v2137_v53 = vadd.f32 %v2105_v43, %v1584_v7  ;;  %v16875_v43 = vld [vmem:[#allocation23_spill] sm:$0xff]  ;;  %v16881_v4 = vld [vmem:[#allocation209_spill] sm:$0xff] }
 0x2ce   : > { %v12127_v11 = vsel %vm16863_vm1, %v1063_v28, %v16862_v2  ;;  %vm5976_vm13 = vmand %vm11557_vm3, %vm16866_vm7  ;;  %vm16869_vm5 = vcmp.eq.s32.totalorder %v16805_v35, 1  ;;  %vm16870_vm8 = vcmp.eq.s32.totalorder %v16812_v30, 1  ;;  %v12142_v28 = vpop.f32.mrb[73].mxu0  ;;  %v16872_v2 = vld [vmem:[#allocation169_spill] sm:$0xff]  ;;  %6088 = vperm.xlu1 %7784, %v6041_v47   ;;  %vm16873_vm11 = vcmp.lt.s32.totalorder %v16865_v52, 15 }
 0x2cf   : > { %v1582_v58 = vsel %vm16869_vm5, %v16868_v10, 0.0  ;;  %v2103_v41 = vsel %vm16870_vm8, %v1710_v46, 0.0  ;;  %16871 = vst [vmem:[#allocation105_spill] sm:$0xff] %v12142_v28  ;;  %vm2725_vm1 = vcmp.eq.s32.totalorder %v16872_v2, 1  ;;  %vm6008_vm15 = vmand %vm5976_vm13, %vm16873_vm11  ;;  %v2756_v56 = vsel %vm2724_vm12, %v16874_v45, 0.0  ;;  %v7417_v10 = vpop.f32.mrb[38].mxu1  ;;  %v12172_v45 = vpop.permute.xlu1 %5033 }
 0x2d0   : > { %v2135_v7 = vadd.f32 %v2103_v41, %v1582_v58  ;;  %vm16876_vm3 = vcmp.eq.s32.totalorder %v16813_v20, 1  ;;  %v12153_v30 = vpop.f32.mrb[74].mxu0  ;;  %v16878_v46 = vld [vmem:[#allocation67_spill] sm:$0xff]  ;;  %v6040_v13 = vsel %vm6008_vm15, 1, %v15824_v54  ;;  %vm16879_vm5 = vcmp.ge.s32.totalorder %v8795_v31, 4294967295  ;;  %v1713_v58 = vpop.f32.mrb[39].mxu1 }
 0x2d1   : > { %v1585_v35 = vsel %vm16876_vm3, %v16875_v43, 0.0  ;;  %16877 = vst [vmem:[#allocation160_spill] sm:$0xff] %v12153_v30  ;;  %vm4272_vm13 = vmand %vm16728_vm6, %vm16879_vm5  ;;  %v12161_v47 = vadd.f32 %v2756_v56, %v2137_v53  ;;  %v2754_v52 = vsel %vm2722_vm9, %v16881_v4, 0.0  ;;  %v2106_v20 = vsel %vm2074_vm4, %v7417_v10, 0.0  ;;  %v12168_v41 = vpop.f32.mrb[75].mxu0  ;;  %6085 = vperm.xlu0 %7783, %v6040_v13   ;;  %v16885_v53 = vld [vmem:[#allocation201_spill] sm:$0xff] }
 0x2d2   : > { %16882 = vst [vmem:[#allocation103_spill] sm:$0xff] %v12168_v41  ;;  %vm16883_vm12 = vcmp.lt.s32.totalorder %v8795_v31, 15  ;;  %16884 = vst [vmem:[#allocation36_spill] sm:$0xff] %v12172_v45  ;;  %v12174_v32 = vadd.f32 %v2754_v52, %v2135_v7  ;;  %v2138_v56 = vadd.f32 %v2106_v20, %v1585_v35  ;;  %vm16886_vm6 = vcmp.eq.s32.totalorder %v16824_v15, 1  ;;  %v16888_v43 = vld [vmem:[#allocation131_spill] sm:$0xff]  ;;  %v16891_v15 = vld [vmem:[#allocation145_spill] sm:$0xff] }
 0x2d3   : > { %16880 = vst [vmem:[#allocation162_spill] sm:$0xff] %v12161_v47  ;;  %vm4304_vm15 = vmand %vm4272_vm13, %vm16883_vm12  ;;  %v1583_v18 = vsel %vm16886_vm6, %v16885_v53, 0.0  ;;  %vm16887_vm9 = vcmp.eq.s32.totalorder %v16828_v24, 1  ;;  %vm16889_vm4 = vcmask 130048   ;;  %vm16890_vm8 = vcmp.ge.s32.totalorder %v16739_v37, 4294967295  ;;  %v16898_v52 = vld [vmem:[#allocation210_spill] sm:$0xff] }
 0x2d4   : > { %v2104_v44 = vsel %vm16887_vm9, %v1713_v58, 0.0  ;;  %7631 = vmatmul.mubr.msk.bf16.gmra.mrb[144].mxu1 %vm16889_vm4, %v16888_v43  ;;  %v4336_v13 = vsel %vm4304_vm15, 1, %v15824_v54  ;;  %vm4271_vm11 = vmand %vm16742_vm0, %vm16890_vm8  ;;  %v2757_v7 = vsel %vm2725_vm1, %v11563_v48, 0.0  ;;  %v16893_v24 = vrot.slane %v11808_v63, 7  ;;  %v16900_v2 = vld [vmem:[#allocation113_spill] sm:$0xff]  ;;  %v16901_v20 = vld [vmem:[#allocation112_spill] sm:$0xff]  ;;  %v12215_v58 = vpop.permute.xlu0 %5030 }
 0x2d5   : > { %v2136_v35 = vadd.f32 %v2104_v44, %v1583_v18  ;;  %vm16892_vm3 = vmmov %vm16889_vm4  ;;  %v16894_v10 = vrot.slane %v11766_v21, 7  ;;  %vm16895_vm5 = vcmask 1040384   ;;  %4423 = vperm.xlu1 %7784, %v4336_v13   ;;  %vm16896_vm13 = vcmp.lt.s32.totalorder %v16739_v37, 15  ;;  %v16902_v63 = vld [vmem:[#allocation84_spill] sm:$0xff]  ;;  %16904 = vst [vmem:[#allocation193_spill] sm:$0xff] %v12215_v58  ;;  %v7420_v53 = vpop.f32.mrb[40].mxu1 }
 0x2d6   : > { %7634 = vmatprep.mubr.msk.bf16.mxu1 %vm16892_vm3, %v16891_v15  ;;  %vm4303_vm12 = vmand %vm4271_vm11, %vm16896_vm13  ;;  %v12202_v3 = vadd.f32 %v2757_v7, %v2138_v56  ;;  %vm16899_vm0 = vcmp.eq.s32.totalorder %v16851_v57, 1  ;;  %vm2075_vm1 = vcmp.eq.s32.totalorder %v16900_v2, 1  ;;  %vm16903_vm9 = vcmp.ge.s32.totalorder %v8751_v27, 0  ;;  %v16905_v57 = vld [vmem:[#allocation117_spill] sm:$0xff]  ;;  %v16906_v18 = vld [vmem:[#allocation115_spill] sm:$0xff] }
 0x2d7   : > { %v12198_v4 = vsel %vm16895_vm5, %v16894_v10, %v16893_v24  ;;  %v2755_v48 = vsel %vm16899_vm0, %v16898_v52, 0.0  ;;  %v4335_v21 = vsel %vm4303_vm12, 1, %v15824_v54  ;;  %vm5409_vm4 = vmand %vm11863_vm2, %vm16903_vm9  ;;  %vm2077_vm8 = vcmp.eq.s32.totalorder %v16905_v57, 1  ;;  %v16907_v44 = vld [vmem:[#allocation79_spill] sm:$0xff]  ;;  %v16908_v43 = vld [vmem:[#allocation173_spill] sm:$0xff]  ;;  %v12229_v24 = vpop.f32.mrb[76].mxu0 }
 0x2d8   : > { %16897 = vst [vmem:[#allocation64_spill] sm:$0xff] %v12202_v3  ;;  %v12217_v56 = vadd.f32 %v2755_v48, %v2136_v35  ;;  %vm2078_vm11 = vcmp.eq.s32.totalorder %v16906_v18, 1  ;;  %vm2726_vm5 = vcmp.eq.s32.totalorder %v16908_v43, 1  ;;  %v16909_v13 = vld [vmem:[#allocation175_spill] sm:$0xff]  ;;  %4420 = vperm.xlu0 %7783, %v4335_v21   ;;  %vm16910_vm12 = vcmp.lt.s32.totalorder %v8751_v27, 16  ;;  %v16911_v7 = vld [vmem:[#allocation206_spill] sm:$0xff]  ;;  %v12238_v21 = vpop.permute.xlu1 %6070  ;;  %v12264_v30 = vpop.permute.xlu0 %6067 }
 0x2d9   : > { %vm2728_vm13 = vcmp.eq.s32.totalorder %v16909_v13, 1  ;;  %vm5441_vm0 = vmand %vm5409_vm4, %vm16910_vm12  ;;  %vm16912_vm9 = vcmp.eq.s32.totalorder %v16850_v55, 1  ;;  %v2109_v15 = vsel %vm2077_vm8, %v7420_v53, 0.0  ;;  %16913 = vst [vmem:[#allocation192_spill] sm:$0xff] %v12229_v24  ;;  %v1726_v10 = vpop.f32.mrb[41].mxu1  ;;  %v16914_v52 = vld [vmem:[#allocation120_spill] sm:$0xff] }
 0x2da   : > { %v1588_v35 = vsel %vm16912_vm9, %v16911_v7, 0.0  ;;  %vm2079_vm6 = vcmp.eq.s32.totalorder %v16914_v52, 1  ;;  %v16915_v48 = vld [vmem:[#allocation82_spill] sm:$0xff]  ;;  %v5473_v57 = vsel %vm5441_vm0, 1, %v15824_v54  ;;  %vm16916_vm15 = vcmp.ge.s32.totalorder %v8774_v17, 0  ;;  %16917 = vst [vmem:[#allocation59_spill] sm:$0xff] %v12238_v21 }
 0x2db   : > { %vm1561_vm3 = vcmp.eq.s32.totalorder %v16915_v48, 1  ;;  %vm5408_vm7 = vmand %vm11921_vm14, %vm16916_vm15  ;;  %v2141_v45 = vadd.f32 %v2109_v15, %v1588_v35  ;;  %v16918_v55 = vld [vmem:[#allocation203_spill] sm:$0xff]  ;;  %v2107_v7 = vsel %vm2075_vm1, %v1726_v10, 0.0  ;;  %v12245_v58 = vpop.f32.mrb[77].mxu0  ;;  %v16920_v24 = vld [vmem:[#allocation174_spill] sm:$0xff]  ;;  %5556 = vperm.xlu1 %7784, %v5473_v57   ;;  %vm16921_vm8 = vcmp.lt.s32.totalorder %v8774_v17, 16 }
 0x2dc   : > { %v1586_v53 = vsel %vm1554_vm10, %v16918_v55, 0.0  ;;  %16919 = vst [vmem:[#allocation194_spill] sm:$0xff] %v12245_v58  ;;  %vm2729_vm4 = vcmp.eq.s32.totalorder %v16920_v24, 1  ;;  %vm5440_vm12 = vmand %vm5408_vm7, %vm16921_vm8  ;;  %v2760_v21 = vsel %vm2728_vm13, %v11574_v23, 0.0  ;;  %v16922_v15 = vld [vmem:[#allocation207_spill] sm:$0xff]  ;;  %vm16923_vm15 = vcmp.eq.s32.totalorder %v16864_v9, 1 }
 0x2dd   : > { %v2139_v35 = vadd.f32 %v2107_v7, %v1586_v53  ;;  %v1589_v0 = vsel %vm16923_vm15, %v16922_v15, 0.0  ;;  %v7421_v55 = vpop.f32.mrb[42].mxu1  ;;  %v12256_v2 = vpop.f32.mrb[78].mxu0  ;;  %v16925_v10 = vld [vmem:[#allocation77_spill] sm:$0xff]  ;;  %v5472_v58 = vsel %vm5440_vm12, 1, %v15824_v54  ;;  %v16926_v57 = vld [vmem:[#allocation70_spill] sm:$0xff]  ;;  %v12266_v23 = vadd.f32 %v2760_v21, %v2141_v45 }
 0x2de   : > { %16924 = vst [vmem:[#allocation108_spill] sm:$0xff] %v12256_v2  ;;  %vm16927_vm1 = vcmp.ge.s32.totalorder %v16926_v57, 4294967295  ;;  %v16928_v41 = vld [vmem:[#allocation111_spill] sm:$0xff]  ;;  %16930 = vst [vmem:[#allocation62_spill] sm:$0xff] %v12264_v30  ;;  %v16932_v13 = vld [vmem:[#allocation218_spill] sm:$0xff]  ;;  %v2110_v53 = vsel %vm2078_vm11, %v7421_v55, 0.0  ;;  %5553 = vperm.xlu0 %7783, %v5472_v58  }
 0x2df   : > { %vm16929_vm7 = vnez %v16928_v41  ;;  %16931 = vst [vmem:[#allocation13_spill] sm:$0xff] %v12266_v23  ;;  %v2758_v9 = vsel %vm2726_vm5, %v16932_v13, 0.0  ;;  %v1729_v7 = vpop.f32.mrb[43].mxu1  ;;  %v16933_v15 = vld [vmem:[#allocation118_spill] sm:$0xff]  ;;  %vm16934_vm9 = vcmp.lt.s32.totalorder %v16926_v57, 15  ;;  %v2142_v2 = vadd.f32 %v2110_v53, %v1589_v0  ;;  %v12283_v21 = vpop.f32.mrb[79].mxu0 }
 0x2e0   : > { %vm4256_vm0 = vmand %vm16929_vm7, %vm16927_vm1  ;;  %v12276_v41 = vadd.f32 %v2758_v9, %v2139_v35  ;;  %v16936_v30 = vld [vmem:[#allocation214_spill] sm:$0xff]  ;;  %vm16937_vm12 = vcmp.eq.s32.totalorder %v16878_v46, 1  ;;  %vm16938_vm15 = vcmp.eq.s32.totalorder %v16901_v20, 1  ;;  %16939 = vst [vmem:[#allocation199_spill] sm:$0xff] %v12283_v21  ;;  %v16940_v18 = vld [vmem:[#allocation143_spill] sm:$0xff]  ;;  %vm16941_vm11 = vcmask 130048   ;;  %v12293_v0 = vpop.permute.xlu1 %4405 }
 0x2e1   : > { %vm4288_vm8 = vmand %vm4256_vm0, %vm16934_vm9  ;;  %v1587_v45 = vsel %vm16937_vm12, %v16936_v30, 0.0  ;;  %v2108_v43 = vsel %vm16938_vm15, %v1729_v7, 0.0  ;;  %7635 = vmatmul.mubr.msk.bf16.gmra.mrb[148].mxu1 %vm16941_vm11, %v16940_v18  ;;  %v16942_v55 = vld [vmem:[#allocation172_spill] sm:$0xff]  ;;  %v16943_v13 = vld [vmem:[#allocation71_spill] sm:$0xff]  ;;  %16947 = vst [vmem:[#allocation107_spill] sm:$0xff] %v12293_v0  ;;  %vm16965_vm13 = vcmp.lt.s32.totalorder %v16820_v12, 16 }
 0x2e2   : > { %16935 = vst [vmem:[#allocation57_spill] sm:$0xff] %v12276_v41  ;;  %vm2727_vm5 = vcmp.eq.s32.totalorder %v16942_v55, 1  ;;  %v4320_v58 = vsel %vm4288_vm8, 1, %v15824_v54  ;;  %vm16944_vm1 = vcmp.ge.s32.totalorder %v16943_v13, 4294967295  ;;  %v16945_v35 = vld [vmem:[#allocation114_spill] sm:$0xff]  ;;  %v16948_v30 = vld [vmem:[#allocation223_spill] sm:$0xff]  ;;  %v2140_v20 = vadd.f32 %v2108_v43, %v1587_v45  ;;  %vm16950_vm9 = vmmov %vm16941_vm11 }
 0x2e3   : > { %vm16946_vm7 = vnez %v16945_v35  ;;  %v2761_v46 = vsel %vm2729_vm4, %v16948_v30, 0.0  ;;  %v16949_v9 = vld [vmem:[#allocation153_spill] sm:$0xff]  ;;  %4375 = vperm.xlu1 %7784, %v4320_v58   ;;  %vm16951_vm12 = vcmp.lt.s32.totalorder %v16943_v13, 15  ;;  %v16953_v7 = vld [vmem:[#allocation219_spill] sm:$0xff]  ;;  %v16954_v55 = vld [vmem:[#allocation124_spill] sm:$0xff]  ;;  %v7424_v30 = vpop.f32.mrb[44].mxu1 }
 0x2e4   : > { %vm4255_vm0 = vmand %vm16946_vm7, %vm16944_vm1  ;;  %7638 = vmatprep.mubr.msk.bf16.mxu1 %vm16950_vm9, %v16949_v9  ;;  %v12302_v53 = vadd.f32 %v2761_v46, %v2142_v2  ;;  %v2759_v18 = vsel %vm2727_vm5, %v16953_v7, 0.0  ;;  %vm2081_vm8 = vcmp.eq.s32.totalorder %v16954_v55, 1  ;;  %v16955_v35 = vld [vmem:[#allocation123_spill] sm:$0xff]  ;;  %v16956_v0 = vld [vmem:[#allocation90_spill] sm:$0xff]  ;;  %vm16959_vm9 = vcmp.ge.s32.totalorder %v16820_v12, 0  ;;  %v12315_v2 = vpop.permute.xlu0 %4402  ;;  %v1742_v28 = vpop.f32.mrb[45].mxu1 }
 0x2e5   : > { %vm4287_vm15 = vmand %vm4255_vm0, %vm16951_vm12  ;;  %vm2082_vm11 = vcmp.eq.s32.totalorder %v16955_v35, 1  ;;  %v16957_v24 = vld [vmem:[#allocation177_spill] sm:$0xff]  ;;  %v16958_v45 = vld [vmem:[#allocation178_spill] sm:$0xff]  ;;  %vm16960_vm0 = vnez %v16817_v5  ;;  %16961 = vst [vmem:[#allocation159_spill] sm:$0xff] %v12315_v2  ;;  %v12317_v58 = vadd.f32 %v2759_v18, %v2140_v20  ;;  %v2113_v20 = vsel %vm2081_vm8, %v7424_v30, 0.0  ;;  %v12331_v18 = vpop.f32.mrb[80].mxu0 }
 0x2e6   : > { %16952 = vst [vmem:[#allocation121_spill] sm:$0xff] %v12302_v53  ;;  %vm2730_vm4 = vcmp.eq.s32.totalorder %v16957_v24, 1  ;;  %v4319_v43 = vsel %vm4287_vm15, 1, %v15824_v54  ;;  %vm5393_vm12 = vmand %vm16960_vm0, %vm16959_vm9  ;;  %v16963_v46 = vld [vmem:[#allocation88_spill] sm:$0xff]  ;;  %v16964_v9 = vld [vmem:[#allocation179_spill] sm:$0xff]  ;;  %vm16967_vm9 = vcmp.eq.s32.totalorder %v16902_v63, 1 }
 0x2e7   : > { %16962 = vst [vmem:[#allocation15_spill] sm:$0xff] %v12317_v58  ;;  %vm2732_vm1 = vcmp.eq.s32.totalorder %v16964_v9, 1  ;;  %4372 = vperm.xlu0 %7783, %v4319_v43   ;;  %vm5425_vm7 = vmand %vm5393_vm12, %vm16965_vm13  ;;  %v7882_v7 = vld [vmem:[%s14985_s1 + $0xd8] sm:$0xff]  ;;  %v16966_v21 = vld [vmem:[#allocation215_spill] sm:$0xff]  ;;  %vm16970_vm13 = vcmp.ge.s32.totalorder %v16838_v33, 0  ;;  %vm16971_vm12 = vnez %v16832_v39  ;;  %v12339_v43 = vpop.permute.xlu1 %5538  ;;  %v2111_v55 = vsel %vm2079_vm6, %v1742_v28, 0.0 }
 0x2e8   : > { %v1592_v2 = vsel %vm16967_vm9, %v16966_v21, 0.0  ;;  %16968 = vst [vmem:[#allocation133_spill] sm:$0xff] %v12331_v18  ;;  %v5457_v12 = vsel %vm5425_vm7, 1, %v15824_v54  ;;  %vm5392_vm10 = vmand %vm16971_vm12, %vm16970_vm13  ;;  %v16973_v63 = vld [vmem:[#allocation216_spill] sm:$0xff]  ;;  %vm16974_vm9 = vcmp.eq.s32.totalorder %v16907_v44, 1  ;;  %v12346_v30 = vpop.f32.mrb[81].mxu0  ;;  %v12365_v53 = vpop.permute.xlu0 %5535 }
 0x2e9   : > { %16972 = vst [vmem:[#allocation200_spill] sm:$0xff] %v12339_v43  ;;  %v2145_v14 = vadd.f32 %v2113_v20, %v1592_v2  ;;  %v1590_v21 = vsel %vm16974_vm9, %v16973_v63, 0.0  ;;  %16975 = vst [vmem:[#allocation110_spill] sm:$0xff] %v12346_v30  ;;  %v16976_v18 = vld [vmem:[#allocation89_spill] sm:$0xff]  ;;  %5508 = vperm.xlu1 %7784, %v5457_v12   ;;  %vm16977_vm7 = vcmp.lt.s32.totalorder %v16838_v33, 16  ;;  %vm4890_vm15 = vcmp.lt.s32.totalorder %v7882_v7, 15 }
 0x2ea   : > { %vm5424_vm5 = vmand %vm5392_vm10, %vm16977_vm7  ;;  %v16978_v13 = vld [vmem:[#allocation225_spill] sm:$0xff]  ;;  %v2143_v20 = vadd.f32 %v2111_v55, %v1590_v21  ;;  %v7425_v52 = vpop.f32.mrb[46].mxu1  ;;  %v12357_v28 = vpop.f32.mrb[82].mxu0  ;;  %v16981_v63 = vld [vmem:[#allocation87_spill] sm:$0xff]  ;;  %16986 = vst [vmem:[#allocation74_spill] sm:$0xff] %v12365_v53  ;;  %vm16993_vm7 = vcmp.eq.s32.totalorder %v16925_v10, 1 }
 0x2eb   : > { %v2764_v2 = vsel %vm2732_vm1, %v16978_v13, 0.0  ;;  %v16979_v43 = vld [vmem:[#allocation221_spill] sm:$0xff]  ;;  %16980 = vst [vmem:[#allocation109_spill] sm:$0xff] %v12357_v28  ;;  %v5456_v12 = vsel %vm5424_vm5, 1, %v15824_v54  ;;  %v16982_v30 = vld [vmem:[#allocation40_spill] sm:$0xff]  ;;  %v16984_v33 = vld [vmem:[#allocation163_spill] sm:$0xff] }
 0x2ec   : > { %v1593_v44 = vsel %vm1561_vm3, %v16979_v43, 0.0  ;;  %vm16983_vm13 = vcmp.ge.s32.totalorder %v16982_v30, 0  ;;  %vm16985_vm10 = vnez %v16984_v33  ;;  %v12367_v13 = vadd.f32 %v2764_v2, %v2145_v14  ;;  %v16988_v9 = vld [vmem:[#allocation226_spill] sm:$0xff]  ;;  %v1745_v21 = vpop.f32.mrb[47].mxu1  ;;  %v16989_v55 = vld [vmem:[#allocation127_spill] sm:$0xff]  ;;  %5505 = vperm.xlu0 %7783, %v5456_v12   ;;  %v12384_v2 = vpop.f32.mrb[83].mxu0 }
 0x2ed   : > { %vm3688_vm9 = vmand %vm16985_vm10, %vm16983_vm13  ;;  %v2762_v48 = vsel %vm2730_vm4, %v16988_v9, 0.0  ;;  %v2114_v43 = vsel %vm2082_vm11, %v7425_v52, 0.0  ;;  %vm16990_vm1 = vcmp.lt.s32.totalorder %v16982_v30, 16  ;;  %v16992_v53 = vld [vmem:[#allocation222_spill] sm:$0xff]  ;;  %vm16994_vm13 = vcmp.eq.s32.totalorder %v16933_v15, 1  ;;  %16995 = vst [vmem:[#allocation63_spill] sm:$0xff] %v12384_v2 }
 0x2ee   : > { %16987 = vst [vmem:[#allocation165_spill] sm:$0xff] %v12367_v13  ;;  %vm3720_vm5 = vmand %vm3688_vm9, %vm16990_vm1  ;;  %v12377_v28 = vadd.f32 %v2762_v48, %v2143_v20  ;;  %v2146_v57 = vadd.f32 %v2114_v43, %v1593_v44  ;;  %v1591_v14 = vsel %vm16993_vm7, %v16992_v53, 0.0  ;;  %v2112_v24 = vsel %vm16994_vm13, %v1745_v21, 0.0  ;;  %v16996_v35 = vld [vmem:[#allocation151_spill] sm:$0xff]  ;;  %v16998_v52 = vld [vmem:[#allocation176_spill] sm:$0xff]  ;;  %v12394_v44 = vpop.permute.xlu1 %4357 }
 0x2ef   : > { %vm16997_vm11 = vcmask 130048   ;;  %vm2731_vm4 = vcmp.eq.s32.totalorder %v16998_v52, 1  ;;  %v3752_v12 = vsel %vm3720_vm5, 1, %v15824_v54  ;;  %v16999_v9 = vld [vmem:[#allocation42_spill] sm:$0xff]  ;;  %17003 = vst [vmem:[#allocation69_spill] sm:$0xff] %v12394_v44  ;;  %v17004_v10 = vld [vmem:[#allocation233_spill] sm:$0xff]  ;;  %v2144_v53 = vadd.f32 %v2112_v24, %v1591_v14  ;;  %v12417_v14 = vpop.permute.xlu0 %4354 }
 0x2f0   : > { %16991 = vst [vmem:[#allocation167_spill] sm:$0xff] %v12377_v28  ;;  %7639 = vmatmul.mubr.msk.bf16.gmra.mrb[152].mxu1 %vm16997_vm11, %v16996_v35  ;;  %vm17000_vm9 = vcmp.ge.s32.totalorder %v16999_v9, 0  ;;  %v17001_v20 = vld [vmem:[#allocation166_spill] sm:$0xff]  ;;  %vm17005_vm7 = vcmp.eq.s32.totalorder %v16958_v45, 1  ;;  %3843 = vperm.xlu1 %7784, %v3752_v12   ;;  %vm17006_vm13 = vcmp.lt.s32.totalorder %v16999_v9, 16  ;;  %v17008_v43 = vld [vmem:[#allocation227_spill] sm:$0xff] }
 0x2f1   : > { %vm17002_vm1 = vnez %v17001_v20  ;;  %v2765_v15 = vsel %vm17005_vm7, %v17004_v10, 0.0  ;;  %v2763_v21 = vsel %vm2731_vm4, %v17008_v43, 0.0  ;;  %v17009_v35 = vld [vmem:[#allocation136_spill] sm:$0xff]  ;;  %v17011_v2 = vld [vmem:[#allocation94_spill] sm:$0xff]  ;;  %vm17012_vm8 = vcmp.ge.s32.totalorder %v7882_v7, 4294967295  ;;  %17015 = vst [vmem:[#allocation196_spill] sm:$0xff] %v12417_v14 }
 0x2f2   : > { %vm3687_vm3 = vmand %vm17002_vm1, %vm17000_vm9  ;;  %v12401_v48 = vadd.f32 %v2765_v15, %v2146_v57  ;;  %vm2085_vm5 = vcmp.eq.s32.totalorder %v17009_v35, 1  ;;  %v17010_v52 = vld [vmem:[#allocation132_spill] sm:$0xff]  ;;  %v12419_v24 = vadd.f32 %v2763_v21, %v2144_v53  ;;  %v7428_v12 = vpop.f32.mrb[48].mxu1  ;;  %v17020_v43 = vld [vmem:[#allocation181_spill] sm:$0xff]  ;;  %vm17021_vm9 = vcmp.ge.s32.totalorder %v8795_v31, 1  ;;  %v12434_v14 = vpop.f32.mrb[84].mxu0 }
 0x2f3   : > { %vm3719_vm11 = vmand %vm3687_vm3, %vm17006_vm13  ;;  %v7883_v57 = vld [vmem:[%s14985_s1 + $0xd0] sm:$0xff]  ;;  %vm17023_vm3 = vcmp.eq.s32.totalorder %v16956_v0, 1  ;;  %v2117_v21 = vsel %vm2085_vm5, %v7428_v12, 0.0  ;;  %17024 = vst [vmem:[#allocation65_spill] sm:$0xff] %v12434_v14  ;;  %v1758_v13 = vpop.f32.mrb[49].mxu1  ;;  %v12441_v23 = vpop.permute.xlu1 %5490  ;;  %v17030_v0 = vld [vmem:[#allocation230_spill] sm:$0xff] }
 0x2f4   : > { %17007 = vst [vmem:[#allocation170_spill] sm:$0xff] %v12401_v48  ;;  %v3751_v44 = vsel %vm3719_vm11, 1, %v15824_v54  ;;  %vm12410_vm7 = vmand %vm17012_vm8, %vm4890_vm15  ;;  %v17017_v10 = vld [vmem:[#allocation148_spill] sm:$0xff]  ;;  %vm17028_vm8 = vcmp.lt.s32.totalorder %v8795_v31, 17  ;;  %vm17032_vm5 = vcmp.eq.s32.totalorder %v16969_v42, 1  ;;  %v12448_v12 = vpop.f32.mrb[85].mxu0 }
 0x2f5   : > { %17016 = vst [vmem:[#allocation72_spill] sm:$0xff] %v12419_v24  ;;  %v17018_v15 = vld [vmem:[#allocation92_spill] sm:$0xff]  ;;  %3840 = vperm.xlu0 %7783, %v3751_v44   ;;  %vm4954_vm6 = vmand %vm12410_vm7, %vm17021_vm9  ;;  %v17026_v24 = vld [vmem:[#allocation93_spill] sm:$0xff]  ;;  %vm17031_vm9 = vcmp.eq.s32.totalorder %v16963_v46, 1  ;;  %v2115_v35 = vsel %vm17032_vm5, %v1758_v13, 0.0  ;;  %vm17036_vm11 = vcmp.lt.s32.totalorder %v7883_v57, 15 }
 0x2f6   : > { %v17019_v7 = vld [vmem:[#allocation180_spill] sm:$0xff]  ;;  %v17027_v44 = vld [vmem:[#allocation183_spill] sm:$0xff]  ;;  %vm4986_vm4 = vmand %vm4954_vm6, %vm17028_vm8  ;;  %17029 = vst [vmem:[#allocation197_spill] sm:$0xff] %v12441_v23  ;;  %vm17037_vm6 = vcmp.ge.s32.totalorder %v7883_v57, 4294967295  ;;  %v12460_v42 = vpop.f32.mrb[86].mxu0  ;;  %vm17043_vm5 = vcmp.ge.s32.totalorder %v16739_v37, 1 }
 0x2f7   : > { %v17022_v48 = vld [vmem:[#allocation228_spill] sm:$0xff]  ;;  %vm2736_vm15 = vcmp.eq.s32.totalorder %v17027_v44, 1  ;;  %17033 = vst [vmem:[#allocation169_spill] sm:$0xff] %v12448_v12  ;;  %v17035_v58 = vld [vmem:[#allocation182_spill] sm:$0xff]  ;;  %v5018_v44 = vsel %vm4986_vm4, 1, %v15824_v54  ;;  %vm12455_vm8 = vmand %vm17037_vm6, %vm17036_vm11  ;;  %v12467_v12 = vpop.permute.xlu0 %5487  ;;  %vm17047_vm11 = vcmp.eq.s32.totalorder %v17020_v43, 1 }
 0x2f8   : > { %v1596_v53 = vsel %vm17023_vm3, %v17022_v48, 0.0  ;;  %v17025_v28 = vld [vmem:[#allocation140_spill] sm:$0xff]  ;;  %v1594_v48 = vsel %vm17031_vm9, %v17030_v0, 0.0  ;;  %v7429_v0 = vpop.f32.mrb[50].mxu1  ;;  %17041 = vst [vmem:[#allocation205_spill] sm:$0xff] %v12460_v42  ;;  %v17042_v13 = vld [vmem:[#allocation91_spill] sm:$0xff]  ;;  %5105 = vperm.xlu1 %7784, %v5018_v44   ;;  %vm4953_vm4 = vmand %vm12455_vm8, %vm17043_vm5 }
 0x2f9   : > { %v2149_v41 = vadd.f32 %v2117_v21, %v1596_v53  ;;  %v17034_v14 = vld [vmem:[#allocation144_spill] sm:$0xff]  ;;  %v2147_v21 = vadd.f32 %v2115_v35, %v1594_v48  ;;  %17044 = vst [vmem:[#allocation23_spill] sm:$0xff] %v12467_v12  ;;  %v17046_v3 = vld [vmem:[#allocation238_spill] sm:$0xff]  ;;  %v17048_v48 = vld [vmem:[#allocation231_spill] sm:$0xff]  ;;  %vm17050_vm6 = vcmp.eq.s32.totalorder %v17010_v52, 1  ;;  %v1761_v42 = vpop.f32.mrb[51].mxu1 }
 0x2fa   : > { %v17040_v53 = vld [vmem:[#allocation236_spill] sm:$0xff]  ;;  %v2118_v44 = vsel %vm17050_vm6, %v7429_v0, 0.0  ;;  %v17051_v47 = vld [vmem:[#allocation139_spill] sm:$0xff]  ;;  %vm17052_vm5 = vcmp.lt.s32.totalorder %v16739_v37, 17  ;;  %vm17054_vm13 = vcmp.eq.s32.totalorder %v16981_v63, 1  ;;  %v12489_v43 = vpop.f32.mrb[87].mxu0 }
 0x2fb   : > { %v2768_v46 = vsel %vm2736_vm15, %v17040_v53, 0.0  ;;  %v2766_v53 = vsel %vm17047_vm11, %v17046_v3, 0.0  ;;  %vm17049_vm15 = vcmp.eq.s32.totalorder %v16976_v18, 1  ;;  %vm4985_vm3 = vmand %vm4953_vm4, %vm17052_vm5  ;;  %vm17055_vm11 = vcmp.eq.s32.totalorder %v16989_v55, 1  ;;  %17056 = vst [vmem:[#allocation209_spill] sm:$0xff] %v12489_v43  ;;  %v17057_v52 = vld [vmem:[#allocation184_spill] sm:$0xff] }
 0x2fc   : > { %v12469_v57 = vadd.f32 %v2768_v46, %v2149_v41  ;;  %v1597_v35 = vsel %vm17049_vm15, %v17048_v48, 0.0  ;;  %v12482_v12 = vadd.f32 %v2766_v53, %v2147_v21  ;;  %v17053_v46 = vld [vmem:[#allocation234_spill] sm:$0xff]  ;;  %v2116_v18 = vsel %vm17055_vm11, %v1761_v42, 0.0  ;;  %v12497_v21 = vpop.permute.xlu1 %3825  ;;  %v17060_v53 = vld [vmem:[#allocation156_spill] sm:$0xff]  ;;  %v17062_v55 = vld [vmem:[#allocation27_spill] sm:$0xff] }
 0x2fd   : > { %v2150_v41 = vadd.f32 %v2118_v44, %v1597_v35  ;;  %v1595_v3 = vsel %vm17054_vm13, %v17053_v46, 0.0  ;;  %v5017_v0 = vsel %vm4985_vm3, 1, %v15824_v54  ;;  %vm17058_vm6 = vcmp.ge.s32.totalorder %v8751_v27, 4294967295  ;;  %17059 = vst [vmem:[#allocation201_spill] sm:$0xff] %v12497_v21  ;;  %v17063_v42 = vld [vmem:[#allocation129_spill] sm:$0xff]  ;;  %v17066_v44 = vld [vmem:[#allocation239_spill] sm:$0xff] }
 0x2fe   : > { %17045 = vst [vmem:[#allocation67_spill] sm:$0xff] %v12469_v57  ;;  %vm5995_vm4 = vmand %vm11863_vm2, %vm17058_vm6  ;;  %vm17061_vm5 = vcmp.eq.s32.totalorder %v17035_v58, 1  ;;  %v2148_v48 = vadd.f32 %v2116_v18, %v1595_v3  ;;  %vm2738_vm13 = vcmp.eq.s32.totalorder %v17062_v55, 1  ;;  %5102 = vperm.xlu0 %7783, %v5017_v0   ;;  %vm17064_vm15 = vcmp.lt.s32.totalorder %v8751_v27, 15  ;;  %v17068_v46 = vld [vmem:[#allocation48_spill] sm:$0xff]  ;;  %v17069_v21 = vld [vmem:[#allocation30_spill] sm:$0xff] }
 0x2ff   : > { %v2769_v63 = vsel %vm17061_vm5, %v17060_v53, 0.0  ;;  %vm6027_vm3 = vmand %vm5995_vm4, %vm17064_vm15  ;;  %vm17067_vm2 = vcmp.eq.s32.totalorder %v17019_v7, 1  ;;  %vm2740_vm9 = vcmp.eq.s32.totalorder %v17069_v21, 1  ;;  %vm17070_vm5 = vcmp.ge.s32.totalorder %v8774_v17, 4294967295  ;;  %v7884_v27 = vld [vmem:[%s14985_s1 + $0x58] sm:$0xff]  ;;  %v7432_v3 = vpop.f32.mrb[52].mxu1 }
 0x300   : > { %v12506_v35 = vadd.f32 %v2769_v63, %v2150_v41  ;;  %v2767_v49 = vsel %vm17067_vm2, %v17066_v44, 0.0  ;;  %v6059_v58 = vsel %vm6027_vm3, 1, %v15824_v54  ;;  %vm5994_vm11 = vmand %vm11921_vm14, %vm17070_vm5  ;;  %v12521_v41 = vpop.permute.xlu0 %3822  ;;  %vm17072_vm4 = vcmp.lt.s32.totalorder %v8774_v17, 15  ;;  %v17073_v18 = vld [vmem:[#allocation240_spill] sm:$0xff]  ;;  %v12535_v63 = vpop.f32.mrb[88].mxu0  ;;  %v17077_v17 = vld [vmem:[#allocation21_spill] sm:$0xff] }
 0x301   : > { %17071 = vst [vmem:[#allocation145_spill] sm:$0xff] %v12521_v41  ;;  %v12523_v7 = vadd.f32 %v2767_v49, %v2148_v48  ;;  %6142 = vperm.xlu1 %7784, %v6059_v58   ;;  %vm6026_vm2 = vmand %vm5994_vm11, %vm17072_vm4  ;;  %vm17074_vm5 = vcmp.eq.s32.totalorder %v17011_v2, 1  ;;  %vm17075_vm6 = vcmp.eq.s32.totalorder %v17017_v10, 1  ;;  %v1774_v48 = vpop.f32.mrb[53].mxu1  ;;  %vm17078_vm11 = vcmp.ge.s32.totalorder %v17077_v17, 0  ;;  %v17079_v49 = vld [vmem:[#allocation116_spill] sm:$0xff] }
 0x302   : > { %17065 = vst [vmem:[#allocation131_spill] sm:$0xff] %v12506_v35  ;;  %v1600_v0 = vsel %vm17074_vm5, %v17073_v18, 0.0  ;;  %v2121_v53 = vsel %vm17075_vm6, %v7432_v3, 0.0  ;;  %17076 = vst [vmem:[#allocation210_spill] sm:$0xff] %v12535_v63  ;;  %v6058_v44 = vsel %vm6026_vm2, 1, %v15824_v54  ;;  %vm17080_vm4 = vnez %v17079_v49  ;;  %v17081_v41 = vld [vmem:[#allocation49_spill] sm:$0xff]  ;;  %v12552_v63 = vpop.permute.xlu1 %5087 }
 0x303   : > { %vm3672_vm15 = vmand %vm17080_vm4, %vm17078_vm11  ;;  %v2153_v58 = vadd.f32 %v2121_v53, %v1600_v0  ;;  %vm17082_vm14 = vcmp.eq.s32.totalorder %v17018_v15, 1  ;;  %vm17083_vm5 = vcmp.eq.s32.totalorder %v17025_v28, 1  ;;  %v12547_v10 = vpop.f32.mrb[89].mxu0  ;;  %v7433_v3 = vpop.f32.mrb[54].mxu1  ;;  %v17085_v18 = vld [vmem:[#allocation50_spill] sm:$0xff]  ;;  %6139 = vperm.xlu0 %7783, %v6058_v44   ;;  %vm17086_vm2 = vcmp.lt.s32.totalorder %v17077_v17, 16 }
 0x304   : > { %v1598_v43 = vsel %vm17082_vm14, %v17081_v41, 0.0  ;;  %v2119_v2 = vsel %vm17083_vm5, %v1774_v48, 0.0  ;;  %17084 = vst [vmem:[#allocation113_spill] sm:$0xff] %v12547_v10  ;;  %vm3704_vm3 = vmand %vm3672_vm15, %vm17086_vm2  ;;  %v17088_v35 = vld [vmem:[#allocation101_spill] sm:$0xff]  ;;  %v17089_v41 = vld [vmem:[#allocation51_spill] sm:$0xff]  ;;  %vm17090_vm14 = vcmp.eq.s32.totalorder %v17026_v24, 1 }
 0x305   : > { %17087 = vst [vmem:[#allocation112_spill] sm:$0xff] %v12552_v63  ;;  %v2772_v0 = vsel %vm2740_vm9, %v17088_v35, 0.0  ;;  %v2151_v15 = vadd.f32 %v2119_v2, %v1598_v43  ;;  %v1601_v28 = vsel %vm17090_vm14, %v17089_v41, 0.0  ;;  %vm17091_vm11 = vcmp.eq.s32.totalorder %v17034_v14, 1  ;;  %v12562_v48 = vpop.f32.mrb[90].mxu0  ;;  %v17093_v10 = vld [vmem:[#allocation22_spill] sm:$0xff] }
 0x306   : > { %v2122_v53 = vsel %vm17091_vm11, %v7433_v3, 0.0  ;;  %17092 = vst [vmem:[#allocation84_spill] sm:$0xff] %v12562_v48  ;;  %v3736_v44 = vsel %vm3704_vm3, 1, %v15824_v54  ;;  %vm17094_vm15 = vcmp.ge.s32.totalorder %v17093_v10, 0  ;;  %v17095_v57 = vld [vmem:[#allocation119_spill] sm:$0xff]  ;;  %v12569_v63 = vadd.f32 %v2772_v0, %v2153_v58  ;;  %v1777_v35 = vpop.f32.mrb[55].mxu1 }
 0x307   : > { %vm17096_vm5 = vnez %v17095_v57  ;;  %v17097_v21 = vld [vmem:[#allocation99_spill] sm:$0xff]  ;;  %v2154_v24 = vadd.f32 %v2122_v53, %v1601_v28  ;;  %v12574_v2 = vpop.f32.mrb[91].mxu0  ;;  %3795 = vperm.xlu1 %7784, %v3736_v44   ;;  %vm17099_vm9 = vcmp.lt.s32.totalorder %v17093_v10, 16  ;;  %vm17100_vm3 = vcmp.eq.s32.totalorder %v17063_v42, 1  ;;  %v17101_v58 = vld [vmem:[#allocation52_spill] sm:$0xff] }
 0x308   : > { %vm3671_vm2 = vmand %vm17096_vm5, %vm17094_vm15  ;;  %v2770_v43 = vsel %vm2738_vm13, %v17097_v21, 0.0  ;;  %17098 = vst [vmem:[#allocation117_spill] sm:$0xff] %v12574_v2  ;;  %v2773_v3 = vsel %vm17100_vm3, %v11948_v40, 0.0  ;;  %vm17102_vm11 = vcmp.eq.s32.totalorder %v17042_v13, 1  ;;  %vm17103_vm13 = vcmp.eq.s32.totalorder %v17051_v47, 1  ;;  %v17109_v53 = vld [vmem:[#allocation95_spill] sm:$0xff] }
 0x309   : > { %vm3703_vm14 = vmand %vm3671_vm2, %vm17099_vm9  ;;  %v12578_v14 = vadd.f32 %v2770_v43, %v2151_v15  ;;  %v1599_v0 = vsel %vm17102_vm11, %v17101_v58, 0.0  ;;  %v2120_v55 = vsel %vm17103_vm13, %v1777_v35, 0.0  ;;  %vm17104_vm15 = vcmp.lt.s32.totalorder %v7884_v27, 15  ;;  %v12595_v15 = vpop.permute.xlu0 %5084  ;;  %v17110_v13 = vld [vmem:[#allocation96_spill] sm:$0xff]  ;;  %v17111_v47 = vld [vmem:[#allocation17_spill] sm:$0xff]  ;;  %v12611_v43 = vpop.permute.xlu1 %6124 }
 0x30a   : > { %v3735_v41 = vsel %vm3703_vm14, 1, %v15824_v54  ;;  %vm17105_vm6 = vcmp.ge.s32.totalorder %v7884_v27, 4294967295  ;;  %v17106_v28 = vmov 0  ;;  %17108 = vst [vmem:[#allocation115_spill] sm:$0xff] %v12595_v15  ;;  %v12597_v42 = vadd.f32 %v2773_v3, %v2154_v24  ;;  %v17113_v27 = vld [vmem:[#allocation157_spill] sm:$0xff]  ;;  %17117 = vst [vmem:[#allocation79_spill] sm:$0xff] %v12611_v43 }
 0x30b   : > { %vm12591_vm5 = vmand %vm17105_vm6, %vm17104_vm15  ;;  %v2152_v40 = vadd.f32 %v2120_v55, %v1599_v0  ;;  %3792 = vperm.xlu0 %7783, %v3735_v41   ;;  %vm17112_vm11 = vcmp.ge.s32.totalorder %v17111_v47, 1  ;;  %vm17114_vm6 = vcmp.eq.s32.totalorder %v17057_v52, 1  ;;  %v17115_v21 = vld [vmem:[#allocation97_spill] sm:$0xff]  ;;  %vm17116_vm15 = vcmp.lt.s32.totalorder %v17111_v47, 17  ;;  %v7436_v35 = vpop.f32.mrb[56].mxu1  ;;  %v17118_v3 = vld [vmem:[#allocation98_spill] sm:$0xff] }
 0x30c   : > { %v17107_v28 = vsel %vm12591_vm5, 4294967295, %v17106_v28  ;;  %vm4938_vm14 = vmand %vm12591_vm5, %vm17112_vm11  ;;  %v2771_v44 = vsel %vm17114_vm6, %v17113_v27, 0.0  ;;  %vm2061_vm9 = vcmp.eq.s32.totalorder %v17118_v3, 1  ;;  %v17119_v58 = vld [vmem:[#allocation150_spill] sm:$0xff]  ;;  %v17120_v0 = vld [vmem:[#allocation149_spill] sm:$0xff]  ;;  %vm17122_vm6 = vcmp.lt.s32.totalorder %v7885_v19, 15 }
 0x30d   : > { %vm4970_vm2 = vmand %vm4938_vm14, %vm17116_vm15  ;;  %v12613_v24 = vadd.f32 %v2771_v44, %v2152_v40  ;;  %vm2091_vm3 = vcmp.eq.s32.totalorder %v17119_v58, 1  ;;  %v17121_v55 = vld [vmem:[#allocation154_spill] sm:$0xff]  ;;  %vm17123_vm13 = vcmp.ge.s32.totalorder %v7885_v19, 4294967295  ;;  %vm17126_vm14 = vcmp.eq.s32.totalorder %v17068_v46, 1  ;;  %v12629_v44 = vpop.f32.mrb[92].mxu0  ;;  %v1790_v3 = vpop.f32.mrb[57].mxu1 }
 0x30e   : > { %vm2712_vm5 = vcmp.eq.s32.totalorder %v17121_v55, 1  ;;  %v5002_v52 = vsel %vm4970_vm2, 1, %v15824_v54  ;;  %vm12622_vm4 = vmand %vm17123_vm13, %vm17122_vm6  ;;  %v1572_v40 = vsel %vm17126_vm14, %v12087_v6, 0.0  ;;  %v2093_v27 = vsel %vm2061_vm9, %v7436_v35, 0.0  ;;  %v17127_v58 = vld [vmem:[#allocation80_spill] sm:$0xff]  ;;  %v17128_v43 = vld [vmem:[#allocation19_spill] sm:$0xff]  ;;  %v12636_v19 = vpop.permute.xlu0 %6121 }
 0x30f   : > { %vm2742_vm15 = vcmp.eq.s32.totalorder %v17127_v58, 1  ;;  %5057 = vperm.xlu1 %7784, %v5002_v52   ;;  %vm17129_vm11 = vcmp.ge.s32.totalorder %v17128_v43, 1  ;;  %17130 = vst [vmem:[#allocation173_spill] sm:$0xff] %v12636_v19  ;;  %v2125_v15 = vadd.f32 %v2093_v27, %v1572_v40  ;;  %vm17131_vm13 = vcmp.eq.s32.totalorder %v17110_v13, 1  ;;  %v12641_v35 = vpop.f32.mrb[93].mxu0  ;;  %v17132_v2 = vld [vmem:[#allocation152_spill] sm:$0xff] }
 0x310   : > { %vm4937_vm2 = vmand %vm12622_vm4, %vm17129_vm11  ;;  %v1602_v46 = vsel %vm17131_vm13, %v12099_v51, 0.0  ;;  %v2123_v6 = vsel %vm2091_vm3, %v1790_v3, 0.0  ;;  %vm2713_vm9 = vcmp.eq.s32.totalorder %v17132_v2, 1  ;;  %vm17133_vm6 = vcmp.lt.s32.totalorder %v17128_v43, 17  ;;  %v7437_v40 = vpop.f32.mrb[58].mxu1  ;;  %v12650_v27 = vpop.f32.mrb[94].mxu0 }
 0x311   : > { %vm4969_vm14 = vmand %vm4937_vm2, %vm17133_vm6  ;;  %v2744_v52 = vsel %vm2712_vm5, %v11962_v61, 0.0  ;;  %v2155_v58 = vadd.f32 %v2123_v6, %v1602_v46  ;;  %v2774_v19 = vsel %vm2742_vm15, %v12001_v22, 0.0  ;;  %v17134_v13 = vld [vmem:[#allocation66_spill] sm:$0xff]  ;;  %vm17136_vm2 = vcmp.eq.s32.totalorder %v17085_v18, 1  ;;  %v1793_v22 = vpop.f32.mrb[59].mxu1  ;;  %v12664_v46 = vpop.f32.mrb[95].mxu0 }
 0x312   : > { %v5001_v51 = vsel %vm4969_vm14, 1, %v15824_v54  ;;  %vm17135_vm3 = vcmp.ge.s32.totalorder %v17134_v13, 4294967295  ;;  %v12657_v3 = vadd.f32 %v2744_v52, %v2125_v15  ;;  %v1573_v55 = vsel %vm17136_vm2, %v12127_v11, 0.0  ;;  %v12668_v6 = vpop.permute.xlu1 %5039  ;;  %v12694_v39 = vpop.permute.xlu0 %5036  ;;  %v7888_v45 = vld [vmem:[%s14985_s1 + $0x68] sm:$0xff] }
 0x313   : > { %vm5979_vm11 = vmand %vm16960_vm0, %vm17135_vm3  ;;  %vm17137_vm5 = vcmp.eq.s32.totalorder %v17115_v21, 1  ;;  %5054 = vperm.xlu0 %7783, %v5001_v51   ;;  %vm17138_vm15 = vcmp.lt.s32.totalorder %v17134_v13, 15  ;;  %17139 = vst [vmem:[#allocation175_spill] sm:$0xff] %v12668_v6  ;;  %v12670_v5 = vadd.f32 %v2774_v19, %v2155_v58  ;;  %vm17140_vm0 = vcmp.eq.s32.totalorder %v17109_v53, 1  ;;  %v17142_v21 = vld [vmem:[#allocation134_spill] sm:$0xff]  ;;  %v12700_v2 = vpop.f32.mrb[96].mxu0 }
 0x314   : > { %v2094_v61 = vsel %vm17137_vm5, %v7437_v40, 0.0  ;;  %vm6011_vm13 = vmand %vm5979_vm11, %vm17138_vm15  ;;  %v1603_v18 = vsel %vm17140_vm0, %v12198_v4, 0.0  ;;  %vm17141_vm6 = vcmp.eq.s32.totalorder %v17120_v0, 1  ;;  %vm2743_vm14 = vcmp.eq.s32.totalorder %v17142_v21, 1  ;;  %v17143_v40 = vld [vmem:[#allocation68_spill] sm:$0xff]  ;;  %17147 = vst [vmem:[#allocation206_spill] sm:$0xff] %v12694_v39 }
 0x315   : > { %v2126_v15 = vadd.f32 %v2094_v61, %v1573_v55  ;;  %v2124_v11 = vsel %vm17141_vm6, %v1793_v22, 0.0  ;;  %v6043_v52 = vsel %vm6011_vm13, 1, %v15824_v54  ;;  %vm17144_vm3 = vcmp.ge.s32.totalorder %v17143_v40, 4294967295  ;;  %17149 = vst [vmem:[#allocation120_spill] sm:$0xff] %v12700_v2  ;;  %v12711_v55 = vpop.f32.mrb[97].mxu0  ;;  %v17153_v61 = vld [vmem:[#allocation81_spill] sm:$0xff] }
 0x316   : > { %vm5978_vm11 = vmand %vm16971_vm12, %vm17144_vm3  ;;  %v2745_v19 = vsel %vm2713_vm9, %v11967_v38, 0.0  ;;  %v2156_v58 = vadd.f32 %v2124_v11, %v1603_v18  ;;  %6094 = vperm.xlu1 %7784, %v6043_v52   ;;  %vm17145_vm2 = vcmp.lt.s32.totalorder %v17143_v40, 15  ;;  %v2775_v53 = vsel %vm2743_vm14, %v12004_v62, 0.0  ;;  %v7476_v38 = vpop.f32.mrb[60].mxu1  ;;  %v12709_v33 = vpop.permute.xlu1 %6076  ;;  %17152 = vst [vmem:[#allocation203_spill] sm:$0xff] %v12711_v55  ;;  %v17156_v18 = vld [vmem:[#allocation55_spill] sm:$0xff] }
 0x317   : > { %vm6010_vm5 = vmand %vm5978_vm11, %vm17145_vm2  ;;  %v2777_v4 = vadd.f32 %v2745_v19, %v2126_v15  ;;  %vm17146_vm15 = vcmp.ge.s32.totalorder %v16982_v30, 4294967295  ;;  %vm17148_vm12 = vcmp.lt.s32.totalorder %v16982_v30, 15  ;;  %v12702_v13 = vpop.f32.mrb[61].mxu1  ;;  %vm17150_vm0 = vcmp.ge.s32.totalorder %v16999_v9, 4294967295  ;;  %17151 = vst [vmem:[#allocation82_spill] sm:$0xff] %v12709_v33  ;;  %v12718_v15 = vpop.f32.mrb[98].mxu0 }
 0x318   : > { %v6042_v0 = vsel %vm6010_vm5, 1, %v15824_v54  ;;  %vm4274_vm13 = vmand %vm16985_vm10, %vm17146_vm15  ;;  %v12696_v51 = vadd.f32 %v2775_v53, %v2156_v58  ;;  %vm3395_vm6 = vcmp.eq.s32.totalorder %v17153_v61, 1  ;;  %vm17154_vm14 = vcmp.lt.s32.totalorder %v16999_v9, 15  ;;  %v12716_v22 = vpop.f32.mrb[62].mxu1  ;;  %17155 = vst [vmem:[#allocation174_spill] sm:$0xff] %v12718_v15  ;;  %v12726_v20 = vpop.permute.xlu0 %6073  ;;  %v17159_v19 = vld [vmem:[#allocation31_spill] sm:$0xff] }
 0x319   : > { %6091 = vperm.xlu0 %7783, %v6042_v0   ;;  %vm4306_vm9 = vmand %vm4274_vm13, %vm17148_vm12  ;;  %vm3397_vm11 = vcmp.eq.s32.totalorder %v17156_v18, 1  ;;  %17158 = vst [vmem:[#allocation207_spill] sm:$0xff] %v12726_v20  ;;  %v3014_v21 = vrot.slane %v7476_v38, 7  ;;  %v3016_v52 = vrot.slane %v12716_v22, 7  ;;  %v2853_v40 = vpop.f32.mrb[63].mxu1  ;;  %vm3396_vm5 = vcmp.eq.s32.totalorder %v17159_v19, 1 }
 0x31a   : > { %v4338_v62 = vsel %vm4306_vm9, 1, %v15824_v54  ;;  %vm4273_vm10 = vmand %vm17002_vm1, %vm17150_vm0  ;;  %vm17157_vm1 = vcmp.ge.s32.totalorder %v8795_v31, 0  ;;  %v17160_v58 = vld [vmem:[#allocation126_spill] sm:$0xff]  ;;  %vm17161_vm13 = vcmp.lt.s32.totalorder %v8795_v31, 16  ;;  %v3012_v0 = vrot.slane %v2853_v40, 7  ;;  %v17163_v2 = vld [vmem:[#allocation32_spill] sm:$0xff]  ;;  %v12742_v22 = vpop.permute.xlu1 %4411 }
 0x31b   : > { %4429 = vperm.xlu1 %7784, %v4338_v62   ;;  %vm4305_vm3 = vmand %vm4273_vm10, %vm17154_vm14  ;;  %v12734_v62 = vpop.f32.mrb[99].mxu0  ;;  %vm17164_vm0 = vcmp.ge.s32.totalorder %v16739_v37, 0  ;;  %17165 = vst [vmem:[#allocation111_spill] sm:$0xff] %v12742_v22  ;;  %v17167_v15 = vld [vmem:[#allocation29_spill] sm:$0xff]  ;;  %v17172_v20 = vld [vmem:[#allocation14_spill] sm:$0xff]  ;;  %v17173_v22 = vrot.slane %v12702_v13, 7 }
 0x31c   : > { %v4337_v11 = vsel %vm4305_vm3, 1, %v15824_v54  ;;  %vm5411_vm2 = vmand %vm12410_vm7, %vm17157_vm1  ;;  %17162 = vst [vmem:[#allocation77_spill] sm:$0xff] %v12734_v62  ;;  %vm17168_vm1 = vcmask 1040384   ;;  %v17169_v40 = vld [vmem:[#allocation137_spill] sm:$0xff]  ;;  %vm3853_vm15 = vcmp.eq.s32.totalorder %v17172_v20, 1 }
 0x31d   : > { %4426 = vperm.xlu0 %7783, %v4337_v11   ;;  %vm5443_vm12 = vmand %vm5411_vm2, %vm17161_vm13  ;;  %v17166_v11 = vld [vmem:[#allocation33_spill] sm:$0xff]  ;;  %v3017_v53 = vsel %vm17168_vm1, %v3014_v21, %v3016_v52  ;;  %vm17178_vm13 = vnez %v17079_v49 }
 0x31e   : > { %v5475_v38 = vsel %vm5443_vm12, 1, %v15824_v54  ;;  %vm5410_vm10 = vmand %vm12455_vm8, %vm17164_vm0  ;;  %vm3854_vm14 = vcmp.eq.s32.totalorder %v17166_v11, 1  ;;  %v17170_v33 = vld [vmem:[#allocation141_spill] sm:$0xff]  ;;  %vm17171_vm12 = vcmp.lt.s32.totalorder %v16739_v37, 16  ;;  %v3429_v55 = vsel %vm3397_vm11, %v3017_v53, 0.0 }
 0x31f   : > { %5562 = vperm.xlu1 %7784, %v5475_v38   ;;  %vm5442_vm9 = vmand %vm5410_vm10, %vm17171_vm12  ;;  %v17176_v39 = vld [vmem:[#allocation73_spill] sm:$0xff]  ;;  %v12763_v38 = vpop.permute.xlu0 %4408  ;;  %v3461_v20 = vadd.f32 %v3429_v55, %v11989_v34  ;;  %v3886_v49 = vsel %vm3854_vm14, %v12041_v60, 0.0  ;;  %v12777_v55 = vpop.f32.mrb[100].mxu0  ;;  %vm17192_vm12 = vnez %v17107_v28 }
 0x320   : > { %vm17174_vm0 = vmmov %vm17168_vm1  ;;  %v5474_v6 = vsel %vm5442_vm9, 1, %v15824_v54  ;;  %vm17177_vm1 = vcmp.ge.s32.totalorder %v17176_v39, 4294967295  ;;  %17179 = vst [vmem:[#allocation218_spill] sm:$0xff] %v12763_v38  ;;  %vm17180_vm11 = vcmp.lt.s32.totalorder %v17176_v39, 15  ;;  %v4734_v11 = vrot.slane %v12777_v55, 7  ;;  %v17350_v28 = vld [vmem:[#allocation121_spill] sm:$0xff] }
 0x321   : > { %v3013_v62 = vsel %vm17174_vm0, %v17173_v22, %v3012_v0  ;;  %vm17175_vm3 = vmmov %vm17174_vm0  ;;  %v7480_v22 = vpop.f32.mrb[64].mxu1  ;;  %5559 = vperm.xlu0 %7783, %v5474_v6   ;;  %v12784_v6 = vpop.permute.xlu1 %5544 }
 0x322   : > { %v3015_v48 = vsel %vm17175_vm3, %v3012_v0, %v3014_v21  ;;  %vm4258_vm2 = vmand %vm17178_vm13, %vm17177_vm1  ;;  %v3427_v18 = vsel %vm3395_vm6, %v3013_v62, 0.0  ;;  %v3885_v21 = vsel %vm3853_vm15, %v12008_v29, 0.0  ;;  %v2866_v61 = vpop.f32.mrb[65].mxu1  ;;  %17184 = vst [vmem:[#allocation118_spill] sm:$0xff] %v12784_v6  ;;  %vm17185_vm15 = vcmp.eq.s32.totalorder %v17167_v15, 1  ;;  %v7887_v6 = vld [vmem:[%s14985_s1 + $0xe0] sm:$0xff] }
 0x323   : > { %v3428_v53 = vsel %vm3396_vm5, %v3015_v48, 0.0  ;;  %vm4290_vm9 = vmand %vm4258_vm2, %vm17180_vm11  ;;  %v3459_v0 = vadd.f32 %v3427_v18, %v2777_v4  ;;  %v17181_v48 = vld [vmem:[#allocation75_spill] sm:$0xff]  ;;  %vm17183_vm5 = vnez %v17095_v57  ;;  %v3884_v29 = vsel %vm17185_vm15, %v12052_v16, 0.0  ;;  %v12789_v4 = vpop.f32.mrb[101].mxu0  ;;  %v12796_v57 = vpop.f32.mrb[66].mxu1 }
 0x324   : > { %v3460_v34 = vadd.f32 %v3428_v53, %v11943_v36  ;;  %v4322_v19 = vsel %vm4290_vm9, 1, %v15824_v54  ;;  %vm17182_vm6 = vcmp.ge.s32.totalorder %v17181_v48, 4294967295  ;;  %v3018_v60 = vrot.slane %v2866_v61, 7  ;;  %v12798_v18 = vpop.f32.mrb[102].mxu0  ;;  %v17190_v16 = vld [vmem:[#allocation83_spill] sm:$0xff]  ;;  %v2869_v61 = vpop.f32.mrb[67].mxu1 }
 0x325   : > { %vm4257_vm10 = vmand %vm17183_vm5, %vm17182_vm6  ;;  %v12791_v36 = vadd.f32 %v3886_v49, %v3461_v20  ;;  %4381 = vperm.xlu1 %7784, %v4322_v19   ;;  %vm17187_vm14 = vcmp.lt.s32.totalorder %v17181_v48, 15  ;;  %v3022_v62 = vrot.slane %v7480_v22, 7  ;;  %v12800_v53 = vadd.f32 %v3884_v29, %v3459_v0  ;;  %v12810_v22 = vpop.permute.xlu0 %5541  ;;  %v17197_v29 = vld [vmem:[#allocation85_spill] sm:$0xff] }
 0x326   : > { %vm4289_vm3 = vmand %vm4257_vm10, %vm17187_vm14  ;;  %v12802_v15 = vadd.f32 %v3885_v21, %v3460_v34  ;;  %vm3402_vm2 = vcmp.eq.s32.totalorder %v17190_v16, 1  ;;  %vm17191_vm13 = vcmp.ge.s32.totalorder %v17111_v47, 0  ;;  %17193 = vst [vmem:[#allocation114_spill] sm:$0xff] %v12810_v22  ;;  %vm17194_vm1 = vcmask 1040384   ;;  %v7886_v21 = vld [vmem:[%s14985_s1 + $0xe8] sm:$0xff] }
 0x327   : > { %17186 = vst [vmem:[#allocation214_spill] sm:$0xff] %v12791_v36  ;;  %17188 = vst [vmem:[#allocation143_spill] sm:$0xff] %v12800_v53  ;;  %v4321_v20 = vsel %vm4289_vm3, 1, %v15824_v54  ;;  %v3019_v49 = vsel %vm17194_vm1, %v3016_v52, %v3018_v60  ;;  %v3024_v55 = vrot.slane %v12796_v57, 7  ;;  %vm17195_vm11 = vcmp.lt.s32.totalorder %v17111_v47, 16  ;;  %v4578_v52 = vpop.f32.mrb[103].mxu0  ;;  %v12828_v47 = vpop.permute.xlu1 %4363 }
 0x328   : > { %17189 = vst [vmem:[#allocation172_spill] sm:$0xff] %v12802_v15  ;;  %vm5395_vm0 = vmand %vm17192_vm12, %vm17191_vm13  ;;  %4378 = vperm.xlu0 %7783, %v4321_v20   ;;  %vm4860_vm6 = vcmp.ge.s32.totalorder %v7886_v21, 4294967295  ;;  %vm4892_vm5 = vcmp.lt.s32.totalorder %v7886_v21, 15  ;;  %vm17196_vm10 = vcmp.eq.s32.totalorder %v17160_v58, 1  ;;  %v3020_v19 = vrot.slane %v2869_v61, 7  ;;  %v17204_v61 = vld [vmem:[#allocation128_spill] sm:$0xff] }
 0x329   : > { %vm5427_vm9 = vmand %vm5395_vm0, %vm17195_vm11  ;;  %v3430_v34 = vsel %vm17196_vm10, %v3019_v49, 0.0  ;;  %vm17198_vm14 = vcmp.ge.s32.totalorder %v17128_v43, 0  ;;  %17199 = vst [vmem:[#allocation223_spill] sm:$0xff] %v12828_v47  ;;  %v17201_v58 = vrot.slane %v12798_v18, 7  ;;  %vm17205_vm11 = vcmp.lt.s32.totalorder %v17128_v43, 16  ;;  %v17212_v43 = vld [vmem:[#allocation168_spill] sm:$0xff]  ;;  %v12855_v36 = vpop.permute.xlu0 %4360 }
 0x32a   : > { %v5459_v57 = vsel %vm5427_vm9, 1, %v15824_v54  ;;  %vm5394_vm3 = vmand %vm12622_vm4, %vm17198_vm14  ;;  %v12831_v20 = vadd.f32 %v3430_v34, %v11935_v26  ;;  %vm17206_vm14 = vcmp.eq.s32.totalorder %v17163_v2, 1  ;;  %vm17226_vm10 = vcmask 1040384   ;;  %v17234_v47 = vld [vmem:[#allocation35_spill] sm:$0xff] }
 0x32b   : > { %vm17200_vm13 = vmmov %vm17194_vm1  ;;  %5514 = vperm.xlu1 %7784, %v5459_v57   ;;  %v17210_v57 = vld [vmem:[#allocation44_spill] sm:$0xff] }
 0x32c   : > { %v3025_v0 = vsel %vm17200_vm13, %v3022_v62, %v3024_v55  ;;  %vm17202_vm0 = vmmov %vm17194_vm1  ;;  %vm17211_vm1 = vcmp.ge.s32.totalorder %v17210_v57, 0 }
 0x32d   : > { %v12837_v49 = vsel %vm17202_vm0, %v4734_v11, %v17201_v58  ;;  %vm5426_vm9 = vmand %vm5394_vm3, %vm17205_vm11  ;;  %v3433_v26 = vsel %vm17206_vm14, %v3025_v0, 0.0  ;;  %v17209_v58 = vld [vmem:[#allocation56_spill] sm:$0xff]  ;;  %vm17213_vm3 = vnez %v17212_v43  ;;  %vm17215_vm14 = vcmp.eq.s32.totalorder %v17169_v40, 1 }
 0x32e   : > { %17203 = vst [vmem:[#allocation153_spill] sm:$0xff] %v12837_v49  ;;  %vm17207_vm13 = vmmov %vm17202_vm0  ;;  %v5458_v38 = vsel %vm5426_vm9, 1, %v15824_v54  ;;  %v12858_v15 = vadd.f32 %v3433_v26, %v12111_v50  ;;  %v4733_v50 = vrot.slane %v4578_v52, 7  ;;  %v12873_v26 = vpop.f32.mrb[104].mxu0 }
 0x32f   : > { %v3021_v34 = vsel %vm17207_vm13, %v3018_v60, %v3020_v19  ;;  %vm17208_vm15 = vmmov %vm17202_vm0  ;;  %vm17216_vm13 = vcmp.eq.s32.totalorder %v17170_v33, 1  ;;  %5511 = vperm.xlu0 %7783, %v5458_v38   ;;  %v17222_v38 = vld [vmem:[#allocation171_spill] sm:$0xff]  ;;  %v4742_v52 = vrot.slane %v12873_v26, 7 }
 0x330   : > { %v3023_v22 = vsel %vm17208_vm15, %v3020_v19, %v3022_v62  ;;  %vm3690_vm11 = vmand %vm17213_vm3, %vm17211_vm1  ;;  %17214 = vst [vmem:[#allocation219_spill] sm:$0xff] %v12858_v15  ;;  %v3431_v2 = vsel %vm17215_vm14, %v3021_v34, 0.0  ;;  %v7484_v62 = vpop.f32.mrb[68].mxu1  ;;  %vm17217_vm15 = vcmp.lt.s32.totalorder %v17210_v57, 16  ;;  %vm17223_vm14 = vnez %v17222_v38  ;;  %v12880_v34 = vpop.permute.xlu1 %5496  ;;  %v17388_v38 = vld [vmem:[#allocation189_spill] sm:$0xff] }
 0x331   : > { %v3432_v60 = vsel %vm17216_vm13, %v3023_v22, 0.0  ;;  %vm3722_vm9 = vmand %vm3690_vm11, %vm17217_vm15  ;;  %v12868_v19 = vadd.f32 %v3431_v2, %v11973_v8  ;;  %v2882_v40 = vpop.f32.mrb[69].mxu1  ;;  %v17220_v22 = vld [vmem:[#allocation46_spill] sm:$0xff]  ;;  %vm4891_vm11 = vcmp.lt.s32.totalorder %v7887_v6, 15  ;;  %17224 = vst [vmem:[#allocation90_spill] sm:$0xff] %v12880_v34  ;;  %v3030_v0 = vrot.slane %v7484_v62, 7 }
 0x332   : > { %v12871_v49 = vadd.f32 %v3432_v60, %v12064_v25  ;;  %v3754_v33 = vsel %vm3722_vm9, 1, %v15824_v54  ;;  %vm17221_vm1 = vcmp.ge.s32.totalorder %v17220_v22, 0  ;;  %v3026_v8 = vrot.slane %v2882_v40, 7  ;;  %v4591_v2 = vpop.f32.mrb[105].mxu0  ;;  %v12888_v15 = vpop.f32.mrb[70].mxu1  ;;  %vm17228_vm9 = vmmov %vm17226_vm10 }
 0x333   : > { %17218 = vst [vmem:[#allocation124_spill] sm:$0xff] %v12868_v19  ;;  %vm3689_vm13 = vmand %vm17223_vm14, %vm17221_vm1  ;;  %3849 = vperm.xlu1 %7784, %v3754_v33   ;;  %vm17225_vm15 = vcmp.lt.s32.totalorder %v17220_v22, 16  ;;  %v12885_v25 = vsel %vm17226_vm10, %v4733_v50, %v4734_v11  ;;  %v4738_v60 = vrot.slane %v4591_v2, 7  ;;  %v17227_v19 = vrot.slane %v12789_v4, 7  ;;  %v12904_v11 = vpop.permute.xlu0 %5493  ;;  %v2885_v53 = vpop.f32.mrb[71].mxu1 }
 0x334   : > { %17219 = vst [vmem:[#allocation123_spill] sm:$0xff] %v12871_v49  ;;  %vm3721_vm0 = vmand %vm3689_vm13, %vm17225_vm15  ;;  %v12890_v49 = vpop.f32.mrb[106].mxu0  ;;  %v17230_v33 = vmov 0  ;;  %vm17239_vm15 = vcmp.lt.s32.totalorder %v16982_v30, 17  ;;  %v3832_v34 = vpop.permute.xlu1 %3831  ;;  %vm17250_vm13 = vcmp.eq.s32.totalorder %v17197_v29, 1 }
 0x335   : > { %v12895_v62 = vsel %vm17228_vm9, %v17227_v19, %v4733_v50  ;;  %v3753_v40 = vsel %vm3721_vm0, 1, %v15824_v54  ;;  %vm12900_vm1 = vmand %vm4860_vm6, %vm4892_vm5  ;;  %17232 = vst [vmem:[#allocation178_spill] sm:$0xff] %v12904_v11  ;;  %vm17235_vm0 = vcmp.ge.s32.totalorder %v16982_v30, 1  ;;  %v17236_v19 = vrot.slane %v12798_v18, 7  ;;  %v4594_v2 = vpop.f32.mrb[107].mxu0 }
 0x336   : > { %17229 = vst [vmem:[#allocation177_spill] sm:$0xff] %v12895_v62  ;;  %v17231_v33 = vsel %vm12900_vm1, 4294967295, %v17230_v33  ;;  %vm17233_vm10 = vmmov %vm17228_vm9  ;;  %3846 = vperm.xlu0 %7783, %v3753_v40   ;;  %v3028_v50 = vrot.slane %v2885_v53, 7  ;;  %v17241_v62 = vrot.slane %v12888_v15, 7  ;;  %v17243_v16 = vrot.slane %v12890_v49, 7 }
 0x337   : > { %v3027_v26 = vsel %vm17233_vm10, %v3024_v55, %v3026_v8  ;;  %vm4956_vm6 = vmand %vm12900_vm1, %vm17235_vm0  ;;  %vm17253_vm1 = vcmp.ge.s32.totalorder %v16999_v9, 1  ;;  %vm17259_vm0 = vcmp.eq.s32.totalorder %v17209_v58, 1 }
 0x338   : > { %v3434_v21 = vsel %vm3402_vm2, %v3027_v26, 0.0  ;;  %vm17237_vm5 = vmmov %vm17228_vm9  ;;  %v4740_v26 = vrot.slane %v4594_v2, 7  ;;  %v3829_v2 = vpop.permute.xlu0 %3828 }
 0x339   : > { %v12919_v55 = vsel %vm17237_vm5, %v17236_v19, %v4738_v60  ;;  %vm4988_vm9 = vmand %vm4956_vm6, %vm17239_vm15  ;;  %v12924_v40 = vadd.f32 %v3434_v21, %v12047_v59  ;;  %v17246_v19 = vld [vmem:[#allocation58_spill] sm:$0xff]  ;;  %vm17247_vm6 = vcmp.ge.s32.totalorder %v7887_v6, 4294967295  ;;  %vm3876_vm15 = vcmp.eq.s32.totalorder %v3832_v34, 1 }
 0x33a   : > { %17238 = vst [vmem:[#allocation88_spill] sm:$0xff] %v12919_v55  ;;  %vm17242_vm10 = vmmov %vm17237_vm5  ;;  %v5020_v53 = vsel %vm4988_vm9, 1, %v15824_v54  ;;  %v17252_v21 = vld [vmem:[#allocation146_spill] sm:$0xff]  ;;  %v12951_v6 = vsel %vm3876_vm15, %v12664_v46, 0.0  ;;  %vm4876_vm15 = vcmp.lt.s32.totalorder %v7888_v45, 15 }
 0x33b   : > { %17240 = vst [vmem:[#allocation179_spill] sm:$0xff] %v12924_v40  ;;  %v3033_v11 = vsel %vm17242_vm10, %v3030_v0, %v17241_v62  ;;  %vm17244_vm2 = vmmov %vm17237_vm5  ;;  %5111 = vperm.xlu1 %7784, %v5020_v53  }
 0x33c   : > { %v12932_v18 = vsel %vm17244_vm2, %v4742_v52, %v17243_v16  ;;  %vm12938_vm5 = vmand %vm17247_vm6, %vm4891_vm11  ;;  %v3437_v59 = vsel %vm17250_vm13, %v3033_v11, 0.0  ;;  %17254 = vst [vmem:[#allocation130_spill] sm:$0xff] %v12951_v6  ;;  %vm17257_vm13 = vcmp.eq.s32.totalorder %v17204_v61, 1  ;;  %vm17258_vm6 = vcmp.lt.s32.totalorder %v16999_v9, 17 }
 0x33d   : > { %17245 = vst [vmem:[#allocation215_spill] sm:$0xff] %v12932_v18  ;;  %vm17251_vm10 = vmmov %vm17244_vm2  ;;  %v12954_v16 = vadd.f32 %v3437_v59, %v12217_v56  ;;  %v7586_v56 = vpop.f32.mrb[108].mxu0  ;;  %v17387_v18 = vld [vmem:[#allocation188_spill] sm:$0xff] }
 0x33e   : > { %v3029_v62 = vsel %vm17251_vm10, %v3026_v8, %v3028_v50  ;;  %vm4955_vm9 = vmand %vm12938_vm5, %vm17253_vm1  ;;  %v7488_v8 = vpop.f32.mrb[72].mxu1 }
 0x33f   : > { %17255 = vst [vmem:[#allocation216_spill] sm:$0xff] %v12954_v16  ;;  %vm17256_vm11 = vmmov %vm17244_vm2  ;;  %v3435_v34 = vsel %vm17257_vm13, %v3029_v62, 0.0  ;;  %vm3875_vm2 = vcmp.eq.s32.totalorder %v3829_v2, 1  ;;  %v2898_v59 = vpop.f32.mrb[73].mxu1  ;;  %vm17269_vm13 = vcmp.lt.s32.totalorder %v8795_v31, 15  ;;  %v3038_v2 = vrot.slane %v7488_v8, 7 }
 0x340   : > { %v3031_v29 = vsel %vm17256_vm11, %v3028_v50, %v3030_v0  ;;  %vm4987_vm10 = vmand %vm4955_vm9, %vm17258_vm6  ;;  %v12964_v53 = vadd.f32 %v3435_v34, %v12080_v1  ;;  %v17263_v0 = vld [vmem:[#allocation135_spill] sm:$0xff]  ;;  %v12976_v58 = vsel %vm3875_vm2, %v12641_v35, 0.0  ;;  %v4607_v50 = vpop.f32.mrb[109].mxu0  ;;  %v12984_v62 = vpop.f32.mrb[74].mxu1  ;;  %v17279_v16 = vld [vmem:[#allocation25_spill] sm:$0xff] }
 0x341   : > { %v3436_v11 = vsel %vm17259_vm0, %v3031_v29, 0.0  ;;  %vm17261_vm1 = vmmov %vm17256_vm11  ;;  %v5019_v61 = vsel %vm4987_vm10, 1, %v15824_v54  ;;  %vm17264_vm11 = vcmp.ge.s32.totalorder %v8795_v31, 4294967295  ;;  %17265 = vst [vmem:[#allocation221_spill] sm:$0xff] %v12976_v58  ;;  %v12991_v35 = vpop.permute.xlu1 %5093  ;;  %v4746_v29 = vrot.slane %v4607_v50, 7  ;;  %v12993_v34 = vpop.f32.mrb[110].mxu0 }
 0x342   : > { %17260 = vst [vmem:[#allocation89_spill] sm:$0xff] %v12964_v53  ;;  %v12967_v46 = vsel %vm17261_vm1, %v4738_v60, %v4740_v26  ;;  %vm5997_vm9 = vmand %vm12410_vm7, %vm17264_vm11  ;;  %v12979_v1 = vadd.f32 %v3436_v11, %v12174_v32  ;;  %5108 = vperm.xlu0 %7783, %v5019_v61   ;;  %v3034_v32 = vrot.slane %v2898_v59, 7  ;;  %vm17272_vm10 = vcmp.ge.s32.totalorder %v16739_v37, 4294967295  ;;  %v2901_v6 = vpop.f32.mrb[75].mxu1  ;;  %v4610_v8 = vpop.f32.mrb[111].mxu0  ;;  %v17302_v53 = vld [vmem:[#allocation162_spill] sm:$0xff] }
 0x343   : > { %17262 = vst [vmem:[#allocation225_spill] sm:$0xff] %v12967_v46  ;;  %vm17267_vm0 = vmmov %vm17261_vm1  ;;  %v4750_v31 = vrot.slane %v7586_v56, 7  ;;  %v3040_v11 = vrot.slane %v12984_v62, 7  ;;  %vm17273_vm11 = vcmp.lt.s32.totalorder %v16739_v37, 15  ;;  %v17274_v59 = vrot.slane %v12888_v15, 7  ;;  %v17278_v62 = vld [vmem:[#allocation185_spill] sm:$0xff]  ;;  %v13019_v37 = vpop.permute.xlu0 %5090 }
 0x344   : > { %17266 = vst [vmem:[#allocation87_spill] sm:$0xff] %v12979_v1  ;;  %v12982_v60 = vsel %vm17267_vm0, %v4740_v26, %v4742_v52  ;;  %vm6029_vm6 = vmand %vm5997_vm9, %vm17269_vm13  ;;  %v17271_v52 = vld [vmem:[#allocation24_spill] sm:$0xff]  ;;  %v17275_v58 = vrot.slane %v12890_v49, 7  ;;  %v3036_v56 = vrot.slane %v2901_v6, 7  ;;  %v17285_v49 = vrot.slane %v12993_v34, 7 }
 0x345   : > { %17268 = vst [vmem:[#allocation40_spill] sm:$0xff] %v12982_v60  ;;  %17270 = vst [vmem:[#allocation163_spill] sm:$0xff] %v12991_v35  ;;  %v6061_v26 = vsel %vm6029_vm6, 1, %v15824_v54  ;;  %v3035_v50 = vsel %vm17267_vm0, %v17274_v59, %v3034_v32  ;;  %v4748_v35 = vrot.slane %v4610_v8, 7  ;;  %vm17280_vm6 = vcmp.ge.s32.totalorder %v17279_v16, 0  ;;  %v17288_v8 = vld [vmem:[#allocation138_spill] sm:$0xff] }
 0x346   : > { %vm5996_vm1 = vmand %vm12455_vm8, %vm17272_vm10  ;;  %6148 = vperm.xlu1 %7784, %v6061_v26   ;;  %v17281_v26 = vld [vmem:[#allocation122_spill] sm:$0xff]  ;;  %17283 = vst [vmem:[#allocation127_spill] sm:$0xff] %v13019_v37  ;;  %v17444_v60 = vld [vmem:[#allocation160_spill] sm:$0xff] }
 0x347   : > { %vm6028_vm9 = vmand %vm5996_vm1, %vm17273_vm11  ;;  %vm17282_vm10 = vnez %v17281_v26 }
 0x348   : > { %vm17276_vm13 = vmmov %vm17267_vm0  ;;  %v6060_v61 = vsel %vm6028_vm9, 1, %v15824_v54  ;;  %vm17289_vm9 = vcmp.lt.s32.totalorder %v17279_v16, 16 }
 0x349   : > { %v13011_v23 = vsel %vm17276_vm13, %v17275_v58, %v4746_v29  ;;  %vm3674_vm1 = vmand %vm17282_vm10, %vm17280_vm6  ;;  %v13025_v58 = vsel %vm17267_vm0, %v4750_v31, %v17285_v49  ;;  %vm17287_vm13 = vcmp.eq.s32.totalorder %v17234_v47, 1  ;;  %6145 = vperm.xlu0 %7783, %v6060_v61   ;;  %v17296_v47 = vld [vmem:[#allocation125_spill] sm:$0xff] }
 0x34a   : > { %17277 = vst [vmem:[#allocation226_spill] sm:$0xff] %v13011_v23  ;;  %vm17284_vm11 = vmmov %vm17267_vm0  ;;  %v3438_v6 = vsel %vm17287_vm13, %v3035_v50, 0.0  ;;  %vm17297_vm13 = vnez %v17296_v47  ;;  %v13042_v50 = vpop.permute.xlu1 %6130 }
 0x34b   : > { %v3041_v15 = vsel %vm17284_vm11, %v3038_v2, %v3040_v11  ;;  %17286 = vst [vmem:[#allocation222_spill] sm:$0xff] %v13025_v58  ;;  %vm3706_vm2 = vmand %vm3674_vm1, %vm17289_vm9  ;;  %v17294_v58 = vld [vmem:[#allocation26_spill] sm:$0xff]  ;;  %vm17301_vm1 = vcmp.eq.s32.totalorder %v17246_v19, 1  ;;  %v13061_v19 = vpop.f32.mrb[112].mxu0 }
 0x34c   : > { %vm17290_vm6 = vmmov %vm17267_vm0  ;;  %v3738_v49 = vsel %vm3706_vm2, 1, %v15824_v54  ;;  %17298 = vst [vmem:[#allocation176_spill] sm:$0xff] %v13042_v50  ;;  %vm17305_vm2 = vcmp.lt.s32.totalorder %v17294_v58, 16  ;;  %v7889_v50 = vld [vmem:[%s14985_s1 + $0x60] sm:$0xff] }
 0x34d   : > { %v3037_v59 = vsel %vm17290_vm6, %v3034_v32, %v3036_v56  ;;  %vm17291_vm7 = vmmov %vm17267_vm0  ;;  %3801 = vperm.xlu1 %7784, %v3738_v49   ;;  %v17310_v49 = vmov 0 }
 0x34e   : > { %v3039_v37 = vsel %vm17291_vm7, %v3036_v56, %v3038_v2  ;;  %vm17292_vm11 = vmmov %vm17267_vm0  ;;  %vm17295_vm0 = vcmp.ge.s32.totalorder %v17294_v58, 0  ;;  %v3439_v32 = vsel %vm17301_vm1, %v3037_v59, 0.0  ;;  %v13050_v2 = vadd.f32 %v3438_v6, %v17302_v53  ;;  %v17304_v56 = vld [vmem:[#allocation86_spill] sm:$0xff] }
 0x34f   : > { %v13035_v1 = vsel %vm17292_vm11, %v4746_v29, %v4748_v35  ;;  %vm3673_vm10 = vmand %vm17297_vm13, %vm17295_vm0  ;;  %v7492_v29 = vpop.f32.mrb[76].mxu1  ;;  %vm17309_vm11 = vcmp.ge.s32.totalorder %v7888_v45, 4294967295  ;;  %vm17315_vm1 = vcmp.ge.s32.totalorder %v17077_v17, 1  ;;  %v4758_v45 = vrot.slane %v13061_v19, 7  ;;  %v17319_v19 = vld [vmem:[#allocation57_spill] sm:$0xff] }
 0x350   : > { %17293 = vst [vmem:[#allocation151_spill] sm:$0xff] %v13035_v1  ;;  %vm17299_vm8 = vmmov %vm17290_vm6  ;;  %vm4843_vm6 = vcmp.ge.s32.totalorder %v7889_v50, 4294967295  ;;  %v2914_v59 = vpop.f32.mrb[77].mxu1  ;;  %v13072_v1 = vpop.permute.xlu0 %6127 }
 0x351   : > { %v13045_v61 = vsel %vm17299_vm8, %v4748_v35, %v4750_v31  ;;  %17303 = vst [vmem:[#allocation166_spill] sm:$0xff] %v13050_v2  ;;  %vm3705_vm9 = vmand %vm3673_vm10, %vm17305_vm2  ;;  %v17306_v35 = vld [vmem:[#allocation64_spill] sm:$0xff]  ;;  %vm17308_vm8 = vcmp.eq.s32.totalorder %v17252_v21, 1  ;;  %vm4875_vm10 = vcmp.lt.s32.totalorder %v7889_v50, 15  ;;  %v3042_v2 = vrot.slane %v2914_v59, 7  ;;  %v13082_v23 = vpop.f32.mrb[78].mxu1 }
 0x352   : > { %17300 = vst [vmem:[#allocation42_spill] sm:$0xff] %v13045_v61  ;;  %v13059_v31 = vadd.f32 %v3439_v32, %v17306_v35  ;;  %v3441_v53 = vsel %vm17308_vm8, %v3041_v15, 0.0  ;;  %v3737_v6 = vsel %vm3705_vm9, 1, %v15824_v54  ;;  %vm13068_vm0 = vmand %vm17309_vm11, %vm4876_vm15  ;;  %v4623_v32 = vpop.f32.mrb[113].mxu0  ;;  %v17313_v35 = vld [vmem:[#allocation15_spill] sm:$0xff]  ;;  %v3046_v21 = vrot.slane %v7492_v29, 7 }
 0x353   : > { %v17311_v49 = vsel %vm13068_vm0, 4294967295, %v17310_v49  ;;  %17312 = vst [vmem:[#allocation227_spill] sm:$0xff] %v13072_v1  ;;  %3798 = vperm.xlu0 %7783, %v3737_v6   ;;  %vm4940_vm2 = vmand %vm13068_vm0, %vm17315_vm1  ;;  %v4754_v15 = vrot.slane %v4623_v32, 7  ;;  %v13084_v61 = vpop.f32.mrb[114].mxu0  ;;  %vm17316_vm15 = vcmp.eq.s32.totalorder %v17263_v0, 1  ;;  %vm17317_vm9 = vcmp.lt.s32.totalorder %v17077_v17, 17 }
 0x354   : > { %17307 = vst [vmem:[#allocation233_spill] sm:$0xff] %v13059_v31  ;;  %v13075_v31 = vadd.f32 %v3441_v53, %v17313_v35  ;;  %v3440_v59 = vsel %vm17316_vm15, %v3039_v37, 0.0  ;;  %vm4972_vm8 = vmand %vm4940_vm2, %vm17317_vm9  ;;  %v3048_v6 = vrot.slane %v13082_v23, 7  ;;  %v2917_v29 = vpop.f32.mrb[79].mxu1  ;;  %v13103_v37 = vpop.permute.xlu1 %5045  ;;  %vm17324_vm2 = vcmp.eq.s32.totalorder %v17271_v52, 1  ;;  %v17330_v50 = vld [vmem:[#allocation13_spill] sm:$0xff] }
 0x355   : > { %vm17318_vm11 = vmmov %vm17291_vm7  ;;  %v13094_v32 = vadd.f32 %v3440_v59, %v17319_v19  ;;  %v5004_v1 = vsel %vm4972_vm8, 1, %v15824_v54  ;;  %17323 = vst [vmem:[#allocation94_spill] sm:$0xff] %v13103_v37  ;;  %v17325_v23 = vrot.slane %v12993_v34, 7  ;;  %v3044_v59 = vrot.slane %v2917_v29, 7  ;;  %v17328_v19 = vld [vmem:[#allocation187_spill] sm:$0xff]  ;;  %v17333_v37 = vld [vmem:[#allocation186_spill] sm:$0xff] }
 0x356   : > { %17314 = vst [vmem:[#allocation136_spill] sm:$0xff] %v13075_v31  ;;  %v3043_v53 = vsel %vm17318_vm11, %v3040_v11, %v3042_v2  ;;  %v4626_v31 = vpop.f32.mrb[115].mxu0  ;;  %vm13099_vm1 = vmand %vm4843_vm6, %vm4875_vm10  ;;  %5063 = vperm.xlu1 %7784, %v5004_v1   ;;  %vm17329_vm8 = vcmp.ge.s32.totalorder %v17093_v10, 1 }
 0x357   : > { %17320 = vst [vmem:[#allocation132_spill] sm:$0xff] %v13094_v32  ;;  %v3442_v11 = vsel %vm17324_vm2, %v3043_v53, 0.0  ;;  %vm17326_vm15 = vmmov %vm17291_vm7  ;;  %v4756_v53 = vrot.slane %v4626_v31, 7  ;;  %vm17334_vm2 = vcmp.lt.s32.totalorder %v17093_v10, 17  ;;  %v17341_v31 = vld [vmem:[#allocation70_spill] sm:$0xff] }
 0x358   : > { %v13110_v35 = vsel %vm17326_vm15, %v17325_v23, %v4754_v15  ;;  %vm4939_vm6 = vmand %vm13099_vm1, %vm17329_vm8  ;;  %v13118_v32 = vadd.f32 %v3442_v11, %v17330_v50  ;;  %v17338_v23 = vrot.slane %v13084_v61, 7 }
 0x359   : > { %17327 = vst [vmem:[#allocation148_spill] sm:$0xff] %v13110_v35  ;;  %vm17332_vm10 = vmmov %vm17291_vm7  ;;  %vm17335_vm7 = vcmp.eq.s32.totalorder %v17278_v62, 1  ;;  %v17344_v62 = vld [vmem:[#allocation72_spill] sm:$0xff]  ;;  %v17352_v35 = vld [vmem:[#allocation167_spill] sm:$0xff] }
 0x35a   : > { %17331 = vst [vmem:[#allocation92_spill] sm:$0xff] %v13118_v32  ;;  %v3049_v52 = vsel %vm17332_vm10, %v3046_v21, %v3048_v6  ;;  %vm4971_vm15 = vmand %vm4939_vm6, %vm17334_vm2  ;;  %v13138_v32 = vpop.permute.xlu0 %5042  ;;  %vm17349_vm6 = vcmp.lt.s32.totalorder %v17341_v31, 15 }
 0x35b   : > { %v3445_v34 = vsel %vm17335_vm7, %v3049_v52, 0.0  ;;  %vm17336_vm9 = vmmov %vm17332_vm10  ;;  %v5003_v50 = vsel %vm4971_vm15, 1, %v15824_v54  ;;  %vm17342_vm10 = vcmp.ge.s32.totalorder %v17341_v31, 4294967295  ;;  %17343 = vst [vmem:[#allocation181_spill] sm:$0xff] %v13138_v32  ;;  %vm17346_vm7 = vcmp.eq.s32.totalorder %v17288_v8, 1  ;;  %v13159_v8 = vpop.f32.mrb[116].mxu0 }
 0x35c   : > { %v3045_v1 = vsel %vm17336_vm9, %v3042_v2, %v3044_v59  ;;  %vm17337_vm0 = vmmov %vm17336_vm9  ;;  %v13141_v52 = vadd.f32 %v3445_v34, %v17344_v62  ;;  %5060 = vperm.xlu0 %7783, %v5003_v50   ;;  %v17358_v31 = vld [vmem:[#allocation71_spill] sm:$0xff]  ;;  %v13168_v62 = vpop.permute.xlu1 %6082 }
 0x35d   : > { %v3047_v29 = vsel %vm17337_vm0, %v3044_v59, %v3046_v21  ;;  %vm17339_vm8 = vmmov %vm17337_vm0  ;;  %v3443_v2 = vsel %vm17346_vm7, %v3045_v1, 0.0  ;;  %vm17347_vm0 = vcmp.eq.s32.totalorder %v17304_v56, 1  ;;  %v7496_v59 = vpop.f32.mrb[80].mxu1  ;;  %v17356_v1 = vld [vmem:[#allocation61_spill] sm:$0xff]  ;;  %17360 = vst [vmem:[#allocation230_spill] sm:$0xff] %v13168_v62  ;;  %vm17361_vm7 = vcmp.lt.s32.totalorder %v17358_v31, 15 }
 0x35e   : > { %v13131_v11 = vsel %vm17339_vm8, %v4758_v45, %v17338_v23  ;;  %vm5981_vm11 = vmand %vm17192_vm12, %vm17342_vm10  ;;  %17345 = vst [vmem:[#allocation228_spill] sm:$0xff] %v13141_v52  ;;  %v3444_v21 = vsel %vm17347_vm0, %v3047_v29, 0.0  ;;  %v17348_v23 = vld [vmem:[#allocation60_spill] sm:$0xff]  ;;  %v2930_v56 = vpop.f32.mrb[81].mxu1  ;;  %vm3416_vm15 = vcmp.eq.s32.totalorder %v17356_v1, 1 }
 0x35f   : > { %17340 = vst [vmem:[#allocation180_spill] sm:$0xff] %v13131_v11  ;;  %vm3417_vm9 = vcmp.eq.s32.totalorder %v17348_v23, 1  ;;  %vm6013_vm2 = vmand %vm5981_vm11, %vm17349_vm6  ;;  %v13151_v11 = vadd.f32 %v3443_v2, %v17350_v28  ;;  %v13154_v32 = vadd.f32 %v3444_v21, %v17352_v35  ;;  %v17357_v29 = vld [vmem:[#allocation12_spill] sm:$0xff]  ;;  %vm17359_vm11 = vcmp.ge.s32.totalorder %v17358_v31, 4294967295  ;;  %v13170_v2 = vpop.f32.mrb[117].mxu0  ;;  %v13176_v52 = vpop.f32.mrb[82].mxu1 }
 0x360   : > { %vm17354_vm12 = vmmov %vm17339_vm8  ;;  %vm3851_vm8 = vcmp.eq.s32.totalorder %v17357_v29, 1  ;;  %v6045_v50 = vsel %vm6013_vm2, 1, %v15824_v54  ;;  %v3050_v35 = vrot.slane %v2930_v56, 7  ;;  %v17369_v28 = vld [vmem:[#allocation195_spill] sm:$0xff]  ;;  %v17372_v40 = vrot.slane %v13170_v2, 7 }
 0x361   : > { %17351 = vst [vmem:[#allocation140_spill] sm:$0xff] %v13151_v11  ;;  %17353 = vst [vmem:[#allocation93_spill] sm:$0xff] %v13154_v32  ;;  %v13157_v34 = vsel %vm17354_vm12, %v4754_v15, %v4756_v53  ;;  %6100 = vperm.xlu1 %7784, %v6045_v50   ;;  %v3054_v15 = vrot.slane %v7496_v59, 7  ;;  %v13178_v32 = vpop.f32.mrb[118].mxu0  ;;  %v17364_v11 = vld [vmem:[#allocation142_spill] sm:$0xff]  ;;  %v17365_v50 = vld [vmem:[#allocation16_spill] sm:$0xff]  ;;  %v13190_v59 = vpop.permute.xlu0 %6079 }
 0x362   : > { %17355 = vst [vmem:[#allocation183_spill] sm:$0xff] %v13157_v34  ;;  %vm5980_vm10 = vmand %vm12622_vm4, %vm17359_vm11  ;;  %vm17371_vm4 = vcmp.eq.s32.totalorder %v17328_v19, 1  ;;  %v4642_v34 = vpop.f32.mrb[119].mxu0  ;;  %v13213_v19 = vpop.permute.xlu1 %4417  ;;  %v17381_v46 = vrot.slane %v13176_v52, 7 }
 0x363   : > { %vm6012_vm0 = vmand %vm5980_vm10, %vm17361_vm7  ;;  %17367 = vst [vmem:[#allocation182_spill] sm:$0xff] %v13190_v59  ;;  %v17432_v59 = vld [vmem:[#allocation45_spill] sm:$0xff] }
 0x364   : > { %vm17362_vm6 = vmmov %vm17354_vm12  ;;  %v6044_v56 = vsel %vm6012_vm0, 1, %v15824_v54  ;;  %vm17366_vm12 = vcmp.ge.s32.totalorder %v17210_v57, 4294967295  ;;  %vm17370_vm0 = vcmp.lt.s32.totalorder %v17210_v57, 15  ;;  %17378 = vst [vmem:[#allocation91_spill] sm:$0xff] %v13213_v19  ;;  %v17401_v19 = vld [vmem:[#allocation198_spill] sm:$0xff] }
 0x365   : > { %v13181_v41 = vsel %vm17362_vm6, %v4756_v53, %v4758_v45  ;;  %vm4276_vm11 = vmand %vm17213_vm3, %vm17366_vm12  ;;  %v2933_v53 = vpop.f32.mrb[83].mxu1  ;;  %6097 = vperm.xlu0 %7783, %v6044_v56   ;;  %v17376_v45 = vld [vmem:[#allocation147_spill] sm:$0xff] }
 0x366   : > { %17363 = vst [vmem:[#allocation144_spill] sm:$0xff] %v13181_v41  ;;  %vm17368_vm10 = vmmov %vm17362_vm6  ;;  %v3052_v43 = vrot.slane %v2933_v53, 7 }
 0x367   : > { %v3051_v31 = vsel %vm17368_vm10, %v3048_v6, %v3050_v35  ;;  %vm4308_vm6 = vmand %vm4276_vm11, %vm17370_vm0  ;;  %v17373_v6 = vrot.slane %v13084_v61, 7 }
 0x368   : > { %v3446_v41 = vsel %vm17371_vm4, %v3051_v31, 0.0  ;;  %vm17374_vm3 = vmmov %vm17368_vm10  ;;  %v4340_v56 = vsel %vm4308_vm6, 1, %v15824_v54  ;;  %vm17377_vm10 = vcmp.ge.s32.totalorder %v17220_v22, 4294967295  ;;  %v17379_v31 = vld [vmem:[#allocation165_spill] sm:$0xff]  ;;  %vm17394_vm6 = vcmp.ge.s32.totalorder %v16982_v30, 0 }
 0x369   : > { %v13205_v21 = vsel %vm17374_vm3, %v17373_v6, %v17372_v40  ;;  %vm4275_vm11 = vmand %vm17223_vm14, %vm17377_vm10  ;;  %v13216_v53 = vadd.f32 %v3446_v41, %v17379_v31  ;;  %v17383_v40 = vrot.slane %v13178_v32, 7  ;;  %v17384_v6 = vrot.slane %v13159_v8, 7  ;;  %4435 = vperm.xlu1 %7784, %v4340_v56   ;;  %v17390_v41 = vld [vmem:[#allocation191_spill] sm:$0xff]  ;;  %v13243_v56 = vpop.permute.xlu0 %4414 }
 0x36a   : > { %17375 = vst [vmem:[#allocation236_spill] sm:$0xff] %v13205_v21  ;;  %vm17382_vm4 = vmmov %vm17374_vm3  ;;  %vm3858_vm12 = vcmp.eq.s32.totalorder %v17390_v41, 1  ;;  %vm17395_vm14 = vnez %v17231_v33 }
 0x36b   : > { %17380 = vst [vmem:[#allocation238_spill] sm:$0xff] %v13216_v53  ;;  %v3057_v61 = vsel %vm17382_vm4, %v3054_v15, %v17381_v46  ;;  %vm17385_vm0 = vmmov %vm17374_vm3  ;;  %vm17389_vm3 = vcmp.lt.s32.totalorder %v17220_v22, 15  ;;  %v13369_v47 = vsel %vm3858_vm12, %v17444_v60, 0.0  ;;  %vm17450_vm12 = vnez %v17311_v49 }
 0x36c   : > { %v13226_v21 = vsel %vm17385_vm0, %v17384_v6, %v17383_v40  ;;  %vm4307_vm10 = vmand %vm4275_vm11, %vm17389_vm3  ;;  %v3449_v46 = vsel %vm3417_vm9, %v3057_v61, 0.0  ;;  %v17393_v6 = vld [vmem:[#allocation34_spill] sm:$0xff]  ;;  %17396 = vst [vmem:[#allocation139_spill] sm:$0xff] %v13243_v56  ;;  %vm17398_vm9 = vcmp.eq.s32.totalorder %v17333_v37, 1  ;;  %v17418_v56 = vld [vmem:[#allocation37_spill] sm:$0xff] }
 0x36d   : > { %17386 = vst [vmem:[#allocation231_spill] sm:$0xff] %v13226_v21  ;;  %vm17391_vm4 = vmmov %vm17385_vm0  ;;  %v4339_v40 = vsel %vm4307_vm10, 1, %v15824_v54  ;;  %v13246_v21 = vadd.f32 %v3449_v46, %v12523_v7  ;;  %v13263_v7 = vld [vmem:[%s14985_s1 + $0xf8] sm:$0xff]  ;;  %v17402_v37 = vld [vmem:[#allocation170_spill] sm:$0xff]  ;;  %v13273_v46 = vpop.f32.mrb[120].mxu0 }
 0x36e   : > { %v3053_v31 = vsel %vm17391_vm4, %v3050_v35, %v3052_v43  ;;  %vm17392_vm2 = vmmov %vm17385_vm0  ;;  %vm3856_vm0 = vcmp.eq.s32.totalorder %v17393_v6, 1  ;;  %4432 = vperm.xlu0 %7783, %v4339_v40   ;;  %v17405_v40 = vld [vmem:[#allocation104_spill] sm:$0xff]  ;;  %vm17410_vm4 = vcmp.lt.s32.totalorder %v16999_v9, 16 }
 0x36f   : > { %v3055_v53 = vsel %vm17392_vm2, %v3052_v43, %v3054_v15  ;;  %vm5413_vm7 = vmand %vm17395_vm14, %vm17394_vm6  ;;  %17397 = vst [vmem:[#allocation234_spill] sm:$0xff] %v13246_v21  ;;  %v3447_v23 = vsel %vm17398_vm9, %v3053_v31, 0.0  ;;  %v7500_v15 = vpop.f32.mrb[84].mxu1  ;;  %v17399_v43 = vld [vmem:[#allocation43_spill] sm:$0xff]  ;;  %vm17400_vm2 = vcmp.lt.s32.totalorder %v16982_v30, 16  ;;  %vm3861_vm6 = vcmp.eq.s32.totalorder %v17401_v19, 1 }
 0x370   : > { %v3448_v35 = vsel %vm3416_vm15, %v3055_v53, 0.0  ;;  %v13255_v61 = vsel %vm3851_vm8, %v17399_v43, 0.0  ;;  %vm5445_vm11 = vmand %vm5413_vm7, %vm17400_vm2  ;;  %vm4894_vm15 = vcmp.lt.s32.totalorder %v13263_v7, 15  ;;  %v13268_v1 = vadd.f32 %v3447_v23, %v17402_v37  ;;  %v2946_v31 = vpop.f32.mrb[85].mxu1  ;;  %v13285_v23 = vpop.permute.xlu1 %5550  ;;  %v13431_v19 = vld [vmem:[%s14985_s1 + $0x78] sm:$0xff] }
 0x371   : > { %v13271_v29 = vadd.f32 %v3448_v35, %v12482_v12  ;;  %v4764_v53 = vrot.slane %v4642_v34, 7  ;;  %vm17406_vm8 = vcmp.eq.s32.totalorder %v17369_v28, 1  ;;  %v5477_v21 = vsel %vm5445_vm11, 1, %v15824_v54  ;;  %17409 = vst [vmem:[#allocation129_spill] sm:$0xff] %v13285_v23  ;;  %v13287_v34 = vpop.f32.mrb[121].mxu0 }
 0x372   : > { %17403 = vst [vmem:[#allocation184_spill] sm:$0xff] %v13268_v1  ;;  %v13278_v43 = vsel %vm17406_vm8, %v17405_v40, 0.0  ;;  %vm17408_vm7 = vcmp.ge.s32.totalorder %v16999_v9, 0  ;;  %v3062_v12 = vrot.slane %v7500_v15, 7  ;;  %v3058_v35 = vrot.slane %v2946_v31, 7  ;;  %5568 = vperm.xlu1 %7784, %v5477_v21   ;;  %v13298_v1 = vpop.f32.mrb[86].mxu1  ;;  %v13314_v40 = vpop.permute.xlu0 %5547 }
 0x373   : > { %17404 = vst [vmem:[#allocation156_spill] sm:$0xff] %v13271_v29  ;;  %17407 = vst [vmem:[#allocation27_spill] sm:$0xff] %v13278_v43  ;;  %v17411_v28 = vrot.slane %v13159_v8, 7  ;;  %vm17412_vm2 = vcmask 1040384   ;;  %v13300_v23 = vpop.f32.mrb[122].mxu0  ;;  %v17414_v15 = vrot.slane %v13170_v2, 7 }
 0x374   : > { %vm5412_vm10 = vmand %vm12938_vm5, %vm17408_vm7  ;;  %v17417_v31 = vld [vmem:[#allocation10_spill] sm:$0xff]  ;;  %17422 = vst [vmem:[#allocation30_spill] sm:$0xff] %v13314_v40  ;;  %v13319_v2 = vld [vmem:[%s14985_s1 + $0xf0] sm:$0xff]  ;;  %vm17428_vm8 = vcmp.eq.s32.totalorder %v17364_v11, 1  ;;  %v4658_v62 = vpop.f32.mrb[123].mxu0  ;;  %v13351_v11 = vpop.permute.xlu1 %4369 }
 0x375   : > { %vm5444_vm9 = vmand %vm5412_vm10, %vm17410_vm4  ;;  %v13294_v37 = vsel %vm17412_vm2, %v4764_v53, %v17411_v28  ;;  %v17419_v28 = vld [vmem:[#allocation76_spill] sm:$0xff]  ;;  %vm17421_vm4 = vnez %v17281_v26 }
 0x376   : > { %17413 = vst [vmem:[#allocation239_spill] sm:$0xff] %v13294_v37  ;;  %vm17415_vm11 = vmmov %vm17412_vm2  ;;  %v5476_v8 = vsel %vm5444_vm9, 1, %v15824_v54  ;;  %vm17420_vm10 = vcmp.ge.s32.totalorder %v17419_v28, 4294967295  ;;  %v17425_v37 = vld [vmem:[#allocation105_spill] sm:$0xff]  ;;  %v13383_v60 = vpop.permute.xlu0 %4366 }
 0x377   : > { %v13305_v21 = vsel %vm17415_vm11, %v17414_v15, %v4764_v53  ;;  %vm4260_vm2 = vmand %vm17421_vm4, %vm17420_vm10  ;;  %v17423_v53 = vrot.slane %v13176_v52, 7  ;;  %vm17426_vm10 = vcmp.eq.s32.totalorder %v17365_v50, 1  ;;  %5565 = vperm.xlu0 %7783, %v5476_v8   ;;  %vm17427_vm4 = vcmp.lt.s32.totalorder %v17419_v28, 15  ;;  %v17433_v50 = vld [vmem:[#allocation28_spill] sm:$0xff]  ;;  %v17434_v8 = vld [vmem:[#allocation78_spill] sm:$0xff] }
 0x378   : > { %17416 = vst [vmem:[#allocation48_spill] sm:$0xff] %v13305_v21  ;;  %vm17424_vm9 = vmmov %vm17415_vm11  ;;  %v2949_v21 = vpop.f32.mrb[87].mxu1  ;;  %v13331_v40 = vsel %vm17426_vm10, %v17425_v37, 0.0  ;;  %v17429_v52 = vrot.slane %v13287_v34, 7 }
 0x379   : > { %v3059_v15 = vsel %vm17424_vm9, %v17423_v53, %v3058_v35  ;;  %vm4292_vm11 = vmand %vm4260_vm2, %vm17427_vm4  ;;  %v17430_v53 = vrot.slane %v13178_v32, 7  ;;  %v3060_v26 = vrot.slane %v2949_v21, 7  ;;  %vm17435_vm2 = vcmp.ge.s32.totalorder %v17434_v8, 4294967295 }
 0x37a   : > { %v3450_v43 = vsel %vm17428_vm8, %v3059_v15, 0.0  ;;  %v4324_v37 = vsel %vm4292_vm11, 1, %v15824_v54  ;;  %vm4259_vm8 = vmand %vm17297_vm13, %vm17435_vm2  ;;  %v17436_v15 = vld [vmem:[#allocation67_spill] sm:$0xff]  ;;  %vm17445_vm13 = vcmp.lt.s32.totalorder %v17434_v8, 15  ;;  %vm17446_vm2 = vcmp.eq.s32.totalorder %v17376_v45, 1 }
 0x37b   : > { %v13342_v29 = vsel %vm17424_vm9, %v17430_v53, %v17429_v52  ;;  %v13354_v32 = vadd.f32 %v3450_v43, %v17436_v15  ;;  %v17438_v52 = vrot.slane %v13298_v1, 7  ;;  %vm17439_vm4 = vmmov %vm17424_vm9  ;;  %v17440_v53 = vrot.slane %v13300_v23, 7  ;;  %4387 = vperm.xlu1 %7784, %v4324_v37   ;;  %v17455_v37 = vld [vmem:[#allocation103_spill] sm:$0xff] }
 0x37c   : > { %17431 = vst [vmem:[#allocation240_spill] sm:$0xff] %v13342_v29  ;;  %v17441_v29 = vrot.slane %v13273_v46, 7  ;;  %vm17442_vm9 = vmmov %vm17439_vm4  ;;  %v3061_v15 = vsel %vm17439_vm4, %v3058_v35, %v3060_v26  ;;  %v13392_v35 = vpop.f32.mrb[88].mxu1 }
 0x37d   : > { %17437 = vst [vmem:[#allocation21_spill] sm:$0xff] %v13354_v32  ;;  %v3065_v21 = vsel %vm17439_vm4, %v3062_v12, %v17438_v52  ;;  %vm4291_vm11 = vmand %vm4259_vm8, %vm17445_vm13  ;;  %v17448_v32 = vld [vmem:[#allocation190_spill] sm:$0xff]  ;;  %vm17452_vm8 = vcmp.eq.s32.totalorder %v17387_v18, 1  ;;  %vm17453_vm13 = vcmp.eq.s32.totalorder %v17388_v38, 1  ;;  %v4772_v38 = vrot.slane %v4658_v62, 7 }
 0x37e   : > { %v13364_v28 = vsel %vm17442_vm9, %v17441_v29, %v17440_v53  ;;  %v3453_v43 = vsel %vm17446_vm2, %v3065_v21, 0.0  ;;  %vm17447_vm10 = vmmov %vm17439_vm4  ;;  %vm3423_vm7 = vcmp.eq.s32.totalorder %v17448_v32, 1  ;;  %v4323_v29 = vsel %vm4291_vm11, 1, %v15824_v54 }
 0x37f   : > { %17443 = vst [vmem:[#allocation116_spill] sm:$0xff] %v13364_v28  ;;  %v3063_v52 = vsel %vm17447_vm10, %v3060_v26, %v3062_v12  ;;  %vm17449_vm9 = vcmp.ge.s32.totalorder %v17077_v17, 0  ;;  %v13386_v41 = vadd.f32 %v3453_v43, %v12613_v24  ;;  %v3451_v45 = vsel %vm17452_vm8, %v3061_v15, 0.0  ;;  %v17454_v26 = vld [vmem:[#allocation11_spill] sm:$0xff]  ;;  %4384 = vperm.xlu0 %7783, %v4323_v29   ;;  %v13408_v43 = vpop.f32.mrb[124].mxu0  ;;  %v2962_v15 = vpop.f32.mrb[89].mxu1 }
 0x380   : > { %vm5397_vm3 = vmand %vm17450_vm12, %vm17449_vm9  ;;  %v3452_v12 = vsel %vm17453_vm13, %v3063_v52, 0.0  ;;  %v13398_v21 = vsel %vm3856_vm0, %v17455_v37, 0.0  ;;  %vm17456_vm11 = vcmp.lt.s32.totalorder %v17077_v17, 16  ;;  %v17457_v24 = vld [vmem:[#allocation131_spill] sm:$0xff]  ;;  %v17460_v52 = vld [vmem:[#allocation192_spill] sm:$0xff]  ;;  %v3070_v62 = vrot.slane %v13392_v35, 7 }
 0x381   : > { %17451 = vst [vmem:[#allocation49_spill] sm:$0xff] %v13386_v41  ;;  %vm5429_vm2 = vmand %vm5397_vm3, %vm17456_vm11  ;;  %v13403_v53 = vadd.f32 %v3451_v45, %v17457_v24  ;;  %v13406_v18 = vadd.f32 %v3452_v12, %v12578_v14  ;;  %v13413_v6 = vsel %vm3861_vm6, %v17460_v52, 0.0  ;;  %v17461_v37 = vld [vmem:[#allocation20_spill] sm:$0xff]  ;;  %vm17462_vm3 = vcmp.ge.s32.totalorder %v17093_v10, 0  ;;  %v13421_v14 = vpop.permute.xlu1 %5502  ;;  %v13424_v45 = vpop.f32.mrb[125].mxu0 }
 0x382   : > { %v5461_v17 = vsel %vm5429_vm2, 1, %v15824_v54  ;;  %vm5396_vm4 = vmand %vm13099_vm1, %vm17462_vm3  ;;  %v3066_v29 = vrot.slane %v2962_v15, 7  ;;  %vm17463_vm6 = vcmp.lt.s32.totalorder %v17093_v10, 16  ;;  %v17464_v12 = vrot.slane %v13287_v34, 7  ;;  %v13447_v41 = vpop.f32.mrb[126].mxu0 }
 0x383   : > { %17458 = vst [vmem:[#allocation50_spill] sm:$0xff] %v13403_v53  ;;  %17459 = vst [vmem:[#allocation101_spill] sm:$0xff] %v13406_v18  ;;  %5520 = vperm.xlu1 %7784, %v5461_v17   ;;  %v17467_v24 = vrot.slane %v13273_v46, 7  ;;  %v7505_v17 = vpop.f32.mrb[90].mxu1  ;;  %vm17470_vm3 = vcmp.ge.s32.totalorder %v13263_v7, 4294967295  ;;  %v13458_v46 = vpop.permute.xlu0 %5499  ;;  %v17475_v53 = vld [vmem:[#allocation194_spill] sm:$0xff] }
 0x384   : > { %vm5428_vm9 = vmand %vm5396_vm4, %vm17463_vm6  ;;  %v2965_v52 = vpop.f32.mrb[91].mxu1  ;;  %vm17497_vm13 = vcmp.eq.s32.totalorder %v17433_v50, 1 }
 0x385   : > { %vm17465_vm11 = vmmov %vm17447_vm10  ;;  %v5460_v18 = vsel %vm5428_vm9, 1, %v15824_v54  ;;  %vm17476_vm9 = vcmp.eq.s32.totalorder %v17418_v56, 1  ;;  %v3068_v10 = vrot.slane %v2965_v52, 7  ;;  %v4674_v56 = vpop.f32.mrb[127].mxu0 }
 0x386   : > { %v13438_v35 = vsel %vm17465_vm11, %v17464_v12, %v4772_v38  ;;  %vm17468_vm2 = vmmov %vm17447_vm10  ;;  %5517 = vperm.xlu0 %7783, %v5460_v18   ;;  %v13488_v18 = vld [vmem:[%s14985_s1 + $0x70] sm:$0xff] }
 0x387   : > { %17466 = vst [vmem:[#allocation51_spill] sm:$0xff] %v13438_v35  ;;  %v13443_v15 = vsel %vm17468_vm2, %v4772_v38, %v17467_v24  ;;  %vm13454_vm4 = vmand %vm17470_vm3, %vm4894_vm15  ;;  %v17473_v38 = vrot.slane %v13298_v1, 7  ;;  %v2978_v24 = vrot.slane %v7505_v17, 7  ;;  %v13467_v35 = vsel %vm17476_vm9, %v17475_v53, 0.0  ;;  %v17483_v53 = vld [vmem:[#allocation18_spill] sm:$0xff] }
 0x388   : > { %17469 = vst [vmem:[#allocation22_spill] sm:$0xff] %v13443_v15  ;;  %vm17474_vm6 = vmmov %vm17468_vm2  ;;  %vm17477_vm15 = vcmp.ge.s32.totalorder %v17210_v57, 1  ;;  %vm17478_vm2 = vcmp.eq.s32.totalorder %v17417_v31, 1  ;;  %v17479_v1 = vrot.slane %v13424_v45, 7  ;;  %v17480_v17 = vrot.slane %v13300_v23, 7  ;;  %v3838_v23 = vpop.permute.xlu1 %3837 }
 0x389   : > { %v3067_v12 = vsel %vm17474_vm6, %v17473_v38, %v3066_v29  ;;  %vm4958_vm11 = vmand %vm13454_vm4, %vm17477_vm15  ;;  %vm17484_vm9 = vcmp.lt.s32.totalorder %v17210_v57, 17  ;;  %vm17493_vm15 = vcmp.ge.s32.totalorder %v13319_v2, 4294967295 }
 0x38a   : > { %v3454_v7 = vsel %vm17478_vm2, %v3067_v12, 0.0  ;;  %vm17481_vm3 = vmmov %vm17474_vm6  ;;  %v17486_v12 = vrot.slane %v12702_v13, 7 }
 0x38b   : > { %v13480_v38 = vsel %vm17481_vm3, %v17480_v17, %v17479_v1  ;;  %vm4990_vm8 = vmand %vm4958_vm11, %vm17484_vm9  ;;  %v13493_v31 = vadd.f32 %v3454_v7, %v12569_v63  ;;  %v3072_v52 = vsel %vm17481_vm3, %v3070_v62, %v2978_v24  ;;  %v17488_v17 = vrot.slane %v13447_v41, 7  ;;  %v17498_v7 = vld [vmem:[#allocation212_spill] sm:$0xff] }
 0x38c   : > { %17482 = vst [vmem:[#allocation119_spill] sm:$0xff] %v13480_v38  ;;  %vm17487_vm6 = vmmov %vm17481_vm3  ;;  %v17489_v38 = vrot.slane %v13408_v43, 7  ;;  %v5022_v15 = vsel %vm4990_vm8, 1, %v15824_v54  ;;  %vm17492_vm9 = vcmp.lt.s32.totalorder %v13319_v2, 15  ;;  %vm17499_vm8 = vcmp.ge.s32.totalorder %v17220_v22, 1  ;;  %v17500_v2 = vld [vmem:[#allocation217_spill] sm:$0xff] }
 0x38d   : > { %17485 = vst [vmem:[#allocation99_spill] sm:$0xff] %v13493_v31  ;;  %v3105_v1 = vsel %vm17487_vm6, %v2978_v24, %v17486_v12  ;;  %vm17490_vm11 = vmmov %vm17481_vm3  ;;  %vm3878_vm3 = vcmp.eq.s32.totalorder %v3838_v23, 1  ;;  %vm17496_vm6 = vcmp.eq.s32.totalorder %v17432_v59, 1  ;;  %v3457_v24 = vsel %vm17497_vm13, %v3072_v52, 0.0  ;;  %5117 = vperm.xlu1 %7784, %v5022_v15   ;;  %v3835_v12 = vpop.permute.xlu0 %3834  ;;  %v7544_v52 = vpop.f32.mrb[92].mxu1 }
 0x38e   : > { %v13504_v28 = vsel %vm17490_vm11, %v17489_v38, %v17488_v17  ;;  %vm13511_vm2 = vmand %vm17493_vm15, %vm17492_vm9  ;;  %v3426_v13 = vsel %vm17496_vm6, %v3105_v1, 0.0  ;;  %v17501_v38 = vld [vmem:[#allocation202_spill] sm:$0xff]  ;;  %v13527_v23 = vsel %vm3878_vm3, %v12650_v27, 0.0  ;;  %v13531_v50 = vadd.f32 %v3457_v24, %v12696_v51  ;;  %v17505_v1 = vld [vmem:[#allocation232_spill] sm:$0xff]  ;;  %v13540_v31 = vpop.f32.mrb[128].mxu0 }
 0x38f   : > { %17491 = vst [vmem:[#allocation52_spill] sm:$0xff] %v13504_v28  ;;  %vm4957_vm0 = vmand %vm13511_vm2, %vm17499_vm8  ;;  %vm3867_vm9 = vcmp.eq.s32.totalorder %v17501_v38, 1  ;;  %v3458_v59 = vadd.f32 %v3426_v13, %v12657_v3  ;;  %vm5119_vm6 = vcmp.eq.s32.totalorder %v17505_v1, 1  ;;  %vm17506_vm8 = vcmp.lt.s32.totalorder %v17220_v22, 17  ;;  %v13542_v3 = vpop.f32.mrb[93].mxu1  ;;  %v17511_v13 = vld [vmem:[#allocation108_spill] sm:$0xff] }
 0x390   : > { %17502 = vst [vmem:[#allocation95_spill] sm:$0xff] %v13527_v23  ;;  %17503 = vst [vmem:[#allocation96_spill] sm:$0xff] %v13531_v50  ;;  %vm3877_vm15 = vcmp.eq.s32.totalorder %v3835_v12, 1  ;;  %v3071_v17 = vsel %vm17447_vm10, %v3068_v10, %v3070_v62  ;;  %v4780_v23 = vrot.slane %v4674_v56, 7  ;;  %vm17507_vm3 = vcmp.ge.s32.totalorder %v16982_v30, 4294967295  ;;  %v13557_v56 = vpop.f32.mrb[94].mxu1 }
 0x391   : > { %vm17504_vm13 = vmmov %vm17447_vm10  ;;  %vm17509_vm10 = vcmp.eq.s32.totalorder %v17454_v26, 1  ;;  %v17519_v12 = vrot.slane %v13408_v43, 7 }
 0x392   : > { %v3069_v15 = vsel %vm17504_vm13, %v3066_v29, %v3068_v10  ;;  %vm4989_vm11 = vmand %vm4957_vm0, %vm17506_vm8  ;;  %v13550_v29 = vsel %vm3877_vm15, %v12629_v44, 0.0  ;;  %v3456_v62 = vsel %vm17509_vm10, %v3071_v17, 0.0  ;;  %v4687_v10 = vpop.f32.mrb[129].mxu0  ;;  %v13566_v44 = vpop.permute.xlu1 %5099  ;;  %v17522_v17 = vld [vmem:[#allocation211_spill] sm:$0xff]  ;;  %vm17524_vm10 = vcmp.lt.s32.totalorder %v16999_v9, 15 }
 0x393   : > { %v3455_v27 = vsel %vm3423_vm7, %v3069_v15, 0.0  ;;  %v5021_v51 = vsel %vm4989_vm11, 1, %v15824_v54  ;;  %vm5999_vm13 = vmand %vm17395_vm14, %vm17507_vm3  ;;  %17508 = vst [vmem:[#allocation17_spill] sm:$0xff] %v13550_v29  ;;  %vm17512_vm7 = vcmp.eq.s32.totalorder %v17461_v37, 1  ;;  %vm17513_vm14 = vcmp.lt.s32.totalorder %v16982_v30, 15  ;;  %v7607_v15 = vpop.f32.mrb[130].mxu0 }
 0x394   : > { %v13555_v32 = vadd.f32 %v3455_v27, %v12597_v42  ;;  %v13562_v24 = vsel %vm17512_vm7, %v17511_v13, 0.0  ;;  %5114 = vperm.xlu0 %7783, %v5021_v51   ;;  %vm6031_vm0 = vmand %vm5999_vm13, %vm17513_vm14  ;;  %17514 = vst [vmem:[#allocation97_spill] sm:$0xff] %v13566_v44  ;;  %v13569_v33 = vadd.f32 %v3456_v62, %v12670_v5  ;;  %v17516_v42 = vrot.slane %v13424_v45, 7  ;;  %v3992_v51 = vpop.f32.mrb[95].mxu1  ;;  %v4690_v43 = vpop.f32.mrb[131].mxu0  ;;  %v17607_v44 = vld [vmem:[#allocation40_spill] sm:$0xff] }
 0x395   : > { %vm17517_vm11 = vcmask 1040384   ;;  %v6063_v30 = vsel %vm6031_vm0, 1, %v15824_v54  ;;  %vm17523_vm3 = vcmp.ge.s32.totalorder %v16999_v9, 4294967295  ;;  %v4151_v5 = vrot.slane %v7544_v52, 1 }
 0x396   : > { %17510 = vst [vmem:[#allocation157_spill] sm:$0xff] %v13555_v32  ;;  %17515 = vst [vmem:[#allocation98_spill] sm:$0xff] %v13569_v33  ;;  %v13574_v26 = vsel %vm17517_vm11, %v17516_v42, %v4780_v23  ;;  %v4790_v45 = vrot.slane %v13540_v31, 7  ;;  %v15668_v27 = vrot.slane %v13542_v3, 1  ;;  %6154 = vperm.xlu1 %7784, %v6063_v30   ;;  %v4153_v62 = vrot.slane %v13557_v56, 1  ;;  %v13601_v31 = vpop.permute.xlu0 %5096  ;;  %v17530_v56 = vld [vmem:[#allocation199_spill] sm:$0xff] }
 0x397   : > { %17518 = vst [vmem:[#allocation150_spill] sm:$0xff] %v13574_v26  ;;  %vm17520_vm15 = vmmov %vm17517_vm11  ;;  %v4792_v13 = vrot.slane %v7607_v15, 7  ;;  %v4149_v42 = vrot.slane %v3992_v51, 1  ;;  %vm17526_vm14 = vcmp.ge.s32.totalorder %v13431_v19, 4294967295  ;;  %v4788_v52 = vrot.slane %v4690_v43, 7  ;;  %v13633_v51 = vpop.permute.xlu1 %6136  ;;  %v17551_v32 = vld [vmem:[#allocation169_spill] sm:$0xff] }
 0x398   : > { %v13579_v37 = vsel %vm17520_vm15, %v4780_v23, %v17519_v12  ;;  %vm5998_vm13 = vmand %vm12938_vm5, %vm17523_vm3  ;;  %v4786_v23 = vrot.slane %v4687_v10, 7  ;;  %vm17525_vm5 = vcmp.lt.s32.totalorder %v13431_v19, 15  ;;  %17529 = vst [vmem:[#allocation154_spill] sm:$0xff] %v13601_v31  ;;  %v3915_v9 = vadd.f32 %v13255_v61, %v3458_v59  ;;  %v17533_v19 = vld [vmem:[#allocation213_spill] sm:$0xff]  ;;  %v17541_v59 = vld [vmem:[#allocation196_spill] sm:$0xff] }
 0x399   : > { %17521 = vst [vmem:[#allocation149_spill] sm:$0xff] %v13579_v37  ;;  %vm6030_vm7 = vmand %vm5998_vm13, %vm17524_vm10  ;;  %v13606_v10 = vadd.f32 %v13331_v40, %v12831_v20  ;;  %vm17531_vm11 = vcmp.eq.s32.totalorder %v17483_v53, 1  ;;  %vm17532_vm15 = vcmp.ge.s32.totalorder %v17279_v16, 1  ;;  %v17534_v30 = vrot.slane %v13447_v41, 7  ;;  %v17540_v53 = vld [vmem:[#allocation229_spill] sm:$0xff]  ;;  %v17593_v37 = vld [vmem:[#allocation102_spill] sm:$0xff] }
 0x39a   : > { %v6062_v12 = vsel %vm6030_vm7, 1, %v15824_v54  ;;  %vm13597_vm0 = vmand %vm17526_vm14, %vm17525_vm5  ;;  %v13611_v15 = vsel %vm17531_vm11, %v17530_v56, 0.0  ;;  %vm17535_vm10 = vcmask 1040384   ;;  %vm17537_vm7 = vcmask 1046528   ;;  %17543 = vst [vmem:[#allocation152_spill] sm:$0xff] %v13633_v51  ;;  %v7548_v56 = vpop.f32.mrb[96].mxu1  ;;  %v13668_v38 = vpop.permute.xlu0 %6133 }
 0x39b   : > { %6151 = vperm.xlu0 %7783, %v6062_v12   ;;  %vm4942_vm3 = vmand %vm13597_vm0, %vm17532_vm15  ;;  %v13621_v61 = vsel %vm17535_vm10, %v17534_v30, %v4786_v23  ;;  %v13624_v20 = vsel %vm17537_vm7, %v4151_v5, %v4153_v62  ;;  %vm5120_vm14 = vcmp.eq.s32.totalorder %v17540_v53, 1  ;;  %vm4441_vm11 = vcmp.eq.s32.totalorder %v17541_v59, 1  ;;  %v17548_v30 = vld [vmem:[#allocation65_spill] sm:$0xff]  ;;  %17558 = vst [vmem:[#allocation68_spill] sm:$0xff] %v13668_v38  ;;  %v17650_v31 = vld [vmem:[#allocation214_spill] sm:$0xff] }
 0x39c   : > { %17536 = vst [vmem:[#allocation80_spill] sm:$0xff] %v13621_v61  ;;  %vm17538_vm5 = vmmov %vm17535_vm10  ;;  %vm17542_vm8 = vcmp.lt.s32.totalorder %v17279_v16, 17  ;;  %v13650_v61 = vsel %vm3867_vm9, %v17551_v32, 0.0  ;;  %vm17557_vm9 = vcmp.ge.s32.totalorder %v17294_v58, 1  ;;  %v17562_v51 = vrot.slane %v12789_v4, 7  ;;  %v17589_v59 = vld [vmem:[#allocation153_spill] sm:$0xff] }
 0x39d   : > { %v13627_v40 = vsel %vm17538_vm5, %v4790_v45, %v4792_v13  ;;  %vm4974_vm15 = vmand %vm4942_vm3, %vm17542_vm8  ;;  %vm17552_vm8 = vcmp.lt.s32.totalorder %v13488_v18, 15  ;;  %vm17553_vm3 = vcmp.ge.s32.totalorder %v13488_v18, 4294967295 }
 0x39e   : > { %17539 = vst [vmem:[#allocation19_spill] sm:$0xff] %v13627_v40  ;;  %vm17544_vm13 = vmmov %vm17537_vm7  ;;  %v5006_v29 = vsel %vm4974_vm15, 1, %v15824_v54 }
 0x39f   : > { %v4150_v41 = vsel %vm17544_vm13, %v15668_v27, %v4149_v42  ;;  %vm17545_vm10 = vmmov %vm17537_vm7  ;;  %5069 = vperm.xlu1 %7784, %v5006_v29   ;;  %v4159_v29 = vrot.slane %v7548_v56, 1 }
 0x3a0   : > { %v4152_v43 = vsel %vm17545_vm10, %v4149_v42, %v4151_v5  ;;  %vm17546_vm7 = vmmov %vm17538_vm5  ;;  %vm17549_vm5 = vcmp.eq.s32.totalorder %v17500_v2, 1  ;;  %vm17556_vm10 = vcmp.eq.s32.totalorder %v17498_v7, 1  ;;  %v4005_v42 = vpop.f32.mrb[97].mxu1  ;;  %v5151_v7 = vsel %vm5119_vm6, %v12885_v25, 0.0 }
 0x3a1   : > { %v13640_v12 = vsel %vm17546_vm7, %v4786_v23, %v4788_v52  ;;  %v13645_v40 = vsel %vm17549_vm5, %v17548_v30, 0.0  ;;  %vm13657_vm13 = vmand %vm17553_vm3, %vm17552_vm8  ;;  %v4469_v2 = vsel %vm17556_vm10, %v4150_v41, 0.0  ;;  %v7646_v23 = vpop.f32.mrb[132].mxu0  ;;  %vm4443_vm7 = vcmp.eq.s32.totalorder %v12855_v36, 1  ;;  %v13680_v27 = vpop.f32.mrb[98].mxu1 }
 0x3a2   : > { %17547 = vst [vmem:[#allocation66_spill] sm:$0xff] %v13640_v12  ;;  %17550 = vst [vmem:[#allocation134_spill] sm:$0xff] %v13645_v40  ;;  %vm17559_vm5 = vcmask 1040384   ;;  %v4155_v32 = vrot.slane %v4005_v42, 1  ;;  %v13673_v30 = vpop.f32.mrb[133].mxu0  ;;  %vm17561_vm8 = vcmp.lt.s32.totalorder %v17294_v58, 17  ;;  %v13744_v36 = vpop.permute.xlu0 %5048 }
 0x3a3   : > { %vm4941_vm15 = vmand %vm13657_vm13, %vm17557_vm9  ;;  %v13671_v18 = vsel %vm17559_vm5, %v4788_v52, %v4790_v45  ;;  %v5871_v41 = vrot.slane %v7646_v23, 1  ;;  %v13682_v12 = vpop.f32.mrb[134].mxu0  ;;  %v4501_v52 = vadd.f32 %v4469_v2, %v3915_v9  ;;  %vm17565_vm9 = vcmp.ge.s32.totalorder %v17176_v39, 4294967295  ;;  %v4008_v23 = vpop.f32.mrb[99].mxu1 }
 0x3a4   : > { %17560 = vst [vmem:[#allocation81_spill] sm:$0xff] %v13671_v18  ;;  %vm4973_vm3 = vmand %vm4941_vm15, %vm17561_vm8  ;;  %vm17566_vm15 = vcmask 1046528   ;;  %v4161_v1 = vrot.slane %v13680_v27, 1  ;;  %v15670_v56 = vrot.slane %v13682_v12, 1  ;;  %v5717_v4 = vpop.f32.mrb[135].mxu0  ;;  %v4157_v49 = vrot.slane %v4008_v23, 1 }
 0x3a5   : > { %vm17563_vm10 = vmmov %vm17559_vm5  ;;  %v5005_v42 = vsel %vm4973_vm3, 1, %v15824_v54  ;;  %v13695_v25 = vsel %vm17566_vm15, %v4153_v62, %v4155_v32  ;;  %vm17567_vm5 = vcmp.lt.s32.totalorder %v17176_v39, 15  ;;  %vm17568_vm3 = vcmp.eq.s32.totalorder %v17522_v17, 1  ;;  %v17569_v62 = vld [vmem:[#allocation158_spill] sm:$0xff]  ;;  %v17578_v23 = vld [vmem:[#allocation205_spill] sm:$0xff] }
 0x3a6   : > { %v13687_v45 = vsel %vm17563_vm10, %v4792_v13, %v17562_v51  ;;  %vm5983_vm6 = vmand %vm17450_vm12, %vm17565_vm9  ;;  %5066 = vperm.xlu0 %7783, %v5005_v42   ;;  %v13701_v13 = vpop.permute.xlu1 %5051  ;;  %v4470_v9 = vsel %vm17568_vm3, %v4152_v43, 0.0  ;;  %v5963_v51 = vrot.slane %v5717_v4, 1  ;;  %v13705_v2 = vadd.f32 %v5151_v7, %v4501_v52 }
 0x3a7   : > { %17564 = vst [vmem:[#allocation55_spill] sm:$0xff] %v13687_v45  ;;  %vm6015_vm8 = vmand %vm5983_vm6, %vm17567_vm5  ;;  %vm4439_vm12 = vcmp.eq.s32.totalorder %v17569_v62, 1  ;;  %vm17570_vm10 = vcmp.ge.s32.totalorder %v17181_v48, 4294967295  ;;  %v15671_v39 = vrot.slane %v13673_v30, 1  ;;  %vm17573_vm5 = vcmp.lt.s32.totalorder %v17181_v48, 15  ;;  %v17590_v45 = vld [vmem:[#allocation193_spill] sm:$0xff] }
 0x3a8   : > { %v6047_v27 = vsel %vm6015_vm8, 1, %v15824_v54  ;;  %vm5982_vm9 = vmand %vm13099_vm1, %vm17570_vm10 }
 0x3a9   : > { %vm17571_vm6 = vmmov %vm17566_vm15  ;;  %6106 = vperm.xlu1 %7784, %v6047_v27   ;;  %v17581_v27 = vld [vmem:[#allocation38_spill] sm:$0xff] }
 0x3aa   : > { %v4162_v42 = vsel %vm17571_vm6, %v4159_v29, %v4161_v1  ;;  %vm17572_vm15 = vmmov %vm17571_vm6 }
 0x3ab   : > { %v13718_v17 = vsel %vm17572_vm15, %v5871_v41, %v15670_v56  ;;  %vm6014_vm3 = vmand %vm5982_vm9, %vm17573_vm5  ;;  %v13724_v43 = vsel %vm4443_vm7, %v4162_v42, 0.0  ;;  %vm3868_vm15 = vcmp.eq.s32.totalorder %v17581_v27, 1  ;;  %vm17582_vm7 = vcmp.ge.s32.totalorder %v17210_v57, 0  ;;  %v7650_v42 = vpop.f32.mrb[136].mxu0  ;;  %v17588_v56 = vld [vmem:[#allocation143_spill] sm:$0xff] }
 0x3ac   : > { %vm17574_vm8 = vmmov %vm17571_vm6  ;;  %v6046_v48 = vsel %vm6014_vm3, 1, %v15824_v54 }
 0x3ad   : > { %v4158_v0 = vsel %vm17574_vm8, %v4155_v32, %v4157_v49  ;;  %vm17575_vm1 = vmmov %vm17571_vm6  ;;  %vm17579_vm6 = vcmp.eq.s32.totalorder %v17533_v19, 1  ;;  %6103 = vperm.xlu0 %7783, %v6046_v48   ;;  %v13768_v48 = vpop.permute.xlu1 %6088 }
 0x3ae   : > { %v13728_v7 = vsel %vm17575_vm1, %v4157_v49, %v4159_v29  ;;  %vm17576_vm10 = vmmov %vm17575_vm1  ;;  %v13736_v4 = vsel %vm17579_vm6, %v17578_v23, 0.0  ;;  %v4473_v32 = vsel %vm4441_vm11, %v4158_v0, 0.0  ;;  %v7552_v29 = vpop.f32.mrb[100].mxu1  ;;  %v17586_v49 = vld [vmem:[#allocation223_spill] sm:$0xff]  ;;  %v5152_v0 = vsel %vm5120_vm14, %v17589_v59, 0.0 }
 0x3af   : > { %v13731_v52 = vsel %vm17576_vm10, %v5963_v51, %v5871_v41  ;;  %17580 = vst [vmem:[#allocation126_spill] sm:$0xff] %v13736_v4  ;;  %vm5415_vm9 = vmand %vm13454_vm4, %vm17582_vm7  ;;  %v17585_v41 = vld [vmem:[#allocation206_spill] sm:$0xff]  ;;  %vm4444_vm3 = vcmp.eq.s32.totalorder %v17586_v49, 1  ;;  %v4021_v23 = vpop.f32.mrb[101].mxu1  ;;  %vm4446_vm6 = vcmp.eq.s32.totalorder %v13351_v11, 1  ;;  %vm17591_vm7 = vcmp.ge.s32.totalorder %v17220_v22, 0 }
 0x3b0   : > { %17577 = vst [vmem:[#allocation31_spill] sm:$0xff] %v13731_v52  ;;  %vm17583_vm5 = vmmov %vm17575_vm1  ;;  %vm5123_vm8 = vcmp.eq.s32.totalorder %v17585_v41, 1  ;;  %vm17587_vm1 = vcmp.lt.s32.totalorder %v17210_v57, 16  ;;  %v4502_v52 = vadd.f32 %v4470_v9, %v17588_v56  ;;  %v4505_v56 = vadd.f32 %v4473_v32, %v13606_v10  ;;  %v13773_v18 = vpop.f32.mrb[102].mxu1  ;;  %v13785_v10 = vpop.permute.xlu0 %6085  ;;  %v17599_v4 = vld [vmem:[#allocation69_spill] sm:$0xff]  ;;  %v17610_v41 = vld [vmem:[#allocation182_spill] sm:$0xff] }
 0x3b1   : > { %v13751_v19 = vsel %vm17583_vm5, %v15671_v39, %v5963_v51  ;;  %vm5447_vm10 = vmand %vm5415_vm9, %vm17587_vm1  ;;  %v4163_v39 = vrot.slane %v4021_v23, 1  ;;  %vm17592_vm14 = vcmp.lt.s32.totalorder %v17220_v22, 16  ;;  %v4167_v53 = vrot.slane %v7552_v29, 1 }
 0x3b2   : > { %17584 = vst [vmem:[#allocation32_spill] sm:$0xff] %v13751_v19  ;;  %v5479_v51 = vsel %vm5447_vm10, 1, %v15824_v54  ;;  %vm5414_vm5 = vmand %vm13511_vm2, %vm17591_vm7  ;;  %v5730_v19 = vpop.f32.mrb[137].mxu0  ;;  %v5878_v9 = vrot.slane %v7650_v42, 1  ;;  %v13777_v28 = vadd.f32 %v5152_v0, %v4502_v52  ;;  %vm17594_vm10 = vcmp.ge.s32.totalorder %v17279_v16, 0  ;;  %v4024_v42 = vpop.f32.mrb[103].mxu1 }
 0x3b3   : > { %5574 = vperm.xlu1 %7784, %v5479_v51   ;;  %vm5446_vm9 = vmand %vm5414_vm5, %vm17592_vm14  ;;  %v5874_v59 = vrot.slane %v5730_v19, 1  ;;  %v13775_v26 = vpop.f32.mrb[138].mxu0  ;;  %vm17595_vm5 = vcmask 1046528   ;;  %v4169_v29 = vrot.slane %v13773_v18, 1  ;;  %vm4445_vm14 = vcmp.eq.s32.totalorder %v13383_v60, 1 }
 0x3b4   : > { %v5478_v23 = vsel %vm5446_vm9, 1, %v15824_v54  ;;  %vm5399_vm7 = vmand %vm13597_vm0, %vm17594_vm10  ;;  %v4164_v32 = vsel %vm17595_vm5, %v4161_v1, %v4163_v39  ;;  %vm17596_vm1 = vcmp.lt.s32.totalorder %v17279_v16, 16  ;;  %v17597_v0 = vrot.slane %v13682_v12, 1  ;;  %v5733_v18 = vpop.f32.mrb[139].mxu0  ;;  %v13808_v16 = vpop.permute.xlu1 %4423 }
 0x3b5   : > { %5571 = vperm.xlu0 %7783, %v5478_v23   ;;  %vm5431_vm9 = vmand %vm5399_vm7, %vm17596_vm1  ;;  %v13795_v52 = vsel %vm4444_vm3, %v4164_v32, 0.0  ;;  %v4165_v1 = vrot.slane %v4024_v42, 1  ;;  %vm17600_vm11 = vcmp.ge.s32.totalorder %v17294_v58, 0  ;;  %v17602_v12 = vrot.slane %v13775_v26, 1  ;;  %v7654_v11 = vpop.f32.mrb[140].mxu0 }
 0x3b6   : > { %vm17598_vm10 = vmmov %vm17595_vm5  ;;  %v5463_v19 = vsel %vm5431_vm9, 1, %v15824_v54  ;;  %v5876_v32 = vrot.slane %v5733_v18, 1  ;;  %v4471_v42 = vsel %vm4439_vm12, %v13624_v20, 0.0  ;;  %v5155_v40 = vsel %vm5123_vm8, %v17607_v44, 0.0  ;;  %v7556_v44 = vpop.f32.mrb[104].mxu1 }
 0x3b7   : > { %v13800_v51 = vsel %vm17598_vm10, %v17597_v0, %v5874_v59  ;;  %vm5398_vm1 = vmand %vm13657_vm13, %vm17600_vm11  ;;  %5526 = vperm.xlu1 %7784, %v5463_v19   ;;  %vm17604_vm10 = vcmp.lt.s32.totalorder %v17294_v58, 16  ;;  %v13831_v58 = vpop.permute.xlu0 %4420  ;;  %vm6166_vm8 = vcmp.eq.s32.totalorder %v17610_v41, 1  ;;  %v13855_v19 = vadd.f32 %v5155_v40, %v4505_v56  ;;  %v17622_v41 = vld [vmem:[#allocation36_spill] sm:$0xff] }
 0x3b8   : > { %vm17601_vm3 = vmmov %vm17595_vm5  ;;  %v13862_v27 = vpop.permute.xlu1 %5556  ;;  %v5886_v40 = vrot.slane %v7654_v11, 1  ;;  %v17629_v55 = vrot.slane %v13775_v26, 1 }
 0x3b9   : > { %v13811_v49 = vsel %vm17601_vm3, %v4167_v53, %v4169_v29  ;;  %vm17603_vm7 = vmmov %vm17601_vm3  ;;  %17614 = vst [vmem:[#allocation33_spill] sm:$0xff] %v13855_v19 }
 0x3ba   : > { %v5881_v23 = vsel %vm17603_vm7, %v5878_v9, %v17602_v12  ;;  %vm5430_vm5 = vmand %vm5398_vm1, %vm17604_vm10  ;;  %17616 = vst [vmem:[#allocation29_spill] sm:$0xff] %v13862_v27  ;;  %v17649_v27 = vld [vmem:[#allocation124_spill] sm:$0xff] }
 0x3bb   : > { %vm17605_vm9 = vmmov %vm17601_vm3  ;;  %v5462_v33 = vsel %vm5430_vm5, 1, %v15824_v54  ;;  %v13864_v18 = vsel %vm6166_vm8, %v5881_v23, 0.0 }
 0x3bc   : > { %v4166_v0 = vsel %vm17605_vm9, %v4163_v39, %v4165_v1  ;;  %vm17606_vm11 = vmmov %vm17601_vm3  ;;  %vm17608_vm3 = vcmp.ge.s32.totalorder %v17210_v57, 4294967295  ;;  %5523 = vperm.xlu0 %7783, %v5462_v33   ;;  %v4175_v33 = vrot.slane %v7556_v44, 1  ;;  %17617 = vst [vmem:[#allocation137_spill] sm:$0xff] %v13864_v18 }
 0x3bd   : > { %v4168_v38 = vsel %vm17606_vm11, %v4165_v1, %v4167_v53  ;;  %vm6001_vm7 = vmand %vm13454_vm4, %vm17608_vm3  ;;  %v13835_v20 = vsel %vm4445_vm14, %v4166_v0, 0.0  ;;  %v17611_v53 = vld [vmem:[#allocation209_spill] sm:$0xff]  ;;  %vm17612_vm4 = vcmp.lt.s32.totalorder %v17210_v57, 15  ;;  %v5746_v57 = vpop.f32.mrb[141].mxu0  ;;  %v17620_v0 = vld [vmem:[#allocation88_spill] sm:$0xff] }
 0x3be   : > { %v13839_v62 = vsel %vm4446_vm6, %v4168_v38, 0.0  ;;  %vm17609_vm12 = vmmov %vm17605_vm9  ;;  %v13848_v34 = vsel %vm3868_vm15, %v17611_v53, 0.0  ;;  %v4037_v38 = vpop.f32.mrb[105].mxu1  ;;  %vm17615_vm6 = vcmp.ge.s32.totalorder %v17220_v22, 4294967295  ;;  %vm17618_vm15 = vcmp.lt.s32.totalorder %v17220_v22, 15  ;;  %v13870_v12 = vpop.f32.mrb[142].mxu0 }
 0x3bf   : > { %v13842_v39 = vsel %vm17609_vm12, %v5874_v59, %v5876_v32  ;;  %vm6033_vm14 = vmand %vm6001_vm7, %vm17612_vm4  ;;  %v4171_v1 = vrot.slane %v4037_v38, 1  ;;  %v5882_v56 = vrot.slane %v5746_v57, 1  ;;  %v17623_v53 = vld [vmem:[#allocation76_spill] sm:$0xff]  ;;  %v13882_v22 = vpop.permute.xlu0 %5553  ;;  %vm17628_vm4 = vcmp.eq.s32.totalorder %v17593_v37, 1 }
 0x3c0   : > { %vm17613_vm5 = vmmov %vm17605_vm9  ;;  %v6065_v59 = vsel %vm6033_vm14, 1, %v15824_v54  ;;  %vm5122_vm9 = vcmp.eq.s32.totalorder %v17622_v41, 1  ;;  %vm17624_vm11 = vcmp.ge.s32.totalorder %v17623_v53, 4294967295  ;;  %17625 = vst [vmem:[#allocation141_spill] sm:$0xff] %v13882_v22  ;;  %vm17627_vm12 = vcmp.lt.s32.totalorder %v17623_v53, 15  ;;  %v17637_v53 = vld [vmem:[#allocation161_spill] sm:$0xff] }
 0x3c1   : > { %v13853_v60 = vsel %vm17613_vm5, %v5876_v32, %v5878_v9  ;;  %vm6000_vm1 = vmand %vm13511_vm2, %vm17615_vm6  ;;  %6160 = vperm.xlu1 %7784, %v6065_v59   ;;  %v13868_v9 = vpop.f32.mrb[106].mxu1  ;;  %v17619_v32 = vld [vmem:[#allocation172_spill] sm:$0xff]  ;;  %vm17621_vm2 = vcmp.eq.s32.totalorder %v17590_v45, 1  ;;  %v4472_v45 = vsel %vm17628_vm4, %v13695_v25, 0.0 }
 0x3c2   : > { %vm6032_vm10 = vmand %vm6000_vm1, %vm17618_vm15  ;;  %v4503_v63 = vadd.f32 %v4471_v42, %v17619_v32  ;;  %v5153_v44 = vsel %vm17621_vm2, %v17620_v0, 0.0  ;;  %v4177_v38 = vrot.slane %v13868_v9, 1  ;;  %v5888_v42 = vrot.slane %v13870_v12, 1  ;;  %v4040_v59 = vpop.f32.mrb[107].mxu1  ;;  %v5749_v0 = vpop.f32.mrb[143].mxu0  ;;  %v17632_v9 = vld [vmem:[#allocation145_spill] sm:$0xff] }
 0x3c3   : > { %v6064_v23 = vsel %vm6032_vm10, 1, %v15824_v54  ;;  %vm5985_vm3 = vmand %vm13597_vm0, %vm17624_vm11  ;;  %v4173_v32 = vrot.slane %v4040_v59, 1  ;;  %vm3873_vm14 = vcmp.eq.s32.totalorder %v17632_v9, 1  ;;  %v5884_v25 = vrot.slane %v5749_v0, 1 }
 0x3c4   : > { %vm17626_vm7 = vmmov %vm17613_vm5  ;;  %6157 = vperm.xlu0 %7783, %v6064_v23   ;;  %v4376_v23 = vpop.permute.xlu1 %4375  ;;  %vm3871_vm10 = vcmp.eq.s32.totalorder %v17637_v53, 1  ;;  %vm17639_vm11 = vcmp.lt.s32.totalorder %v17434_v8, 15  ;;  %v4504_v50 = vadd.f32 %v4472_v45, %v17650_v31 }
 0x3c5   : > { %v4172_v11 = vsel %vm17626_vm7, %v4169_v29, %v4171_v1  ;;  %vm6017_vm8 = vmand %vm5985_vm3, %vm17627_vm12  ;;  %v13895_v29 = vadd.f32 %v5153_v44, %v4503_v63  ;;  %v17638_v63 = vld [vmem:[#allocation201_spill] sm:$0xff]  ;;  %vm4448_vm7 = vcmp.eq.s32.totalorder %v4376_v23, 1 }
 0x3c6   : > { %vm17630_vm0 = vmmov %vm17613_vm5  ;;  %v6049_v12 = vsel %vm6017_vm8, 1, %v15824_v54  ;;  %vm17633_vm5 = vcmp.ge.s32.totalorder %v17434_v8, 4294967295  ;;  %vm3874_vm2 = vcmp.eq.s32.totalorder %v17638_v63, 1 }
 0x3c7   : > { %v5883_v57 = vsel %vm17630_vm0, %v17629_v55, %v5882_v56  ;;  %17631 = vst [vmem:[#allocation14_spill] sm:$0xff] %v13895_v29  ;;  %vm5984_vm6 = vmand %vm13657_vm13, %vm17633_vm5  ;;  %6112 = vperm.xlu1 %7784, %v6049_v12   ;;  %vm17640_vm13 = vcmp.eq.s32.totalorder %v17599_v4, 1  ;;  %v17645_v55 = vld [vmem:[#allocation39_spill] sm:$0xff]  ;;  %v13924_v12 = vsel %vm4448_vm7, %v4172_v11, 0.0  ;;  %v13927_v8 = vsel %vm17630_vm0, %v5882_v56, %v5884_v25 }
 0x3c8   : > { %vm17634_vm1 = vmmov %vm17630_vm0  ;;  %v4474_v5 = vsel %vm17640_vm13, %v13728_v7, 0.0  ;;  %vm3872_vm4 = vcmp.eq.s32.totalorder %v17645_v55, 1  ;;  %v7560_v7 = vpop.f32.mrb[108].mxu1  ;;  %v17647_v4 = vld [vmem:[#allocation175_spill] sm:$0xff]  ;;  %v13936_v11 = vpop.permute.xlu1 %5508 }
 0x3c9   : > { %v13904_v37 = vsel %vm17634_vm1, %v4175_v33, %v4177_v38  ;;  %vm17636_vm15 = vmmov %vm17630_vm0  ;;  %v4183_v22 = vrot.slane %v7560_v7, 1 }
 0x3ca   : > { %17635 = vst [vmem:[#allocation73_spill] sm:$0xff] %v13904_v37  ;;  %v13907_v26 = vsel %vm17636_vm15, %v5886_v40, %v5888_v42  ;;  %vm6016_vm3 = vmand %vm5984_vm6, %vm17639_vm11  ;;  %v4373_v37 = vpop.permute.xlu0 %4372  ;;  %vm5124_vm6 = vcmp.eq.s32.totalorder %v17647_v4, 1 }
 0x3cb   : > { %vm17641_vm12 = vmmov %vm17630_vm0  ;;  %v6048_v0 = vsel %vm6016_vm3, 1, %v15824_v54  ;;  %vm4447_vm15 = vcmp.eq.s32.totalorder %v4373_v37, 1  ;;  %v3920_v54 = vadd.f32 %v13398_v21, %v17649_v27 }
 0x3cc   : > { %v13917_v44 = vsel %vm17641_vm12, %v4171_v1, %v4173_v32  ;;  %vm17643_vm8 = vmmov %vm17630_vm0  ;;  %v17648_v1 = vld [vmem:[#allocation230_spill] sm:$0xff]  ;;  %6109 = vperm.xlu0 %7783, %v6048_v0   ;;  %v13939_v56 = vsel %vm4447_vm15, %v13811_v49, 0.0  ;;  %v17651_v0 = vld [vmem:[#allocation215_spill] sm:$0xff] }
 0x3cd   : > { %17642 = vst [vmem:[#allocation75_spill] sm:$0xff] %v13917_v44  ;;  %v13920_v59 = vsel %vm17643_vm8, %v4173_v32, %v4175_v33  ;;  %vm17646_vm5 = vmmov %vm17630_vm0  ;;  %vm6167_vm1 = vcmp.eq.s32.totalorder %v17648_v1, 1  ;;  %v7658_v33 = vpop.f32.mrb[144].mxu0  ;;  %v4053_v32 = vpop.f32.mrb[109].mxu1  ;;  %v4506_v37 = vadd.f32 %v4474_v5, %v3920_v54  ;;  %v5156_v29 = vsel %vm5124_vm6, %v17651_v0, 0.0  ;;  %v17657_v1 = vld [vmem:[#allocation225_spill] sm:$0xff] }
 0x3ce   : > { %17644 = vst [vmem:[#allocation83_spill] sm:$0xff] %v13920_v59  ;;  %v13930_v23 = vsel %vm17646_vm5, %v5884_v25, %v5886_v40  ;;  %v4179_v40 = vrot.slane %v4053_v32, 1  ;;  %v5762_v25 = vpop.f32.mrb[145].mxu0  ;;  %v7561_v18 = vpop.f32.mrb[110].mxu1  ;;  %v13949_v21 = vsel %vm6167_vm1, %v5883_v57, 0.0  ;;  %v5894_v27 = vrot.slane %v7658_v33, 1  ;;  %vm17653_vm11 = vmmov %vm17630_vm0 }
 0x3cf   : > { %v5890_v44 = vrot.slane %v5762_v25, 1  ;;  %v13942_v59 = vpop.f32.mrb[146].mxu0  ;;  %17652 = vst [vmem:[#allocation85_spill] sm:$0xff] %v13949_v21  ;;  %v13951_v49 = vpop.permute.xlu0 %5505  ;;  %v4185_v31 = vrot.slane %v7561_v18, 1  ;;  %vm17655_vm3 = vmmov %vm17630_vm0  ;;  %v13960_v25 = vadd.f32 %v5156_v29, %v4506_v37  ;;  %v5154_v57 = vsel %vm5122_vm9, %v17657_v1, 0.0  ;;  %v17667_v1 = vld [vmem:[#allocation113_spill] sm:$0xff] }
 0x3d0   : > { %v13954_v7 = vsel %vm17653_vm11, %v4177_v38, %v4179_v40  ;;  %v5896_v45 = vrot.slane %v13942_v59, 1  ;;  %v4056_v32 = vpop.f32.mrb[111].mxu1  ;;  %v5765_v4 = vpop.f32.mrb[147].mxu0  ;;  %vm17658_vm7 = vmmov %vm17630_vm0  ;;  %v13971_v59 = vadd.f32 %v5154_v57, %v4504_v50  ;;  %v13989_v50 = vsel %vm3871_vm10, %v17667_v1, 0.0  ;;  %v17669_v57 = vld [vmem:[#allocation84_spill] sm:$0xff] }
 0x3d1   : > { %17654 = vst [vmem:[#allocation128_spill] sm:$0xff] %v13954_v7  ;;  %v13958_v5 = vsel %vm17655_vm3, %v5888_v42, %v5890_v44  ;;  %v4181_v54 = vrot.slane %v4056_v32, 1  ;;  %17656 = vst [vmem:[#allocation56_spill] sm:$0xff] %v13960_v25  ;;  %v3844_v0 = vpop.permute.xlu1 %3843  ;;  %v13966_v33 = vsel %vm17658_vm7, %v4183_v22, %v4185_v31  ;;  %v5892_v38 = vrot.slane %v5765_v4, 1  ;;  %v17662_v42 = vld [vmem:[#allocation62_spill] sm:$0xff]  ;;  %v17666_v4 = vld [vmem:[#allocation59_spill] sm:$0xff] }
 0x3d2   : > { %vm17659_vm13 = vmmov %vm17630_vm0  ;;  %17661 = vst [vmem:[#allocation168_spill] sm:$0xff] %v13971_v59  ;;  %vm6162_vm12 = vcmp.eq.s32.totalorder %v17662_v42, 1  ;;  %v17663_v32 = vld [vmem:[#allocation210_spill] sm:$0xff]  ;;  %vm3880_vm8 = vcmp.eq.s32.totalorder %v3844_v0, 1  ;;  %vm6163_vm5 = vcmp.eq.s32.totalorder %v17666_v4, 1  ;;  %v13994_v9 = vsel %vm3874_vm2, %v17669_v57, 0.0 }
 0x3d3   : > { %v13969_v18 = vsel %vm17659_vm13, %v5894_v27, %v5896_v45  ;;  %v13977_v29 = vsel %vm3873_vm14, %v17663_v32, 0.0  ;;  %v13980_v41 = vsel %vm17630_vm0, %v4179_v40, %v4181_v54  ;;  %vm17665_vm9 = vmmov %vm17630_vm0  ;;  %17668 = vst [vmem:[#allocation171_spill] sm:$0xff] %v13989_v50  ;;  %v17671_v32 = vld [vmem:[#allocation77_spill] sm:$0xff]  ;;  %v3841_v40 = vpop.permute.xlu0 %3840  ;;  %vm5127_vm10 = vcmp.eq.s32.totalorder %v13744_v36, 1  ;;  %v7662_v63 = vpop.f32.mrb[148].mxu0  ;;  %v17679_v57 = vld [vmem:[#allocation203_spill] sm:$0xff] }
 0x3d4   : > { %17660 = vst [vmem:[#allocation44_spill] sm:$0xff] %v13969_v18  ;;  %17664 = vst [vmem:[#allocation46_spill] sm:$0xff] %v13977_v29  ;;  %v13983_v37 = vsel %vm17665_vm9, %v4181_v54, %v4183_v22  ;;  %v13997_v0 = vsel %vm3880_vm8, %v17671_v32, 0.0  ;;  %v7564_v22 = vpop.f32.mrb[112].mxu1  ;;  %v17675_v54 = vld [vmem:[#allocation117_spill] sm:$0xff]  ;;  %vm3879_vm6 = vcmp.eq.s32.totalorder %v3841_v40, 1 }
 0x3d5   : > { %17670 = vst [vmem:[#allocation35_spill] sm:$0xff] %v13994_v9  ;;  %17672 = vst [vmem:[#allocation58_spill] sm:$0xff] %v13997_v0  ;;  %v14005_v7 = vsel %vm3872_vm4, %v17675_v54, 0.0  ;;  %v4069_v1 = vpop.f32.mrb[113].mxu1  ;;  %v14012_v32 = vsel %vm3879_vm6, %v17679_v57, 0.0  ;;  %v4191_v0 = vrot.slane %v7564_v22, 1  ;;  %v14018_v54 = vpop.permute.xlu1 %5105 }
 0x3d6   : > { %vm17673_vm14 = vmmov %vm17630_vm0  ;;  %17676 = vst [vmem:[#allocation135_spill] sm:$0xff] %v14005_v7  ;;  %v14014_v9 = vpop.f32.mrb[114].mxu1  ;;  %v17681_v29 = vld [vmem:[#allocation179_spill] sm:$0xff]  ;;  %v5902_v22 = vrot.slane %v7662_v63, 1  ;;  %vm5128_vm8 = vcmp.eq.s32.totalorder %v13701_v13, 1 }
 0x3d7   : > { %v14000_v18 = vsel %vm17673_vm14, %v5890_v44, %v5892_v38  ;;  %vm17677_vm1 = vmmov %vm17630_vm0  ;;  %17680 = vst [vmem:[#allocation185_spill] sm:$0xff] %v14012_v32  ;;  %v4187_v44 = vrot.slane %v4069_v1, 1  ;;  %v3923_v55 = vadd.f32 %v13467_v35, %v17681_v29  ;;  %v4193_v40 = vrot.slane %v14014_v9, 1  ;;  %v17684_v7 = vld [vmem:[#allocation123_spill] sm:$0xff]  ;;  %v4072_v21 = vpop.f32.mrb[115].mxu1 }
 0x3d8   : > { %17674 = vst [vmem:[#allocation146_spill] sm:$0xff] %v14000_v18  ;;  %v14009_v53 = vsel %vm17677_vm1, %v5892_v38, %v5894_v27  ;;  %v5778_v18 = vpop.f32.mrb[149].mxu0  ;;  %17682 = vst [vmem:[#allocation25_spill] sm:$0xff] %v14018_v54  ;;  %v17683_v38 = vld [vmem:[#allocation42_spill] sm:$0xff]  ;;  %v17685_v57 = vld [vmem:[#allocation27_spill] sm:$0xff]  ;;  %vm6168_vm1 = vcmp.eq.s32.totalorder %v13785_v10, 1 }
 0x3d9   : > { %17678 = vst [vmem:[#allocation24_spill] sm:$0xff] %v14009_v53  ;;  %v5898_v36 = vrot.slane %v5778_v18, 1  ;;  %v14021_v27 = vpop.f32.mrb[150].mxu0  ;;  %v5159_v53 = vsel %vm5127_vm10, %v17683_v38, 0.0  ;;  %v3921_v32 = vadd.f32 %v17685_v57, %v17684_v7  ;;  %vm17686_vm2 = vmmov %vm17630_vm0  ;;  %v4509_v29 = vadd.f32 %v13835_v20, %v3923_v55  ;;  %v7800_v18 = vld [vmem:[%s14995_s11 + $0x4] ss:$8 sps:$4 sm:$0xff]   ;;  %v14042_v57 = vpop.permute.xlu0 %5102 }
 0x3da   : > { %v14027_v1 = vsel %vm17686_vm2, %v4185_v31, %v4187_v44  ;;  %v5904_v50 = vrot.slane %v14021_v27, 1  ;;  %v5781_v35 = vpop.f32.mrb[151].mxu0  ;;  %v17687_v9 = vld [vmem:[#allocation207_spill] sm:$0xff]  ;;  %vm17688_vm15 = vmmov %vm17630_vm0  ;;  %v4189_v7 = vrot.slane %v4072_v21, 1  ;;  %v17689_v27 = vld [vmem:[#allocation181_spill] sm:$0xff]  ;;  %17690 = vst [vmem:[#allocation122_spill] sm:$0xff] %v14042_v57  ;;  %6425 = vmatprep.mubr.bf16.mxu1 %v7800_v18  ;;  %6494 = vmatprep.mubr.bf16.mxu0 %v7800_v18  ;;  %v14069_v18 = vpop.permute.xlu1 %6142 }
 0x3db   : > { %vm6164_vm4 = vcmp.eq.s32.totalorder %v17687_v9, 1  ;;  %v14036_v38 = vsel %vm17688_vm15, %v4191_v0, %v4193_v40  ;;  %v5900_v63 = vrot.slane %v5781_v35, 1  ;;  %v7798_v31 = vld [vmem:[%s14995_s11] ss:$8 sps:$4 sm:$0xff]   ;;  %vm5125_vm11 = vcmp.eq.s32.totalorder %v17689_v27, 1  ;;  %vm17691_vm3 = vmmov %vm17630_vm0  ;;  %17702 = vst [vmem:[#allocation86_spill] sm:$0xff] %v14069_v18 }
 0x3dc   : > { %v14045_v20 = vsel %vm17691_vm3, %v5902_v22, %v5904_v50  ;;  %vm17693_vm7 = vmmov %vm17630_vm0  ;;  %v14050_v54 = vadd.f32 %v5159_v53, %v4509_v29  ;;  %v7801_v21 = vld [vmem:[%s14995_s11 + $0x14] ss:$8 sps:$4 sm:$0xff]   ;;  %v17696_v35 = vld [vmem:[#allocation139_spill] sm:$0xff]  ;;  %v14058_v57 = vsel %vm17630_vm0, %v4187_v44, %v4189_v7  ;;  %6495 = vmatmul.mubr.bf16.vlgmr.msra.gmra.mrb[164].mxu0 %v7798_v31  ;;  %v4507_v44 = vadd.f32 %v13724_v43, %v3921_v32 }
 0x3dd   : > { %17692 = vst [vmem:[#allocation138_spill] sm:$0xff] %v14045_v20  ;;  %v14048_v55 = vsel %vm17693_vm7, %v5896_v45, %v5898_v36  ;;  %vm4461_vm13 = vcmp.eq.s32.totalorder %v17696_v35, 1  ;;  %vm17697_vm9 = vmmov %vm17630_vm0  ;;  %v17700_v53 = vld [vmem:[#allocation237_spill] sm:$0xff]  ;;  %v17701_v29 = vld [vmem:[#allocation91_spill] sm:$0xff]  ;;  %6502 = vmatprep.mubr.bf16.mxu0 %v7801_v21  ;;  %vm4463_vm15 = vcmp.eq.s32.totalorder %v13831_v58, 1  ;;  %v14084_v10 = vsel %vm6163_vm5, %v13800_v51, 0.0  ;;  %v14094_v43 = vpop.permute.xlu0 %6139 }
 0x3de   : > { %17694 = vst [vmem:[#allocation26_spill] sm:$0xff] %v14048_v55  ;;  %17695 = vst [vmem:[#allocation125_spill] sm:$0xff] %v14050_v54  ;;  %v14061_v20 = vsel %vm17697_vm9, %v4189_v7, %v4191_v0  ;;  %vm4455_vm10 = vcmp.eq.s32.totalorder %v17700_v53, 1  ;;  %vm4462_vm6 = vcmp.eq.s32.totalorder %v17701_v29, 1  ;;  %v7568_v55 = vpop.f32.mrb[116].mxu1  ;;  %v14077_v0 = vsel %vm6162_vm12, %v13718_v17, 0.0 }
 0x3df   : > { %vm17698_vm14 = vmmov %vm17630_vm0  ;;  %v4085_v7 = vpop.f32.mrb[117].mxu1  ;;  %v17705_v31 = vld [vmem:[#allocation226_spill] sm:$0xff]  ;;  %v14090_v42 = vsel %vm6168_vm1, %v13927_v8, 0.0  ;;  %vm6169_vm3 = vcmp.eq.s32.totalorder %v13768_v48, 1  ;;  %17708 = vst [vmem:[#allocation57_spill] sm:$0xff] %v14094_v43  ;;  %v4199_v32 = vrot.slane %v7568_v55, 1 }
 0x3e0   : > { %v14064_v45 = vsel %vm17698_vm14, %v5900_v63, %v5902_v22  ;;  %vm17703_vm2 = vmmov %vm17630_vm0  ;;  %v7666_v22 = vpop.f32.mrb[152].mxu0  ;;  %17706 = vst [vmem:[#allocation15_spill] sm:$0xff] %v14090_v42  ;;  %v17707_v17 = vld [vmem:[#allocation94_spill] sm:$0xff]  ;;  %v17710_v51 = vld [vmem:[#allocation89_spill] sm:$0xff]  ;;  %v14170_v35 = vsel %vm4455_vm10, %v13966_v33, 0.0 }
 0x3e1   : > { %17699 = vst [vmem:[#allocation162_spill] sm:$0xff] %v14064_v45  ;;  %v14072_v54 = vsel %vm17703_vm2, %v5898_v36, %v5900_v63  ;;  %v5157_v36 = vsel %vm5125_vm11, %v17705_v31, 0.0  ;;  %vm5126_vm12 = vcmp.eq.s32.totalorder %v17707_v17, 1  ;;  %v4195_v63 = vrot.slane %v4085_v7, 1  ;;  %v5794_v21 = vpop.f32.mrb[153].mxu0  ;;  %v14100_v31 = vpop.f32.mrb[118].mxu1  ;;  %vm17713_vm5 = vmmov %vm17630_vm0 }
 0x3e2   : > { %17704 = vst [vmem:[#allocation64_spill] sm:$0xff] %v14072_v54  ;;  %v14096_v54 = vadd.f32 %v5157_v36, %v4507_v44  ;;  %v3924_v4 = vadd.f32 %v13611_v15, %v17710_v51  ;;  %v5910_v45 = vrot.slane %v7666_v22, 1  ;;  %v5906_v27 = vrot.slane %v5794_v21, 1  ;;  %v14102_v8 = vpop.f32.mrb[154].mxu0  ;;  %v17711_v18 = vld [vmem:[#allocation222_spill] sm:$0xff]  ;;  %v17712_v59 = vld [vmem:[#allocation219_spill] sm:$0xff]  ;;  %v3796_v7 = vpop.permute.xlu1 %3795  ;;  %vm17718_vm9 = vmmov %vm17630_vm0 }
 0x3e3   : > { %v5160_v42 = vsel %vm5128_vm8, %v17711_v18, 0.0  ;;  %v3922_v55 = vadd.f32 %v13369_v47, %v17712_v59  ;;  %v14110_v44 = vsel %vm17713_vm5, %v4193_v40, %v4195_v63  ;;  %v15681_v36 = vrot.slane %v14100_v31, 1  ;;  %v4088_v22 = vpop.f32.mrb[119].mxu1  ;;  %v5797_v51 = vpop.f32.mrb[155].mxu0  ;;  %v7803_v59 = vld [vmem:[%s14995_s11 + $0x10] ss:$8 sps:$4 sm:$0xff]   ;;  %vm17720_vm14 = vmmov %vm17630_vm0 }
 0x3e4   : > { %17709 = vst [vmem:[#allocation187_spill] sm:$0xff] %v14096_v54  ;;  %v4510_v21 = vadd.f32 %v13839_v62, %v3924_v4  ;;  %vm4464_vm11 = vcmp.eq.s32.totalorder %v13808_v16, 1  ;;  %vm3864_vm7 = vcmp.eq.s32.totalorder %v3796_v7, 1  ;;  %v14117_v13 = vsel %vm17630_vm0, %v5904_v50, %v5906_v27  ;;  %v17716_v40 = vld [vmem:[#allocation208_spill] sm:$0xff]  ;;  %v17717_v62 = vld [vmem:[#allocation63_spill] sm:$0xff]  ;;  %v3793_v15 = vpop.permute.xlu0 %3792  ;;  %vm17726_vm5 = vmmov %vm17630_vm0  ;;  %6503 = vmatmul.mubr.bf16.gmra.mrb[168].mxu0 %v7803_v59 }
 0x3e5   : > { %17714 = vst [vmem:[#allocation13_spill] sm:$0xff] %v14117_v13  ;;  %v4197_v18 = vrot.slane %v4088_v22, 1  ;;  %v14122_v47 = vsel %vm6164_vm4, %v13842_v39, 0.0  ;;  %vm4453_vm8 = vcmp.eq.s32.totalorder %v17716_v40, 1  ;;  %v3896_v4 = vsel %vm3864_vm7, %v17717_v62, 0.0  ;;  %v17722_v43 = vld [vmem:[#allocation204_spill] sm:$0xff]  ;;  %vm17728_vm7 = vmmov %vm17630_vm0 }
 0x3e6   : > { %17715 = vst [vmem:[#allocation186_spill] sm:$0xff] %v14122_v47  ;;  %v4202_v50 = vsel %vm17718_vm9, %v4199_v32, %v15681_v36  ;;  %v17719_v7 = vrot.slane %v14102_v8, 1  ;;  %v5908_v39 = vrot.slane %v5797_v51, 1  ;;  %v7804_v9 = vld [vmem:[%s14995_s11 + $0x24] ss:$8 sps:$4 sm:$0xff]   ;;  %vm4454_vm4 = vcmp.eq.s32.totalorder %v17722_v43, 1 }
 0x3e7   : > { %v17723_v13 = vld [vmem:[#allocation82_spill] sm:$0xff]  ;;  %v17724_v62 = vld [vmem:[#allocation233_spill] sm:$0xff]  ;;  %vm3863_vm2 = vcmp.eq.s32.totalorder %v3793_v15, 1  ;;  %v14147_v36 = vsel %vm4463_vm15, %v4202_v50, 0.0  ;;  %v4200_v25 = vsel %vm17728_vm7, %v4197_v18, %v4199_v32  ;;  %v17731_v15 = vld [vmem:[#allocation155_spill] sm:$0xff]  ;;  %6510 = vmatprep.mubr.bf16.mxu0 %v7804_v9  ;;  %v17742_v17 = vrot.slane %v14100_v31, 1 }
 0x3e8   : > { %v14135_v22 = vsel %vm17720_vm14, %v5910_v45, %v17719_v7  ;;  %vm6165_vm1 = vcmp.eq.s32.totalorder %v17723_v13, 1  ;;  %v14143_v54 = vadd.f32 %v3896_v4, %v17724_v62  ;;  %17725 = vst [vmem:[#allocation72_spill] sm:$0xff] %v14147_v36  ;;  %v4198_v7 = vsel %vm17726_vm5, %v4195_v63, %v4197_v18  ;;  %v17727_v51 = vld [vmem:[#allocation110_spill] sm:$0xff]  ;;  %v7572_v4 = vpop.f32.mrb[120].mxu1  ;;  %v17732_v58 = vld [vmem:[#allocation235_spill] sm:$0xff]  ;;  %v14165_v62 = vpop.permute.xlu1 %5057  ;;  %v17737_v29 = vld [vmem:[#allocation41_spill] sm:$0xff] }
 0x3e9   : > { %17721 = vst [vmem:[#allocation70_spill] sm:$0xff] %v14135_v22  ;;  %v3895_v22 = vsel %vm3863_vm2, %v17727_v51, 0.0  ;;  %v14154_v47 = vsel %vm4461_vm13, %v4198_v7, 0.0  ;;  %v14157_v19 = vsel %vm17630_vm0, %v5906_v27, %v5908_v39  ;;  %vm5576_vm9 = vcmp.eq.s32.totalorder %v17731_v15, 1  ;;  %v17733_v50 = vld [vmem:[#allocation218_spill] sm:$0xff]  ;;  %vm17735_vm13 = vmmov %vm17630_vm0  ;;  %v7670_v18 = vpop.f32.mrb[156].mxu0 }
 0x3ea   : > { %17729 = vst [vmem:[#allocation60_spill] sm:$0xff] %v14154_v47  ;;  %17730 = vst [vmem:[#allocation121_spill] sm:$0xff] %v14157_v19  ;;  %vm4456_vm15 = vcmp.eq.s32.totalorder %v17732_v58, 1  ;;  %vm4459_vm14 = vcmp.eq.s32.totalorder %v17733_v50, 1  ;;  %v17734_v63 = vld [vmem:[#allocation166_spill] sm:$0xff]  ;;  %v14174_v32 = vsel %vm4462_vm6, %v4200_v25, 0.0  ;;  %v14177_v27 = vsel %vm17735_vm13, %v5908_v39, %v5910_v45 }
 0x3eb   : > { %v14163_v59 = vadd.f32 %v3895_v22, %v17734_v63  ;;  %17736 = vst [vmem:[#allocation167_spill] sm:$0xff] %v14177_v27  ;;  %v4207_v9 = vrot.slane %v7572_v4, 1  ;;  %v5918_v7 = vrot.slane %v7670_v18, 1  ;;  %v4101_v51 = vpop.f32.mrb[121].mxu1  ;;  %v5810_v22 = vpop.f32.mrb[157].mxu0  ;;  %v14179_v63 = vadd.f32 %v5160_v42, %v4510_v21  ;;  %v17738_v25 = vld [vmem:[#allocation151_spill] sm:$0xff]  ;;  %vm17743_vm5 = vmmov %vm17630_vm0 }
 0x3ec   : > { %v4508_v36 = vadd.f32 %v13795_v52, %v3922_v55  ;;  %v4203_v47 = vrot.slane %v4101_v51, 1  ;;  %v5914_v53 = vrot.slane %v5810_v22, 1  ;;  %v7573_v33 = vpop.f32.mrb[122].mxu1  ;;  %v14182_v19 = vpop.f32.mrb[158].mxu0  ;;  %vm5577_vm10 = vcmp.eq.s32.totalorder %v17737_v29, 1  ;;  %v17739_v42 = vld [vmem:[#allocation159_spill] sm:$0xff]  ;;  %vm17747_vm7 = vmmov %vm17630_vm0 }
 0x3ed   : > { %v5158_v45 = vsel %vm5126_vm12, %v17738_v25, 0.0  ;;  %v14191_v39 = vsel %vm6169_vm3, %v13930_v23, 0.0  ;;  %vm4457_vm6 = vcmp.eq.s32.totalorder %v17739_v42, 1  ;;  %v5055_v21 = vpop.permute.xlu0 %5054  ;;  %v4209_v52 = vrot.slane %v7573_v33, 1  ;;  %v4104_v4 = vpop.f32.mrb[123].mxu1  ;;  %v17740_v51 = vld [vmem:[#allocation87_spill] sm:$0xff]  ;;  %vm17745_vm3 = vmmov %vm17630_vm0 }
 0x3ee   : > { %v5920_v55 = vrot.slane %v14182_v19, 1  ;;  %v14195_v18 = vadd.f32 %v5158_v45, %v4508_v36  ;;  %v3925_v22 = vadd.f32 %v13413_v6, %v17740_v51  ;;  %v17741_v27 = vld [vmem:[#allocation107_spill] sm:$0xff]  ;;  %vm5129_vm12 = vcmp.eq.s32.totalorder %v5055_v21, 1  ;;  %v5813_v19 = vpop.f32.mrb[159].mxu0  ;;  %v14211_v45 = vpop.permute.xlu1 %6094  ;;  %vm17751_vm13 = vmmov %vm17630_vm0  ;;  %v17756_v40 = vld [vmem:[#allocation216_spill] sm:$0xff] }
 0x3ef   : > { %vm4458_vm2 = vcmp.eq.s32.totalorder %v17741_v27, 1  ;;  %v4204_v48 = vsel %vm17743_vm5, %v17742_v17, %v4203_v47  ;;  %v17744_v23 = vrot.slane %v14102_v8, 1  ;;  %v4205_v33 = vrot.slane %v4104_v4, 1  ;;  %v7806_v36 = vld [vmem:[%s14995_s11 + $0x20] ss:$8 sps:$4 sm:$0xff]   ;;  %v7674_v13 = vpop.f32.mrb[160].mxu0 }
 0x3f0   : > { %v14215_v6 = vsel %vm4464_vm11, %v4204_v48, 0.0  ;;  %v14218_v31 = vsel %vm17747_vm7, %v4207_v9, %v4209_v52  ;;  %v17749_v8 = vrot.slane %v13542_v3, 1  ;;  %v14226_v4 = vsel %vm17751_vm13, %v5918_v7, %v5920_v55  ;;  %v7807_v17 = vld [vmem:[%s14995_s11 + $0x34] ss:$8 sps:$4 sm:$0xff]   ;;  %vm17753_vm11 = vmmov %vm17630_vm0  ;;  %6511 = vmatmul.mubr.bf16.gmra.mrb[172].mxu0 %v7806_v36  ;;  %v17760_v36 = vld [vmem:[#allocation23_spill] sm:$0xff] }
 0x3f1   : > { %v14206_v25 = vsel %vm17745_vm3, %v17744_v23, %v5914_v53  ;;  %17746 = vst [vmem:[#allocation61_spill] sm:$0xff] %v14215_v6  ;;  %17748 = vst [vmem:[#allocation12_spill] sm:$0xff] %v14218_v31  ;;  %v17752_v23 = vld [vmem:[#allocation111_spill] sm:$0xff]  ;;  %v14235_v16 = vsel %vm4453_vm8, %v13980_v41, 0.0  ;;  %v14238_v48 = vsel %vm17753_vm11, %v4203_v47, %v4205_v33  ;;  %v6092_v6 = vpop.permute.xlu0 %6091  ;;  %v14247_v31 = vsel %vm4454_vm4, %v13983_v37, 0.0  ;;  %6518 = vmatprep.mubr.bf16.mxu0 %v7807_v17  ;;  %v17774_v27 = vld [vmem:[#allocation92_spill] sm:$0xff] }
 0x3f2   : > { %v14223_v51 = vsel %vm17630_vm0, %v4209_v52, %v17749_v8  ;;  %vm4460_vm5 = vcmp.eq.s32.totalorder %v17752_v23, 1  ;;  %vm17754_vm3 = vmmov %vm17630_vm0  ;;  %v5916_v52 = vrot.slane %v5813_v19, 1  ;;  %v17755_v8 = vld [vmem:[#allocation224_spill] sm:$0xff]  ;;  %v14252_v41 = vsel %vm6165_vm1, %v13853_v60, 0.0 }
 0x3f3   : > { %17750 = vst [vmem:[#allocation71_spill] sm:$0xff] %v14223_v51  ;;  %v14241_v3 = vsel %vm17754_vm3, %v4205_v33, %v4207_v9  ;;  %vm5135_vm7 = vcmp.eq.s32.totalorder %v17755_v8, 1  ;;  %v7612_v51 = vpop.f32.mrb[124].mxu1  ;;  %v4511_v47 = vadd.f32 %v13939_v56, %v3925_v22  ;;  %v3926_v9 = vadd.f32 %v13562_v24, %v17756_v40  ;;  %v17757_v33 = vld [vmem:[#allocation178_spill] sm:$0xff]  ;;  %vm17758_vm13 = vmmov %vm17630_vm0  ;;  %v17761_v56 = vld [vmem:[#allocation148_spill] sm:$0xff]  ;;  %v14271_v22 = vpop.permute.xlu1 %4429 }
 0x3f4   : > { %vm5580_vm8 = vcmp.eq.s32.totalorder %v17757_v33, 1  ;;  %v14259_v19 = vsel %vm17630_vm0, %v5914_v53, %v5916_v52  ;;  %v14262_v37 = vsel %vm17758_vm13, %v5916_v52, %v5918_v7  ;;  %v5608_v43 = vsel %vm5576_vm9, %v7612_v51, 0.0  ;;  %v14266_v60 = vpop.f32.mrb[125].mxu1  ;;  %v5826_v51 = vpop.f32.mrb[161].mxu0  ;;  %v17762_v52 = vld [vmem:[#allocation90_spill] sm:$0xff]  ;;  %vm17772_vm11 = vmmov %vm17630_vm0 }
 0x3f5   : > { %17759 = vst [vmem:[#allocation142_spill] sm:$0xff] %v14266_v60  ;;  %vm5578_vm4 = vcmp.eq.s32.totalorder %v17760_v36, 1  ;;  %v5161_v24 = vsel %vm5129_vm12, %v17761_v56, 0.0  ;;  %v14276_v53 = vsel %vm4456_vm15, %v14027_v1, 0.0  ;;  %v14281_v15 = vsel %vm4459_vm14, %v14036_v38, 0.0  ;;  %v7613_v56 = vpop.f32.mrb[126].mxu1  ;;  %v14290_v50 = vpop.permute.xlu0 %4426  ;;  %vm17766_vm14 = vmmov %vm17630_vm0 }
 0x3f6   : > { %v5640_v7 = vadd.f32 %v5608_v43, %v13705_v2  ;;  %v14284_v17 = vadd.f32 %v5161_v24, %v4511_v47  ;;  %vm5581_vm1 = vcmp.eq.s32.totalorder %v17762_v52, 1  ;;  %vm5130_vm9 = vcmp.eq.s32.totalorder %v14165_v62, 1  ;;  %v7675_v58 = vpop.f32.mrb[162].mxu0  ;;  %v17763_v1 = vld [vmem:[#allocation197_spill] sm:$0xff]  ;;  %v14295_v43 = vpop.f32.mrb[127].mxu1  ;;  %v17765_v24 = vld [vmem:[#allocation183_spill] sm:$0xff] }
 0x3f7   : > { %v5926_v21 = vrot.slane %v7674_v13, 1  ;;  %v5922_v40 = vrot.slane %v5826_v51, 1  ;;  %vm5579_vm15 = vcmp.eq.s32.totalorder %v17763_v1, 1  ;;  %v4512_v60 = vadd.f32 %v13924_v12, %v3926_v9  ;;  %17764 = vst [vmem:[#allocation16_spill] sm:$0xff] %v14295_v43  ;;  %v5829_v9 = vpop.f32.mrb[163].mxu0  ;;  %v14316_v42 = vpop.permute.xlu1 %5562  ;;  %v17784_v33 = vld [vmem:[#allocation14_spill] sm:$0xff] }
 0x3f8   : > { %v6226_v38 = vadd.f32 %v14077_v0, %v5640_v7  ;;  %v5609_v2 = vsel %vm5577_vm10, %v7613_v56, 0.0  ;;  %v5928_v47 = vrot.slane %v7675_v58, 1  ;;  %v5162_v62 = vsel %vm5130_vm9, %v17765_v24, 0.0  ;;  %v14312_v29 = vld [vmem:[%s14995_s11 + $0x30] ss:$8 sps:$4 sm:$0xff]   ;;  %v17790_v52 = vld [vmem:[#allocation75_spill] sm:$0xff] }
 0x3f9   : > { %v14301_v13 = vsel %vm4457_vm6, %v14058_v57, 0.0  ;;  %v14304_v51 = vsel %vm17766_vm14, %v5920_v55, %v5922_v40  ;;  %v5641_v12 = vadd.f32 %v5609_v2, %v13777_v28  ;;  %v14307_v0 = vadd.f32 %v5162_v62, %v4512_v60  ;;  %17767 = vst [vmem:[#allocation195_spill] sm:$0xff] %v14312_v29  ;;  %v17768_v7 = vld [vmem:[#allocation220_spill] sm:$0xff]  ;;  %v14326_v28 = vld [vmem:[%s14990_s6] ss:$0 sm:$0xff]  ;;  %vm17769_vm6 = vmmov %vm17630_vm0  ;;  %6519 = vmatmul.mubr.bf16.gmra.mrb[176].mxu0 %v14312_v29  ;;  %v14341_v62 = vpop.permute.xlu0 %5559 }
 0x3fa   : > { %vm5136_vm10 = vcmp.eq.s32.totalorder %v17768_v7, 1  ;;  %vm6171_vm12 = vcmp.eq.s32.totalorder %v14211_v45, 1  ;;  %v14321_v57 = vsel %vm4458_vm2, %v14061_v20, 0.0  ;;  %v14329_v55 = vsel %vm17769_vm6, %v5926_v21, %v5928_v47  ;;  %v17775_v24 = vld [vmem:[#allocation164_spill] sm:$0xff]  ;;  %v17781_v45 = vld [vmem:[#allocation239_spill] sm:$0xff]  ;;  %v17803_v7 = vld [vmem:[#allocation13_spill] sm:$0xff] }
 0x3fb   : > { %17770 = vst [vmem:[#allocation147_spill] sm:$0xff] %v14329_v55  ;;  %v17771_v60 = vrot.slane %v13673_v30, 1  ;;  %vm6170_vm3 = vcmp.eq.s32.totalorder %v6092_v6, 1  ;;  %v6227_v58 = vadd.f32 %v14084_v10, %v5641_v12  ;;  %v5924_v2 = vrot.slane %v5829_v9, 1 }
 0x3fc   : > { %v3931_v20 = vadd.f32 %v13650_v61, %v17774_v27  ;;  %vm6178_vm2 = vcmp.eq.s32.totalorder %v17775_v24, 1  ;;  %v14346_v30 = vsel %vm4460_vm5, %v14110_v44, 0.0  ;;  %v14349_v6 = vsel %vm6170_vm3, %v13907_v26, 0.0  ;;  %v17776_v61 = vld [vmem:[#allocation140_spill] sm:$0xff]  ;;  %vm17777_vm5 = vmmov %vm17769_vm6  ;;  %v17801_v24 = vld [vmem:[#allocation125_spill] sm:$0xff] }
 0x3fd   : > { %v14334_v56 = vsel %vm17772_vm11, %v5928_v47, %v17771_v60  ;;  %v7616_v47 = vpop.f32.mrb[128].mxu1  ;;  %v14354_v10 = vsel %vm6171_vm12, %v13958_v5, 0.0  ;;  %v3932_v12 = vadd.f32 %v13848_v34, %v17776_v61  ;;  %vm5582_vm0 = vcmp.eq.s32.totalorder %v13458_v46, 1  ;;  %vm17779_vm9 = vmmov %vm17777_vm5  ;;  %v17782_v60 = vld [vmem:[#allocation106_spill] sm:$0xff]  ;;  %v4382_v34 = vpop.permute.xlu1 %4381  ;;  %v17804_v46 = vld [vmem:[#allocation173_spill] sm:$0xff] }
 0x3fe   : > { %17773 = vst [vmem:[#allocation165_spill] sm:$0xff] %v14334_v56  ;;  %vm5584_vm13 = vcmp.eq.s32.totalorder %v13951_v49, 1  ;;  %v14361_v23 = vadd.f32 %v14326_v28, %v6226_v38  ;;  %v14364_v44 = vsel %vm17777_vm5, %v5922_v40, %v5924_v2  ;;  %v14367_v26 = vsel %vm17779_vm9, %v5924_v2, %v5926_v21  ;;  %v5273_v9 = vpop.f32.mrb[129].mxu1  ;;  %v17783_v2 = vld [vmem:[#allocation33_spill] sm:$0xff]  ;;  %v4379_v36 = vpop.permute.xlu0 %4378  ;;  %v17812_v56 = vld [vmem:[#allocation120_spill] sm:$0xff] }
 0x3ff   : > { %17778 = vst [vmem:[#allocation188_spill] sm:$0xff] %v14364_v44  ;;  %17780 = vst [vmem:[#allocation189_spill] sm:$0xff] %v14367_v26  ;;  %v5167_v5 = vsel %vm5135_vm7, %v17781_v45, 0.0  ;;  %vm6179_vm14 = vcmp.eq.s32.totalorder %v17782_v60, 1  ;;  %v5612_v27 = vsel %vm5580_vm8, %v7616_v47, 0.0  ;;  %v5610_v38 = vsel %vm5578_vm4, %v5273_v9, 0.0 }
 0x400   : > { %v7617_v61 = vpop.f32.mrb[130].mxu1  ;;  %v4517_v40 = vadd.f32 %v14235_v16, %v3931_v20  ;;  %v4518_v21 = vadd.f32 %v14247_v31, %v3932_v12  ;;  %vm5583_vm12 = vcmp.eq.s32.totalorder %v13421_v14, 1  ;;  %vm5585_vm6 = vcmp.eq.s32.totalorder %v13936_v11, 1  ;;  %v17785_v9 = vld [vmem:[#allocation83_spill] sm:$0xff]  ;;  %v17786_v12 = vld [vmem:[#allocation137_spill] sm:$0xff]  ;;  %v17808_v60 = vld [vmem:[#allocation96_spill] sm:$0xff] }
 0x401   : > { %vm4450_vm11 = vcmp.eq.s32.totalorder %v4382_v34, 1  ;;  %v14382_v8 = vadd.f32 %v14326_v28, %v6227_v58  ;;  %v5644_v45 = vadd.f32 %v5612_v27, %v17783_v2  ;;  %v5642_v47 = vadd.f32 %v5610_v38, %v17784_v33  ;;  %v5276_v29 = vpop.f32.mrb[131].mxu1  ;;  %v17787_v34 = vld [vmem:[#allocation186_spill] sm:$0xff]  ;;  %v17788_v27 = vld [vmem:[#allocation56_spill] sm:$0xff]  ;;  %v17789_v38 = vld [vmem:[#allocation115_spill] sm:$0xff]  ;;  %v14398_v33 = vpop.permute.xlu1 %5514 }
 0x402   : > { %v4482_v43 = vsel %vm4450_vm11, %v17785_v9, 0.0  ;;  %v5613_v16 = vsel %vm5581_vm1, %v7617_v61, 0.0  ;;  %v5611_v31 = vsel %vm5579_vm15, %v5276_v29, 0.0  ;;  %v14391_v20 = vadd.f32 %v5167_v5, %v4517_v40  ;;  %v17791_v9 = vld [vmem:[#allocation168_spill] sm:$0xff]  ;;  %v17793_v40 = vld [vmem:[#allocation85_spill] sm:$0xff]  ;;  %v17827_v26 = vld [vmem:[#allocation47_spill] sm:$0xff] }
 0x403   : > { %vm4449_vm7 = vcmp.eq.s32.totalorder %v4379_v36, 1  ;;  %v6230_v58 = vadd.f32 %v17786_v12, %v5644_v45  ;;  %v6228_v55 = vadd.f32 %v17787_v34, %v5642_v47  ;;  %v5645_v2 = vadd.f32 %v5613_v16, %v17788_v27  ;;  %v17794_v47 = vld [vmem:[#allocation231_spill] sm:$0xff]  ;;  %v14414_v16 = vpop.permute.xlu0 %5511  ;;  %v17810_v12 = vld [vmem:[#allocation54_spill] sm:$0xff]  ;;  %v17833_v44 = vld [vmem:[#allocation121_spill] sm:$0xff] }
 0x404   : > { %vm5139_vm8 = vcmp.eq.s32.totalorder %v17789_v38, 1  ;;  %vm4466_vm4 = vcmp.eq.s32.totalorder %v14271_v22, 1  ;;  %v4481_v61 = vsel %vm4449_vm7, %v17790_v52, 0.0  ;;  %v5643_v1 = vadd.f32 %v5611_v31, %v17791_v9  ;;  %v17795_v36 = vld [vmem:[#allocation227_spill] sm:$0xff]  ;;  %v17798_v9 = vld [vmem:[#allocation238_spill] sm:$0xff] }
 0x405   : > { %v14403_v29 = vadd.f32 %v4482_v43, %v14143_v54  ;;  %vm4465_vm1 = vcmp.eq.s32.totalorder %v14290_v50, 1  ;;  %v14407_v5 = vsel %vm4466_vm4, %v14241_v3, 0.0  ;;  %v6231_v45 = vadd.f32 %v17793_v40, %v5645_v2  ;;  %v7620_v43 = vpop.f32.mrb[132].mxu1  ;;  %v17797_v2 = vld [vmem:[#allocation138_spill] sm:$0xff]  ;;  %v17800_v40 = vld [vmem:[#allocation53_spill] sm:$0xff] }
 0x406   : > { %17792 = vst [vmem:[#allocation191_spill] sm:$0xff] %v14407_v5  ;;  %v5168_v22 = vsel %vm5136_vm10, %v17794_v47, 0.0  ;;  %vm6182_vm15 = vcmp.eq.s32.totalorder %v17795_v36, 1  ;;  %v14417_v31 = vsel %vm4465_vm1, %v14238_v48, 0.0  ;;  %v6229_v54 = vadd.f32 %v14252_v41, %v5643_v1  ;;  %v5289_v27 = vpop.f32.mrb[133].mxu1  ;;  %v3850_v41 = vpop.permute.xlu1 %3849  ;;  %v17830_v36 = vld [vmem:[#allocation240_spill] sm:$0xff] }
 0x407   : > { %v14421_v50 = vadd.f32 %v4481_v61, %v14163_v59  ;;  %v14423_v3 = vadd.f32 %v5168_v22, %v4518_v21  ;;  %v14428_v34 = vadd.f32 %v14326_v28, %v6230_v58  ;;  %v14433_v48 = vsel %vm6178_vm2, %v17797_v2, 0.0  ;;  %v7621_v61 = vpop.f32.mrb[134].mxu1  ;;  %v17799_v58 = vld [vmem:[#allocation171_spill] sm:$0xff] }
 0x408   : > { %v14436_v52 = vadd.f32 %v14326_v28, %v6228_v55  ;;  %v5616_v59 = vsel %vm5584_vm13, %v7620_v43, 0.0  ;;  %v5614_v21 = vsel %vm5582_vm0, %v5289_v27, 0.0  ;;  %v3935_v1 = vadd.f32 %v17799_v58, %v17798_v9  ;;  %v17802_v22 = vld [vmem:[#allocation187_spill] sm:$0xff]  ;;  %v5292_v2 = vpop.f32.mrb[135].mxu1  ;;  %v17805_v43 = vld [vmem:[#allocation174_spill] sm:$0xff]  ;;  %v3847_v9 = vpop.permute.xlu0 %3846 }
 0x409   : > { %17796 = vst [vmem:[#allocation34_spill] sm:$0xff] %v14428_v34  ;;  %vm5137_vm10 = vcmp.eq.s32.totalorder %v17800_v40, 1  ;;  %vm5587_vm3 = vcmp.eq.s32.totalorder %v14398_v33, 1  ;;  %vm3882_vm2 = vcmp.eq.s32.totalorder %v3850_v41, 1  ;;  %v5648_v47 = vadd.f32 %v5616_v59, %v17801_v24  ;;  %v17828_v34 = vld [vmem:[#allocation97_spill] sm:$0xff] }
 0x40a   : > { %v5646_v55 = vadd.f32 %v5614_v21, %v17802_v22  ;;  %v14451_v49 = vsel %vm6179_vm14, %v17803_v7, 0.0  ;;  %vm6180_vm0 = vcmp.eq.s32.totalorder %v17804_v46, 1  ;;  %v3914_v27 = vsel %vm3882_vm2, %v17805_v43, 0.0  ;;  %v17807_v21 = vld [vmem:[#allocation176_spill] sm:$0xff]  ;;  %v17809_v22 = vld [vmem:[#allocation15_spill] sm:$0xff] }
 0x40b   : > { %v14456_v58 = vadd.f32 %v14326_v28, %v6231_v45  ;;  %v5617_v41 = vsel %vm5585_vm6, %v7621_v61, 0.0  ;;  %v5615_v59 = vsel %vm5583_vm12, %v5292_v2, 0.0  ;;  %vm6183_vm13 = vcmp.eq.s32.totalorder %v17807_v21, 1  ;;  %v17811_v45 = vld [vmem:[#allocation112_spill] sm:$0xff] }
 0x40c   : > { %vm3881_vm5 = vcmp.eq.s32.totalorder %v3847_v9, 1  ;;  %v14464_v7 = vadd.f32 %v3914_v27, %v17808_v60  ;;  %v6234_v24 = vadd.f32 %v14349_v6, %v5648_v47  ;;  %v6232_v43 = vadd.f32 %v17809_v22, %v5646_v55  ;;  %v17813_v9 = vld [vmem:[#allocation154_spill] sm:$0xff]  ;;  %v17814_v27 = vld [vmem:[#allocation57_spill] sm:$0xff]  ;;  %v14476_v60 = vpop.permute.xlu1 %5111  ;;  %v17820_v22 = vld [vmem:[#allocation100_spill] sm:$0xff] }
 0x40d   : > { %17806 = vst [vmem:[#allocation43_spill] sm:$0xff] %v14456_v58  ;;  %vm5138_vm9 = vcmp.eq.s32.totalorder %v17810_v12, 1  ;;  %vm5140_vm14 = vcmp.eq.s32.totalorder %v17811_v45, 1  ;;  %v3913_v11 = vsel %vm3881_vm5, %v17812_v56, 0.0  ;;  %v5649_v61 = vadd.f32 %v5617_v41, %v14179_v63  ;;  %v17815_v6 = vld [vmem:[#allocation98_spill] sm:$0xff] }
 0x40e   : > { %v5647_v14 = vadd.f32 %v5615_v59, %v14195_v18  ;;  %v4521_v2 = vadd.f32 %v14301_v13, %v3935_v1  ;;  %vm5143_vm12 = vcmp.eq.s32.totalorder %v17813_v9, 1  ;;  %vm6186_vm6 = vcmp.eq.s32.totalorder %v17814_v27, 1  ;;  %v17817_v63 = vld [vmem:[#allocation22_spill] sm:$0xff]  ;;  %v14495_v59 = vpop.f32.mrb[136].mxu1 }
 0x40f   : > { %v14479_v47 = vadd.f32 %v3913_v11, %v17815_v6  ;;  %v14482_v55 = vadd.f32 %v14326_v28, %v6229_v54  ;;  %v14485_v56 = vadd.f32 %v14326_v28, %v6234_v24  ;;  %v5171_v18 = vsel %vm5139_vm8, %v17817_v63, 0.0  ;;  %17819 = vst [vmem:[#allocation104_spill] sm:$0xff] %v14495_v59  ;;  %v17821_v11 = vld [vmem:[#allocation127_spill] sm:$0xff]  ;;  %v5305_v24 = vpop.f32.mrb[137].mxu1  ;;  %v17822_v6 = vld [vmem:[#allocation70_spill] sm:$0xff]  ;;  %v17829_v63 = vld [vmem:[#allocation68_spill] sm:$0xff] }
 0x410   : > { %v14491_v13 = vadd.f32 %v14326_v28, %v6232_v43  ;;  %v6235_v1 = vadd.f32 %v14354_v10, %v5649_v61  ;;  %v6233_v41 = vadd.f32 %v14191_v39, %v5647_v14  ;;  %vm5592_vm11 = vcmp.eq.s32.totalorder %v17820_v22, 1  ;;  %v17823_v10 = vld [vmem:[#allocation93_spill] sm:$0xff]  ;;  %v17824_v39 = vld [vmem:[#allocation134_spill] sm:$0xff]  ;;  %v14510_v14 = vpop.permute.xlu0 %5108  ;;  %v14517_v38 = vpop.f32.mrb[138].mxu1  ;;  %v17853_v22 = vld [vmem:[#allocation119_spill] sm:$0xff] }
 0x411   : > { %17816 = vst [vmem:[#allocation198_spill] sm:$0xff] %v14485_v56  ;;  %v14498_v54 = vadd.f32 %v5171_v18, %v4521_v2  ;;  %vm5141_vm7 = vcmp.eq.s32.totalorder %v17821_v11, 1  ;;  %vm5586_vm4 = vcmp.eq.s32.totalorder %v14414_v16, 1  ;;  %v14506_v43 = vsel %vm6182_vm15, %v17822_v6, 0.0  ;;  %17826 = vst [vmem:[#allocation37_spill] sm:$0xff] %v14517_v38  ;;  %v17851_v9 = vld [vmem:[#allocation118_spill] sm:$0xff] }
 0x412   : > { %17818 = vst [vmem:[#allocation170_spill] sm:$0xff] %v14491_v13  ;;  %v3933_v61 = vadd.f32 %v17824_v39, %v17823_v10  ;;  %v14515_v18 = vadd.f32 %v14326_v28, %v6235_v1  ;;  %v5618_v16 = vsel %vm5586_vm4, %v5305_v24, 0.0  ;;  %vm5593_vm8 = vcmp.eq.s32.totalorder %v17827_v26, 1  ;;  %v5308_v39 = vpop.f32.mrb[139].mxu1  ;;  %v14528_v1 = vpop.permute.xlu1 %6148  ;;  %v17843_v24 = vld [vmem:[#allocation221_spill] sm:$0xff] }
 0x413   : > { %v14523_v10 = vadd.f32 %v5618_v16, %v14284_v17  ;;  %vm5144_vm1 = vcmp.eq.s32.totalorder %v17828_v34, 1  ;;  %vm6184_vm15 = vcmp.eq.s32.totalorder %v17829_v63, 1  ;;  %v5619_v58 = vsel %vm5587_vm3, %v5308_v39, 0.0  ;;  %v17831_v17 = vld [vmem:[#allocation184_spill] sm:$0xff]  ;;  %v17832_v16 = vld [vmem:[#allocation135_spill] sm:$0xff]  ;;  %v17834_v39 = vld [vmem:[#allocation86_spill] sm:$0xff] }
 0x414   : > { %17825 = vst [vmem:[#allocation10_spill] sm:$0xff] %v14515_v18  ;;  %v4519_v2 = vadd.f32 %v14170_v35, %v3933_v61  ;;  %v5169_v6 = vsel %vm5137_vm10, %v17830_v36, 0.0  ;;  %v3936_v56 = vadd.f32 %v17832_v16, %v17831_v17  ;;  %v14539_v35 = vadd.f32 %v14326_v28, %v6233_v41  ;;  %v14552_v40 = vpop.permute.xlu0 %6145  ;;  %v17836_v41 = vld [vmem:[#allocation126_spill] sm:$0xff]  ;;  %v17839_v16 = vld [vmem:[#allocation51_spill] sm:$0xff]  ;;  %v7628_v13 = vpop.f32.mrb[140].mxu1 }
 0x415   : > { %v14542_v61 = vadd.f32 %v5619_v58, %v14307_v0  ;;  %v14549_v33 = vsel %vm6180_vm0, %v17833_v44, 0.0  ;;  %vm6187_vm3 = vcmp.eq.s32.totalorder %v17834_v39, 1  ;;  %v14559_v0 = vsel %vm6183_vm13, %v14206_v25, 0.0  ;;  %v17835_v58 = vld [vmem:[#allocation228_spill] sm:$0xff]  ;;  %v17842_v25 = vld [vmem:[#allocation21_spill] sm:$0xff]  ;;  %v17863_v34 = vld [vmem:[#allocation234_spill] sm:$0xff] }
 0x416   : > { %v14544_v5 = vadd.f32 %v5169_v6, %v4519_v2  ;;  %v4522_v17 = vadd.f32 %v14321_v57, %v3936_v56  ;;  %v3934_v2 = vadd.f32 %v17836_v41, %v17835_v58  ;;  %v17837_v6 = vld [vmem:[#allocation163_spill] sm:$0xff]  ;;  %v17838_v44 = vld [vmem:[#allocation116_spill] sm:$0xff]  ;;  %v5170_v36 = vsel %vm5138_vm9, %v17839_v16, 0.0  ;;  %v17844_v58 = vld [vmem:[#allocation114_spill] sm:$0xff]  ;;  %v3802_v41 = vpop.permute.xlu1 %3801 }
 0x417   : > { %vm5142_vm10 = vcmp.eq.s32.totalorder %v17837_v6, 1  ;;  %v5172_v46 = vsel %vm5140_vm14, %v17838_v44, 0.0  ;;  %v17840_v57 = vmax.f32 %v14361_v23, 0.0  ;;  %v17841_v56 = vmax.f32 %v14382_v8, 0.0  ;;  %v17845_v44 = vld [vmem:[#allocation149_spill] sm:$0xff]  ;;  %v17847_v16 = vld [vmem:[#allocation74_spill] sm:$0xff] }
 0x418   : > { %v3939_v18 = vadd.f32 %v17843_v24, %v17842_v25  ;;  %vm5596_vm2 = vcmp.eq.s32.totalorder %v17844_v58, 1  ;;  %v14579_v59 = vadd.f32 %v5172_v46, %v4522_v17  ;;  %v4520_v45 = vadd.f32 %v14276_v53, %v3934_v2  ;;  %v14592_v24 = vpop.f32.mrb[141].mxu1  ;;  %v17848_v17 = vld [vmem:[#allocation60_spill] sm:$0xff]  ;;  %v17850_v2 = vld [vmem:[#allocation46_spill] sm:$0xff]  ;;  %v3799_v27 = vpop.permute.xlu0 %3798  ;;  %v17867_v39 = vld [vmem:[#allocation141_spill] sm:$0xff] }
 0x419   : > { %v14574_v21 = vpack.c.bf16 %v17841_v56, %v17840_v57  ;;  %v5175_v12 = vsel %vm5143_vm12, %v17845_v44, 0.0  ;;  %v14588_v23 = vsel %vm6186_vm6, %v14226_v4, 0.0  ;;  %vm3866_vm0 = vcmp.eq.s32.totalorder %v3802_v41, 1  ;;  %17846 = vst [vmem:[#allocation105_spill] sm:$0xff] %v14592_v24  ;;  %v17849_v53 = vld [vmem:[#allocation156_spill] sm:$0xff]  ;;  %v17852_v56 = vld [vmem:[#allocation109_spill] sm:$0xff] }
 0x41a   : > { %v5624_v8 = vsel %vm5592_vm11, %v7628_v13, 0.0  ;;  %vm5594_vm13 = vcmp.eq.s32.totalorder %v17847_v16, 1  ;;  %v4525_v46 = vadd.f32 %v17848_v17, %v3939_v18  ;;  %v3937_v57 = vadd.f32 %v17850_v2, %v17849_v53  ;;  %v7629_v41 = vpop.f32.mrb[142].mxu1  ;;  %v17854_v24 = vld [vmem:[#allocation136_spill] sm:$0xff]  ;;  %v17871_v58 = vld [vmem:[#allocation29_spill] sm:$0xff] }
 0x41b   : > { %vm5597_vm5 = vcmp.eq.s32.totalorder %v17851_v9, 1  ;;  %v3898_v25 = vsel %vm3866_vm0, %v17852_v56, 0.0  ;;  %v5656_v4 = vadd.f32 %v5624_v8, %v14391_v20  ;;  %v5202_v44 = vadd.f32 %v5170_v36, %v4520_v45  ;;  %v14609_v17 = vpop.f32.mrb[143].mxu1  ;;  %v17855_v53 = vld [vmem:[#allocation200_spill] sm:$0xff]  ;;  %v17856_v20 = vld [vmem:[#allocation133_spill] sm:$0xff] }
 0x41c   : > { %v5173_v13 = vsel %vm5141_vm7, %v17853_v22, 0.0  ;;  %v14605_v38 = vadd.f32 %v3898_v25, %v17854_v24  ;;  %vm3865_vm9 = vcmp.eq.s32.totalorder %v3799_v27, 1  ;;  %v5625_v18 = vsel %vm5593_vm8, %v7629_v41, 0.0  ;;  %v17857_v24 = vld [vmem:[#allocation132_spill] sm:$0xff]  ;;  %v5064_v25 = vpop.permute.xlu1 %5063  ;;  %v17858_v27 = vld [vmem:[#allocation50_spill] sm:$0xff] }
 0x41d   : > { %vm5595_vm14 = vcmp.eq.s32.totalorder %v17855_v53, 1  ;;  %v14612_v2 = vadd.f32 %v5175_v12, %v4525_v46  ;;  %v3897_v8 = vsel %vm3865_vm9, %v17856_v20, 0.0  ;;  %v6242_v36 = vadd.f32 %v14433_v48, %v5656_v4  ;;  %v17859_v12 = vld [vmem:[#allocation130_spill] sm:$0xff]  ;;  %v17860_v41 = vld [vmem:[#allocation52_spill] sm:$0xff]  ;;  %v17861_v4 = vld [vmem:[#allocation79_spill] sm:$0xff] }
 0x41e   : > { %v5657_v11 = vadd.f32 %v5625_v18, %v14423_v3  ;;  %v4523_v45 = vadd.f32 %v14281_v15, %v3937_v57  ;;  %v14619_v56 = vadd.f32 %v3897_v8, %v17857_v24  ;;  %v14624_v26 = vsel %vm6184_vm15, %v14259_v19, 0.0  ;;  %v17862_v22 = vld [vmem:[#allocation180_spill] sm:$0xff]  ;;  %v17864_v20 = vld [vmem:[#allocation35_spill] sm:$0xff]  ;;  %v5061_v24 = vpop.permute.xlu0 %5060 }
 0x41f   : > { %v3940_v46 = vadd.f32 %v17859_v12, %v17858_v27  ;;  %v5176_v48 = vsel %vm5144_vm1, %v17860_v41, 0.0  ;;  %vm6181_vm12 = vcmp.eq.s32.totalorder %v17861_v4, 1  ;;  %vm5132_vm6 = vcmp.eq.s32.totalorder %v5064_v25, 1  ;;  %v17874_v53 = vld [vmem:[#allocation167_spill] sm:$0xff] }
 0x420   : > { %v6281_v15 = vadd.f32 %v14326_v28, %v6242_v36  ;;  %v6243_v3 = vadd.f32 %v14451_v49, %v5657_v11  ;;  %v14634_v57 = vadd.f32 %v5173_v13, %v4523_v45  ;;  %v5164_v63 = vsel %vm5132_vm6, %v17862_v22, 0.0  ;;  %v7632_v13 = vpop.f32.mrb[144].mxu1  ;;  %v17865_v11 = vld [vmem:[#allocation150_spill] sm:$0xff] }
 0x421   : > { %v4526_v19 = vadd.f32 %v14174_v32, %v3940_v46  ;;  %v14641_v18 = vsel %vm6187_vm3, %v14304_v51, 0.0  ;;  %v3938_v8 = vadd.f32 %v17864_v20, %v17863_v34  ;;  %v14646_v25 = vadd.f32 %v5164_v63, %v14403_v29  ;;  %v17866_v45 = vld [vmem:[#allocation30_spill] sm:$0xff]  ;;  %v5337_v27 = vpop.f32.mrb[145].mxu1  ;;  %v17868_v46 = vld [vmem:[#allocation144_spill] sm:$0xff]  ;;  %v17869_v34 = vld [vmem:[#allocation129_spill] sm:$0xff] }
 0x422   : > { %v6282_v49 = vadd.f32 %v14326_v28, %v6243_v3  ;;  %v6313_v36 = vmax.f32 %v6281_v15, 0.0  ;;  %v5174_v32 = vsel %vm5142_vm10, %v17865_v11, 0.0  ;;  %vm5598_vm11 = vcmp.eq.s32.totalorder %v17866_v45, 1  ;;  %v6101_v15 = vpop.permute.xlu1 %6100  ;;  %v7633_v22 = vpop.f32.mrb[146].mxu1  ;;  %v17870_v20 = vld [vmem:[#allocation152_spill] sm:$0xff] }
 0x423   : > { %vm5600_vm7 = vcmp.eq.s32.totalorder %v17867_v39, 1  ;;  %vm5131_vm4 = vcmp.eq.s32.totalorder %v5061_v24, 1  ;;  %v5628_v51 = vsel %vm5596_vm2, %v7632_v13, 0.0  ;;  %v14656_v12 = vadd.f32 %v5176_v48, %v4526_v19  ;;  %v5340_v19 = vpop.f32.mrb[147].mxu1  ;;  %v6098_v16 = vpop.permute.xlu0 %6097 }
 0x424   : > { %v4524_v29 = vadd.f32 %v14346_v30, %v3938_v8  ;;  %v5163_v41 = vsel %vm5131_vm4, %v17868_v46, 0.0  ;;  %v5660_v3 = vadd.f32 %v5628_v51, %v14498_v54  ;;  %v5626_v6 = vsel %vm5594_vm13, %v5337_v27, 0.0  ;;  %v17872_v8 = vld [vmem:[#allocation24_spill] sm:$0xff]  ;;  %v17873_v46 = vld [vmem:[#allocation146_spill] sm:$0xff] }
 0x425   : > { %v6314_v63 = vmax.f32 %v6282_v49, 0.0  ;;  %vm5599_vm8 = vcmp.eq.s32.totalorder %v17869_v34, 1  ;;  %vm6185_vm1 = vcmp.eq.s32.totalorder %v17870_v20, 1  ;;  %vm5601_vm15 = vcmp.eq.s32.totalorder %v17871_v58, 1 }
 0x426   : > { %vm6173_vm3 = vcmp.eq.s32.totalorder %v6101_v15, 1  ;;  %v14667_v48 = vadd.f32 %v5163_v41, %v14421_v50  ;;  %v5658_v30 = vadd.f32 %v5626_v6, %v14544_v5  ;;  %v5629_v54 = vsel %vm5597_vm5, %v7633_v22, 0.0  ;;  %v4436_v27 = vpop.permute.xlu1 %4435 }
 0x427   : > { %v6205_v24 = vsel %vm6173_vm3, %v17872_v8, 0.0  ;;  %v6246_v49 = vadd.f32 %v14506_v43, %v5660_v3  ;;  %v5661_v13 = vadd.f32 %v5629_v54, %v14579_v59  ;;  %v5627_v11 = vsel %vm5595_vm14, %v5340_v19, 0.0 }
 0x428   : > { %vm6172_vm10 = vcmp.eq.s32.totalorder %v6098_v16, 1  ;;  %v6237_v50 = vadd.f32 %v6205_v24, %v14542_v61  ;;  %v6244_v51 = vadd.f32 %v14549_v33, %v5658_v30  ;;  %v5659_v5 = vadd.f32 %v5627_v11, %v5202_v44  ;;  %v4433_v33 = vpop.permute.xlu0 %4432  ;;  %v17875_v44 = vld [vmem:[#allocation71_spill] sm:$0xff]  ;;  %v17876_v16 = vld [vmem:[#allocation12_spill] sm:$0xff] }
 0x429   : > { %v6304_v9 = vmax.f32 %v14539_v35, 0.0  ;;  %v6204_v41 = vsel %vm6172_vm10, %v17873_v46, 0.0  ;;  %v6247_v15 = vadd.f32 %v14559_v0, %v5661_v13  ;;  %v6337_v6 = vpack.c.bf16 %v6314_v63, %v6313_v36  ;;  %v7636_v0 = vpop.f32.mrb[148].mxu1 }
 0x42a   : > { %vm4468_vm2 = vcmp.eq.s32.totalorder %v4436_v27, 1  ;;  %v6236_v59 = vadd.f32 %v6204_v41, %v14523_v10  ;;  %v14684_v43 = vadd.f32 %v14326_v28, %v6237_v50  ;;  %v6213_v61 = vsel %vm6181_vm12, %v17874_v53, 0.0  ;;  %v5353_v54 = vpop.f32.mrb[149].mxu1  ;;  %v14702_v19 = vpop.permute.xlu1 %5568  ;;  %v17879_v53 = vld [vmem:[#allocation185_spill] sm:$0xff] }
 0x42b   : > { %v4500_v3 = vsel %vm4468_vm2, %v17875_v44, 0.0  ;;  %v14691_v22 = vadd.f32 %v14326_v28, %v6246_v49  ;;  %v6245_v30 = vadd.f32 %v6213_v61, %v5659_v5  ;;  %7237 = vmatprep.subr.bf16.mxu1 %v6337_v6  ;;  %v5206_v36 = vadd.f32 %v5174_v32, %v4524_v29  ;;  %v7637_v24 = vpop.f32.mrb[150].mxu1  ;;  %v17877_v49 = vld [vmem:[#allocation122_spill] sm:$0xff]  ;;  %v17880_v61 = vld [vmem:[#allocation25_spill] sm:$0xff] }
 0x42c   : > { %vm5147_vm0 = vcmp.eq.s32.totalorder %v14510_v14, 1  ;;  %vm4467_vm13 = vcmp.eq.s32.totalorder %v4433_v33, 1  ;;  %v14695_v10 = vadd.f32 %v4500_v3, %v14464_v7  ;;  %v14698_v63 = vadd.f32 %v14326_v28, %v6236_v59  ;;  %7238 = vmatpush3.bf16.msra.mxu1 %v14574_v21  ;;  %v5356_v39 = vpop.f32.mrb[151].mxu1  ;;  %v17878_v59 = vld [vmem:[#allocation99_spill] sm:$0xff]  ;;  %v17881_v33 = vld [vmem:[#allocation128_spill] sm:$0xff] }
 0x42d   : > { %v6283_v4 = vadd.f32 %v14326_v28, %v6244_v51  ;;  %v4499_v8 = vsel %vm4467_vm13, %v17876_v16, 0.0  ;;  %v6284_v32 = vadd.f32 %v14326_v28, %v6245_v30  ;;  %v5632_v29 = vsel %vm5600_vm7, %v7636_v0, 0.0  ;;  %v5566_v51 = vpop.permute.xlu0 %5565  ;;  %v7640_v0 = vpop.f32.mrb[152].mxu1 }
 0x42e   : > { %v5630_v7 = vsel %vm5598_vm11, %v5353_v54, 0.0  ;;  %vm5145_vm5 = vcmp.eq.s32.totalorder %v17877_v49, 1  ;;  %vm5602_vm9 = vcmp.eq.s32.totalorder %v14341_v62, 1  ;;  %v14713_v21 = vadd.f32 %v4499_v8, %v14479_v47  ;;  %v5369_v54 = vpop.f32.mrb[153].mxu1  ;;  %v17882_v8 = vld [vmem:[#allocation73_spill] sm:$0xff] }
 0x42f   : > { %v6308_v13 = vmax.f32 %v14684_v43, 0.0  ;;  %v14717_v11 = vadd.f32 %v14326_v28, %v6247_v15  ;;  %v5664_v50 = vadd.f32 %v5632_v29, %v14612_v2  ;;  %v5662_v45 = vadd.f32 %v5630_v7, %v14634_v57  ;;  %v4388_v57 = vpop.permute.xlu1 %4387  ;;  %v17883_v29 = vld [vmem:[#allocation81_spill] sm:$0xff] }
 0x430   : > { %v5633_v5 = vsel %vm5601_vm15, %v7637_v24, 0.0  ;;  %v5631_v27 = vsel %vm5599_vm8, %v5356_v39, 0.0  ;;  %v6217_v47 = vsel %vm6185_vm1, %v14262_v37, 0.0  ;;  %v6307_v46 = vmax.f32 %v14698_v63, 0.0  ;;  %v7641_v39 = vpop.f32.mrb[154].mxu1 }
 0x431   : > { %v6250_v41 = vadd.f32 %v14588_v23, %v5664_v50  ;;  %v5665_v2 = vadd.f32 %v5633_v5, %v14656_v12  ;;  %v5663_v15 = vadd.f32 %v5631_v27, %v5206_v36  ;;  %vm5148_vm14 = vcmp.eq.s32.totalorder %v14476_v60, 1  ;;  %v4385_v12 = vpop.permute.xlu0 %4384  ;;  %v17886_v27 = vld [vmem:[#allocation101_spill] sm:$0xff] }
 0x432   : > { %vm6188_vm12 = vcmp.eq.s32.totalorder %v14552_v40, 1  ;;  %v6248_v58 = vadd.f32 %v14624_v26, %v5662_v45  ;;  %v6315_v34 = vmax.f32 %v6283_v4, 0.0  ;;  %v6316_v6 = vmax.f32 %v6284_v32, 0.0 }
 0x433   : > { %v3943_v20 = vadd.f32 %v17879_v53, %v17878_v59  ;;  %vm5604_vm6 = vcmp.eq.s32.totalorder %v5566_v51, 1  ;;  %vm4452_vm11 = vcmp.eq.s32.totalorder %v4388_v57, 1  ;;  %v6251_v37 = vadd.f32 %v14641_v18, %v5665_v2  ;;  %v5521_v16 = vpop.permute.xlu1 %5520  ;;  %v5372_v2 = vpop.f32.mrb[155].mxu1  ;;  %v17888_v51 = vld [vmem:[#allocation37_spill] sm:$0xff]  ;;  %v17891_v53 = vld [vmem:[#allocation104_spill] sm:$0xff] }
 0x434   : > { %v6249_v23 = vadd.f32 %v6217_v47, %v5663_v15  ;;  %vm5146_vm7 = vcmp.eq.s32.totalorder %v17880_v61, 1  ;;  %vm5605_vm4 = vcmp.eq.s32.totalorder %v14702_v19, 1  ;;  %v4484_v44 = vsel %vm4452_vm11, %v17881_v33, 0.0  ;;  %v17887_v47 = vld [vmem:[#allocation17_spill] sm:$0xff]  ;;  %v17893_v33 = vld [vmem:[#allocation58_spill] sm:$0xff] }
 0x435   : > { %v14741_v3 = vadd.f32 %v14326_v28, %v6250_v41  ;;  %v6338_v26 = vpack.c.bf16 %v6316_v6, %v6315_v34  ;;  %v4529_v30 = vadd.f32 %v14417_v31, %v3943_v20  ;;  %vm5603_vm8 = vcmp.eq.s32.totalorder %v14316_v42, 1  ;;  %v5518_v14 = vpop.permute.xlu0 %5517  ;;  %v17890_v6 = vld [vmem:[#allocation72_spill] sm:$0xff]  ;;  %v17907_v42 = vld [vmem:[#allocation189_spill] sm:$0xff] }
 0x436   : > { %vm4451_vm1 = vcmp.eq.s32.totalorder %v4385_v12, 1  ;;  %v14746_v18 = vadd.f32 %v4484_v44, %v14605_v38  ;;  %v14749_v36 = vadd.f32 %v14326_v28, %v6248_v58  ;;  %v14752_v4 = vadd.f32 %v14326_v28, %v6251_v37  ;;  %v17892_v12 = vld [vmem:[#allocation157_spill] sm:$0xff] }
 0x437   : > { %v4483_v32 = vsel %vm4451_vm1, %v17882_v8, 0.0  ;;  %7239 = vmatprep.subr.bf16.mxu1 %v6338_v26  ;;  %v5179_v31 = vsel %vm5147_vm0, %v17883_v29, 0.0  ;;  %v5636_v7 = vsel %vm5604_vm6, %v7640_v0, 0.0  ;;  %v17884_v38 = vmax.f32 %v14436_v52, 0.0  ;;  %v5118_v44 = vpop.permute.xlu1 %5117  ;;  %v17895_v0 = vld [vmem:[#allocation19_spill] sm:$0xff]  ;;  %v17897_v8 = vld [vmem:[#allocation49_spill] sm:$0xff] }
 0x438   : > { %v17885_v24 = vmax.f32 %v14482_v55, 0.0  ;;  %vm5589_vm15 = vcmp.eq.s32.totalorder %v5521_v16, 1  ;;  %v14764_v45 = vadd.f32 %v4483_v32, %v14619_v56  ;;  %v5211_v5 = vadd.f32 %v5179_v31, %v4529_v30  ;;  %v17889_v55 = vld [vmem:[#allocation80_spill] sm:$0xff]  ;;  %v17896_v16 = vld [vmem:[#allocation191_spill] sm:$0xff]  ;;  %v17899_v31 = vld [vmem:[#allocation177_spill] sm:$0xff] }
 0x439   : > { %v3941_v41 = vadd.f32 %v17887_v47, %v17886_v27  ;;  %vm6189_vm3 = vcmp.eq.s32.totalorder %v14528_v1, 1  ;;  %v5621_v15 = vsel %vm5589_vm15, %v17888_v51, 0.0  ;;  %v6288_v52 = vadd.f32 %v14326_v28, %v6249_v23  ;;  %v17894_v30 = vld [vmem:[#allocation188_spill] sm:$0xff]  ;;  %v17898_v32 = vld [vmem:[#allocation95_spill] sm:$0xff]  ;;  %v17901_v27 = vld [vmem:[#allocation61_spill] sm:$0xff] }
 0x43a   : > { %v6330_v50 = vpack.c.bf16 %v17885_v24, %v17884_v38  ;;  %v5177_v57 = vsel %vm5145_vm5, %v17889_v55, 0.0  ;;  %v5634_v56 = vsel %vm5602_vm9, %v5369_v54, 0.0  ;;  %vm5588_vm10 = vcmp.eq.s32.totalorder %v5518_v14, 1  ;;  %v17900_v24 = vld [vmem:[#allocation66_spill] sm:$0xff] }
 0x43b   : > { %v14777_v58 = vadd.f32 %v5621_v15, %v14646_v25  ;;  %v5668_v34 = vadd.f32 %v5636_v7, %v5211_v5  ;;  %v4527_v59 = vadd.f32 %v17890_v6, %v3941_v41  ;;  %v5620_v20 = vsel %vm5588_vm10, %v17891_v53, 0.0  ;;  %v17902_v51 = vld [vmem:[#allocation34_spill] sm:$0xff] }
 0x43c   : > { %7240 = vmatpush3.bf16.msra.mxu1 %v6330_v50  ;;  %v6317_v37 = vmax.f32 %v14691_v22, 0.0  ;;  %v6318_v23 = vmax.f32 %v14717_v11, 0.0  ;;  %v3944_v49 = vadd.f32 %v17893_v33, %v17892_v12  ;;  %v14786_v62 = vadd.f32 %v5620_v20, %v14667_v48  ;;  %v5115_v50 = vpop.permute.xlu0 %5114  ;;  %v17910_v33 = vld [vmem:[#allocation165_spill] sm:$0xff] }
 0x43d   : > { %v5209_v26 = vadd.f32 %v5177_v57, %v4527_v59  ;;  %v6220_v25 = vsel %vm6188_vm12, %v17894_v30, 0.0  ;;  %v5180_v54 = vsel %vm5148_vm14, %v17895_v0, 0.0  ;;  %vm5150_vm2 = vcmp.eq.s32.totalorder %v5118_v44, 1  ;;  %v17906_v57 = vld [vmem:[#allocation55_spill] sm:$0xff]  ;;  %v17913_v0 = vld [vmem:[#allocation10_spill] sm:$0xff] }
 0x43e   : > { %v6339_v22 = vpack.c.bf16 %v6318_v23, %v6317_v37  ;;  %v4530_v11 = vadd.f32 %v17896_v16, %v3944_v49  ;;  %v3942_v29 = vadd.f32 %v17898_v32, %v17897_v8  ;;  %v5182_v7 = vsel %vm5150_vm2, %v17899_v31, 0.0  ;;  %v17908_v37 = vld [vmem:[#allocation170_spill] sm:$0xff]  ;;  %v17915_v16 = vld [vmem:[#allocation147_spill] sm:$0xff] }
 0x43f   : > { %v5666_v48 = vadd.f32 %v5634_v56, %v5209_v26  ;;  %v5637_v38 = vsel %vm5605_vm4, %v7641_v39, 0.0  ;;  %v5178_v40 = vsel %vm5146_vm7, %v17900_v24, 0.0  ;;  %v14804_v60 = vadd.f32 %v5182_v7, %v14695_v10  ;;  %v17904_v39 = vld [vmem:[#allocation43_spill] sm:$0xff]  ;;  %v6155_v10 = vpop.permute.xlu1 %6154  ;;  %v17916_v7 = vld [vmem:[#allocation48_spill] sm:$0xff] }
 0x440   : > { %7241 = vmatprep.subr.bf16.mxu1 %v6339_v22  ;;  %v5212_v5 = vadd.f32 %v5180_v54, %v4530_v11  ;;  %v4528_v47 = vadd.f32 %v17901_v27, %v3942_v29  ;;  %v5635_v41 = vsel %vm5603_vm8, %v5372_v2, 0.0  ;;  %vm5149_vm0 = vcmp.eq.s32.totalorder %v5115_v50, 1  ;;  %v6152_v12 = vpop.permute.xlu0 %6151 }
 0x441   : > { %v6252_v14 = vadd.f32 %v6220_v25, %v5666_v48  ;;  %v17903_v19 = vmax.f32 %v17902_v51, 0.0  ;;  %v17905_v15 = vmax.f32 %v17904_v39, 0.0  ;;  %v6319_v61 = vmax.f32 %v14749_v36, 0.0  ;;  %v17911_v25 = vld [vmem:[#allocation198_spill] sm:$0xff]  ;;  %v17919_v39 = vld [vmem:[#allocation44_spill] sm:$0xff] }
 0x442   : > { %v5181_v56 = vsel %vm5149_vm0, %v17906_v57, 0.0  ;;  %v5669_v6 = vadd.f32 %v5637_v38, %v5212_v5  ;;  %v5210_v59 = vadd.f32 %v5178_v40, %v4528_v47  ;;  %v6320_v53 = vmax.f32 %v6288_v52, 0.0 }
 0x443   : > { %v6331_v55 = vpack.c.bf16 %v17905_v15, %v17903_v19  ;;  %vm6191_vm13 = vcmp.eq.s32.totalorder %v6155_v10, 1  ;;  %v14816_v20 = vadd.f32 %v5181_v56, %v14713_v21  ;;  %v6221_v2 = vsel %vm6189_vm3, %v17907_v42, 0.0  ;;  %v5070_v8 = vpop.permute.xlu1 %5069  ;;  %v17920_v56 = vld [vmem:[#allocation16_spill] sm:$0xff]  ;;  %v17921_v42 = vld [vmem:[#allocation142_spill] sm:$0xff] }
 0x444   : > { %v17909_v23 = vmax.f32 %v17908_v37, 0.0  ;;  %v6223_v49 = vsel %vm6191_vm13, %v17910_v33, 0.0  ;;  %v5667_v44 = vadd.f32 %v5635_v41, %v5210_v59  ;;  %v6340_v26 = vpack.c.bf16 %v6320_v53, %v6319_v61  ;;  %v5067_v40 = vpop.permute.xlu0 %5066 }
 0x445   : > { %7242 = vmatpush3.bf16.msra.mxu1 %v6331_v55  ;;  %v6321_v52 = vmax.f32 %v14741_v3, 0.0  ;;  %vm6190_vm5 = vcmp.eq.s32.totalorder %v6152_v12, 1  ;;  %v6255_v21 = vadd.f32 %v6223_v49, %v5669_v6  ;;  %v6322_v30 = vmax.f32 %v14752_v4, 0.0 }
 0x446   : > { %v6332_v36 = vpack.c.bf16 %v6304_v9, %v17909_v23  ;;  %v17912_v1 = vmax.f32 %v17911_v25, 0.0  ;;  %v17914_v54 = vmax.f32 %v17913_v0, 0.0  ;;  %v6222_v11 = vsel %vm6190_vm5, %v17915_v16, 0.0  ;;  %7243 = vmatprep.subr.bf16.mxu1 %v6340_v26 }
 0x447   : > { %v6291_v35 = vadd.f32 %v14326_v28, %v6252_v14  ;;  %v6253_v9 = vadd.f32 %v6221_v2, %v5667_v44  ;;  %v6334_v3 = vpack.c.bf16 %v6308_v13, %v6307_v46  ;;  %v6254_v32 = vadd.f32 %v6222_v11, %v5668_v34  ;;  %v17917_v34 = vld [vmem:[#allocation236_spill] sm:$0xff]  ;;  %v6107_v5 = vpop.permute.xlu1 %6106  ;;  %v17918_v14 = vld [vmem:[#allocation26_spill] sm:$0xff]  ;;  %v17922_v44 = vld [vmem:[#allocation105_spill] sm:$0xff] }
 0x448   : > { %v6333_v22 = vpack.c.bf16 %v17914_v54, %v17912_v1  ;;  %v6294_v4 = vadd.f32 %v14326_v28, %v6255_v21  ;;  %v6341_v29 = vpack.c.bf16 %v6322_v30, %v6321_v52  ;;  %vm5134_vm9 = vcmp.eq.s32.totalorder %v5070_v8, 1  ;;  %v6104_v19 = vpop.permute.xlu0 %6103  ;;  %v17923_v52 = vld [vmem:[#allocation31_spill] sm:$0xff]  ;;  %v17924_v1 = vld [vmem:[#allocation32_spill] sm:$0xff] }
 0x449   : > { %7244 = vmatpush3.bf16.msra.mxu1 %v6332_v36  ;;  %v6292_v31 = vadd.f32 %v14326_v28, %v6253_v9  ;;  %v5166_v48 = vsel %vm5134_vm9, %v17916_v7, 0.0  ;;  %v6293_v38 = vadd.f32 %v14326_v28, %v6254_v32  ;;  %v6323_v43 = vmax.f32 %v6291_v35, 0.0  ;;  %v17926_v8 = vld [vmem:[#allocation64_spill] sm:$0xff] }
 0x44a   : > { %7245 = vmatprep.subr.bf16.mxu1 %v6341_v29  ;;  %v6326_v24 = vmax.f32 %v6294_v4, 0.0  ;;  %v5198_v63 = vadd.f32 %v5166_v48, %v14746_v18  ;;  %vm5133_vm14 = vcmp.eq.s32.totalorder %v5067_v40, 1  ;;  %vm6175_vm12 = vcmp.eq.s32.totalorder %v6107_v5, 1  ;;  %v7894_v40 = vld [vmem:[%s14995_s11] ss:$8 sps:$4 sm:$0xff]  }
 0x44b   : > { %v6324_v13 = vmax.f32 %v6292_v31, 0.0  ;;  %v6325_v46 = vmax.f32 %v6293_v38, 0.0  ;;  %v5165_v50 = vsel %vm5133_vm14, %v17917_v34, 0.0  ;;  %v6207_v51 = vsel %vm6175_vm12, %v17918_v14, 0.0  ;;  %v5575_v55 = vpop.permute.xlu1 %5574  ;;  %v7899_v34 = vld [vmem:[%s14995_s11 + $0x34] ss:$8 sps:$4 sm:$0xff]  }
 0x44c   : > { %v5197_v47 = vadd.f32 %v5165_v50, %v14764_v45  ;;  %vm6174_vm6 = vcmp.eq.s32.totalorder %v6104_v19, 1  ;;  %v6239_v18 = vadd.f32 %v6207_v51, %v14777_v58  ;;  %vm5607_vm11 = vcmp.eq.s32.totalorder %v5575_v55, 1  ;;  %v5572_v45 = vpop.permute.xlu0 %5571  ;;  %v17927_v50 = vld [vmem:[#allocation195_spill] sm:$0xff]  ;;  %v7810_v5 = vld [vmem:[%s14991_s7] sm:$0xff]  }
 0x44d   : > { %7246 = vmatpush3.bf16.msra.mxu1 %v6333_v22  ;;  %v6342_v27 = vpack.c.bf16 %v6324_v13, %v6323_v43  ;;  %v6343_v41 = vpack.c.bf16 %v6326_v24, %v6325_v46  ;;  %v6206_v15 = vsel %vm6174_vm6, %v17919_v39, 0.0  ;;  %v5639_v10 = vsel %vm5607_vm11, %v17920_v56, 0.0  ;;  %v17925_v22 = vld [vmem:[#allocation162_spill] sm:$0xff]  ;;  %v7895_v43 = vld [vmem:[%s14995_s11 + $0x14] ss:$8 sps:$4 sm:$0xff]  }
 0x44e   : > { %v6238_v61 = vadd.f32 %v6206_v15, %v14786_v62  ;;  %v6278_v57 = vadd.f32 %v14326_v28, %v6239_v18  ;;  %vm5606_vm7 = vcmp.eq.s32.totalorder %v5572_v45, 1  ;;  %v5671_v6 = vadd.f32 %v5639_v10, %v14804_v60  ;;  %v7897_v13 = vld [vmem:[%s14995_s11 + $0x24] ss:$8 sps:$4 sm:$0xff]   ;;  %v7898_v46 = vld [vmem:[%s14995_s11 + $0x20] ss:$8 sps:$4 sm:$0xff]  }
 0x44f   : > { %7247 = vmatprep.subr.bf16.mxu1 %v6342_v27  ;;  %v5527_v58 = vpop.permute.xlu1 %5526  ;;  %v5638_v2 = vsel %vm5606_vm7, %v17921_v42, 0.0  ;;  %v7811_v27 = vld [vmem:[%s14993_s9] sm:$0xff]   ;;  %vm17928_vm2 = vcmask 130048   ;;  %vm17932_vm9 = vcmask 523264  }
 0x450   : > { %v6277_v59 = vadd.f32 %v14326_v28, %v6238_v61  ;;  %v6310_v53 = vmax.f32 %v6278_v57, 0.0  ;;  %vm5591_vm4 = vcmp.eq.s32.totalorder %v5527_v58, 1  ;;  %v5670_v37 = vadd.f32 %v5638_v2, %v14816_v20  ;;  %v5524_v36 = vpop.permute.xlu0 %5523  ;;  %vm17929_vm0 = vmmov %vm17928_vm2 }
 0x451   : > { %7248 = vmatpush3.bf16.msra.mxu1 %v6334_v3  ;;  %v5623_v62 = vsel %vm5591_vm4, %v14609_v17, 0.0  ;;  %vm5590_vm8 = vcmp.eq.s32.totalorder %v5524_v36, 1  ;;  %vm17930_vm13 = vmmov %vm17929_vm0 }
 0x452   : > { %7249 = vmatprep.subr.bf16.mxu1 %v6343_v41  ;;  %v6309_v23 = vmax.f32 %v6277_v59, 0.0  ;;  %v5655_v12 = vadd.f32 %v5623_v62, %v5198_v63  ;;  %v5622_v26 = vsel %vm5590_vm8, %v17922_v44, 0.0  ;;  %vm17931_vm5 = vmmov %vm17929_vm0 }
 0x453   : > { %v6161_v49 = vpop.permute.xlu1 %6160  ;;  %v5654_v60 = vadd.f32 %v5622_v26, %v5197_v47  ;;  %vm17933_vm14 = vmmov %vm17932_vm9 }
 0x454   : > { %v6335_v33 = vpack.c.bf16 %v6310_v53, %v6309_v23  ;;  %vm6193_vm1 = vcmp.eq.s32.totalorder %v6161_v49, 1  ;;  %v6158_v30 = vpop.permute.xlu0 %6157  ;;  %vm17934_vm12 = vmmov %vm17932_vm9 }
 0x455   : > { %v6225_v21 = vsel %vm6193_vm1, %v17923_v52, 0.0  ;;  %vm6192_vm15 = vcmp.eq.s32.totalorder %v6158_v30, 1  ;;  %vm17935_vm6 = vmmov %vm17932_vm9 }
 0x456   : > { %7250 = vmatpush3.bf16.msra.mxu1 %v6335_v33  ;;  %v6257_v25 = vadd.f32 %v6225_v21, %v5671_v6  ;;  %v6224_v20 = vsel %vm6192_vm15, %v17924_v1, 0.0  ;;  %vm17936_vm11 = vmmov %vm17935_vm6 }
 0x457   : > { %v6113_v0 = vpop.permute.xlu1 %6112  ;;  %v6256_v54 = vadd.f32 %v6224_v20, %v5670_v37  ;;  %vm17937_vm7 = vmmov %vm17935_vm6 }
 0x458   : > { %vm6177_vm3 = vcmp.eq.s32.totalorder %v6113_v0, 1  ;;  %v6296_v17 = vadd.f32 %v14326_v28, %v6257_v25  ;;  %v6110_v11 = vpop.permute.xlu0 %6109  ;;  %vm17938_vm4 = vmmov %vm17935_vm6 }
 0x459   : > { %v6209_v16 = vsel %vm6177_vm3, %v17925_v22, 0.0  ;;  %vm6176_vm10 = vcmp.eq.s32.totalorder %v6110_v11, 1  ;;  %v6295_v35 = vadd.f32 %v14326_v28, %v6256_v54  ;;  %vm17939_vm8 = vmmov %vm17938_vm4 }
 0x45a   : > { %v6241_v9 = vadd.f32 %v6209_v16, %v5655_v12  ;;  %v6328_v3 = vmax.f32 %v6296_v17, 0.0  ;;  %v6208_v32 = vsel %vm6176_vm10, %v17926_v8, 0.0  ;;  %vm17940_vm1 = vmmov %vm17938_vm4 }
 0x45b   : > { %v6240_v4 = vadd.f32 %v6208_v32, %v5654_v60  ;;  %v6327_v31 = vmax.f32 %v6295_v35, 0.0  ;;  %v7812_v35 = vld [vmem:[%s14993_s9 + $0x8] sm:$0xff]   ;;  %vm17941_vm15 = vmmov %vm17940_vm1 }
 0x45c   : > { %v6280_v29 = vadd.f32 %v14326_v28, %v6241_v9  ;;  %vm17942_vm3 = vmmov %vm17940_vm1 }
 0x45d   : > { %v6279_v7 = vadd.f32 %v14326_v28, %v6240_v4  ;;  %v6344_v38 = vpack.c.bf16 %v6328_v3, %v6327_v31  ;;  %v7896_v28 = vld [vmem:[%s14995_s11 + $0x10] ss:$8 sps:$4 sm:$0xff]   ;;  %vm17943_vm10 = vmmov %vm17940_vm1 }
 0x45e   : > { %v6312_v48 = vmax.f32 %v6280_v29, 0.0  ;;  %v7813_v4 = vld [vmem:[%s14993_s9 + $0x10] sm:$0xff]  }
 0x45f   : > { %v6311_v24 = vmax.f32 %v6279_v7, 0.0  ;;  %7251 = vmatprep.subr.bf16.mxu1 %v6344_v38 }
 0x461   : > { %v6336_v63 = vpack.c.bf16 %v6312_v48, %v6311_v24  ;;  %v7814_v48 = vld [vmem:[%s14993_s9 + $0x18] sm:$0xff]  }
 0x463   : > { %7252 = vmatpush3.bf16.msra.mxu1 %v6336_v63 }
 0x464   : > { %7676 = vmatprep.subr.bf16.mxu1 %v7810_v5 }
 0x466   : > { %6426 = vmatmul.mubr.bf16.vlgmr.msra.gmra.mrb[156].mxu1 %v7894_v40 }
 0x467   : > { %6433 = vmatprep.mubr.bf16.mxu1 %v7895_v43  ;;  %7677 = vmatpush3.bf16.msra.mxu1 %v7810_v5 }
 0x468   : > { %7686 = vmatprep.subr.bf16.mxu1 %v7811_v27 }
 0x46e   : > { %6434 = vmatmul.mubr.bf16.gmra.mrb[160].mxu1 %v7896_v28 }
 0x46f   : > { %6441 = vmatprep.mubr.bf16.mxu1 %v7897_v13 }
 0x476   : > { %6442 = vmatmul.mubr.bf16.gmra.mrb[164].mxu1 %v7898_v46  ;;  %v7043_v46 = vld [vmem:[%s14992_s8] ss:$0 sm:$0xff] }
 0x477   : > { %6449 = vmatprep.mubr.bf16.mxu1 %v7899_v34  ;;  %v7049_v34 = vld [vmem:[%s14994_s10] ss:$0 sm:$0xff] }
 0x47e   : > { %6450 = vmatmul.mubr.bf16.gmra.mrb[168].mxu1 %v17927_v50  ;;  %v7710_v50 = vadd.f32 %v7049_v34, %v7043_v46 }
 0x4af   : > { %v7293_v47 = vpop.f32.mrb[164].mxu0 }
 0x4b0   : > { %v7294_v41 = vpop.f32.mrb[165].mxu0 }
 0x4b1   : > { %v14890_v14 = vadd.f32 %v7294_v41, %v7293_v47  ;;  %v7296_v51 = vpop.f32.mrb[166].mxu0 }
 0x4b2   : > { %v7297_v19 = vpop.f32.mrb[167].mxu0 }
 0x4b3   : > { %v14892_v18 = vadd.f32 %v7297_v19, %v7296_v51 }
 0x4b5   : > { %v6527_v55 = vpack.c.bf16 %v14892_v18, %v14890_v14 }
 0x4b7   : > { %v7299_v39 = vpop.f32.mrb[168].mxu0 }
 0x4b8   : > { %v7300_v15 = vpop.f32.mrb[169].mxu0 }
 0x4b9   : > { %v14896_v61 = vadd.f32 %v7300_v15, %v7299_v39  ;;  %v7302_v57 = vpop.f32.mrb[170].mxu0 }
 0x4ba   : > { %v7303_v45 = vpop.f32.mrb[171].mxu0 }
 0x4bb   : > { %v7304_v56 = vadd.f32 %v7303_v45, %v7302_v57 }
 0x4bd   : > { %v6528_v10 = vpack.c.bf16 %v7304_v56, %v14896_v61 }
 0x4c3   : > { %v7305_v6 = vpop.f32.mrb[172].mxu0 }
 0x4c4   : > { %v7306_v59 = vpop.f32.mrb[173].mxu0 }
 0x4c5   : > { %v7307_v53 = vadd.f32 %v7306_v59, %v7305_v6  ;;  %v7308_v58 = vpop.f32.mrb[174].mxu0 }
 0x4c6   : > { %v7309_v42 = vpop.f32.mrb[175].mxu0 }
 0x4c7   : > { %v7310_v2 = vadd.f32 %v7309_v42, %v7308_v58 }
 0x4c9   : > { %v6529_v36 = vpack.c.bf16 %v7310_v2, %v7307_v53 }
 0x4cc   : > { %v7311_v37 = vpop.f32.mrb[176].mxu0 }
 0x4cd   : > { %v7312_v23 = vpop.f32.mrb[177].mxu0 }
 0x4ce   : > { %v7313_v62 = vadd.f32 %v7312_v23, %v7311_v37  ;;  %v7314_v12 = vpop.f32.mrb[178].mxu0 }
 0x4cf   : > { %v7315_v33 = vpop.f32.mrb[179].mxu0 }
 0x4d0   : > { %v7316_v49 = vadd.f32 %v7315_v33, %v7314_v12 }
 0x4d2   : > { %v6530_v44 = vpack.c.bf16 %v7316_v49, %v7313_v62 }
 0x539   : > { %v7253_v26 = vpop.f32.mrb[156].mxu1 }
 0x53a   : > { %v7254_v60 = vpop.f32.mrb[157].mxu1 }
 0x53b   : > { %v7255_v52 = vadd.f32 %v7254_v60, %v7253_v26  ;;  %v7256_v21 = vpop.f32.mrb[158].mxu1 }
 0x53c   : > { %v7257_v30 = vpop.f32.mrb[159].mxu1 }
 0x53d   : > { %v7258_v25 = vadd.f32 %v7257_v30, %v7256_v21 }
 0x53f   : > { %v6458_v1 = vpack.c.bf16 %v7258_v25, %v7255_v52 }
 0x541   : > { %v7259_v20 = vpop.f32.mrb[160].mxu1  ;;  %7678 = vmatprep.mubr.msk.bf16.mxu1 %vm17928_vm2, %v6458_v1 }
 0x542   : > { %v7260_v0 = vpop.f32.mrb[161].mxu1 }
 0x543   : > { %v7261_v54 = vadd.f32 %v7260_v0, %v7259_v20  ;;  %v7262_v17 = vpop.f32.mrb[162].mxu1 }
 0x544   : > { %v7263_v22 = vpop.f32.mrb[163].mxu1 }
 0x545   : > { %v7264_v16 = vadd.f32 %v7263_v22, %v7262_v17 }
 0x547   : > { %v6459_v11 = vpack.c.bf16 %v7264_v16, %v7261_v54 }
 0x549   : > { %v7265_v9 = vpop.f32.mrb[164].mxu1  ;;  %7679 = vmatmul.mubr.msk.bf16.vlgmr.msra.gmra.mrb[172].mxu1 %vm17929_vm0, %v6459_v11 }
 0x54a   : > { %v7266_v3 = vpop.f32.mrb[165].mxu1  ;;  %7687 = vmatpush3.bf16.msra.mxu1 %v7811_v27 }
 0x54b   : > { %v7267_v8 = vadd.f32 %v7266_v3, %v7265_v9  ;;  %v7268_v32 = vpop.f32.mrb[166].mxu1  ;;  %7688 = vmatprep.subr.bf16.mxu1 %v7812_v35 }
 0x54c   : > { %v7269_v29 = vpop.f32.mrb[167].mxu1 }
 0x54d   : > { %v7270_v31 = vadd.f32 %v7269_v29, %v7268_v32 }
 0x54e   : > { %7689 = vmatpush3.bf16.msra.mxu1 %v7812_v35 }
 0x54f   : > { %v6460_v7 = vpack.c.bf16 %v7270_v31, %v7267_v8  ;;  %7690 = vmatprep.subr.bf16.mxu1 %v7813_v4 }
 0x551   : > { %v7271_v38 = vpop.f32.mrb[168].mxu1  ;;  %7682 = vmatprep.mubr.msk.bf16.mxu1 %vm17930_vm13, %v6460_v7 }
 0x552   : > { %v7272_v24 = vpop.f32.mrb[169].mxu1  ;;  %7691 = vmatpush3.bf16.msra.mxu1 %v7813_v4 }
 0x553   : > { %v7273_v63 = vadd.f32 %v7272_v24, %v7271_v38  ;;  %v7274_v40 = vpop.f32.mrb[170].mxu1  ;;  %7692 = vmatprep.subr.bf16.mxu1 %v7814_v48 }
 0x554   : > { %v7275_v43 = vpop.f32.mrb[171].mxu1 }
 0x555   : > { %v7276_v28 = vadd.f32 %v7275_v43, %v7274_v40 }
 0x556   : > { %7693 = vmatpush3.bf16.msra.mxu1 %v7814_v48 }
 0x557   : > { %v6461_v13 = vpack.c.bf16 %v7276_v28, %v7273_v63 }
 0x559   : > { %7683 = vmatmul.mubr.msk.bf16.gmra.mrb[176].mxu1 %vm17931_vm5, %v6461_v13 }
 0x55a   : > { %7694 = vmatprep.mubr.msk.bf16.mxu1 %vm17932_vm9, %v6527_v55 }
 0x561   : > { %7695 = vmatmul.mubr.msk.bf16.vlgmr.msra.gmra.mrb[172].mxu1 %vm17933_vm14, %v6528_v10 }
 0x562   : > { %7698 = vmatprep.mubr.msk.bf16.mxu1 %vm17934_vm12, %v6529_v36 }
 0x569   : > { %7699 = vmatmul.mubr.msk.bf16.gmra.mrb[176].mxu1 %vm17935_vm6, %v6530_v44 }
 0x634   : > { %v7696_v5 = vpop.f32.mrb[172].mxu1 }
 0x635   : > { %v7704_v27 = vadd.f32 %v7696_v5, %v7043_v46  ;;  %v6708_v47 = vpop.f32.mrb[173].mxu1 }
 0x636   : > { %v7706_v41 = vadd.f32 %v7043_v46, %v6708_v47  ;;  %v7697_v14 = vpop.f32.mrb[174].mxu1 }
 0x637   : > { %v7705_v51 = vadd.f32 %v7704_v27, %v7049_v34  ;;  %v7709_v19 = vadd.f32 %v7710_v50, %v7697_v14  ;;  %v6711_v18 = vpop.f32.mrb[175].mxu1 }
 0x638   : > { %v7707_v39 = vadd.f32 %v7706_v41, %v7049_v34  ;;  %v7711_v15 = vadd.f32 %v7710_v50, %v6711_v18 }
 0x639   : > { %v6749_v55 = vmax.f32 %v7705_v51, 0.0  ;;  %v6750_v61 = vmax.f32 %v7709_v19, 0.0 }
 0x63a   : > { %v6747_v57 = vmax.f32 %v7707_v39, 0.0  ;;  %v6748_v45 = vmax.f32 %v7711_v15, 0.0 }
 0x63b   : > { %6757 = vst.msk [vmem:[%s422_s18 + $0x10] sm:$0xff] %vm17936_vm11, %v6749_v55 }
 0x63c   : > { %6758 = vst.msk [vmem:[%s422_s18 + $0x18] sm:$0xff] %vm17937_vm7, %v6750_v61  ;;  %v7700_v56 = vpop.f32.mrb[176].mxu1 }
 0x63d   : > { %6755 = vst.msk [vmem:[%s422_s18] sm:$0xff] %vm17938_vm4, %v6747_v57  ;;  %v7713_v10 = vadd.f32 %v7710_v50, %v7700_v56  ;;  %v6724_v6 = vpop.f32.mrb[177].mxu1 }
 0x63e   : > { %6756 = vst.msk [vmem:[%s422_s18 + $0x8] sm:$0xff] %vm17939_vm8, %v6748_v45  ;;  %v7715_v59 = vadd.f32 %v7710_v50, %v6724_v6  ;;  %v7701_v53 = vpop.f32.mrb[178].mxu1 }
 0x63f   : > { %v6753_v58 = vmax.f32 %v7713_v10, 0.0  ;;  %v7717_v42 = vadd.f32 %v7710_v50, %v7701_v53  ;;  %v6727_v2 = vpop.f32.mrb[179].mxu1 }
 0x640   : > { %v6751_v37 = vmax.f32 %v7715_v59, 0.0  ;;  %v7719_v23 = vadd.f32 %v7710_v50, %v6727_v2 }
 0x641   : > { %6761 = vst.msk [vmem:[%s422_s18 + $0x30] sm:$0xff] %vm17940_vm1, %v6753_v58  ;;  %v6754_v36 = vmax.f32 %v7717_v42, 0.0 }
 0x642   : > { %6759 = vst.msk [vmem:[%s422_s18 + $0x20] sm:$0xff] %vm17941_vm15, %v6751_v37  ;;  %v6752_v62 = vmax.f32 %v7719_v23, 0.0 }
 0x643   : > { %6762 = vst.msk [vmem:[%s422_s18 + $0x38] sm:$0xff] %vm17942_vm3, %v6754_v36 }
 0x644   : > { %6760 = vst.msk [vmem:[%s422_s18 + $0x28] sm:$0xff] %vm17943_vm10, %v6752_v62 }
 0x645   : > { %7941 = shalt.err (!%p7938_p7)
}
 0x646   : > { %s7942_s15 = scalar_lea.hbm %s14934_s20, 1024  ;;  %s7946_s16 = scalar_lea.hbm %s14996_s12, 2048 }
 0x647   : > { %p7943_p8 = scmp.ne.s32.totalorder %s14934_s20, %s7942_s15  ;;  %p7947_p1 = scmp.lt.u32.totalorder %s14934_s20, %s14996_s12 }
 0x648   : > { %p7948_p0 = scmp.lt.u32.totalorder %s7946_s16, %s7942_s15  ;;  %p7950_p6 = scmp.lt.u32.totalorder %s7942_s15, %s14934_s20 }
 0x649   : > { %p7944_p11 = pnand %p7943_p8, %p17944_p9 }
 0x64a   : > { %p7949_p5 = por %p7948_p0, %p7947_p1 }
 0x64b   : > { %p7945_p13 = pneg %p7944_p11 }
 0x64c   : > { %p7951_p10 = por %p7950_p6, %p7949_p5 }
 0x64e   : > { %p7952_p12 = pnand %p7951_p10, %p7945_p13 }
 0x650   : > { %7955 = shalt.err (!%p7952_p12)
}
 0x651   : > { %s8001_s28 = smov 128   ;;  %s8002_s23 = smov 8  }
 0x652   : > { %7732 = dma.vmem_to_hbm [thread:$0]  (%p17944_p9), %s14936_s30, 1024, %s14934_s20, %s14943_s25, %s8001_s28, %s8001_s28, %s8002_s23  }
 0x653 PF: > { %p7744_p2 = scmp.ge.s32.totalorder %s7994_s24, 2  ;;  %s6792_s17 = sand.u32 1, %s7982_s21  }
 0x654   : > { %p17945_p3 = scmp.ne.s32.totalorder %s15691_s14, 0  ;;  %s6793_s15 = scalar_lea.sflag [#allocation4], %s6792_s17 }
 0x656   : > { %p7739_p4 = pnand %p7744_p2, %p17945_p3 }
 0x658   : > { %7977 = dma.done.wait (!%p7739_p4), %s6793_s15, 1024  }
 0x659   : > { %7979 = vsyncadd (!%p7739_p4), %s6793_s15, 4294966272  ;;  %s17946_s18 = sld [smem:[#allocation8_spill]]  ;;  %s17947_s23 = sld [smem:[#allocation9_spill]] }
 0x65a   : > { %p23_p7 = scmp.ge.s32.totalorder %s8093_s27, 4   ;;  %s17948_s21 = smov %s7986_s22 }
 0x65b   : > { %s17950_s24 = smov %s8093_s27 }
 0x65c   :  { %25 = sbr.rel (!%p23_p7) target bundleno = 4 (0x4), region = 108 }
 0x65f   : > { %s17949_s22 = smov %s17946_s18 }
 0x663   :  { %6798 = vsyncpa [#allocation3], 1 }
 0x664   :  { %6800 = vsyncpa [#allocation3 + $0x1], 1 }
 0x665   :  { %6801 = vsyncpa [#allocation4], 1 }
 0x666   :  { %6803 = vsyncpa [#allocation4 + $0x1], 1 }

</bundles_post_ra>
